<compile_context>
chip_gen: v7x
topology: tpu7x:2x2x1
jax: 0.10.0
libtpu: 0.0.40
codegen_flags: <defaults>
</compile_context>

<pallas_src>
import numpy as np
import jax
import jax.numpy as jnp
from jax.experimental import pallas as pl
from jax.experimental.pallas import tpu as pltpu


def _round_up(x, m):
    return (x + m - 1) // m * m


# ------------------------------ Pallas kernel ------------------------------

def _lenet5_kernel(x_ref, a1_ref, b1_ref, a2_ref, b2_ref,
                   w1_ref, fb1_ref, w2_ref, fb2_ref, w3_ref, fb3_ref,
                   o_ref, p1_ref, p2_ref):
    """Whole LeNet-5 forward for one batch tile of BT images.

    x_ref : (BT, 1024) bf16  flattened 32x32 inputs (col = r*32 + s)
    a1_ref: (192, 512) bf16  conv1 row-band matrix (col = quad*128 + j*6 + c)
    b1_ref: (1, 128)   f32   conv1 bias row (84 valid cols)
    a2_ref: (768, 512) bf16  conv2 row-band matrix (col = quad*128 + v*16 + o)
    b2_ref: (1, 128)   f32   conv2 bias row (80 valid cols)
    w1_ref: (640, 128) bf16  fc1 weight (NCHW flatten + zero pad folded in)
    w2_ref: (128, 128) bf16  fc2 weight (120/84 zero padded)
    w3_ref: (128, 128) bf16  fc3 weight (84/10 zero padded)
    fb*   : (1, 128)   f32   fc biases (zero padded)
    o_ref : (BT, 128)  f32   logits (cols 0..9 valid)
    p1_ref: (BT, 1792) bf16  pooled conv1 activations (col = i*128 + j*6 + c)
    p2_ref: (BT, 640)  bf16  pooled conv2 activations (col = u*128 + v*16 + o)
    """
    a1 = a1_ref[...]
    b1 = b1_ref[...]
    # conv1 + bias + ReLU + 2x2 max-pool: one matmul per pooled output row.
    # The four pool-quadrant results are the four aligned 128-wide column
    # blocks of the matmul output; bias+ReLU commute with the quadrant max.
    for i in range(14):
        band = x_ref[:, 64 * i: 64 * i + 192]            # input rows 2i..2i+5
        y = jnp.dot(band, a1, preferred_element_type=jnp.float32)   # (BT, 512)
        m = jnp.maximum(jnp.maximum(y[:, 0:128], y[:, 128:256]),
                        jnp.maximum(y[:, 256:384], y[:, 384:512]))
        p1_ref[:, 128 * i: 128 * (i + 1)] = (
            jnp.maximum(m + b1, 0.0).astype(p1_ref.dtype))

    a2 = a2_ref[...]
    b2 = b2_ref[...]
    # conv2 + bias + ReLU + 2x2 max-pool, same row-band scheme (5 pooled rows).
    for u in range(5):
        band = p1_ref[:, 256 * u: 256 * u + 768]         # pooled1 rows 2u..2u+5
        y = jnp.dot(band, a2, preferred_element_type=jnp.float32)   # (BT, 512)
        m = jnp.maximum(jnp.maximum(y[:, 0:128], y[:, 128:256]),
                        jnp.maximum(y[:, 256:384], y[:, 384:512]))
        p2_ref[:, 128 * u: 128 * (u + 1)] = (
            jnp.maximum(m + b2, 0.0).astype(p2_ref.dtype))

    # fc1 -> ReLU -> fc2 -> ReLU -> fc3, all 128-lane dense.
    h = jnp.dot(p2_ref[...], w1_ref[...], preferred_element_type=jnp.float32)
    h = jnp.maximum(h + fb1_ref[...], 0.0)
    h = jnp.dot(h.astype(jnp.bfloat16), w2_ref[...],
                preferred_element_type=jnp.float32)
    h = jnp.maximum(h + fb2_ref[...], 0.0)
    h = jnp.dot(h.astype(jnp.bfloat16), w3_ref[...],
                preferred_element_type=jnp.float32)
    o_ref[...] = h + fb3_ref[...]


# --------------------------- pallas_call wrapper ----------------------------

def _lenet5_pallas(x_flat, a1, b1r, a2, b2r, w1p, fb1, w2p, fb2, w3p, fb3, *,
                   bt):
    b_pad = x_flat.shape[0]
    n_tiles = b_pad // bt

    def const(shape):
        return pl.BlockSpec(shape, lambda i: (0, 0))

    return pl.pallas_call(
        _lenet5_kernel,
        out_shape=jax.ShapeDtypeStruct((b_pad, 128), jnp.float32),
        grid_spec=pltpu.PrefetchScalarGridSpec(
            num_scalar_prefetch=0,
            grid=(n_tiles,),
            in_specs=[
                pl.BlockSpec((bt, 1024), lambda i: (i, 0)),
                const((192, 512)), const((1, 128)),
                const((768, 512)), const((1, 128)),
                const((640, 128)), const((1, 128)),
                const((128, 128)), const((1, 128)),
                const((128, 128)), const((1, 128)),
            ],
            out_specs=pl.BlockSpec((bt, 128), lambda i: (i, 0)),
            scratch_shapes=[
                pltpu.VMEM((bt, 14 * 128), jnp.bfloat16),   # pooled conv1
                pltpu.VMEM((bt, 5 * 128), jnp.bfloat16),    # pooled conv2
            ],
        ),
        compiler_params=pltpu.CompilerParams(
            dimension_semantics=("parallel",)),
    )(x_flat, a1, b1r, a2, b2r, w1p, fb1, w2p, fb2, w3p, fb3)


# ---------------------- trace-time weight-matrix prep -----------------------

def _conv1_band_matrix(w_conv1):
    """(192, 512): rows = 6x32 input band, cols = quad*128 + j*6 + c.

    For pooled output row i, band_i[k] = x[2i + k//32, k%32] and
    (band_i @ A1)[quad*128 + j*6 + c] = conv1_pre_bias[2i+qy, 2j+qx, c].
    """
    k = np.arange(192)[:, None]
    col = np.arange(512)[None, :]
    q, rem = col // 128, col % 128
    j, o = rem // 6, rem % 6
    qy, qx = q // 2, q % 2
    dy = k // 32 - qy
    dx = k % 32 - 2 * j - qx
    valid = (rem < 84) & (dy >= 0) & (dy <= 4) & (dx >= 0) & (dx <= 4)
    w = w_conv1[:, 0]                                          # (6, 5, 5)
    vals = w[o, np.clip(dy, 0, 4), np.clip(dx, 0, 4)]
    return jnp.where(jnp.asarray(valid), vals, 0.0).astype(jnp.bfloat16)


def _conv2_band_matrix(w_conv2):
    """(768, 512): rows = 6x128 pooled1 band, cols = quad*128 + v*16 + o."""
    m = np.arange(768)[:, None]
    col = np.arange(512)[None, :]
    iloc, rm = m // 128, m % 128
    j, c = rm // 6, rm % 6
    q, rem = col // 128, col % 128
    v, o = rem // 16, rem % 16
    qy, qx = q // 2, q % 2
    dy = iloc - qy
    dx = j - 2 * v - qx
    valid = ((rm < 84) & (rem < 80) &
             (dy >= 0) & (dy <= 4) & (dx >= 0) & (dx <= 4))
    vals = w_conv2[o, c, np.clip(dy, 0, 4), np.clip(dx, 0, 4)]
    return jnp.where(jnp.asarray(valid), vals, 0.0).astype(jnp.bfloat16)


def _fc1_matrix(w_fc1):
    """(640, 128): rows = u*128 + v*16 + o (pooled2 layout), cols = fc1 unit.

    Folds torch's NCHW x.view(-1, 400) flatten order (o*25 + u*5 + v) and the
    120 -> 128 output padding into the weight.
    """
    r = np.arange(640)[:, None]
    n = np.arange(128)[None, :]
    u, rem = r // 128, r % 128
    v, o = rem // 16, rem % 16
    valid = (rem < 80) & (n < 120)
    flat = o * 25 + u * 5 + v
    vals = w_fc1[np.clip(n, 0, 119), np.clip(flat, 0, 399)]
    return jnp.where(jnp.asarray(valid), vals, 0.0).astype(jnp.bfloat16)


def _prep_params(params):
    a1 = _conv1_band_matrix(params["w_conv1"])
    a2 = _conv2_band_matrix(params["w_conv2"])
    b1r = jnp.zeros((1, 128), jnp.float32).at[0, :84].set(
        jnp.tile(params["b_conv1"].astype(jnp.float32), 14))
    b2r = jnp.zeros((1, 128), jnp.float32).at[0, :80].set(
        jnp.tile(params["b_conv2"].astype(jnp.float32), 5))
    w1p = _fc1_matrix(params["w_fc1"])
    w2p = jnp.zeros((128, 128), jnp.bfloat16).at[:120, :84].set(
        params["w_fc2"].T.astype(jnp.bfloat16))
    w3p = jnp.zeros((128, 128), jnp.bfloat16).at[:84, :10].set(
        params["w_fc3"].T.astype(jnp.bfloat16))
    fb1 = jnp.zeros((1, 128), jnp.float32).at[0, :120].set(
        params["b_fc1"].astype(jnp.float32))
    fb2 = jnp.zeros((1, 128), jnp.float32).at[0, :84].set(
        params["b_fc2"].astype(jnp.float32))
    fb3 = jnp.zeros((1, 128), jnp.float32).at[0, :10].set(
        params["b_fc3"].astype(jnp.float32))
    return a1, b1r, a2, b2r, w1p, fb1, w2p, fb2, w3p, fb3


# ------------------------------- forward glue --------------------------------

_MAX_BATCH_TILE = 256


def _pick_batch_tile(b):
    b_pad = _round_up(max(b, 8), 8)
    if b_pad <= 8:
        return 8, 8
    # >=2 grid steps whenever possible (keeps both v7x TensorCores busy) while
    # capping the per-step tile so VMEM stays small and overhead is amortized.
    bt = min(_MAX_BATCH_TILE, _round_up(b_pad // 2, 8))
    b_pad = _round_up(b_pad, bt)
    return b_pad, bt


def lenet5_forward(x_nchw, params):
    """Inference forward pass (is_training=False, so dropout is a no-op)."""
    b = x_nchw.shape[0]
    assert x_nchw.shape[1:] == (1, 32, 32), "LeNet-5 expects (B, 1, 32, 32)"
    b_pad, bt = _pick_batch_tile(b)

    x = x_nchw.reshape(b, 32 * 32).astype(jnp.bfloat16)
    if b_pad != b:
        x = jnp.pad(x, ((0, b_pad - b), (0, 0)))

    a1, b1r, a2, b2r, w1p, fb1, w2p, fb2, w3p, fb3 = _prep_params(params)
    logits_pad = _lenet5_pallas(x, a1, b1r, a2, b2r, w1p, fb1, w2p, fb2,
                                w3p, fb3, bt=bt)
    return logits_pad[:b, :10]                           # (B, 10) f32


# ------------------------------ f32 reference --------------------------------

def lenet5_reference(x_nchw, params):
    """Pure-XLA f32 reference mirroring the PyTorch forward exactly."""
    x = x_nchw.astype(jnp.float32)
    y = jax.lax.conv_general_dilated(
        x, params["w_conv1"], (1, 1), "VALID",
        dimension_numbers=("NCHW", "OIHW", "NCHW"))
    y = jax.nn.relu(y + params["b_conv1"][None, :, None, None])
    y = jax.lax.reduce_window(y, -jnp.inf, jax.lax.max,
                              (1, 1, 2, 2), (1, 1, 2, 2), "VALID")
    y = jax.lax.conv_general_dilated(
        y, params["w_conv2"], (1, 1), "VALID",
        dimension_numbers=("NCHW", "OIHW", "NCHW"))
    y = jax.nn.relu(y + params["b_conv2"][None, :, None, None])
    y = jax.lax.reduce_window(y, -jnp.inf, jax.lax.max,
                              (1, 1, 2, 2), (1, 1, 2, 2), "VALID")
    flat = y.reshape(y.shape[0], -1)             # torch's NCHW x.view(-1, 400)
    h = jax.nn.relu(flat @ params["w_fc1"].T + params["b_fc1"])
    h = jax.nn.relu(h @ params["w_fc2"].T + params["b_fc2"])
    return h @ params["w_fc3"].T + params["b_fc3"]


def init_params(key):
    ks = jax.random.split(key, 10)
    s = 0.05
    return {
        "w_conv1": s * jax.random.normal(ks[0], (6, 1, 5, 5), jnp.float32),
        "b_conv1": s * jax.random.normal(ks[1], (6,), jnp.float32),
        "w_conv2": s * jax.random.normal(ks[2], (16, 6, 5, 5), jnp.float32),
        "b_conv2": s * jax.random.normal(ks[3], (16,), jnp.float32),
        "w_fc1":   s * jax.random.normal(ks[4], (120, 400), jnp.float32),
        "b_fc1":   s * jax.random.normal(ks[5], (120,), jnp.float32),
        "w_fc2":   s * jax.random.normal(ks[6], (84, 120), jnp.float32),
        "b_fc2":   s * jax.random.normal(ks[7], (84,), jnp.float32),
        "w_fc3":   s * jax.random.normal(ks[8], (10, 84), jnp.float32),
        "b_fc3":   s * jax.random.normal(ks[9], (10,), jnp.float32),
    }


if __name__ == "__main__":
    key = jax.random.PRNGKey(0)
    k_x, k_p = jax.random.split(key)
    params = init_params(k_p)
    # LeNet-5 requires 32x32 single-channel input so 16*5*5 = 400 after conv2+pool.
    x = jax.random.normal(k_x, (2, 1, 32, 32), jnp.float32)

    logits = jax.jit(lenet5_forward)(x, params)
    jax.block_until_ready(logits)
    assert logits.shape == (2, 10) and logits.dtype == jnp.float32

    # Sanity check against a pure-XLA f32 reference.  Matmul operands are bf16
    # (f32 accumulation) so expect ~1e-2-level deviation; use a loose tolerance.
    ref = lenet5_reference(x, params)
    err = float(jnp.max(jnp.abs(logits - ref)))
    tol = 5e-2 * (float(jnp.max(jnp.abs(ref))) + 1.0)
    assert err <= tol, f"kernel/reference mismatch: {err} > {tol}"
    print("KERNEL_OK")
</pallas_src>

<mosaic_0001>
module attributes {stable_mosaic.version = 11 : i64} {
  func.func @_lenet5_kernel(%arg0: i32, %arg1: memref<8x1024xbf16, #tpu.memory_space<vmem>>, %arg2: memref<192x512xbf16, #tpu.memory_space<vmem>>, %arg3: memref<1x128xf32, #tpu.memory_space<vmem>>, %arg4: memref<768x512xbf16, #tpu.memory_space<vmem>>, %arg5: memref<1x128xf32, #tpu.memory_space<vmem>>, %arg6: memref<640x128xbf16, #tpu.memory_space<vmem>>, %arg7: memref<1x128xf32, #tpu.memory_space<vmem>>, %arg8: memref<128x128xbf16, #tpu.memory_space<vmem>>, %arg9: memref<1x128xf32, #tpu.memory_space<vmem>>, %arg10: memref<128x128xbf16, #tpu.memory_space<vmem>>, %arg11: memref<1x128xf32, #tpu.memory_space<vmem>>, %arg12: memref<8x128xf32, #tpu.memory_space<vmem>>, %arg13: memref<8x1792xbf16, #tpu.memory_space<vmem>>, %arg14: memref<8x640xbf16, #tpu.memory_space<vmem>>) attributes {dimension_semantics = [#tpu.dimension_semantics<parallel>], iteration_bounds = array<i64: 1>, scalar_prefetch = 0 : i64, scratch_operands = 2 : i64, tpu.core_type = #tpu.core_type<tc>, window_params = [{transform_indices = @transform_0, window_bounds = array<i64: 8, 1024>}, {pipeline_mode = #tpu.pipeline_mode<synchronous>, transform_indices = @transform_1, window_bounds = array<i64: 192, 512>}, {pipeline_mode = #tpu.pipeline_mode<synchronous>, transform_indices = @transform_2, window_bounds = array<i64: 1, 128>}, {pipeline_mode = #tpu.pipeline_mode<synchronous>, transform_indices = @transform_3, window_bounds = array<i64: 768, 512>}, {pipeline_mode = #tpu.pipeline_mode<synchronous>, transform_indices = @transform_4, window_bounds = array<i64: 1, 128>}, {pipeline_mode = #tpu.pipeline_mode<synchronous>, transform_indices = @transform_5, window_bounds = array<i64: 640, 128>}, {pipeline_mode = #tpu.pipeline_mode<synchronous>, transform_indices = @transform_6, window_bounds = array<i64: 1, 128>}, {pipeline_mode = #tpu.pipeline_mode<synchronous>, transform_indices = @transform_7, window_bounds = array<i64: 128, 128>}, {pipeline_mode = #tpu.pipeline_mode<synchronous>, transform_indices = @transform_8, window_bounds = array<i64: 1, 128>}, {pipeline_mode = #tpu.pipeline_mode<synchronous>, transform_indices = @transform_9, window_bounds = array<i64: 128, 128>}, {pipeline_mode = #tpu.pipeline_mode<synchronous>, transform_indices = @transform_10, window_bounds = array<i64: 1, 128>}, {transform_indices = @transform_11, window_bounds = array<i64: 8, 128>}]} {
    %c0 = arith.constant 0 : index
    %c0_0 = arith.constant 0 : index
    %0 = vector.load %arg2[%c0, %c0_0] : memref<192x512xbf16, #tpu.memory_space<vmem>>, vector<192x512xbf16>
    %c0_1 = arith.constant 0 : index
    %c0_2 = arith.constant 0 : index
    %1 = vector.load %arg3[%c0_1, %c0_2] : memref<1x128xf32, #tpu.memory_space<vmem>>, vector<1x128xf32>
    %c0_3 = arith.constant 0 : index
    %c0_4 = arith.constant 0 : index
    %2 = vector.load %arg1[%c0_3, %c0_4] : memref<8x1024xbf16, #tpu.memory_space<vmem>>, vector<8x192xbf16>
    %cst = arith.constant dense<0.000000e+00> : vector<8x512xf32>
    %3 = tpu.matmul %2, %0, %cst {dimension_numbers = #tpu.dot_dimension_numbers<[1], [0], [0], [1], [0, 0, 1, 1], [], []>} : vector<8x192xbf16>, vector<192x512xbf16>, vector<8x512xf32> -> vector<8x512xf32>
    %4 = vector.extract_strided_slice %3 {offsets = [0, 0], sizes = [8, 128], strides = [1, 1]} : vector<8x512xf32> to vector<8x128xf32>
    %5 = vector.extract_strided_slice %3 {offsets = [0, 128], sizes = [8, 128], strides = [1, 1]} : vector<8x512xf32> to vector<8x128xf32>
    %6 = arith.maximumf %4, %5 : vector<8x128xf32>
    %7 = vector.extract_strided_slice %3 {offsets = [0, 256], sizes = [8, 128], strides = [1, 1]} : vector<8x512xf32> to vector<8x128xf32>
    %8 = vector.extract_strided_slice %3 {offsets = [0, 384], sizes = [8, 128], strides = [1, 1]} : vector<8x512xf32> to vector<8x128xf32>
    %9 = arith.maximumf %7, %8 : vector<8x128xf32>
    %10 = arith.maximumf %6, %9 : vector<8x128xf32>
    %11 = vector.broadcast %1 : vector<1x128xf32> to vector<8x128xf32>
    %12 = arith.addf %10, %11 : vector<8x128xf32>
    %cst_5 = arith.constant 0.000000e+00 : f32
    %13 = vector.broadcast %cst_5 : f32 to vector<8x128xf32>
    %14 = arith.maximumf %12, %13 : vector<8x128xf32>
    %15 = arith.truncf %14 : vector<8x128xf32> to vector<8x128xbf16>
    %c0_6 = arith.constant 0 : index
    %c0_7 = arith.constant 0 : index
    %16 = vector.load %arg13[%c0_6, %c0_7] : memref<8x1792xbf16, #tpu.memory_space<vmem>>, vector<8x128xbf16>
    tpu.vector_store %arg13[%c0_6, %c0_7], %15 {strides = array<i32>} : memref<8x1792xbf16, #tpu.memory_space<vmem>>, vector<8x128xbf16>,
    %c0_8 = arith.constant 0 : index
    %c64 = arith.constant 64 : index
    %17 = vector.load %arg1[%c0_8, %c64] : memref<8x1024xbf16, #tpu.memory_space<vmem>>, vector<8x192xbf16>
    %cst_9 = arith.constant dense<0.000000e+00> : vector<8x512xf32>
    %18 = tpu.matmul %17, %0, %cst_9 {dimension_numbers = #tpu.dot_dimension_numbers<[1], [0], [0], [1], [0, 0, 1, 1], [], []>} : vector<8x192xbf16>, vector<192x512xbf16>, vector<8x512xf32> -> vector<8x512xf32>
    %19 = vector.extract_strided_slice %18 {offsets = [0, 0], sizes = [8, 128], strides = [1, 1]} : vector<8x512xf32> to vector<8x128xf32>
    %20 = vector.extract_strided_slice %18 {offsets = [0, 128], sizes = [8, 128], strides = [1, 1]} : vector<8x512xf32> to vector<8x128xf32>
    %21 = arith.maximumf %19, %20 : vector<8x128xf32>
    %22 = vector.extract_strided_slice %18 {offsets = [0, 256], sizes = [8, 128], strides = [1, 1]} : vector<8x512xf32> to vector<8x128xf32>
    %23 = vector.extract_strided_slice %18 {offsets = [0, 384], sizes = [8, 128], strides = [1, 1]} : vector<8x512xf32> to vector<8x128xf32>
    %24 = arith.maximumf %22, %23 : vector<8x128xf32>
    %25 = arith.maximumf %21, %24 : vector<8x128xf32>
    %26 = vector.broadcast %1 : vector<1x128xf32> to vector<8x128xf32>
    %27 = arith.addf %25, %26 : vector<8x128xf32>
    %cst_10 = arith.constant 0.000000e+00 : f32
    %28 = vector.broadcast %cst_10 : f32 to vector<8x128xf32>
    %29 = arith.maximumf %27, %28 : vector<8x128xf32>
    %30 = arith.truncf %29 : vector<8x128xf32> to vector<8x128xbf16>
    %c0_11 = arith.constant 0 : index
    %c128 = arith.constant 128 : index
    %31 = vector.load %arg13[%c0_11, %c128] : memref<8x1792xbf16, #tpu.memory_space<vmem>>, vector<8x128xbf16>
    tpu.vector_store %arg13[%c0_11, %c128], %30 {strides = array<i32>} : memref<8x1792xbf16, #tpu.memory_space<vmem>>, vector<8x128xbf16>,
    %c0_12 = arith.constant 0 : index
    %c128_13 = arith.constant 128 : index
    %32 = vector.load %arg1[%c0_12, %c128_13] : memref<8x1024xbf16, #tpu.memory_space<vmem>>, vector<8x192xbf16>
    %cst_14 = arith.constant dense<0.000000e+00> : vector<8x512xf32>
    %33 = tpu.matmul %32, %0, %cst_14 {dimension_numbers = #tpu.dot_dimension_numbers<[1], [0], [0], [1], [0, 0, 1, 1], [], []>} : vector<8x192xbf16>, vector<192x512xbf16>, vector<8x512xf32> -> vector<8x512xf32>
    %34 = vector.extract_strided_slice %33 {offsets = [0, 0], sizes = [8, 128], strides = [1, 1]} : vector<8x512xf32> to vector<8x128xf32>
    %35 = vector.extract_strided_slice %33 {offsets = [0, 128], sizes = [8, 128], strides = [1, 1]} : vector<8x512xf32> to vector<8x128xf32>
    %36 = arith.maximumf %34, %35 : vector<8x128xf32>
    %37 = vector.extract_strided_slice %33 {offsets = [0, 256], sizes = [8, 128], strides = [1, 1]} : vector<8x512xf32> to vector<8x128xf32>
    %38 = vector.extract_strided_slice %33 {offsets = [0, 384], sizes = [8, 128], strides = [1, 1]} : vector<8x512xf32> to vector<8x128xf32>
    %39 = arith.maximumf %37, %38 : vector<8x128xf32>
    %40 = arith.maximumf %36, %39 : vector<8x128xf32>
    %41 = vector.broadcast %1 : vector<1x128xf32> to vector<8x128xf32>
    %42 = arith.addf %40, %41 : vector<8x128xf32>
    %cst_15 = arith.constant 0.000000e+00 : f32
    %43 = vector.broadcast %cst_15 : f32 to vector<8x128xf32>
    %44 = arith.maximumf %42, %43 : vector<8x128xf32>
    %45 = arith.truncf %44 : vector<8x128xf32> to vector<8x128xbf16>
    %c0_16 = arith.constant 0 : index
    %c256 = arith.constant 256 : index
    %46 = vector.load %arg13[%c0_16, %c256] : memref<8x1792xbf16, #tpu.memory_space<vmem>>, vector<8x128xbf16>
    tpu.vector_store %arg13[%c0_16, %c256], %45 {strides = array<i32>} : memref<8x1792xbf16, #tpu.memory_space<vmem>>, vector<8x128xbf16>,
    %c0_17 = arith.constant 0 : index
    %c192 = arith.constant 192 : index
    %47 = vector.load %arg1[%c0_17, %c192] : memref<8x1024xbf16, #tpu.memory_space<vmem>>, vector<8x192xbf16>
    %cst_18 = arith.constant dense<0.000000e+00> : vector<8x512xf32>
    %48 = tpu.matmul %47, %0, %cst_18 {dimension_numbers = #tpu.dot_dimension_numbers<[1], [0], [0], [1], [0, 0, 1, 1], [], []>} : vector<8x192xbf16>, vector<192x512xbf16>, vector<8x512xf32> -> vector<8x512xf32>
    %49 = vector.extract_strided_slice %48 {offsets = [0, 0], sizes = [8, 128], strides = [1, 1]} : vector<8x512xf32> to vector<8x128xf32>
    %50 = vector.extract_strided_slice %48 {offsets = [0, 128], sizes = [8, 128], strides = [1, 1]} : vector<8x512xf32> to vector<8x128xf32>
    %51 = arith.maximumf %49, %50 : vector<8x128xf32>
    %52 = vector.extract_strided_slice %48 {offsets = [0, 256], sizes = [8, 128], strides = [1, 1]} : vector<8x512xf32> to vector<8x128xf32>
    %53 = vector.extract_strided_slice %48 {offsets = [0, 384], sizes = [8, 128], strides = [1, 1]} : vector<8x512xf32> to vector<8x128xf32>
    %54 = arith.maximumf %52, %53 : vector<8x128xf32>
    %55 = arith.maximumf %51, %54 : vector<8x128xf32>
    %56 = vector.broadcast %1 : vector<1x128xf32> to vector<8x128xf32>
    %57 = arith.addf %55, %56 : vector<8x128xf32>
    %cst_19 = arith.constant 0.000000e+00 : f32
    %58 = vector.broadcast %cst_19 : f32 to vector<8x128xf32>
    %59 = arith.maximumf %57, %58 : vector<8x128xf32>
    %60 = arith.truncf %59 : vector<8x128xf32> to vector<8x128xbf16>
    %c0_20 = arith.constant 0 : index
    %c384 = arith.constant 384 : index
    %61 = vector.load %arg13[%c0_20, %c384] : memref<8x1792xbf16, #tpu.memory_space<vmem>>, vector<8x128xbf16>
    tpu.vector_store %arg13[%c0_20, %c384], %60 {strides = array<i32>} : memref<8x1792xbf16, #tpu.memory_space<vmem>>, vector<8x128xbf16>,
    %c0_21 = arith.constant 0 : index
    %c256_22 = arith.constant 256 : index
    %62 = vector.load %arg1[%c0_21, %c256_22] : memref<8x1024xbf16, #tpu.memory_space<vmem>>, vector<8x192xbf16>
    %cst_23 = arith.constant dense<0.000000e+00> : vector<8x512xf32>
    %63 = tpu.matmul %62, %0, %cst_23 {dimension_numbers = #tpu.dot_dimension_numbers<[1], [0], [0], [1], [0, 0, 1, 1], [], []>} : vector<8x192xbf16>, vector<192x512xbf16>, vector<8x512xf32> -> vector<8x512xf32>
    %64 = vector.extract_strided_slice %63 {offsets = [0, 0], sizes = [8, 128], strides = [1, 1]} : vector<8x512xf32> to vector<8x128xf32>
    %65 = vector.extract_strided_slice %63 {offsets = [0, 128], sizes = [8, 128], strides = [1, 1]} : vector<8x512xf32> to vector<8x128xf32>
    %66 = arith.maximumf %64, %65 : vector<8x128xf32>
    %67 = vector.extract_strided_slice %63 {offsets = [0, 256], sizes = [8, 128], strides = [1, 1]} : vector<8x512xf32> to vector<8x128xf32>
    %68 = vector.extract_strided_slice %63 {offsets = [0, 384], sizes = [8, 128], strides = [1, 1]} : vector<8x512xf32> to vector<8x128xf32>
    %69 = arith.maximumf %67, %68 : vector<8x128xf32>
    %70 = arith.maximumf %66, %69 : vector<8x128xf32>
    %71 = vector.broadcast %1 : vector<1x128xf32> to vector<8x128xf32>
    %72 = arith.addf %70, %71 : vector<8x128xf32>
    %cst_24 = arith.constant 0.000000e+00 : f32
    %73 = vector.broadcast %cst_24 : f32 to vector<8x128xf32>
    %74 = arith.maximumf %72, %73 : vector<8x128xf32>
    %75 = arith.truncf %74 : vector<8x128xf32> to vector<8x128xbf16>
    %c0_25 = arith.constant 0 : index
    %c512 = arith.constant 512 : index
    %76 = vector.load %arg13[%c0_25, %c512] : memref<8x1792xbf16, #tpu.memory_space<vmem>>, vector<8x128xbf16>
    tpu.vector_store %arg13[%c0_25, %c512], %75 {strides = array<i32>} : memref<8x1792xbf16, #tpu.memory_space<vmem>>, vector<8x128xbf16>,
    %c0_26 = arith.constant 0 : index
    %c320 = arith.constant 320 : index
    %77 = vector.load %arg1[%c0_26, %c320] : memref<8x1024xbf16, #tpu.memory_space<vmem>>, vector<8x192xbf16>
    %cst_27 = arith.constant dense<0.000000e+00> : vector<8x512xf32>
    %78 = tpu.matmul %77, %0, %cst_27 {dimension_numbers = #tpu.dot_dimension_numbers<[1], [0], [0], [1], [0, 0, 1, 1], [], []>} : vector<8x192xbf16>, vector<192x512xbf16>, vector<8x512xf32> -> vector<8x512xf32>
    %79 = vector.extract_strided_slice %78 {offsets = [0, 0], sizes = [8, 128], strides = [1, 1]} : vector<8x512xf32> to vector<8x128xf32>
    %80 = vector.extract_strided_slice %78 {offsets = [0, 128], sizes = [8, 128], strides = [1, 1]} : vector<8x512xf32> to vector<8x128xf32>
    %81 = arith.maximumf %79, %80 : vector<8x128xf32>
    %82 = vector.extract_strided_slice %78 {offsets = [0, 256], sizes = [8, 128], strides = [1, 1]} : vector<8x512xf32> to vector<8x128xf32>
    %83 = vector.extract_strided_slice %78 {offsets = [0, 384], sizes = [8, 128], strides = [1, 1]} : vector<8x512xf32> to vector<8x128xf32>
    %84 = arith.maximumf %82, %83 : vector<8x128xf32>
    %85 = arith.maximumf %81, %84 : vector<8x128xf32>
    %86 = vector.broadcast %1 : vector<1x128xf32> to vector<8x128xf32>
    %87 = arith.addf %85, %86 : vector<8x128xf32>
    %cst_28 = arith.constant 0.000000e+00 : f32
    %88 = vector.broadcast %cst_28 : f32 to vector<8x128xf32>
    %89 = arith.maximumf %87, %88 : vector<8x128xf32>
    %90 = arith.truncf %89 : vector<8x128xf32> to vector<8x128xbf16>
    %c0_29 = arith.constant 0 : index
    %c640 = arith.constant 640 : index
    %91 = vector.load %arg13[%c0_29, %c640] : memref<8x1792xbf16, #tpu.memory_space<vmem>>, vector<8x128xbf16>
    tpu.vector_store %arg13[%c0_29, %c640], %90 {strides = array<i32>} : memref<8x1792xbf16, #tpu.memory_space<vmem>>, vector<8x128xbf16>,
    %c0_30 = arith.constant 0 : index
    %c384_31 = arith.constant 384 : index
    %92 = vector.load %arg1[%c0_30, %c384_31] : memref<8x1024xbf16, #tpu.memory_space<vmem>>, vector<8x192xbf16>
    %cst_32 = arith.constant dense<0.000000e+00> : vector<8x512xf32>
    %93 = tpu.matmul %92, %0, %cst_32 {dimension_numbers = #tpu.dot_dimension_numbers<[1], [0], [0], [1], [0, 0, 1, 1], [], []>} : vector<8x192xbf16>, vector<192x512xbf16>, vector<8x512xf32> -> vector<8x512xf32>
    %94 = vector.extract_strided_slice %93 {offsets = [0, 0], sizes = [8, 128], strides = [1, 1]} : vector<8x512xf32> to vector<8x128xf32>
    %95 = vector.extract_strided_slice %93 {offsets = [0, 128], sizes = [8, 128], strides = [1, 1]} : vector<8x512xf32> to vector<8x128xf32>
    %96 = arith.maximumf %94, %95 : vector<8x128xf32>
    %97 = vector.extract_strided_slice %93 {offsets = [0, 256], sizes = [8, 128], strides = [1, 1]} : vector<8x512xf32> to vector<8x128xf32>
    %98 = vector.extract_strided_slice %93 {offsets = [0, 384], sizes = [8, 128], strides = [1, 1]} : vector<8x512xf32> to vector<8x128xf32>
    %99 = arith.maximumf %97, %98 : vector<8x128xf32>
    %100 = arith.maximumf %96, %99 : vector<8x128xf32>
    %101 = vector.broadcast %1 : vector<1x128xf32> to vector<8x128xf32>
    %102 = arith.addf %100, %101 : vector<8x128xf32>
    %cst_33 = arith.constant 0.000000e+00 : f32
    %103 = vector.broadcast %cst_33 : f32 to vector<8x128xf32>
    %104 = arith.maximumf %102, %103 : vector<8x128xf32>
    %105 = arith.truncf %104 : vector<8x128xf32> to vector<8x128xbf16>
    %c0_34 = arith.constant 0 : index
    %c768 = arith.constant 768 : index
    %106 = vector.load %arg13[%c0_34, %c768] : memref<8x1792xbf16, #tpu.memory_space<vmem>>, vector<8x128xbf16>
    tpu.vector_store %arg13[%c0_34, %c768], %105 {strides = array<i32>} : memref<8x1792xbf16, #tpu.memory_space<vmem>>, vector<8x128xbf16>,
    %c0_35 = arith.constant 0 : index
    %c448 = arith.constant 448 : index
    %107 = vector.load %arg1[%c0_35, %c448] : memref<8x1024xbf16, #tpu.memory_space<vmem>>, vector<8x192xbf16>
    %cst_36 = arith.constant dense<0.000000e+00> : vector<8x512xf32>
    %108 = tpu.matmul %107, %0, %cst_36 {dimension_numbers = #tpu.dot_dimension_numbers<[1], [0], [0], [1], [0, 0, 1, 1], [], []>} : vector<8x192xbf16>, vector<192x512xbf16>, vector<8x512xf32> -> vector<8x512xf32>
    %109 = vector.extract_strided_slice %108 {offsets = [0, 0], sizes = [8, 128], strides = [1, 1]} : vector<8x512xf32> to vector<8x128xf32>
    %110 = vector.extract_strided_slice %108 {offsets = [0, 128], sizes = [8, 128], strides = [1, 1]} : vector<8x512xf32> to vector<8x128xf32>
    %111 = arith.maximumf %109, %110 : vector<8x128xf32>
    %112 = vector.extract_strided_slice %108 {offsets = [0, 256], sizes = [8, 128], strides = [1, 1]} : vector<8x512xf32> to vector<8x128xf32>
    %113 = vector.extract_strided_slice %108 {offsets = [0, 384], sizes = [8, 128], strides = [1, 1]} : vector<8x512xf32> to vector<8x128xf32>
    %114 = arith.maximumf %112, %113 : vector<8x128xf32>
    %115 = arith.maximumf %111, %114 : vector<8x128xf32>
    %116 = vector.broadcast %1 : vector<1x128xf32> to vector<8x128xf32>
    %117 = arith.addf %115, %116 : vector<8x128xf32>
    %cst_37 = arith.constant 0.000000e+00 : f32
    %118 = vector.broadcast %cst_37 : f32 to vector<8x128xf32>
    %119 = arith.maximumf %117, %118 : vector<8x128xf32>
    %120 = arith.truncf %119 : vector<8x128xf32> to vector<8x128xbf16>
    %c0_38 = arith.constant 0 : index
    %c896 = arith.constant 896 : index
    %121 = vector.load %arg13[%c0_38, %c896] : memref<8x1792xbf16, #tpu.memory_space<vmem>>, vector<8x128xbf16>
    tpu.vector_store %arg13[%c0_38, %c896], %120 {strides = array<i32>} : memref<8x1792xbf16, #tpu.memory_space<vmem>>, vector<8x128xbf16>,
    %c0_39 = arith.constant 0 : index
    %c512_40 = arith.constant 512 : index
    %122 = vector.load %arg1[%c0_39, %c512_40] : memref<8x1024xbf16, #tpu.memory_space<vmem>>, vector<8x192xbf16>
    %cst_41 = arith.constant dense<0.000000e+00> : vector<8x512xf32>
    %123 = tpu.matmul %122, %0, %cst_41 {dimension_numbers = #tpu.dot_dimension_numbers<[1], [0], [0], [1], [0, 0, 1, 1], [], []>} : vector<8x192xbf16>, vector<192x512xbf16>, vector<8x512xf32> -> vector<8x512xf32>
    %124 = vector.extract_strided_slice %123 {offsets = [0, 0], sizes = [8, 128], strides = [1, 1]} : vector<8x512xf32> to vector<8x128xf32>
    %125 = vector.extract_strided_slice %123 {offsets = [0, 128], sizes = [8, 128], strides = [1, 1]} : vector<8x512xf32> to vector<8x128xf32>
    %126 = arith.maximumf %124, %125 : vector<8x128xf32>
    %127 = vector.extract_strided_slice %123 {offsets = [0, 256], sizes = [8, 128], strides = [1, 1]} : vector<8x512xf32> to vector<8x128xf32>
    %128 = vector.extract_strided_slice %123 {offsets = [0, 384], sizes = [8, 128], strides = [1, 1]} : vector<8x512xf32> to vector<8x128xf32>
    %129 = arith.maximumf %127, %128 : vector<8x128xf32>
    %130 = arith.maximumf %126, %129 : vector<8x128xf32>
    %131 = vector.broadcast %1 : vector<1x128xf32> to vector<8x128xf32>
    %132 = arith.addf %130, %131 : vector<8x128xf32>
    %cst_42 = arith.constant 0.000000e+00 : f32
    %133 = vector.broadcast %cst_42 : f32 to vector<8x128xf32>
    %134 = arith.maximumf %132, %133 : vector<8x128xf32>
    %135 = arith.truncf %134 : vector<8x128xf32> to vector<8x128xbf16>
    %c0_43 = arith.constant 0 : index
    %c1024 = arith.constant 1024 : index
    %136 = vector.load %arg13[%c0_43, %c1024] : memref<8x1792xbf16, #tpu.memory_space<vmem>>, vector<8x128xbf16>
    tpu.vector_store %arg13[%c0_43, %c1024], %135 {strides = array<i32>} : memref<8x1792xbf16, #tpu.memory_space<vmem>>, vector<8x128xbf16>,
    %c0_44 = arith.constant 0 : index
    %c576 = arith.constant 576 : index
    %137 = vector.load %arg1[%c0_44, %c576] : memref<8x1024xbf16, #tpu.memory_space<vmem>>, vector<8x192xbf16>
    %cst_45 = arith.constant dense<0.000000e+00> : vector<8x512xf32>
    %138 = tpu.matmul %137, %0, %cst_45 {dimension_numbers = #tpu.dot_dimension_numbers<[1], [0], [0], [1], [0, 0, 1, 1], [], []>} : vector<8x192xbf16>, vector<192x512xbf16>, vector<8x512xf32> -> vector<8x512xf32>
    %139 = vector.extract_strided_slice %138 {offsets = [0, 0], sizes = [8, 128], strides = [1, 1]} : vector<8x512xf32> to vector<8x128xf32>
    %140 = vector.extract_strided_slice %138 {offsets = [0, 128], sizes = [8, 128], strides = [1, 1]} : vector<8x512xf32> to vector<8x128xf32>
    %141 = arith.maximumf %139, %140 : vector<8x128xf32>
    %142 = vector.extract_strided_slice %138 {offsets = [0, 256], sizes = [8, 128], strides = [1, 1]} : vector<8x512xf32> to vector<8x128xf32>
    %143 = vector.extract_strided_slice %138 {offsets = [0, 384], sizes = [8, 128], strides = [1, 1]} : vector<8x512xf32> to vector<8x128xf32>
    %144 = arith.maximumf %142, %143 : vector<8x128xf32>
    %145 = arith.maximumf %141, %144 : vector<8x128xf32>
    %146 = vector.broadcast %1 : vector<1x128xf32> to vector<8x128xf32>
    %147 = arith.addf %145, %146 : vector<8x128xf32>
    %cst_46 = arith.constant 0.000000e+00 : f32
    %148 = vector.broadcast %cst_46 : f32 to vector<8x128xf32>
    %149 = arith.maximumf %147, %148 : vector<8x128xf32>
    %150 = arith.truncf %149 : vector<8x128xf32> to vector<8x128xbf16>
    %c0_47 = arith.constant 0 : index
    %c1152 = arith.constant 1152 : index
    %151 = vector.load %arg13[%c0_47, %c1152] : memref<8x1792xbf16, #tpu.memory_space<vmem>>, vector<8x128xbf16>
    tpu.vector_store %arg13[%c0_47, %c1152], %150 {strides = array<i32>} : memref<8x1792xbf16, #tpu.memory_space<vmem>>, vector<8x128xbf16>,
    %c0_48 = arith.constant 0 : index
    %c640_49 = arith.constant 640 : index
    %152 = vector.load %arg1[%c0_48, %c640_49] : memref<8x1024xbf16, #tpu.memory_space<vmem>>, vector<8x192xbf16>
    %cst_50 = arith.constant dense<0.000000e+00> : vector<8x512xf32>
    %153 = tpu.matmul %152, %0, %cst_50 {dimension_numbers = #tpu.dot_dimension_numbers<[1], [0], [0], [1], [0, 0, 1, 1], [], []>} : vector<8x192xbf16>, vector<192x512xbf16>, vector<8x512xf32> -> vector<8x512xf32>
    %154 = vector.extract_strided_slice %153 {offsets = [0, 0], sizes = [8, 128], strides = [1, 1]} : vector<8x512xf32> to vector<8x128xf32>
    %155 = vector.extract_strided_slice %153 {offsets = [0, 128], sizes = [8, 128], strides = [1, 1]} : vector<8x512xf32> to vector<8x128xf32>
    %156 = arith.maximumf %154, %155 : vector<8x128xf32>
    %157 = vector.extract_strided_slice %153 {offsets = [0, 256], sizes = [8, 128], strides = [1, 1]} : vector<8x512xf32> to vector<8x128xf32>
    %158 = vector.extract_strided_slice %153 {offsets = [0, 384], sizes = [8, 128], strides = [1, 1]} : vector<8x512xf32> to vector<8x128xf32>
    %159 = arith.maximumf %157, %158 : vector<8x128xf32>
    %160 = arith.maximumf %156, %159 : vector<8x128xf32>
    %161 = vector.broadcast %1 : vector<1x128xf32> to vector<8x128xf32>
    %162 = arith.addf %160, %161 : vector<8x128xf32>
    %cst_51 = arith.constant 0.000000e+00 : f32
    %163 = vector.broadcast %cst_51 : f32 to vector<8x128xf32>
    %164 = arith.maximumf %162, %163 : vector<8x128xf32>
    %165 = arith.truncf %164 : vector<8x128xf32> to vector<8x128xbf16>
    %c0_52 = arith.constant 0 : index
    %c1280 = arith.constant 1280 : index
    %166 = vector.load %arg13[%c0_52, %c1280] : memref<8x1792xbf16, #tpu.memory_space<vmem>>, vector<8x128xbf16>
    tpu.vector_store %arg13[%c0_52, %c1280], %165 {strides = array<i32>} : memref<8x1792xbf16, #tpu.memory_space<vmem>>, vector<8x128xbf16>,
    %c0_53 = arith.constant 0 : index
    %c704 = arith.constant 704 : index
    %167 = vector.load %arg1[%c0_53, %c704] : memref<8x1024xbf16, #tpu.memory_space<vmem>>, vector<8x192xbf16>
    %cst_54 = arith.constant dense<0.000000e+00> : vector<8x512xf32>
    %168 = tpu.matmul %167, %0, %cst_54 {dimension_numbers = #tpu.dot_dimension_numbers<[1], [0], [0], [1], [0, 0, 1, 1], [], []>} : vector<8x192xbf16>, vector<192x512xbf16>, vector<8x512xf32> -> vector<8x512xf32>
    %169 = vector.extract_strided_slice %168 {offsets = [0, 0], sizes = [8, 128], strides = [1, 1]} : vector<8x512xf32> to vector<8x128xf32>
    %170 = vector.extract_strided_slice %168 {offsets = [0, 128], sizes = [8, 128], strides = [1, 1]} : vector<8x512xf32> to vector<8x128xf32>
    %171 = arith.maximumf %169, %170 : vector<8x128xf32>
    %172 = vector.extract_strided_slice %168 {offsets = [0, 256], sizes = [8, 128], strides = [1, 1]} : vector<8x512xf32> to vector<8x128xf32>
    %173 = vector.extract_strided_slice %168 {offsets = [0, 384], sizes = [8, 128], strides = [1, 1]} : vector<8x512xf32> to vector<8x128xf32>
    %174 = arith.maximumf %172, %173 : vector<8x128xf32>
    %175 = arith.maximumf %171, %174 : vector<8x128xf32>
    %176 = vector.broadcast %1 : vector<1x128xf32> to vector<8x128xf32>
    %177 = arith.addf %175, %176 : vector<8x128xf32>
    %cst_55 = arith.constant 0.000000e+00 : f32
    %178 = vector.broadcast %cst_55 : f32 to vector<8x128xf32>
    %179 = arith.maximumf %177, %178 : vector<8x128xf32>
    %180 = arith.truncf %179 : vector<8x128xf32> to vector<8x128xbf16>
    %c0_56 = arith.constant 0 : index
    %c1408 = arith.constant 1408 : index
    %181 = vector.load %arg13[%c0_56, %c1408] : memref<8x1792xbf16, #tpu.memory_space<vmem>>, vector<8x128xbf16>
    tpu.vector_store %arg13[%c0_56, %c1408], %180 {strides = array<i32>} : memref<8x1792xbf16, #tpu.memory_space<vmem>>, vector<8x128xbf16>,
    %c0_57 = arith.constant 0 : index
    %c768_58 = arith.constant 768 : index
    %182 = vector.load %arg1[%c0_57, %c768_58] : memref<8x1024xbf16, #tpu.memory_space<vmem>>, vector<8x192xbf16>
    %cst_59 = arith.constant dense<0.000000e+00> : vector<8x512xf32>
    %183 = tpu.matmul %182, %0, %cst_59 {dimension_numbers = #tpu.dot_dimension_numbers<[1], [0], [0], [1], [0, 0, 1, 1], [], []>} : vector<8x192xbf16>, vector<192x512xbf16>, vector<8x512xf32> -> vector<8x512xf32>
    %184 = vector.extract_strided_slice %183 {offsets = [0, 0], sizes = [8, 128], strides = [1, 1]} : vector<8x512xf32> to vector<8x128xf32>
    %185 = vector.extract_strided_slice %183 {offsets = [0, 128], sizes = [8, 128], strides = [1, 1]} : vector<8x512xf32> to vector<8x128xf32>
    %186 = arith.maximumf %184, %185 : vector<8x128xf32>
    %187 = vector.extract_strided_slice %183 {offsets = [0, 256], sizes = [8, 128], strides = [1, 1]} : vector<8x512xf32> to vector<8x128xf32>
    %188 = vector.extract_strided_slice %183 {offsets = [0, 384], sizes = [8, 128], strides = [1, 1]} : vector<8x512xf32> to vector<8x128xf32>
    %189 = arith.maximumf %187, %188 : vector<8x128xf32>
    %190 = arith.maximumf %186, %189 : vector<8x128xf32>
    %191 = vector.broadcast %1 : vector<1x128xf32> to vector<8x128xf32>
    %192 = arith.addf %190, %191 : vector<8x128xf32>
    %cst_60 = arith.constant 0.000000e+00 : f32
    %193 = vector.broadcast %cst_60 : f32 to vector<8x128xf32>
    %194 = arith.maximumf %192, %193 : vector<8x128xf32>
    %195 = arith.truncf %194 : vector<8x128xf32> to vector<8x128xbf16>
    %c0_61 = arith.constant 0 : index
    %c1536 = arith.constant 1536 : index
    %196 = vector.load %arg13[%c0_61, %c1536] : memref<8x1792xbf16, #tpu.memory_space<vmem>>, vector<8x128xbf16>
    tpu.vector_store %arg13[%c0_61, %c1536], %195 {strides = array<i32>} : memref<8x1792xbf16, #tpu.memory_space<vmem>>, vector<8x128xbf16>,
    %c0_62 = arith.constant 0 : index
    %c832 = arith.constant 832 : index
    %197 = vector.load %arg1[%c0_62, %c832] : memref<8x1024xbf16, #tpu.memory_space<vmem>>, vector<8x192xbf16>
    %cst_63 = arith.constant dense<0.000000e+00> : vector<8x512xf32>
    %198 = tpu.matmul %197, %0, %cst_63 {dimension_numbers = #tpu.dot_dimension_numbers<[1], [0], [0], [1], [0, 0, 1, 1], [], []>} : vector<8x192xbf16>, vector<192x512xbf16>, vector<8x512xf32> -> vector<8x512xf32>
    %199 = vector.extract_strided_slice %198 {offsets = [0, 0], sizes = [8, 128], strides = [1, 1]} : vector<8x512xf32> to vector<8x128xf32>
    %200 = vector.extract_strided_slice %198 {offsets = [0, 128], sizes = [8, 128], strides = [1, 1]} : vector<8x512xf32> to vector<8x128xf32>
    %201 = arith.maximumf %199, %200 : vector<8x128xf32>
    %202 = vector.extract_strided_slice %198 {offsets = [0, 256], sizes = [8, 128], strides = [1, 1]} : vector<8x512xf32> to vector<8x128xf32>
    %203 = vector.extract_strided_slice %198 {offsets = [0, 384], sizes = [8, 128], strides = [1, 1]} : vector<8x512xf32> to vector<8x128xf32>
    %204 = arith.maximumf %202, %203 : vector<8x128xf32>
    %205 = arith.maximumf %201, %204 : vector<8x128xf32>
    %206 = vector.broadcast %1 : vector<1x128xf32> to vector<8x128xf32>
    %207 = arith.addf %205, %206 : vector<8x128xf32>
    %cst_64 = arith.constant 0.000000e+00 : f32
    %208 = vector.broadcast %cst_64 : f32 to vector<8x128xf32>
    %209 = arith.maximumf %207, %208 : vector<8x128xf32>
    %210 = arith.truncf %209 : vector<8x128xf32> to vector<8x128xbf16>
    %c0_65 = arith.constant 0 : index
    %c1664 = arith.constant 1664 : index
    %211 = vector.load %arg13[%c0_65, %c1664] : memref<8x1792xbf16, #tpu.memory_space<vmem>>, vector<8x128xbf16>
    tpu.vector_store %arg13[%c0_65, %c1664], %210 {strides = array<i32>} : memref<8x1792xbf16, #tpu.memory_space<vmem>>, vector<8x128xbf16>,
    %c0_66 = arith.constant 0 : index
    %c0_67 = arith.constant 0 : index
    %212 = vector.load %arg4[%c0_66, %c0_67] : memref<768x512xbf16, #tpu.memory_space<vmem>>, vector<768x512xbf16>
    %c0_68 = arith.constant 0 : index
    %c0_69 = arith.constant 0 : index
    %213 = vector.load %arg5[%c0_68, %c0_69] : memref<1x128xf32, #tpu.memory_space<vmem>>, vector<1x128xf32>
    %c0_70 = arith.constant 0 : index
    %c0_71 = arith.constant 0 : index
    %214 = vector.load %arg13[%c0_70, %c0_71] : memref<8x1792xbf16, #tpu.memory_space<vmem>>, vector<8x768xbf16>
    %cst_72 = arith.constant dense<0.000000e+00> : vector<8x512xf32>
    %215 = tpu.matmul %214, %212, %cst_72 {dimension_numbers = #tpu.dot_dimension_numbers<[1], [0], [0], [1], [0, 0, 1, 1], [], []>} : vector<8x768xbf16>, vector<768x512xbf16>, vector<8x512xf32> -> vector<8x512xf32>
    %216 = vector.extract_strided_slice %215 {offsets = [0, 0], sizes = [8, 128], strides = [1, 1]} : vector<8x512xf32> to vector<8x128xf32>
    %217 = vector.extract_strided_slice %215 {offsets = [0, 128], sizes = [8, 128], strides = [1, 1]} : vector<8x512xf32> to vector<8x128xf32>
    %218 = arith.maximumf %216, %217 : vector<8x128xf32>
    %219 = vector.extract_strided_slice %215 {offsets = [0, 256], sizes = [8, 128], strides = [1, 1]} : vector<8x512xf32> to vector<8x128xf32>
    %220 = vector.extract_strided_slice %215 {offsets = [0, 384], sizes = [8, 128], strides = [1, 1]} : vector<8x512xf32> to vector<8x128xf32>
    %221 = arith.maximumf %219, %220 : vector<8x128xf32>
    %222 = arith.maximumf %218, %221 : vector<8x128xf32>
    %223 = vector.broadcast %213 : vector<1x128xf32> to vector<8x128xf32>
    %224 = arith.addf %222, %223 : vector<8x128xf32>
    %cst_73 = arith.constant 0.000000e+00 : f32
    %225 = vector.broadcast %cst_73 : f32 to vector<8x128xf32>
    %226 = arith.maximumf %224, %225 : vector<8x128xf32>
    %227 = arith.truncf %226 : vector<8x128xf32> to vector<8x128xbf16>
    %c0_74 = arith.constant 0 : index
    %c0_75 = arith.constant 0 : index
    %228 = vector.load %arg14[%c0_74, %c0_75] : memref<8x640xbf16, #tpu.memory_space<vmem>>, vector<8x128xbf16>
    tpu.vector_store %arg14[%c0_74, %c0_75], %227 {strides = array<i32>} : memref<8x640xbf16, #tpu.memory_space<vmem>>, vector<8x128xbf16>,
    %c0_76 = arith.constant 0 : index
    %c256_77 = arith.constant 256 : index
    %229 = vector.load %arg13[%c0_76, %c256_77] : memref<8x1792xbf16, #tpu.memory_space<vmem>>, vector<8x768xbf16>
    %cst_78 = arith.constant dense<0.000000e+00> : vector<8x512xf32>
    %230 = tpu.matmul %229, %212, %cst_78 {dimension_numbers = #tpu.dot_dimension_numbers<[1], [0], [0], [1], [0, 0, 1, 1], [], []>} : vector<8x768xbf16>, vector<768x512xbf16>, vector<8x512xf32> -> vector<8x512xf32>
    %231 = vector.extract_strided_slice %230 {offsets = [0, 0], sizes = [8, 128], strides = [1, 1]} : vector<8x512xf32> to vector<8x128xf32>
    %232 = vector.extract_strided_slice %230 {offsets = [0, 128], sizes = [8, 128], strides = [1, 1]} : vector<8x512xf32> to vector<8x128xf32>
    %233 = arith.maximumf %231, %232 : vector<8x128xf32>
    %234 = vector.extract_strided_slice %230 {offsets = [0, 256], sizes = [8, 128], strides = [1, 1]} : vector<8x512xf32> to vector<8x128xf32>
    %235 = vector.extract_strided_slice %230 {offsets = [0, 384], sizes = [8, 128], strides = [1, 1]} : vector<8x512xf32> to vector<8x128xf32>
    %236 = arith.maximumf %234, %235 : vector<8x128xf32>
    %237 = arith.maximumf %233, %236 : vector<8x128xf32>
    %238 = vector.broadcast %213 : vector<1x128xf32> to vector<8x128xf32>
    %239 = arith.addf %237, %238 : vector<8x128xf32>
    %cst_79 = arith.constant 0.000000e+00 : f32
    %240 = vector.broadcast %cst_79 : f32 to vector<8x128xf32>
    %241 = arith.maximumf %239, %240 : vector<8x128xf32>
    %242 = arith.truncf %241 : vector<8x128xf32> to vector<8x128xbf16>
    %c0_80 = arith.constant 0 : index
    %c128_81 = arith.constant 128 : index
    %243 = vector.load %arg14[%c0_80, %c128_81] : memref<8x640xbf16, #tpu.memory_space<vmem>>, vector<8x128xbf16>
    tpu.vector_store %arg14[%c0_80, %c128_81], %242 {strides = array<i32>} : memref<8x640xbf16, #tpu.memory_space<vmem>>, vector<8x128xbf16>,
    %c0_82 = arith.constant 0 : index
    %c512_83 = arith.constant 512 : index
    %244 = vector.load %arg13[%c0_82, %c512_83] : memref<8x1792xbf16, #tpu.memory_space<vmem>>, vector<8x768xbf16>
    %cst_84 = arith.constant dense<0.000000e+00> : vector<8x512xf32>
    %245 = tpu.matmul %244, %212, %cst_84 {dimension_numbers = #tpu.dot_dimension_numbers<[1], [0], [0], [1], [0, 0, 1, 1], [], []>} : vector<8x768xbf16>, vector<768x512xbf16>, vector<8x512xf32> -> vector<8x512xf32>
    %246 = vector.extract_strided_slice %245 {offsets = [0, 0], sizes = [8, 128], strides = [1, 1]} : vector<8x512xf32> to vector<8x128xf32>
    %247 = vector.extract_strided_slice %245 {offsets = [0, 128], sizes = [8, 128], strides = [1, 1]} : vector<8x512xf32> to vector<8x128xf32>
    %248 = arith.maximumf %246, %247 : vector<8x128xf32>
    %249 = vector.extract_strided_slice %245 {offsets = [0, 256], sizes = [8, 128], strides = [1, 1]} : vector<8x512xf32> to vector<8x128xf32>
    %250 = vector.extract_strided_slice %245 {offsets = [0, 384], sizes = [8, 128], strides = [1, 1]} : vector<8x512xf32> to vector<8x128xf32>
    %251 = arith.maximumf %249, %250 : vector<8x128xf32>
    %252 = arith.maximumf %248, %251 : vector<8x128xf32>
    %253 = vector.broadcast %213 : vector<1x128xf32> to vector<8x128xf32>
    %254 = arith.addf %252, %253 : vector<8x128xf32>
    %cst_85 = arith.constant 0.000000e+00 : f32
    %255 = vector.broadcast %cst_85 : f32 to vector<8x128xf32>
    %256 = arith.maximumf %254, %255 : vector<8x128xf32>
    %257 = arith.truncf %256 : vector<8x128xf32> to vector<8x128xbf16>
    %c0_86 = arith.constant 0 : index
    %c256_87 = arith.constant 256 : index
    %258 = vector.load %arg14[%c0_86, %c256_87] : memref<8x640xbf16, #tpu.memory_space<vmem>>, vector<8x128xbf16>
    tpu.vector_store %arg14[%c0_86, %c256_87], %257 {strides = array<i32>} : memref<8x640xbf16, #tpu.memory_space<vmem>>, vector<8x128xbf16>,
    %c0_88 = arith.constant 0 : index
    %c768_89 = arith.constant 768 : index
    %259 = vector.load %arg13[%c0_88, %c768_89] : memref<8x1792xbf16, #tpu.memory_space<vmem>>, vector<8x768xbf16>
    %cst_90 = arith.constant dense<0.000000e+00> : vector<8x512xf32>
    %260 = tpu.matmul %259, %212, %cst_90 {dimension_numbers = #tpu.dot_dimension_numbers<[1], [0], [0], [1], [0, 0, 1, 1], [], []>} : vector<8x768xbf16>, vector<768x512xbf16>, vector<8x512xf32> -> vector<8x512xf32>
    %261 = vector.extract_strided_slice %260 {offsets = [0, 0], sizes = [8, 128], strides = [1, 1]} : vector<8x512xf32> to vector<8x128xf32>
    %262 = vector.extract_strided_slice %260 {offsets = [0, 128], sizes = [8, 128], strides = [1, 1]} : vector<8x512xf32> to vector<8x128xf32>
    %263 = arith.maximumf %261, %262 : vector<8x128xf32>
    %264 = vector.extract_strided_slice %260 {offsets = [0, 256], sizes = [8, 128], strides = [1, 1]} : vector<8x512xf32> to vector<8x128xf32>
    %265 = vector.extract_strided_slice %260 {offsets = [0, 384], sizes = [8, 128], strides = [1, 1]} : vector<8x512xf32> to vector<8x128xf32>
    %266 = arith.maximumf %264, %265 : vector<8x128xf32>
    %267 = arith.maximumf %263, %266 : vector<8x128xf32>
    %268 = vector.broadcast %213 : vector<1x128xf32> to vector<8x128xf32>
    %269 = arith.addf %267, %268 : vector<8x128xf32>
    %cst_91 = arith.constant 0.000000e+00 : f32
    %270 = vector.broadcast %cst_91 : f32 to vector<8x128xf32>
    %271 = arith.maximumf %269, %270 : vector<8x128xf32>
    %272 = arith.truncf %271 : vector<8x128xf32> to vector<8x128xbf16>
    %c0_92 = arith.constant 0 : index
    %c384_93 = arith.constant 384 : index
    %273 = vector.load %arg14[%c0_92, %c384_93] : memref<8x640xbf16, #tpu.memory_space<vmem>>, vector<8x128xbf16>
    tpu.vector_store %arg14[%c0_92, %c384_93], %272 {strides = array<i32>} : memref<8x640xbf16, #tpu.memory_space<vmem>>, vector<8x128xbf16>,
    %c0_94 = arith.constant 0 : index
    %c1024_95 = arith.constant 1024 : index
    %274 = vector.load %arg13[%c0_94, %c1024_95] : memref<8x1792xbf16, #tpu.memory_space<vmem>>, vector<8x768xbf16>
    %cst_96 = arith.constant dense<0.000000e+00> : vector<8x512xf32>
    %275 = tpu.matmul %274, %212, %cst_96 {dimension_numbers = #tpu.dot_dimension_numbers<[1], [0], [0], [1], [0, 0, 1, 1], [], []>} : vector<8x768xbf16>, vector<768x512xbf16>, vector<8x512xf32> -> vector<8x512xf32>
    %276 = vector.extract_strided_slice %275 {offsets = [0, 0], sizes = [8, 128], strides = [1, 1]} : vector<8x512xf32> to vector<8x128xf32>
    %277 = vector.extract_strided_slice %275 {offsets = [0, 128], sizes = [8, 128], strides = [1, 1]} : vector<8x512xf32> to vector<8x128xf32>
    %278 = arith.maximumf %276, %277 : vector<8x128xf32>
    %279 = vector.extract_strided_slice %275 {offsets = [0, 256], sizes = [8, 128], strides = [1, 1]} : vector<8x512xf32> to vector<8x128xf32>
    %280 = vector.extract_strided_slice %275 {offsets = [0, 384], sizes = [8, 128], strides = [1, 1]} : vector<8x512xf32> to vector<8x128xf32>
    %281 = arith.maximumf %279, %280 : vector<8x128xf32>
    %282 = arith.maximumf %278, %281 : vector<8x128xf32>
    %283 = vector.broadcast %213 : vector<1x128xf32> to vector<8x128xf32>
    %284 = arith.addf %282, %283 : vector<8x128xf32>
    %cst_97 = arith.constant 0.000000e+00 : f32
    %285 = vector.broadcast %cst_97 : f32 to vector<8x128xf32>
    %286 = arith.maximumf %284, %285 : vector<8x128xf32>
    %287 = arith.truncf %286 : vector<8x128xf32> to vector<8x128xbf16>
    %c0_98 = arith.constant 0 : index
    %c512_99 = arith.constant 512 : index
    %288 = vector.load %arg14[%c0_98, %c512_99] : memref<8x640xbf16, #tpu.memory_space<vmem>>, vector<8x128xbf16>
    tpu.vector_store %arg14[%c0_98, %c512_99], %287 {strides = array<i32>} : memref<8x640xbf16, #tpu.memory_space<vmem>>, vector<8x128xbf16>,
    %c0_100 = arith.constant 0 : index
    %c0_101 = arith.constant 0 : index
    %289 = vector.load %arg14[%c0_100, %c0_101] : memref<8x640xbf16, #tpu.memory_space<vmem>>, vector<8x640xbf16>
    %c0_102 = arith.constant 0 : index
    %c0_103 = arith.constant 0 : index
    %290 = vector.load %arg6[%c0_102, %c0_103] : memref<640x128xbf16, #tpu.memory_space<vmem>>, vector<640x128xbf16>
    %cst_104 = arith.constant dense<0.000000e+00> : vector<8x128xf32>
    %291 = tpu.matmul %289, %290, %cst_104 {dimension_numbers = #tpu.dot_dimension_numbers<[1], [0], [0], [1], [0, 0, 1, 1], [], []>} : vector<8x640xbf16>, vector<640x128xbf16>, vector<8x128xf32> -> vector<8x128xf32>
    %c0_105 = arith.constant 0 : index
    %c0_106 = arith.constant 0 : index
    %292 = vector.load %arg7[%c0_105, %c0_106] : memref<1x128xf32, #tpu.memory_space<vmem>>, vector<1x128xf32>
    %293 = vector.broadcast %292 : vector<1x128xf32> to vector<8x128xf32>
    %294 = arith.addf %291, %293 : vector<8x128xf32>
    %cst_107 = arith.constant 0.000000e+00 : f32
    %295 = vector.broadcast %cst_107 : f32 to vector<8x128xf32>
    %296 = arith.maximumf %294, %295 : vector<8x128xf32>
    %297 = arith.truncf %296 : vector<8x128xf32> to vector<8x128xbf16>
    %c0_108 = arith.constant 0 : index
    %c0_109 = arith.constant 0 : index
    %298 = vector.load %arg8[%c0_108, %c0_109] : memref<128x128xbf16, #tpu.memory_space<vmem>>, vector<128x128xbf16>
    %cst_110 = arith.constant dense<0.000000e+00> : vector<8x128xf32>
    %299 = tpu.matmul %297, %298, %cst_110 {dimension_numbers = #tpu.dot_dimension_numbers<[1], [0], [0], [1], [0, 0, 1, 1], [], []>} : vector<8x128xbf16>, vector<128x128xbf16>, vector<8x128xf32> -> vector<8x128xf32>
    %c0_111 = arith.constant 0 : index
    %c0_112 = arith.constant 0 : index
    %300 = vector.load %arg9[%c0_111, %c0_112] : memref<1x128xf32, #tpu.memory_space<vmem>>, vector<1x128xf32>
    %301 = vector.broadcast %300 : vector<1x128xf32> to vector<8x128xf32>
    %302 = arith.addf %299, %301 : vector<8x128xf32>
    %cst_113 = arith.constant 0.000000e+00 : f32
    %303 = vector.broadcast %cst_113 : f32 to vector<8x128xf32>
    %304 = arith.maximumf %302, %303 : vector<8x128xf32>
    %305 = arith.truncf %304 : vector<8x128xf32> to vector<8x128xbf16>
    %c0_114 = arith.constant 0 : index
    %c0_115 = arith.constant 0 : index
    %306 = vector.load %arg10[%c0_114, %c0_115] : memref<128x128xbf16, #tpu.memory_space<vmem>>, vector<128x128xbf16>
    %cst_116 = arith.constant dense<0.000000e+00> : vector<8x128xf32>
    %307 = tpu.matmul %305, %306, %cst_116 {dimension_numbers = #tpu.dot_dimension_numbers<[1], [0], [0], [1], [0, 0, 1, 1], [], []>} : vector<8x128xbf16>, vector<128x128xbf16>, vector<8x128xf32> -> vector<8x128xf32>
    %c0_117 = arith.constant 0 : index
    %c0_118 = arith.constant 0 : index
    %308 = vector.load %arg11[%c0_117, %c0_118] : memref<1x128xf32, #tpu.memory_space<vmem>>, vector<1x128xf32>
    %309 = vector.broadcast %308 : vector<1x128xf32> to vector<8x128xf32>
    %310 = arith.addf %307, %309 : vector<8x128xf32>
    %c0_119 = arith.constant 0 : index
    %c0_120 = arith.constant 0 : index
    %311 = vector.load %arg12[%c0_119, %c0_120] : memref<8x128xf32, #tpu.memory_space<vmem>>, vector<8x128xf32>
    tpu.vector_store %arg12[%c0_119, %c0_120], %310 {strides = array<i32>} : memref<8x128xf32, #tpu.memory_space<vmem>>, vector<8x128xf32>,
    return
  }
  func.func @transform_0(%arg0: i32) -> (i32, i32) {
    %c0_i32 = arith.constant 0 : i32
    %c0_i32_0 = arith.constant 0 : i32
    return %arg0, %c0_i32 : i32, i32
  }
  func.func @transform_1(%arg0: i32) -> (i32, i32) {
    %c0_i32 = arith.constant 0 : i32
    %c0_i32_0 = arith.constant 0 : i32
    %c0_i32_1 = arith.constant 0 : i32
    return %c0_i32, %c0_i32_0 : i32, i32
  }
  func.func @transform_2(%arg0: i32) -> (i32, i32) {
    %c0_i32 = arith.constant 0 : i32
    %c0_i32_0 = arith.constant 0 : i32
    %c0_i32_1 = arith.constant 0 : i32
    return %c0_i32, %c0_i32_0 : i32, i32
  }
  func.func @transform_3(%arg0: i32) -> (i32, i32) {
    %c0_i32 = arith.constant 0 : i32
    %c0_i32_0 = arith.constant 0 : i32
    %c0_i32_1 = arith.constant 0 : i32
    return %c0_i32, %c0_i32_0 : i32, i32
  }
  func.func @transform_4(%arg0: i32) -> (i32, i32) {
    %c0_i32 = arith.constant 0 : i32
    %c0_i32_0 = arith.constant 0 : i32
    %c0_i32_1 = arith.constant 0 : i32
    return %c0_i32, %c0_i32_0 : i32, i32
  }
  func.func @transform_5(%arg0: i32) -> (i32, i32) {
    %c0_i32 = arith.constant 0 : i32
    %c0_i32_0 = arith.constant 0 : i32
    %c0_i32_1 = arith.constant 0 : i32
    return %c0_i32, %c0_i32_0 : i32, i32
  }
  func.func @transform_6(%arg0: i32) -> (i32, i32) {
    %c0_i32 = arith.constant 0 : i32
    %c0_i32_0 = arith.constant 0 : i32
    %c0_i32_1 = arith.constant 0 : i32
    return %c0_i32, %c0_i32_0 : i32, i32
  }
  func.func @transform_7(%arg0: i32) -> (i32, i32) {
    %c0_i32 = arith.constant 0 : i32
    %c0_i32_0 = arith.constant 0 : i32
    %c0_i32_1 = arith.constant 0 : i32
    return %c0_i32, %c0_i32_0 : i32, i32
  }
  func.func @transform_8(%arg0: i32) -> (i32, i32) {
    %c0_i32 = arith.constant 0 : i32
    %c0_i32_0 = arith.constant 0 : i32
    %c0_i32_1 = arith.constant 0 : i32
    return %c0_i32, %c0_i32_0 : i32, i32
  }
  func.func @transform_9(%arg0: i32) -> (i32, i32) {
    %c0_i32 = arith.constant 0 : i32
    %c0_i32_0 = arith.constant 0 : i32
    %c0_i32_1 = arith.constant 0 : i32
    return %c0_i32, %c0_i32_0 : i32, i32
  }
  func.func @transform_10(%arg0: i32) -> (i32, i32) {
    %c0_i32 = arith.constant 0 : i32
    %c0_i32_0 = arith.constant 0 : i32
    %c0_i32_1 = arith.constant 0 : i32
    return %c0_i32, %c0_i32_0 : i32, i32
  }
  func.func @transform_11(%arg0: i32) -> (i32, i32) {
    %c0_i32 = arith.constant 0 : i32
    %c0_i32_0 = arith.constant 0 : i32
    return %arg0, %c0_i32 : i32, i32
  }
}

</mosaic_0001>

<bundles_post_ra>
// kernel: lenet5_forward.1
= control target key start
LH: loop header
LB: loop body
LE: loop exit
PB: predicated region body
PF: predicated region fallthrough
CT: control target
= control target key end

     0   :  { %s6396_s27 = smov 64   ;;  %vm335_vm0 = vcmask 523264   ;;  %vm6398_vm1 = vmmov 0   ;;  %s11216_s0 = inlined_call_operand.vmem [shape: bf16[8,1024], index: 0, kind: input, shape index: {}]   ;;  %s11217_s1 = inlined_call_operand.vmem [shape: bf16[192,512], index: 1, kind: input, shape index: {}]   ;;  %s11218_s2 = inlined_call_operand.vmem [shape: f32[1,128], index: 2, kind: input, shape index: {}]   ;;  %s11219_s3 = inlined_call_operand.vmem [shape: bf16[768,512], index: 3, kind: input, shape index: {}]   ;;  %s11220_s4 = inlined_call_operand.vmem [shape: f32[1,128], index: 4, kind: input, shape index: {}]   ;;  %s11221_s5 = inlined_call_operand.vmem [shape: bf16[640,128], index: 5, kind: input, shape index: {}]   ;;  %s11222_s7 = inlined_call_operand.vmem [shape: bf16[128,128], index: 7, kind: input, shape index: {}]   ;;  %s11223_s6 = inlined_call_operand.vmem [shape: f32[1,128], index: 6, kind: input, shape index: {}]   ;;  %s11224_s9 = inlined_call_operand.vmem [shape: bf16[128,128], index: 9, kind: input, shape index: {}]   ;;  %s11225_s8 = inlined_call_operand.vmem [shape: f32[1,128], index: 8, kind: input, shape index: {}]   ;;  %s11226_s10 = inlined_call_operand.vmem [shape: f32[1,128], index: 10, kind: input, shape index: {}]   ;;  %s11227_s11 = inlined_call_operand.vmem [shape: f32[8,128], index: 11, kind: output, shape index: {}]  }
   0x1   :  { %v434_v0 = vld [vmem:[%s11216_s0] sm:$0xff]  ;;  %v6472_v3 = vld [vmem:[%s11217_s1 + $0xc] ss:$16 sps:$4 sm:$0xff]   ;;  %v6482_v5 = vld [vmem:[%s11217_s1 + $0x8] ss:$16 sps:$4 sm:$0xff]  }
   0x2   :  { %v6462_v1 = vcombine.low %v434_v0, %v434_v0  ;;  %v6467_v2 = vld [vmem:[%s11217_s1 + $0x4] ss:$16 sps:$4 sm:$0xff]   ;;  %v6477_v4 = vld [vmem:[%s11217_s1] ss:$16 sps:$4 sm:$0xff]   ;;  %v5054_v6 = vcombine.high %v434_v0, %v434_v0  ;;  %380 = vmatprep.subr.bf16.mxu1 %v6472_v3  ;;  %v6497_v8 = vld [vmem:[%s11217_s1 + $0x2c] ss:$16 sps:$4 sm:$0xff]  }
   0x3   :  { %339 = vmatprep.subr.bf16.mxu0 %v6467_v2  ;;  %v6490_v7 = vld [vmem:[%s11217_s1 + $0x24] ss:$16 sps:$4 sm:$0xff]   ;;  %381 = vmatpush1.bf16.msra.mxu1 %v6482_v5  ;;  %v6504_v9 = vld [vmem:[%s11217_s1 + $0x20] ss:$16 sps:$4 sm:$0xff]   ;;  %v6509_v10 = vld [vmem:[%s11217_s1 + $0x28] ss:$16 sps:$4 sm:$0xff]  }
   0x4   :  { %440 = vrot.lane.b32.xlu0 %v6462_v1, %s6396_s27  ;;  %340 = vmatpush1.bf16.msra.mxu0 %v6477_v4  ;;  %v6515_v11 = vld [vmem:[%s11217_s1 + $0x44] ss:$16 sps:$4 sm:$0xff]   ;;  %v6522_v12 = vld [vmem:[%s11217_s1 + $0x4c] ss:$16 sps:$4 sm:$0xff]   ;;  %v6527_v13 = vld [vmem:[%s11217_s1 + $0x40] ss:$16 sps:$4 sm:$0xff]  }
   0x5   :  { %341 = vmatprep.subr.bf16.mxu0 %v6490_v7  ;;  %382 = vmatprep.subr.bf16.mxu1 %v6497_v8  ;;  %v6534_v14 = vld [vmem:[%s11217_s1 + $0x48] ss:$16 sps:$4 sm:$0xff]   ;;  %v6541_v15 = vld [vmem:[%s11217_s1 + $0x64] ss:$16 sps:$4 sm:$0xff]   ;;  %v6547_v16 = vld [vmem:[%s11217_s1 + $0x6c] ss:$16 sps:$4 sm:$0xff]  }
   0x6   :  { %5050 = vmatprep.mubr.msk.bf16.mxu0 %vm335_vm0, %v5054_v6  ;;  %5051 = vmatprep.mubr.msk.bf16.mxu1 %vm335_vm0, %v5054_v6  ;;  %v6553_v17 = vld [vmem:[%s11217_s1 + $0x60] ss:$16 sps:$4 sm:$0xff]   ;;  %v6560_v18 = vld [vmem:[%s11217_s1 + $0x68] ss:$16 sps:$4 sm:$0xff]   ;;  %v6565_v19 = vld [vmem:[%s11217_s1 + $0x84] ss:$16 sps:$4 sm:$0xff]  }
   0x7   :  { %383 = vmatpush1.bf16.msra.mxu1 %v6509_v10  ;;  %v6571_v20 = vld [vmem:[%s11217_s1 + $0x8c] ss:$16 sps:$4 sm:$0xff]   ;;  %v6576_v21 = vld [vmem:[%s11217_s1 + $0x80] ss:$16 sps:$4 sm:$0xff]   ;;  %v6582_v22 = vld [vmem:[%s11217_s1 + $0x88] ss:$16 sps:$4 sm:$0xff]  }
   0x8   :  { %442 = vrot.lane.b32.xlu0 %v5054_v6, %s6396_s27  ;;  %342 = vmatpush1.bf16.msra.mxu0 %v6504_v9  ;;  %v6589_v23 = vld [vmem:[%s11217_s1 + $0xa4] ss:$16 sps:$4 sm:$0xff]   ;;  %v6595_v24 = vld [vmem:[%s11217_s1 + $0xac] ss:$16 sps:$4 sm:$0xff]   ;;  %v6601_v25 = vld [vmem:[%s11217_s1 + $0xa0] ss:$16 sps:$4 sm:$0xff]  }
   0x9   :  { %343 = vmatprep.subr.bf16.mxu0 %v6515_v11  ;;  %384 = vmatprep.subr.bf16.mxu1 %v6522_v12  ;;  %v6608_v26 = vld [vmem:[%s11217_s1 + $0xa8] ss:$16 sps:$4 sm:$0xff]   ;;  %v6613_v27 = vld [vmem:[%s11217_s1 + $0xc4] ss:$16 sps:$4 sm:$0xff]   ;;  %v6619_v28 = vld [vmem:[%s11217_s1 + $0xcc] ss:$16 sps:$4 sm:$0xff]  }
   0xa   :  { %v6624_v29 = vld [vmem:[%s11217_s1 + $0xc0] ss:$16 sps:$4 sm:$0xff]   ;;  %v6630_v30 = vld [vmem:[%s11217_s1 + $0xc8] ss:$16 sps:$4 sm:$0xff]   ;;  %v6637_v31 = vld [vmem:[%s11217_s1 + $0xe4] ss:$16 sps:$4 sm:$0xff]  }
   0xb   :  { %385 = vmatpush1.bf16.msra.mxu1 %v6534_v14  ;;  %v6643_v32 = vld [vmem:[%s11217_s1 + $0xec] ss:$16 sps:$4 sm:$0xff]   ;;  %v6649_v33 = vld [vmem:[%s11217_s1 + $0xe0] ss:$16 sps:$4 sm:$0xff]   ;;  %v6656_v34 = vld [vmem:[%s11217_s1 + $0xe8] ss:$16 sps:$4 sm:$0xff]  }
   0xc   :  { %344 = vmatpush1.bf16.msra.mxu0 %v6527_v13  ;;  %386 = vmatprep.subr.bf16.mxu1 %v6547_v16  ;;  %v6661_v35 = vld [vmem:[%s11217_s1 + $0x104] ss:$16 sps:$4 sm:$0xff]   ;;  %v6667_v36 = vld [vmem:[%s11217_s1 + $0x10c] ss:$16 sps:$4 sm:$0xff]   ;;  %v6673_v37 = vld [vmem:[%s11217_s1 + $0x100] ss:$16 sps:$4 sm:$0xff]  }
   0xd   :  { %345 = vmatprep.subr.bf16.mxu0 %v6541_v15  ;;  %v638_v38 = vld [vmem:[%s11216_s0 + $0x4] sm:$0xff]  ;;  %v6696_v42 = vld [vmem:[%s11217_s1 + $0x12c] ss:$16 sps:$4 sm:$0xff]   ;;  %v6706_v44 = vld [vmem:[%s11217_s1 + $0x120] ss:$16 sps:$4 sm:$0xff]  }
   0xe   :  { %v6683_v39 = vld [vmem:[%s11217_s1 + $0x108] ss:$16 sps:$4 sm:$0xff]   ;;  %v6688_v40 = vld [vmem:[%s11217_s1 + $0x124] ss:$16 sps:$4 sm:$0xff]   ;;  %v6690_v41 = vcombine.low %v638_v38, %v638_v38  ;;  %v6698_v43 = vcombine.high %v638_v38, %v638_v38  ;;  %v6724_v47 = vld [vmem:[%s11217_s1 + $0x14c] ss:$16 sps:$4 sm:$0xff]  }
   0xf   :  { %387 = vmatpush1.bf16.msra.mxu1 %v6560_v18  ;;  %v6713_v45 = vld [vmem:[%s11217_s1 + $0x128] ss:$16 sps:$4 sm:$0xff]   ;;  %v6718_v46 = vld [vmem:[%s11217_s1 + $0x144] ss:$16 sps:$4 sm:$0xff]   ;;  %v6732_v48 = vld [vmem:[%s11217_s1 + $0x140] ss:$16 sps:$4 sm:$0xff]  }
  0x10   :  { %346 = vmatpush1.bf16.msra.mxu0 %v6553_v17  ;;  %388 = vmatprep.subr.bf16.mxu1 %v6571_v20  ;;  %v6739_v49 = vld [vmem:[%s11217_s1 + $0x148] ss:$16 sps:$4 sm:$0xff]   ;;  %v6744_v50 = vld [vmem:[%s11217_s1 + $0x164] ss:$16 sps:$4 sm:$0xff]   ;;  %v6750_v51 = vld [vmem:[%s11217_s1 + $0x16c] ss:$16 sps:$4 sm:$0xff]  }
  0x11   :  { %347 = vmatprep.subr.bf16.mxu0 %v6565_v19  ;;  %644 = vrot.lane.b32.xlu1 %v6690_v41, %s6396_s27  ;;  %v6756_v52 = vld [vmem:[%s11217_s1 + $0x160] ss:$16 sps:$4 sm:$0xff]   ;;  %v6763_v53 = vld [vmem:[%s11217_s1 + $0x168] ss:$16 sps:$4 sm:$0xff]  }
  0x12   :  { %v841_v54 = vld [vmem:[%s11216_s0 + $0x8] sm:$0xff]  ;;  %v1247_v6 = vld [vmem:[%s11216_s0 + $0x10] sm:$0xff] }
  0x13   :  { %389 = vmatpush1.bf16.msra.mxu1 %v6582_v22  ;;  %v6794_v55 = vcombine.high %v841_v54, %v841_v54  ;;  %v6796_v56 = vcombine.low %v841_v54, %v841_v54  ;;  %v1044_v60 = vld [vmem:[%s11216_s0 + $0xc] sm:$0xff]  ;;  %v7001_v38 = vcombine.high %v1247_v6, %v1247_v6 }
  0x14   :  { %348 = vmatpush1.bf16.msra.mxu0 %v6576_v21  ;;  %390 = vmatprep.subr.bf16.mxu1 %v6595_v24  ;;  %v6885_v61 = vcombine.high %v1044_v60, %v1044_v60  ;;  %v6887_v62 = vcombine.low %v1044_v60, %v1044_v60 }
  0x15   :  { %349 = vmatprep.subr.bf16.mxu0 %v6589_v23  ;;  %646 = vrot.lane.b32.xlu1 %v6698_v43, %s6396_s27 }
  0x16   :  { %847 = vrot.lane.b32.xlu0 %v6796_v56, %s6396_s27 }
  0x17   :  { %391 = vmatpush1.bf16.msra.mxu1 %v6608_v26 }
  0x18   :  { %350 = vmatpush1.bf16.msra.mxu0 %v6601_v25  ;;  %392 = vmatprep.subr.bf16.mxu1 %v6619_v28 }
  0x19   :  { %351 = vmatprep.subr.bf16.mxu0 %v6613_v27  ;;  %849 = vrot.lane.b32.xlu1 %v6794_v55, %s6396_s27 }
  0x1a   :  { %1050 = vrot.lane.b32.xlu0 %v6887_v62, %s6396_s27 }
  0x1b   :  { %393 = vmatpush1.bf16.msra.mxu1 %v6630_v30 }
  0x1c   :  { %352 = vmatpush1.bf16.msra.mxu0 %v6624_v29  ;;  %394 = vmatprep.subr.bf16.mxu1 %v6643_v32 }
  0x1d   :  { %353 = vmatprep.subr.bf16.mxu0 %v6637_v31  ;;  %1052 = vrot.lane.b32.xlu1 %v6885_v61, %s6396_s27 }
  0x1f   :  { %395 = vmatpush1.bf16.msra.mxu1 %v6656_v34 }
  0x20   :  { %354 = vmatpush1.bf16.msra.mxu0 %v6649_v33  ;;  %396 = vmatprep.subr.bf16.mxu1 %v6667_v36 }
  0x21   :  { %355 = vmatprep.subr.bf16.mxu0 %v6661_v35  ;;  %1255 = vrot.lane.b32.xlu1 %v7001_v38, %s6396_s27 }
  0x23   :  { %397 = vmatpush1.bf16.msra.mxu1 %v6683_v39 }
  0x24   :  { %356 = vmatpush1.bf16.msra.mxu0 %v6673_v37  ;;  %398 = vmatprep.subr.bf16.mxu1 %v6696_v42 }
  0x25   :  { %357 = vmatprep.subr.bf16.mxu0 %v6688_v40 }
  0x27   :  { %399 = vmatpush1.bf16.msra.mxu1 %v6713_v45 }
  0x28   :  { %358 = vmatpush1.bf16.msra.mxu0 %v6706_v44  ;;  %400 = vmatprep.subr.bf16.mxu1 %v6724_v47 }
  0x29   :  { %359 = vmatprep.subr.bf16.mxu0 %v6718_v46 }
  0x2b   :  { %401 = vmatpush1.bf16.msra.mxu1 %v6739_v49 }
  0x2c   :  { %360 = vmatpush1.bf16.msra.mxu0 %v6732_v48  ;;  %402 = vmatprep.subr.bf16.mxu1 %v6750_v51 }
  0x2d   :  { %361 = vmatprep.subr.bf16.mxu0 %v6744_v50 }
  0x2f   :  { %403 = vmatpush1.bf16.msra.mxu1 %v6763_v53 }
  0x30   :  { %362 = vmatpush1.bf16.msra.mxu0 %v6756_v52  ;;  %491 = vmatprep.subr.bf16.mxu1 %v6472_v3 }
  0x31   :  { %450 = vmatprep.subr.bf16.mxu0 %v6467_v2 }
  0x32   :  { %413 = vmatmul.mubr.bf16.vlgmr.msra.gmra.mrb[0].mxu1 %v6462_v1 }
  0x33   :  { %372 = vmatmul.mubr.bf16.vlgmr.msra.gmra.mrb[0].mxu0 %v6462_v1  ;;  %492 = vmatpush1.bf16.msra.mxu1 %v6482_v5 }
  0x34   :  { %451 = vmatpush1.bf16.msra.mxu0 %v6477_v4  ;;  %493 = vmatprep.subr.bf16.mxu1 %v6497_v8 }
  0x35   :  { %452 = vmatprep.subr.bf16.mxu0 %v6490_v7 }
  0x37   :  { %494 = vmatpush1.bf16.msra.mxu1 %v6509_v10 }
  0x38   :  { %453 = vmatpush1.bf16.msra.mxu0 %v6504_v9  ;;  %495 = vmatprep.subr.bf16.mxu1 %v6522_v12 }
  0x39   :  { %454 = vmatprep.subr.bf16.mxu0 %v6515_v11 }
  0x3b   :  { %496 = vmatpush1.bf16.msra.mxu1 %v6534_v14 }
  0x3c   :  { %455 = vmatpush1.bf16.msra.mxu0 %v6527_v13  ;;  %497 = vmatprep.subr.bf16.mxu1 %v6547_v16 }
  0x3d   :  { %456 = vmatprep.subr.bf16.mxu0 %v6541_v15 }
  0x3f   :  { %498 = vmatpush1.bf16.msra.mxu1 %v6560_v18 }
  0x40   :  { %457 = vmatpush1.bf16.msra.mxu0 %v6553_v17  ;;  %499 = vmatprep.subr.bf16.mxu1 %v6571_v20 }
  0x41   :  { %458 = vmatprep.subr.bf16.mxu0 %v6565_v19 }
  0x43   :  { %500 = vmatpush1.bf16.msra.mxu1 %v6582_v22 }
  0x44   :  { %459 = vmatpush1.bf16.msra.mxu0 %v6576_v21  ;;  %501 = vmatprep.subr.bf16.mxu1 %v6595_v24 }
  0x45   :  { %460 = vmatprep.subr.bf16.mxu0 %v6589_v23 }
  0x47   :  { %502 = vmatpush1.bf16.msra.mxu1 %v6608_v26 }
  0x48   :  { %461 = vmatpush1.bf16.msra.mxu0 %v6601_v25  ;;  %503 = vmatprep.subr.bf16.mxu1 %v6619_v28 }
  0x49   :  { %462 = vmatprep.subr.bf16.mxu0 %v6613_v27 }
  0x4b   :  { %504 = vmatpush1.bf16.msra.mxu1 %v6630_v30 }
  0x4c   :  { %463 = vmatpush1.bf16.msra.mxu0 %v6624_v29  ;;  %505 = vmatprep.subr.bf16.mxu1 %v6643_v32 }
  0x4d   :  { %464 = vmatprep.subr.bf16.mxu0 %v6637_v31 }
  0x4f   :  { %506 = vmatpush1.bf16.msra.mxu1 %v6656_v34 }
  0x50   :  { %465 = vmatpush1.bf16.msra.mxu0 %v6649_v33  ;;  %507 = vmatprep.subr.bf16.mxu1 %v6667_v36 }
  0x51   :  { %466 = vmatprep.subr.bf16.mxu0 %v6661_v35 }
  0x53   :  { %508 = vmatpush1.bf16.msra.mxu1 %v6683_v39 }
  0x54   :  { %467 = vmatpush1.bf16.msra.mxu0 %v6673_v37  ;;  %509 = vmatprep.subr.bf16.mxu1 %v6696_v42 }
  0x55   :  { %468 = vmatprep.subr.bf16.mxu0 %v6688_v40 }
  0x57   :  { %510 = vmatpush1.bf16.msra.mxu1 %v6713_v45 }
  0x58   :  { %469 = vmatpush1.bf16.msra.mxu0 %v6706_v44  ;;  %511 = vmatprep.subr.bf16.mxu1 %v6724_v47 }
  0x59   :  { %470 = vmatprep.subr.bf16.mxu0 %v6718_v46 }
  0x5b   :  { %512 = vmatpush1.bf16.msra.mxu1 %v6739_v49 }
  0x5c   :  { %471 = vmatpush1.bf16.msra.mxu0 %v6732_v48  ;;  %513 = vmatprep.subr.bf16.mxu1 %v6750_v51 }
  0x5d   :  { %472 = vmatprep.subr.bf16.mxu0 %v6744_v50 }
  0x5f   :  { %514 = vmatpush1.bf16.msra.mxu1 %v6763_v53 }
  0x60   :  { %473 = vmatpush1.bf16.msra.mxu0 %v6756_v52  ;;  %590 = vmatprep.subr.bf16.mxu1 %v6472_v3 }
  0x61   :  { %549 = vmatprep.subr.bf16.mxu0 %v6467_v2 }
  0x76   :  { %v441_v57 = vpop.permute.xlu0 %440 }
  0x7a   :  { %v443_v58 = vpop.permute.xlu0 %442 }
  0x7b   :  { %5055 = vmatprep.mubr.msk.bf16.mxu0 %vm335_vm0, %v443_v58  ;;  %5056 = vmatprep.mubr.msk.bf16.mxu1 %vm335_vm0, %v443_v58  ;;  %v445_v59 = vsel %vm335_vm0, %v441_v57, %v443_v58 }
  0x7c   :  { %483 = vmatmul.mubr.bf16.vlgmr.msra.gmra.mrb[4].mxu0 %v445_v59  ;;  %524 = vmatmul.mubr.bf16.vlgmr.msra.gmra.mrb[4].mxu1 %v445_v59 }
  0x7d   :  { %550 = vmatpush1.bf16.msra.mxu0 %v6477_v4  ;;  %591 = vmatpush1.bf16.msra.mxu1 %v6482_v5 }
  0x7e   :  { %551 = vmatprep.subr.bf16.mxu0 %v6490_v7  ;;  %592 = vmatprep.subr.bf16.mxu1 %v6497_v8 }
  0x7f   :  { %5059 = vmatprep.mubr.msk.bf16.mxu0 %vm335_vm0, %v6698_v43  ;;  %5060 = vmatprep.mubr.msk.bf16.mxu1 %vm335_vm0, %v6698_v43 }
  0x81   :  { %552 = vmatpush1.bf16.msra.mxu0 %v6504_v9  ;;  %593 = vmatpush1.bf16.msra.mxu1 %v6509_v10 }
  0x82   :  { %553 = vmatprep.subr.bf16.mxu0 %v6515_v11  ;;  %594 = vmatprep.subr.bf16.mxu1 %v6522_v12 }
  0x83   :  { %v645_v63 = vpop.permute.xlu1 %644 }
  0x85   :  { %554 = vmatpush1.bf16.msra.mxu0 %v6527_v13  ;;  %595 = vmatpush1.bf16.msra.mxu1 %v6534_v14 }
  0x86   :  { %555 = vmatprep.subr.bf16.mxu0 %v6541_v15  ;;  %596 = vmatprep.subr.bf16.mxu1 %v6547_v16 }
  0x87   :  { %v647_v0 = vpop.permute.xlu1 %646 }
  0x88   :  { %v648_v1 = vsel %vm335_vm0, %v645_v63, %v647_v0 }
  0x89   :  { %556 = vmatpush1.bf16.msra.mxu0 %v6553_v17  ;;  %597 = vmatpush1.bf16.msra.mxu1 %v6560_v18 }
  0x8a   :  { %557 = vmatprep.subr.bf16.mxu0 %v6565_v19  ;;  %598 = vmatprep.subr.bf16.mxu1 %v6571_v20 }
  0x8d   :  { %558 = vmatpush1.bf16.msra.mxu0 %v6576_v21  ;;  %599 = vmatpush1.bf16.msra.mxu1 %v6582_v22 }
  0x8e   :  { %559 = vmatprep.subr.bf16.mxu0 %v6589_v23  ;;  %600 = vmatprep.subr.bf16.mxu1 %v6595_v24 }
  0x91   :  { %560 = vmatpush1.bf16.msra.mxu0 %v6601_v25  ;;  %601 = vmatpush1.bf16.msra.mxu1 %v6608_v26 }
  0x92   :  { %561 = vmatprep.subr.bf16.mxu0 %v6613_v27  ;;  %602 = vmatprep.subr.bf16.mxu1 %v6619_v28 }
  0x95   :  { %562 = vmatpush1.bf16.msra.mxu0 %v6624_v29  ;;  %603 = vmatpush1.bf16.msra.mxu1 %v6630_v30 }
  0x96   :  { %563 = vmatprep.subr.bf16.mxu0 %v6637_v31  ;;  %604 = vmatprep.subr.bf16.mxu1 %v6643_v32 }
  0x99   :  { %564 = vmatpush1.bf16.msra.mxu0 %v6649_v33  ;;  %605 = vmatpush1.bf16.msra.mxu1 %v6656_v34 }
  0x9a   :  { %565 = vmatprep.subr.bf16.mxu0 %v6661_v35  ;;  %606 = vmatprep.subr.bf16.mxu1 %v6667_v36 }
  0x9d   :  { %566 = vmatpush1.bf16.msra.mxu0 %v6673_v37  ;;  %607 = vmatpush1.bf16.msra.mxu1 %v6683_v39 }
  0x9e   :  { %567 = vmatprep.subr.bf16.mxu0 %v6688_v40  ;;  %608 = vmatprep.subr.bf16.mxu1 %v6696_v42 }
  0xa1   :  { %568 = vmatpush1.bf16.msra.mxu0 %v6706_v44  ;;  %609 = vmatpush1.bf16.msra.mxu1 %v6713_v45 }
  0xa2   :  { %569 = vmatprep.subr.bf16.mxu0 %v6718_v46  ;;  %610 = vmatprep.subr.bf16.mxu1 %v6724_v47 }
  0xa5   :  { %570 = vmatpush1.bf16.msra.mxu0 %v6732_v48  ;;  %611 = vmatpush1.bf16.msra.mxu1 %v6739_v49 }
  0xa6   :  { %571 = vmatprep.subr.bf16.mxu0 %v6744_v50  ;;  %612 = vmatprep.subr.bf16.mxu1 %v6750_v51 }
  0xa9   :  { %572 = vmatpush1.bf16.msra.mxu0 %v6756_v52  ;;  %613 = vmatpush1.bf16.msra.mxu1 %v6763_v53 }
  0xaa   :  { %653 = vmatprep.subr.bf16.mxu0 %v6467_v2  ;;  %694 = vmatprep.subr.bf16.mxu1 %v6472_v3 }
  0xac   :  { %582 = vmatmul.mubr.bf16.vlgmr.msra.gmra.mrb[8].mxu0 %v6690_v41  ;;  %623 = vmatmul.mubr.bf16.vlgmr.msra.gmra.mrb[8].mxu1 %v6690_v41  ;;  %v7003_v41 = vcombine.low %v1247_v6, %v1247_v6 }
  0xad   :  { %654 = vmatpush1.bf16.msra.mxu0 %v6477_v4  ;;  %695 = vmatpush1.bf16.msra.mxu1 %v6482_v5 }
  0xae   :  { %655 = vmatprep.subr.bf16.mxu0 %v6490_v7  ;;  %696 = vmatprep.subr.bf16.mxu1 %v6497_v8 }
  0xaf   :  { %5063 = vmatprep.mubr.msk.bf16.mxu0 %vm335_vm0, %v647_v0  ;;  %5064 = vmatprep.mubr.msk.bf16.mxu1 %vm335_vm0, %v647_v0 }
  0xb0   :  { %1253 = vrot.lane.b32.xlu0 %v7003_v41, %s6396_s27 }
  0xb1   :  { %656 = vmatpush1.bf16.msra.mxu0 %v6504_v9  ;;  %697 = vmatpush1.bf16.msra.mxu1 %v6509_v10 }
  0xb2   :  { %657 = vmatprep.subr.bf16.mxu0 %v6515_v11  ;;  %698 = vmatprep.subr.bf16.mxu1 %v6522_v12 }
  0xb5   :  { %658 = vmatpush1.bf16.msra.mxu0 %v6527_v13  ;;  %699 = vmatpush1.bf16.msra.mxu1 %v6534_v14 }
  0xb6   :  { %659 = vmatprep.subr.bf16.mxu0 %v6541_v15  ;;  %700 = vmatprep.subr.bf16.mxu1 %v6547_v16 }
  0xb9   :  { %660 = vmatpush1.bf16.msra.mxu0 %v6553_v17  ;;  %701 = vmatpush1.bf16.msra.mxu1 %v6560_v18 }
  0xba   :  { %661 = vmatprep.subr.bf16.mxu0 %v6565_v19  ;;  %702 = vmatprep.subr.bf16.mxu1 %v6571_v20 }
  0xbd   :  { %662 = vmatpush1.bf16.msra.mxu0 %v6576_v21  ;;  %703 = vmatpush1.bf16.msra.mxu1 %v6582_v22 }
  0xbe   :  { %663 = vmatprep.subr.bf16.mxu0 %v6589_v23  ;;  %704 = vmatprep.subr.bf16.mxu1 %v6595_v24 }
  0xc1   :  { %664 = vmatpush1.bf16.msra.mxu0 %v6601_v25  ;;  %705 = vmatpush1.bf16.msra.mxu1 %v6608_v26 }
  0xc2   :  { %665 = vmatprep.subr.bf16.mxu0 %v6613_v27  ;;  %706 = vmatprep.subr.bf16.mxu1 %v6619_v28 }
  0xc5   :  { %666 = vmatpush1.bf16.msra.mxu0 %v6624_v29  ;;  %707 = vmatpush1.bf16.msra.mxu1 %v6630_v30 }
  0xc6   :  { %667 = vmatprep.subr.bf16.mxu0 %v6637_v31  ;;  %708 = vmatprep.subr.bf16.mxu1 %v6643_v32 }
  0xc9   :  { %668 = vmatpush1.bf16.msra.mxu0 %v6649_v33  ;;  %709 = vmatpush1.bf16.msra.mxu1 %v6656_v34 }
  0xca   :  { %669 = vmatprep.subr.bf16.mxu0 %v6661_v35  ;;  %710 = vmatprep.subr.bf16.mxu1 %v6667_v36 }
  0xcd   :  { %670 = vmatpush1.bf16.msra.mxu0 %v6673_v37  ;;  %711 = vmatpush1.bf16.msra.mxu1 %v6683_v39 }
  0xce   :  { %671 = vmatprep.subr.bf16.mxu0 %v6688_v40  ;;  %712 = vmatprep.subr.bf16.mxu1 %v6696_v42 }
  0xd1   :  { %672 = vmatpush1.bf16.msra.mxu0 %v6706_v44  ;;  %713 = vmatpush1.bf16.msra.mxu1 %v6713_v45 }
  0xd2   :  { %673 = vmatprep.subr.bf16.mxu0 %v6718_v46  ;;  %714 = vmatprep.subr.bf16.mxu1 %v6724_v47 }
  0xd5   :  { %674 = vmatpush1.bf16.msra.mxu0 %v6732_v48  ;;  %715 = vmatpush1.bf16.msra.mxu1 %v6739_v49 }
  0xd6   :  { %675 = vmatprep.subr.bf16.mxu0 %v6744_v50  ;;  %716 = vmatprep.subr.bf16.mxu1 %v6750_v51 }
  0xd9   :  { %676 = vmatpush1.bf16.msra.mxu0 %v6756_v52  ;;  %717 = vmatpush1.bf16.msra.mxu1 %v6763_v53 }
  0xda   :  { %752 = vmatprep.subr.bf16.mxu0 %v6467_v2  ;;  %793 = vmatprep.subr.bf16.mxu1 %v6472_v3 }
  0xdc   :  { %686 = vmatmul.mubr.bf16.vlgmr.msra.gmra.mrb[12].mxu0 %v648_v1  ;;  %727 = vmatmul.mubr.bf16.vlgmr.msra.gmra.mrb[12].mxu1 %v648_v1  ;;  %v7016_v1 = vld [vmem:[%s11218_s2] ss:$0 sm:$0xff] }
  0xdd   :  { %753 = vmatpush1.bf16.msra.mxu0 %v6477_v4  ;;  %794 = vmatpush1.bf16.msra.mxu1 %v6482_v5 }
  0xde   :  { %754 = vmatprep.subr.bf16.mxu0 %v6490_v7  ;;  %795 = vmatprep.subr.bf16.mxu1 %v6497_v8 }
  0xdf   :  { %5067 = vmatprep.mubr.msk.bf16.mxu0 %vm335_vm0, %v6794_v55  ;;  %5068 = vmatprep.mubr.msk.bf16.mxu1 %vm335_vm0, %v6794_v55 }
  0xe1   :  { %755 = vmatpush1.bf16.msra.mxu0 %v6504_v9  ;;  %796 = vmatpush1.bf16.msra.mxu1 %v6509_v10 }
  0xe2   :  { %756 = vmatprep.subr.bf16.mxu0 %v6515_v11  ;;  %797 = vmatprep.subr.bf16.mxu1 %v6522_v12 }
  0xe5   :  { %757 = vmatpush1.bf16.msra.mxu0 %v6527_v13  ;;  %798 = vmatpush1.bf16.msra.mxu1 %v6534_v14 }
  0xe6   :  { %758 = vmatprep.subr.bf16.mxu0 %v6541_v15  ;;  %799 = vmatprep.subr.bf16.mxu1 %v6547_v16 }
  0xe9   :  { %759 = vmatpush1.bf16.msra.mxu0 %v6553_v17  ;;  %800 = vmatpush1.bf16.msra.mxu1 %v6560_v18 }
  0xea   :  { %760 = vmatprep.subr.bf16.mxu0 %v6565_v19  ;;  %801 = vmatprep.subr.bf16.mxu1 %v6571_v20 }
  0xed   :  { %761 = vmatpush1.bf16.msra.mxu0 %v6576_v21  ;;  %802 = vmatpush1.bf16.msra.mxu1 %v6582_v22 }
  0xee   :  { %762 = vmatprep.subr.bf16.mxu0 %v6589_v23  ;;  %803 = vmatprep.subr.bf16.mxu1 %v6595_v24 }
  0xf1   :  { %763 = vmatpush1.bf16.msra.mxu0 %v6601_v25  ;;  %804 = vmatpush1.bf16.msra.mxu1 %v6608_v26 }
  0xf2   :  { %764 = vmatprep.subr.bf16.mxu0 %v6613_v27  ;;  %805 = vmatprep.subr.bf16.mxu1 %v6619_v28 }
  0xf5   :  { %765 = vmatpush1.bf16.msra.mxu0 %v6624_v29  ;;  %806 = vmatpush1.bf16.msra.mxu1 %v6630_v30 }
  0xf6   :  { %766 = vmatprep.subr.bf16.mxu0 %v6637_v31  ;;  %807 = vmatprep.subr.bf16.mxu1 %v6643_v32 }
  0xf9   :  { %767 = vmatpush1.bf16.msra.mxu0 %v6649_v33  ;;  %808 = vmatpush1.bf16.msra.mxu1 %v6656_v34 }
  0xfa   :  { %768 = vmatprep.subr.bf16.mxu0 %v6661_v35  ;;  %809 = vmatprep.subr.bf16.mxu1 %v6667_v36 }
  0xfd   :  { %769 = vmatpush1.bf16.msra.mxu0 %v6673_v37  ;;  %810 = vmatpush1.bf16.msra.mxu1 %v6683_v39 }
  0xfe   :  { %770 = vmatprep.subr.bf16.mxu0 %v6688_v40  ;;  %811 = vmatprep.subr.bf16.mxu1 %v6696_v42 }
 0x101   :  { %771 = vmatpush1.bf16.msra.mxu0 %v6706_v44  ;;  %812 = vmatpush1.bf16.msra.mxu1 %v6713_v45 }
 0x102   :  { %772 = vmatprep.subr.bf16.mxu0 %v6718_v46  ;;  %813 = vmatprep.subr.bf16.mxu1 %v6724_v47 }
 0x105   :  { %773 = vmatpush1.bf16.msra.mxu0 %v6732_v48  ;;  %814 = vmatpush1.bf16.msra.mxu1 %v6739_v49  ;;  %v414_v54 = vpop.f32.mrb[0].mxu1 }
 0x106   :  { %774 = vmatprep.subr.bf16.mxu0 %v6744_v50  ;;  %815 = vmatprep.subr.bf16.mxu1 %v6750_v51  ;;  %v373_v43 = vpop.f32.mrb[0].mxu0  ;;  %v416_v58 = vpop.f32.mrb[1].mxu1 }
 0x107   :  { %v375_v55 = vpop.f32.mrb[1].mxu0  ;;  %v422_v60 = vmax.f32 %v414_v54, %v416_v58  ;;  %v418_v63 = vpop.f32.mrb[2].mxu1 }
 0x108   :  { %v421_v57 = vmax.f32 %v373_v43, %v375_v55  ;;  %v377_v59 = vpop.f32.mrb[2].mxu0  ;;  %v419_v6 = vpop.f32.mrb[3].mxu1 }
 0x109   :  { %775 = vmatpush1.bf16.msra.mxu0 %v6756_v52  ;;  %816 = vmatpush1.bf16.msra.mxu1 %v6763_v53  ;;  %v378_v0 = vpop.f32.mrb[3].mxu0  ;;  %v850_v55 = vpop.permute.xlu1 %849 }
 0x10a   :  { %856 = vmatprep.subr.bf16.mxu0 %v6467_v2  ;;  %897 = vmatprep.subr.bf16.mxu1 %v6472_v3  ;;  %v423_v43 = vmax.f32 %v421_v57, %v422_v60  ;;  %v848_v57 = vpop.permute.xlu0 %847 }
 0x10b   :  { %v851_v59 = vsel %vm335_vm0, %v848_v57, %v850_v55 }
 0x10c   :  { %785 = vmatmul.mubr.bf16.vlgmr.msra.gmra.mrb[16].mxu0 %v6796_v56  ;;  %826 = vmatmul.mubr.bf16.vlgmr.msra.gmra.mrb[16].mxu1 %v6796_v56  ;;  %v430_v54 = vadd.f32 %v7016_v1, %v423_v43  ;;  %v1450_v43 = vld [vmem:[%s11216_s0 + $0x14] sm:$0xff] }
 0x10d   :  { %857 = vmatpush1.bf16.msra.mxu0 %v6477_v4  ;;  %898 = vmatpush1.bf16.msra.mxu1 %v6482_v5  ;;  %v7148_v57 = vpop.permute.xlu1 %1052 }
 0x10e   :  { %858 = vmatprep.subr.bf16.mxu0 %v6490_v7  ;;  %899 = vmatprep.subr.bf16.mxu1 %v6497_v8  ;;  %v431_v58 = vmax.f32 %v430_v54, 0.0  ;;  %v7126_v54 = vcombine.low %v1450_v43, %v1450_v43 }
 0x10f   :  { %5071 = vmatprep.mubr.msk.bf16.mxu0 %vm335_vm0, %v850_v55  ;;  %5072 = vmatprep.mubr.msk.bf16.mxu1 %vm335_vm0, %v850_v55  ;;  %v7124_v55 = vcombine.high %v1450_v43, %v1450_v43 }
 0x110   :  { %v432_v56 = vpack.c.bf16 %v431_v58, %v431_v58  ;;  %1456 = vrot.lane.b32.xlu0 %v7126_v54, %s6396_s27  ;;  %v7137_v58 = vld [vmem:[%s11217_s1 + $0x4] ss:$16 sps:$4 sm:$0xff]  }
 0x111   :  { %859 = vmatpush1.bf16.msra.mxu0 %v6504_v9  ;;  %900 = vmatpush1.bf16.msra.mxu1 %v6509_v10 }
 0x112   :  { %860 = vmatprep.subr.bf16.mxu0 %v6515_v11  ;;  %901 = vmatprep.subr.bf16.mxu1 %v6522_v12  ;;  %433 = vst [vmem:[#allocation2] sm:$0xf] %v432_v56  ;;  %v7143_v56 = vld [vmem:[%s11217_s1 + $0xc] ss:$16 sps:$4 sm:$0xff]  }
 0x113   :  { %1458 = vrot.lane.b32.xlu1 %v7124_v55, %s6396_s27 }
 0x115   :  { %861 = vmatpush1.bf16.msra.mxu0 %v6527_v13  ;;  %902 = vmatpush1.bf16.msra.mxu1 %v6534_v14 }
 0x116   :  { %862 = vmatprep.subr.bf16.mxu0 %v6541_v15  ;;  %903 = vmatprep.subr.bf16.mxu1 %v6547_v16 }
 0x119   :  { %863 = vmatpush1.bf16.msra.mxu0 %v6553_v17  ;;  %904 = vmatpush1.bf16.msra.mxu1 %v6560_v18 }
 0x11a   :  { %864 = vmatprep.subr.bf16.mxu0 %v6565_v19  ;;  %905 = vmatprep.subr.bf16.mxu1 %v6571_v20 }
 0x11d   :  { %865 = vmatpush1.bf16.msra.mxu0 %v6576_v21  ;;  %906 = vmatpush1.bf16.msra.mxu1 %v6582_v22 }
 0x11e   :  { %866 = vmatprep.subr.bf16.mxu0 %v6589_v23  ;;  %907 = vmatprep.subr.bf16.mxu1 %v6595_v24 }
 0x121   :  { %867 = vmatpush1.bf16.msra.mxu0 %v6601_v25  ;;  %908 = vmatpush1.bf16.msra.mxu1 %v6608_v26 }
 0x122   :  { %868 = vmatprep.subr.bf16.mxu0 %v6613_v27  ;;  %909 = vmatprep.subr.bf16.mxu1 %v6619_v28 }
 0x125   :  { %869 = vmatpush1.bf16.msra.mxu0 %v6624_v29  ;;  %910 = vmatpush1.bf16.msra.mxu1 %v6630_v30 }
 0x126   :  { %870 = vmatprep.subr.bf16.mxu0 %v6637_v31  ;;  %911 = vmatprep.subr.bf16.mxu1 %v6643_v32 }
 0x129   :  { %871 = vmatpush1.bf16.msra.mxu0 %v6649_v33  ;;  %912 = vmatpush1.bf16.msra.mxu1 %v6656_v34 }
 0x12a   :  { %872 = vmatprep.subr.bf16.mxu0 %v6661_v35  ;;  %913 = vmatprep.subr.bf16.mxu1 %v6667_v36 }
 0x12d   :  { %873 = vmatpush1.bf16.msra.mxu0 %v6673_v37  ;;  %914 = vmatpush1.bf16.msra.mxu1 %v6683_v39 }
 0x12e   :  { %874 = vmatprep.subr.bf16.mxu0 %v6688_v40  ;;  %915 = vmatprep.subr.bf16.mxu1 %v6696_v42 }
 0x131   :  { %875 = vmatpush1.bf16.msra.mxu0 %v6706_v44  ;;  %916 = vmatpush1.bf16.msra.mxu1 %v6713_v45 }
 0x132   :  { %876 = vmatprep.subr.bf16.mxu0 %v6718_v46  ;;  %917 = vmatprep.subr.bf16.mxu1 %v6724_v47 }
 0x135   :  { %877 = vmatpush1.bf16.msra.mxu0 %v6732_v48  ;;  %918 = vmatpush1.bf16.msra.mxu1 %v6739_v49 }
 0x136   :  { %878 = vmatprep.subr.bf16.mxu0 %v6744_v50  ;;  %919 = vmatprep.subr.bf16.mxu1 %v6750_v51 }
 0x139   :  { %879 = vmatpush1.bf16.msra.mxu0 %v6756_v52  ;;  %920 = vmatpush1.bf16.msra.mxu1 %v6763_v53 }
 0x13a   :  { %955 = vmatprep.subr.bf16.mxu0 %v6467_v2  ;;  %996 = vmatprep.subr.bf16.mxu1 %v6472_v3 }
 0x13c   :  { %889 = vmatmul.mubr.bf16.vlgmr.msra.gmra.mrb[20].mxu0 %v851_v59  ;;  %930 = vmatmul.mubr.bf16.vlgmr.msra.gmra.mrb[20].mxu1 %v851_v59  ;;  %v7153_v59 = vld [vmem:[%s11217_s1] ss:$16 sps:$4 sm:$0xff]  }
 0x13d   :  { %956 = vmatpush1.bf16.msra.mxu0 %v6477_v4  ;;  %997 = vmatpush1.bf16.msra.mxu1 %v6482_v5 }
 0x13e   :  { %957 = vmatprep.subr.bf16.mxu0 %v6490_v7  ;;  %998 = vmatprep.subr.bf16.mxu1 %v6497_v8 }
 0x13f   :  { %5075 = vmatprep.mubr.msk.bf16.mxu0 %vm335_vm0, %v6885_v61  ;;  %5076 = vmatprep.mubr.msk.bf16.mxu1 %vm335_vm0, %v6885_v61 }
 0x141   :  { %958 = vmatpush1.bf16.msra.mxu0 %v6504_v9  ;;  %999 = vmatpush1.bf16.msra.mxu1 %v6509_v10 }
 0x142   :  { %959 = vmatprep.subr.bf16.mxu0 %v6515_v11  ;;  %1000 = vmatprep.subr.bf16.mxu1 %v6522_v12 }
 0x145   :  { %960 = vmatpush1.bf16.msra.mxu0 %v6527_v13  ;;  %1001 = vmatpush1.bf16.msra.mxu1 %v6534_v14 }
 0x146   :  { %961 = vmatprep.subr.bf16.mxu0 %v6541_v15  ;;  %1002 = vmatprep.subr.bf16.mxu1 %v6547_v16 }
 0x149   :  { %962 = vmatpush1.bf16.msra.mxu0 %v6553_v17  ;;  %1003 = vmatpush1.bf16.msra.mxu1 %v6560_v18 }
 0x14a   :  { %963 = vmatprep.subr.bf16.mxu0 %v6565_v19  ;;  %1004 = vmatprep.subr.bf16.mxu1 %v6571_v20 }
 0x14d   :  { %964 = vmatpush1.bf16.msra.mxu0 %v6576_v21  ;;  %1005 = vmatpush1.bf16.msra.mxu1 %v6582_v22 }
 0x14e   :  { %965 = vmatprep.subr.bf16.mxu0 %v6589_v23  ;;  %1006 = vmatprep.subr.bf16.mxu1 %v6595_v24 }
 0x14f   :  { %v484_v2 = vpop.f32.mrb[4].mxu0  ;;  %v525_v3 = vpop.f32.mrb[4].mxu1 }
 0x150   :  { %v486_v4 = vpop.f32.mrb[5].mxu0  ;;  %v527_v5 = vpop.f32.mrb[5].mxu1 }
 0x151   :  { %v532_v7 = vmax.f32 %v484_v2, %v486_v4  ;;  %v533_v8 = vmax.f32 %v525_v3, %v527_v5  ;;  %966 = vmatpush1.bf16.msra.mxu0 %v6601_v25  ;;  %1007 = vmatpush1.bf16.msra.mxu1 %v6608_v26  ;;  %v488_v9 = vpop.f32.mrb[6].mxu0  ;;  %v529_v10 = vpop.f32.mrb[6].mxu1  ;;  %v7159_v2 = vld [vmem:[%s11217_s1 + $0x8] ss:$16 sps:$4 sm:$0xff]   ;;  %v7171_v3 = vld [vmem:[%s11217_s1 + $0x2c] ss:$16 sps:$4 sm:$0xff]  }
 0x152   :  { %v489_v11 = vpop.f32.mrb[7].mxu0  ;;  %v530_v61 = vpop.f32.mrb[7].mxu1  ;;  %967 = vmatprep.subr.bf16.mxu0 %v6613_v27  ;;  %1008 = vmatprep.subr.bf16.mxu1 %v6619_v28  ;;  %v7181_v4 = vld [vmem:[%s11217_s1 + $0x20] ss:$16 sps:$4 sm:$0xff]   ;;  %v7187_v5 = vld [vmem:[%s11217_s1 + $0x28] ss:$16 sps:$4 sm:$0xff]  }
 0x153   :  { %v534_v60 = vmax.f32 %v532_v7, %v533_v8  ;;  %v7193_v7 = vld [vmem:[%s11217_s1 + $0x44] ss:$16 sps:$4 sm:$0xff]   ;;  %v7350_v10 = vld [vmem:[%s11217_s1 + $0xcc] ss:$16 sps:$4 sm:$0xff]  }
 0x154   :  { %v7344_v9 = vld [vmem:[%s11217_s1 + $0xc4] ss:$16 sps:$4 sm:$0xff]  }
 0x155   :  { %v535_v63 = vadd.f32 %v7016_v1, %v534_v60  ;;  %968 = vmatpush1.bf16.msra.mxu0 %v6624_v29  ;;  %1009 = vmatpush1.bf16.msra.mxu1 %v6630_v30  ;;  %v7357_v60 = vld [vmem:[%s11217_s1 + $0xc0] ss:$16 sps:$4 sm:$0xff]  }
 0x156   :  { %969 = vmatprep.subr.bf16.mxu0 %v6637_v31  ;;  %1010 = vmatprep.subr.bf16.mxu1 %v6643_v32 }
 0x157   :  { %v536_v0 = vmax.f32 %v535_v63, 0.0  ;;  %v7363_v63 = vld [vmem:[%s11217_s1 + $0xc8] ss:$16 sps:$4 sm:$0xff]  }
 0x159   :  { %v537_v6 = vpack.c.bf16 %v536_v0, %v536_v0  ;;  %970 = vmatpush1.bf16.msra.mxu0 %v6649_v33  ;;  %1011 = vmatpush1.bf16.msra.mxu1 %v6656_v34  ;;  %v7369_v0 = vld [vmem:[%s11217_s1 + $0xe4] ss:$16 sps:$4 sm:$0xff]  }
 0x15a   :  { %971 = vmatprep.subr.bf16.mxu0 %v6661_v35  ;;  %1012 = vmatprep.subr.bf16.mxu1 %v6667_v36 }
 0x15b   :  { %538 = vst [vmem:[#allocation2 + $0x4] sm:$0xf] %v537_v6  ;;  %v7375_v6 = vld [vmem:[%s11217_s1 + $0xec] ss:$16 sps:$4 sm:$0xff]  }
 0x15d   :  { %972 = vmatpush1.bf16.msra.mxu0 %v6673_v37  ;;  %1013 = vmatpush1.bf16.msra.mxu1 %v6683_v39 }
 0x15e   :  { %973 = vmatprep.subr.bf16.mxu0 %v6688_v40  ;;  %1014 = vmatprep.subr.bf16.mxu1 %v6696_v42 }
 0x161   :  { %974 = vmatpush1.bf16.msra.mxu0 %v6706_v44  ;;  %1015 = vmatpush1.bf16.msra.mxu1 %v6713_v45 }
 0x162   :  { %975 = vmatprep.subr.bf16.mxu0 %v6718_v46  ;;  %1016 = vmatprep.subr.bf16.mxu1 %v6724_v47 }
 0x165   :  { %976 = vmatpush1.bf16.msra.mxu0 %v6732_v48  ;;  %1017 = vmatpush1.bf16.msra.mxu1 %v6739_v49 }
 0x166   :  { %977 = vmatprep.subr.bf16.mxu0 %v6744_v50  ;;  %1018 = vmatprep.subr.bf16.mxu1 %v6750_v51 }
 0x169   :  { %978 = vmatpush1.bf16.msra.mxu0 %v6756_v52  ;;  %1019 = vmatpush1.bf16.msra.mxu1 %v6763_v53 }
 0x16a   :  { %1059 = vmatprep.subr.bf16.mxu0 %v7137_v58  ;;  %1100 = vmatprep.subr.bf16.mxu1 %v7143_v56 }
 0x16c   :  { %988 = vmatmul.mubr.bf16.vlgmr.msra.gmra.mrb[24].mxu0 %v6887_v62  ;;  %1029 = vmatmul.mubr.bf16.vlgmr.msra.gmra.mrb[24].mxu1 %v6887_v62  ;;  %v7165_v62 = vld [vmem:[%s11217_s1 + $0x24] ss:$16 sps:$4 sm:$0xff]  }
 0x16d   :  { %1060 = vmatpush1.bf16.msra.mxu0 %v7153_v59  ;;  %1101 = vmatpush1.bf16.msra.mxu1 %v7159_v2 }
 0x16e   :  { %1061 = vmatprep.subr.bf16.mxu0 %v7165_v62  ;;  %1102 = vmatprep.subr.bf16.mxu1 %v7171_v3 }
 0x16f   :  { %5079 = vmatprep.mubr.msk.bf16.mxu0 %vm335_vm0, %v7148_v57  ;;  %5080 = vmatprep.mubr.msk.bf16.mxu1 %vm335_vm0, %v7148_v57 }
 0x171   :  { %1062 = vmatpush1.bf16.msra.mxu0 %v7181_v4  ;;  %1103 = vmatpush1.bf16.msra.mxu1 %v7187_v5 }
 0x172   :  { %1063 = vmatprep.subr.bf16.mxu0 %v7193_v7  ;;  %1104 = vmatprep.subr.bf16.mxu1 %v6522_v12 }
 0x175   :  { %1064 = vmatpush1.bf16.msra.mxu0 %v6527_v13  ;;  %1105 = vmatpush1.bf16.msra.mxu1 %v6534_v14 }
 0x176   :  { %1065 = vmatprep.subr.bf16.mxu0 %v6541_v15  ;;  %1106 = vmatprep.subr.bf16.mxu1 %v6547_v16 }
 0x179   :  { %1066 = vmatpush1.bf16.msra.mxu0 %v6553_v17  ;;  %1107 = vmatpush1.bf16.msra.mxu1 %v6560_v18 }
 0x17a   :  { %1067 = vmatprep.subr.bf16.mxu0 %v6565_v19  ;;  %1108 = vmatprep.subr.bf16.mxu1 %v6571_v20 }
 0x17d   :  { %1068 = vmatpush1.bf16.msra.mxu0 %v6576_v21  ;;  %1109 = vmatpush1.bf16.msra.mxu1 %v6582_v22 }
 0x17e   :  { %1069 = vmatprep.subr.bf16.mxu0 %v6589_v23  ;;  %1110 = vmatprep.subr.bf16.mxu1 %v6595_v24 }
 0x17f   :  { %v583_v12 = vpop.f32.mrb[8].mxu0  ;;  %v624_v13 = vpop.f32.mrb[8].mxu1 }
 0x180   :  { %v585_v14 = vpop.f32.mrb[9].mxu0  ;;  %v626_v15 = vpop.f32.mrb[9].mxu1 }
 0x181   :  { %v631_v16 = vmax.f32 %v583_v12, %v585_v14  ;;  %v632_v17 = vmax.f32 %v624_v13, %v626_v15  ;;  %v587_v8 = vpop.f32.mrb[10].mxu0  ;;  %v628_v18 = vpop.f32.mrb[10].mxu1  ;;  %1070 = vmatpush1.bf16.msra.mxu0 %v6601_v25  ;;  %1111 = vmatpush1.bf16.msra.mxu1 %v6608_v26  ;;  %v7381_v12 = vld [vmem:[%s11217_s1 + $0xe0] ss:$16 sps:$4 sm:$0xff]   ;;  %v7387_v13 = vld [vmem:[%s11217_s1 + $0xe8] ss:$16 sps:$4 sm:$0xff]  }
 0x182   :  { %v588_v19 = vpop.f32.mrb[11].mxu0  ;;  %v629_v20 = vpop.f32.mrb[11].mxu1  ;;  %1071 = vmatprep.subr.bf16.mxu0 %v6613_v27  ;;  %1112 = vmatprep.subr.bf16.mxu1 %v6619_v28  ;;  %v7254_v27 = vld [vmem:[%s11217_s1 + $0x4c] ss:$16 sps:$4 sm:$0xff]   ;;  %v7260_v28 = vld [vmem:[%s11217_s1 + $0x40] ss:$16 sps:$4 sm:$0xff]  }
 0x183   :  { %v633_v21 = vmax.f32 %v631_v16, %v632_v17  ;;  %v1051_v25 = vpop.permute.xlu0 %1050  ;;  %v7393_v14 = vld [vmem:[%s11217_s1 + $0x104] ss:$16 sps:$4 sm:$0xff]   ;;  %v7399_v15 = vld [vmem:[%s11217_s1 + $0x10c] ss:$16 sps:$4 sm:$0xff]   ;;  %v7405_v16 = vld [vmem:[%s11217_s1 + $0x100] ss:$16 sps:$4 sm:$0xff]  }
 0x184   :  { %v1054_v26 = vsel %vm335_vm0, %v1051_v25, %v7148_v57  ;;  %v7411_v17 = vld [vmem:[%s11217_s1 + $0x108] ss:$16 sps:$4 sm:$0xff]   ;;  %v7417_v8 = vld [vmem:[%s11217_s1 + $0x124] ss:$16 sps:$4 sm:$0xff]   ;;  %v7423_v18 = vld [vmem:[%s11217_s1 + $0x12c] ss:$16 sps:$4 sm:$0xff]  }
 0x185   :  { %v634_v22 = vadd.f32 %v7016_v1, %v633_v21  ;;  %1072 = vmatpush1.bf16.msra.mxu0 %v6624_v29  ;;  %1113 = vmatpush1.bf16.msra.mxu1 %v6630_v30  ;;  %v7266_v29 = vld [vmem:[%s11217_s1 + $0x48] ss:$16 sps:$4 sm:$0xff]   ;;  %v7272_v30 = vld [vmem:[%s11217_s1 + $0x64] ss:$16 sps:$4 sm:$0xff]   ;;  %v7429_v19 = vld [vmem:[%s11217_s1 + $0x120] ss:$16 sps:$4 sm:$0xff]  }
 0x186   :  { %1073 = vmatprep.subr.bf16.mxu0 %v6637_v31  ;;  %1114 = vmatprep.subr.bf16.mxu1 %v6643_v32  ;;  %v7278_v31 = vld [vmem:[%s11217_s1 + $0x6c] ss:$16 sps:$4 sm:$0xff]   ;;  %v7284_v32 = vld [vmem:[%s11217_s1 + $0x60] ss:$16 sps:$4 sm:$0xff]   ;;  %v7435_v20 = vld [vmem:[%s11217_s1 + $0x128] ss:$16 sps:$4 sm:$0xff]  }
 0x187   :  { %v635_v23 = vmax.f32 %v634_v22, 0.0  ;;  %v7441_v21 = vld [vmem:[%s11217_s1 + $0x144] ss:$16 sps:$4 sm:$0xff]   ;;  %v7447_v22 = vld [vmem:[%s11217_s1 + $0x14c] ss:$16 sps:$4 sm:$0xff]  }
 0x188   :  { %v1653_v25 = vld [vmem:[%s11216_s0 + $0x18] sm:$0xff] }
 0x189   :  { %v636_v24 = vpack.c.bf16 %v635_v23, %v635_v23  ;;  %1074 = vmatpush1.bf16.msra.mxu0 %v6649_v33  ;;  %1115 = vmatpush1.bf16.msra.mxu1 %v6656_v34  ;;  %v7290_v33 = vld [vmem:[%s11217_s1 + $0x68] ss:$16 sps:$4 sm:$0xff]   ;;  %v7296_v34 = vld [vmem:[%s11217_s1 + $0x84] ss:$16 sps:$4 sm:$0xff]   ;;  %v7453_v23 = vld [vmem:[%s11217_s1 + $0x140] ss:$16 sps:$4 sm:$0xff]  }
 0x18a   :  { %1075 = vmatprep.subr.bf16.mxu0 %v6661_v35  ;;  %1116 = vmatprep.subr.bf16.mxu1 %v6667_v36  ;;  %v7302_v35 = vld [vmem:[%s11217_s1 + $0x8c] ss:$16 sps:$4 sm:$0xff]   ;;  %v7308_v36 = vld [vmem:[%s11217_s1 + $0x80] ss:$16 sps:$4 sm:$0xff]  }
 0x18b   :  { %637 = vst [vmem:[#allocation2 + $0x8] sm:$0xf] %v636_v24  ;;  %v7459_v24 = vld [vmem:[%s11217_s1 + $0x148] ss:$16 sps:$4 sm:$0xff]  }
 0x18d   :  { %1076 = vmatpush1.bf16.msra.mxu0 %v6673_v37  ;;  %1117 = vmatpush1.bf16.msra.mxu1 %v6683_v39  ;;  %v7314_v37 = vld [vmem:[%s11217_s1 + $0x88] ss:$16 sps:$4 sm:$0xff]   ;;  %v7320_v39 = vld [vmem:[%s11217_s1 + $0xa4] ss:$16 sps:$4 sm:$0xff]  }
 0x18e   :  { %1077 = vmatprep.subr.bf16.mxu0 %v6688_v40  ;;  %1118 = vmatprep.subr.bf16.mxu1 %v6696_v42  ;;  %v7326_v40 = vld [vmem:[%s11217_s1 + $0xac] ss:$16 sps:$4 sm:$0xff]  }
 0x191   :  { %1078 = vmatpush1.bf16.msra.mxu0 %v6706_v44  ;;  %1119 = vmatpush1.bf16.msra.mxu1 %v6713_v45 }
 0x192   :  { %1079 = vmatprep.subr.bf16.mxu0 %v6718_v46  ;;  %1120 = vmatprep.subr.bf16.mxu1 %v6724_v47 }
 0x195   :  { %1080 = vmatpush1.bf16.msra.mxu0 %v6732_v48  ;;  %1121 = vmatpush1.bf16.msra.mxu1 %v6739_v49 }
 0x196   :  { %1081 = vmatprep.subr.bf16.mxu0 %v6744_v50  ;;  %1122 = vmatprep.subr.bf16.mxu1 %v6750_v51  ;;  %v7332_v51 = vld [vmem:[%s11217_s1 + $0xa0] ss:$16 sps:$4 sm:$0xff]  }
 0x199   :  { %1082 = vmatpush1.bf16.msra.mxu0 %v6756_v52  ;;  %1123 = vmatpush1.bf16.msra.mxu1 %v6763_v53  ;;  %v7338_v52 = vld [vmem:[%s11217_s1 + $0xa8] ss:$16 sps:$4 sm:$0xff]  }
 0x19a   :  { %1158 = vmatprep.subr.bf16.mxu0 %v7137_v58  ;;  %1199 = vmatprep.subr.bf16.mxu1 %v7143_v56 }
 0x19c   :  { %1092 = vmatmul.mubr.bf16.vlgmr.msra.gmra.mrb[28].mxu0 %v1054_v26  ;;  %1133 = vmatmul.mubr.bf16.vlgmr.msra.gmra.mrb[28].mxu1 %v1054_v26  ;;  %v7468_v26 = vld [vmem:[%s11217_s1 + $0x164] ss:$16 sps:$4 sm:$0xff]  }
 0x19d   :  { %1159 = vmatpush1.bf16.msra.mxu0 %v7153_v59  ;;  %1200 = vmatpush1.bf16.msra.mxu1 %v7159_v2 }
 0x19e   :  { %1160 = vmatprep.subr.bf16.mxu0 %v7165_v62  ;;  %1201 = vmatprep.subr.bf16.mxu1 %v7171_v3 }
 0x19f   :  { %5083 = vmatprep.mubr.msk.bf16.mxu0 %vm335_vm0, %v7001_v38  ;;  %5084 = vmatprep.mubr.msk.bf16.mxu1 %vm335_vm0, %v7001_v38 }
 0x1a1   :  { %1161 = vmatpush1.bf16.msra.mxu0 %v7181_v4  ;;  %1202 = vmatpush1.bf16.msra.mxu1 %v7187_v5 }
 0x1a2   :  { %1162 = vmatprep.subr.bf16.mxu0 %v7193_v7  ;;  %1203 = vmatprep.subr.bf16.mxu1 %v7254_v27 }
 0x1a5   :  { %1163 = vmatpush1.bf16.msra.mxu0 %v7260_v28  ;;  %1204 = vmatpush1.bf16.msra.mxu1 %v7266_v29 }
 0x1a6   :  { %1164 = vmatprep.subr.bf16.mxu0 %v7272_v30  ;;  %1205 = vmatprep.subr.bf16.mxu1 %v7278_v31 }
 0x1a9   :  { %1165 = vmatpush1.bf16.msra.mxu0 %v7284_v32  ;;  %1206 = vmatpush1.bf16.msra.mxu1 %v7290_v33 }
 0x1aa   :  { %1166 = vmatprep.subr.bf16.mxu0 %v7296_v34  ;;  %1207 = vmatprep.subr.bf16.mxu1 %v7302_v35 }
 0x1ad   :  { %1167 = vmatpush1.bf16.msra.mxu0 %v7308_v36  ;;  %1208 = vmatpush1.bf16.msra.mxu1 %v7314_v37 }
 0x1ae   :  { %1168 = vmatprep.subr.bf16.mxu0 %v7320_v39  ;;  %1209 = vmatprep.subr.bf16.mxu1 %v7326_v40 }
 0x1af   :  { %v687_v42 = vpop.f32.mrb[12].mxu0  ;;  %v728_v44 = vpop.f32.mrb[12].mxu1 }
 0x1b0   :  { %v689_v45 = vpop.f32.mrb[13].mxu0  ;;  %v730_v46 = vpop.f32.mrb[13].mxu1 }
 0x1b1   :  { %v735_v47 = vmax.f32 %v687_v42, %v689_v45  ;;  %v736_v48 = vmax.f32 %v728_v44, %v730_v46  ;;  %v691_v49 = vpop.f32.mrb[14].mxu0  ;;  %v732_v50 = vpop.f32.mrb[14].mxu1  ;;  %1169 = vmatpush1.bf16.msra.mxu0 %v7332_v51  ;;  %1210 = vmatpush1.bf16.msra.mxu1 %v7338_v52  ;;  %v7474_v42 = vld [vmem:[%s11217_s1 + $0x16c] ss:$16 sps:$4 sm:$0xff]   ;;  %v7477_v44 = vcombine.high %v1653_v25, %v1653_v25  ;;  %v7488_v46 = vld [vmem:[%s11217_s1 + $0x160] ss:$16 sps:$4 sm:$0xff]  }
 0x1b2   :  { %v692_v53 = vpop.f32.mrb[15].mxu0  ;;  %v733_v38 = vpop.f32.mrb[15].mxu1  ;;  %1170 = vmatprep.subr.bf16.mxu0 %v7344_v9  ;;  %1211 = vmatprep.subr.bf16.mxu1 %v7350_v10  ;;  %v7479_v45 = vcombine.low %v1653_v25, %v1653_v25 }
 0x1b3   :  { %v737_v11 = vmax.f32 %v735_v47, %v736_v48  ;;  %11656 = vst [vmem:[#allocation4_spill] sm:$0xff] %v7477_v44  ;;  %1661 = vrot.lane.b32.xlu1 %v7477_v44, %s6396_s27  ;;  %v7494_v47 = vld [vmem:[%s11217_s1 + $0x168] ss:$16 sps:$4 sm:$0xff]   ;;  %v7501_v48 = vpop.permute.xlu1 %1255 }
 0x1b4   :  { %11657 = vst [vmem:[#allocation5_spill] sm:$0xff] %v7479_v45  ;;  %1659 = vrot.lane.b32.xlu0 %v7479_v45, %s6396_s27 }
 0x1b5   :  { %v738_v61 = vadd.f32 %v7016_v1, %v737_v11  ;;  %1171 = vmatpush1.bf16.msra.mxu0 %v7357_v60  ;;  %1212 = vmatpush1.bf16.msra.mxu1 %v7363_v63 }
 0x1b6   :  { %1172 = vmatprep.subr.bf16.mxu0 %v7369_v0  ;;  %1213 = vmatprep.subr.bf16.mxu1 %v7375_v6 }
 0x1b7   :  { %v739_v43 = vmax.f32 %v738_v61, 0.0 }
 0x1b9   :  { %v740_v57 = vpack.c.bf16 %v739_v43, %v739_v43  ;;  %1173 = vmatpush1.bf16.msra.mxu0 %v7381_v12  ;;  %1214 = vmatpush1.bf16.msra.mxu1 %v7387_v13 }
 0x1ba   :  { %1174 = vmatprep.subr.bf16.mxu0 %v7393_v14  ;;  %1215 = vmatprep.subr.bf16.mxu1 %v7399_v15 }
 0x1bb   :  { %741 = vst [vmem:[#allocation2 + $0xc] sm:$0xf] %v740_v57 }
 0x1bd   :  { %1175 = vmatpush1.bf16.msra.mxu0 %v7405_v16  ;;  %1216 = vmatpush1.bf16.msra.mxu1 %v7411_v17 }
 0x1be   :  { %1176 = vmatprep.subr.bf16.mxu0 %v7417_v8  ;;  %1217 = vmatprep.subr.bf16.mxu1 %v7423_v18 }
 0x1c1   :  { %1177 = vmatpush1.bf16.msra.mxu0 %v7429_v19  ;;  %1218 = vmatpush1.bf16.msra.mxu1 %v7435_v20 }
 0x1c2   :  { %1178 = vmatprep.subr.bf16.mxu0 %v7441_v21  ;;  %1219 = vmatprep.subr.bf16.mxu1 %v7447_v22 }
 0x1c5   :  { %1179 = vmatpush1.bf16.msra.mxu0 %v7453_v23  ;;  %1220 = vmatpush1.bf16.msra.mxu1 %v7459_v24 }
 0x1c6   :  { %1180 = vmatprep.subr.bf16.mxu0 %v7468_v26  ;;  %1221 = vmatprep.subr.bf16.mxu1 %v7474_v42 }
 0x1c9   :  { %1181 = vmatpush1.bf16.msra.mxu0 %v7488_v46  ;;  %1222 = vmatpush1.bf16.msra.mxu1 %v7494_v47 }
 0x1ca   :  { %1262 = vmatprep.subr.bf16.mxu0 %v7137_v58  ;;  %1303 = vmatprep.subr.bf16.mxu1 %v7143_v56 }
 0x1cc   :  { %1191 = vmatmul.mubr.bf16.vlgmr.msra.gmra.mrb[32].mxu0 %v7003_v41  ;;  %1232 = vmatmul.mubr.bf16.vlgmr.msra.gmra.mrb[32].mxu1 %v7003_v41 }
 0x1cd   :  { %1263 = vmatpush1.bf16.msra.mxu0 %v7153_v59  ;;  %1304 = vmatpush1.bf16.msra.mxu1 %v7159_v2 }
 0x1ce   :  { %1264 = vmatprep.subr.bf16.mxu0 %v7165_v62  ;;  %1305 = vmatprep.subr.bf16.mxu1 %v7171_v3 }
 0x1cf   :  { %5087 = vmatprep.mubr.msk.bf16.mxu0 %vm335_vm0, %v7501_v48  ;;  %5088 = vmatprep.mubr.msk.bf16.mxu1 %vm335_vm0, %v7501_v48 }
 0x1d1   :  { %1265 = vmatpush1.bf16.msra.mxu0 %v7181_v4  ;;  %1306 = vmatpush1.bf16.msra.mxu1 %v7187_v5 }
 0x1d2   :  { %1266 = vmatprep.subr.bf16.mxu0 %v7193_v7  ;;  %1307 = vmatprep.subr.bf16.mxu1 %v7254_v27 }
 0x1d5   :  { %1267 = vmatpush1.bf16.msra.mxu0 %v7260_v28  ;;  %1308 = vmatpush1.bf16.msra.mxu1 %v7266_v29 }
 0x1d6   :  { %1268 = vmatprep.subr.bf16.mxu0 %v7272_v30  ;;  %1309 = vmatprep.subr.bf16.mxu1 %v7278_v31 }
 0x1d9   :  { %1269 = vmatpush1.bf16.msra.mxu0 %v7284_v32  ;;  %1310 = vmatpush1.bf16.msra.mxu1 %v7290_v33 }
 0x1da   :  { %1270 = vmatprep.subr.bf16.mxu0 %v7296_v34  ;;  %1311 = vmatprep.subr.bf16.mxu1 %v7302_v35 }
 0x1dd   :  { %1271 = vmatpush1.bf16.msra.mxu0 %v7308_v36  ;;  %1312 = vmatpush1.bf16.msra.mxu1 %v7314_v37 }
 0x1de   :  { %1272 = vmatprep.subr.bf16.mxu0 %v7320_v39  ;;  %1313 = vmatprep.subr.bf16.mxu1 %v7326_v40 }
 0x1df   :  { %v786_v41 = vpop.f32.mrb[16].mxu0  ;;  %v827_v49 = vpop.f32.mrb[16].mxu1 }
 0x1e0   :  { %v788_v50 = vpop.f32.mrb[17].mxu0  ;;  %v829_v53 = vpop.f32.mrb[17].mxu1 }
 0x1e1   :  { %v834_v38 = vmax.f32 %v786_v41, %v788_v50  ;;  %v835_v11 = vmax.f32 %v827_v49, %v829_v53  ;;  %v790_v61 = vpop.f32.mrb[18].mxu0  ;;  %v831_v43 = vpop.f32.mrb[18].mxu1  ;;  %1273 = vmatpush1.bf16.msra.mxu0 %v7332_v51  ;;  %1314 = vmatpush1.bf16.msra.mxu1 %v7338_v52 }
 0x1e2   :  { %v791_v57 = vpop.f32.mrb[19].mxu0  ;;  %v832_v25 = vpop.f32.mrb[19].mxu1  ;;  %1274 = vmatprep.subr.bf16.mxu0 %v7344_v9  ;;  %1315 = vmatprep.subr.bf16.mxu1 %v7350_v10 }
 0x1e3   :  { %v836_v45 = vmax.f32 %v834_v38, %v835_v11 }
 0x1e5   :  { %v837_v44 = vadd.f32 %v7016_v1, %v836_v45  ;;  %1275 = vmatpush1.bf16.msra.mxu0 %v7357_v60  ;;  %1316 = vmatpush1.bf16.msra.mxu1 %v7363_v63 }
 0x1e6   :  { %1276 = vmatprep.subr.bf16.mxu0 %v7369_v0  ;;  %1317 = vmatprep.subr.bf16.mxu1 %v7375_v6 }
 0x1e7   :  { %v838_v41 = vmax.f32 %v837_v44, 0.0  ;;  %v1254_v44 = vpop.permute.xlu0 %1253 }
 0x1e8   :  { %v1257_v45 = vsel %vm335_vm0, %v1254_v44, %v7501_v48 }
 0x1e9   :  { %v839_v49 = vpack.c.bf16 %v838_v41, %v838_v41  ;;  %1277 = vmatpush1.bf16.msra.mxu0 %v7381_v12  ;;  %1318 = vmatpush1.bf16.msra.mxu1 %v7387_v13 }
 0x1ea   :  { %1278 = vmatprep.subr.bf16.mxu0 %v7393_v14  ;;  %1319 = vmatprep.subr.bf16.mxu1 %v7399_v15 }
 0x1eb   :  { %840 = vst [vmem:[#allocation2 + $0x10] sm:$0xf] %v839_v49 }
 0x1ed   :  { %1279 = vmatpush1.bf16.msra.mxu0 %v7405_v16  ;;  %1320 = vmatpush1.bf16.msra.mxu1 %v7411_v17 }
 0x1ee   :  { %1280 = vmatprep.subr.bf16.mxu0 %v7417_v8  ;;  %1321 = vmatprep.subr.bf16.mxu1 %v7423_v18 }
 0x1f1   :  { %1281 = vmatpush1.bf16.msra.mxu0 %v7429_v19  ;;  %1322 = vmatpush1.bf16.msra.mxu1 %v7435_v20 }
 0x1f2   :  { %1282 = vmatprep.subr.bf16.mxu0 %v7441_v21  ;;  %1323 = vmatprep.subr.bf16.mxu1 %v7447_v22 }
 0x1f5   :  { %1283 = vmatpush1.bf16.msra.mxu0 %v7453_v23  ;;  %1324 = vmatpush1.bf16.msra.mxu1 %v7459_v24 }
 0x1f6   :  { %1284 = vmatprep.subr.bf16.mxu0 %v7468_v26  ;;  %1325 = vmatprep.subr.bf16.mxu1 %v7474_v42 }
 0x1f9   :  { %1285 = vmatpush1.bf16.msra.mxu0 %v7488_v46  ;;  %1326 = vmatpush1.bf16.msra.mxu1 %v7494_v47 }
 0x1fa   :  { %1361 = vmatprep.subr.bf16.mxu0 %v7137_v58  ;;  %1402 = vmatprep.subr.bf16.mxu1 %v7143_v56 }
 0x1fc   :  { %1295 = vmatmul.mubr.bf16.vlgmr.msra.gmra.mrb[36].mxu0 %v1257_v45  ;;  %1336 = vmatmul.mubr.bf16.vlgmr.msra.gmra.mrb[36].mxu1 %v1257_v45 }
 0x1fd   :  { %1362 = vmatpush1.bf16.msra.mxu0 %v7153_v59  ;;  %1403 = vmatpush1.bf16.msra.mxu1 %v7159_v2 }
 0x1fe   :  { %1363 = vmatprep.subr.bf16.mxu0 %v7165_v62  ;;  %1404 = vmatprep.subr.bf16.mxu1 %v7171_v3 }
 0x1ff   :  { %5091 = vmatprep.mubr.msk.bf16.mxu0 %vm335_vm0, %v7124_v55  ;;  %5092 = vmatprep.mubr.msk.bf16.mxu1 %vm335_vm0, %v7124_v55 }
 0x201   :  { %1364 = vmatpush1.bf16.msra.mxu0 %v7181_v4  ;;  %1405 = vmatpush1.bf16.msra.mxu1 %v7187_v5 }
 0x202   :  { %1365 = vmatprep.subr.bf16.mxu0 %v7193_v7  ;;  %1406 = vmatprep.subr.bf16.mxu1 %v7254_v27 }
 0x205   :  { %1366 = vmatpush1.bf16.msra.mxu0 %v7260_v28  ;;  %1407 = vmatpush1.bf16.msra.mxu1 %v7266_v29 }
 0x206   :  { %1367 = vmatprep.subr.bf16.mxu0 %v7272_v30  ;;  %1408 = vmatprep.subr.bf16.mxu1 %v7278_v31 }
 0x209   :  { %1368 = vmatpush1.bf16.msra.mxu0 %v7284_v32  ;;  %1409 = vmatpush1.bf16.msra.mxu1 %v7290_v33 }
 0x20a   :  { %1369 = vmatprep.subr.bf16.mxu0 %v7296_v34  ;;  %1410 = vmatprep.subr.bf16.mxu1 %v7302_v35 }
 0x20d   :  { %1370 = vmatpush1.bf16.msra.mxu0 %v7308_v36  ;;  %1411 = vmatpush1.bf16.msra.mxu1 %v7314_v37 }
 0x20e   :  { %1371 = vmatprep.subr.bf16.mxu0 %v7320_v39  ;;  %1412 = vmatprep.subr.bf16.mxu1 %v7326_v40 }
 0x20f   :  { %v890_v55 = vpop.f32.mrb[20].mxu0  ;;  %v931_v48 = vpop.f32.mrb[20].mxu1 }
 0x210   :  { %v892_v50 = vpop.f32.mrb[21].mxu0  ;;  %v933_v53 = vpop.f32.mrb[21].mxu1 }
 0x211   :  { %v938_v38 = vmax.f32 %v890_v55, %v892_v50  ;;  %v939_v11 = vmax.f32 %v931_v48, %v933_v53  ;;  %v894_v61 = vpop.f32.mrb[22].mxu0  ;;  %v935_v43 = vpop.f32.mrb[22].mxu1  ;;  %1372 = vmatpush1.bf16.msra.mxu0 %v7332_v51  ;;  %1413 = vmatpush1.bf16.msra.mxu1 %v7338_v52 }
 0x212   :  { %v895_v57 = vpop.f32.mrb[23].mxu0  ;;  %v936_v25 = vpop.f32.mrb[23].mxu1  ;;  %1373 = vmatprep.subr.bf16.mxu0 %v7344_v9  ;;  %1414 = vmatprep.subr.bf16.mxu1 %v7350_v10 }
 0x213   :  { %v940_v41 = vmax.f32 %v938_v38, %v939_v11  ;;  %v7613_v55 = vpop.permute.xlu1 %1458 }
 0x215   :  { %v941_v49 = vadd.f32 %v7016_v1, %v940_v41  ;;  %1374 = vmatpush1.bf16.msra.mxu0 %v7357_v60  ;;  %1415 = vmatpush1.bf16.msra.mxu1 %v7363_v63 }
 0x216   :  { %1375 = vmatprep.subr.bf16.mxu0 %v7369_v0  ;;  %1416 = vmatprep.subr.bf16.mxu1 %v7375_v6 }
 0x217   :  { %v942_v44 = vmax.f32 %v941_v49, 0.0 }
 0x219   :  { %v943_v45 = vpack.c.bf16 %v942_v44, %v942_v44  ;;  %1376 = vmatpush1.bf16.msra.mxu0 %v7381_v12  ;;  %1417 = vmatpush1.bf16.msra.mxu1 %v7387_v13 }
 0x21a   :  { %1377 = vmatprep.subr.bf16.mxu0 %v7393_v14  ;;  %1418 = vmatprep.subr.bf16.mxu1 %v7399_v15 }
 0x21b   :  { %944 = vst [vmem:[#allocation2 + $0x14] sm:$0xf] %v943_v45 }
 0x21d   :  { %1378 = vmatpush1.bf16.msra.mxu0 %v7405_v16  ;;  %1419 = vmatpush1.bf16.msra.mxu1 %v7411_v17 }
 0x21e   :  { %1379 = vmatprep.subr.bf16.mxu0 %v7417_v8  ;;  %1420 = vmatprep.subr.bf16.mxu1 %v7423_v18 }
 0x221   :  { %1380 = vmatpush1.bf16.msra.mxu0 %v7429_v19  ;;  %1421 = vmatpush1.bf16.msra.mxu1 %v7435_v20 }
 0x222   :  { %1381 = vmatprep.subr.bf16.mxu0 %v7441_v21  ;;  %1422 = vmatprep.subr.bf16.mxu1 %v7447_v22 }
 0x225   :  { %1382 = vmatpush1.bf16.msra.mxu0 %v7453_v23  ;;  %1423 = vmatpush1.bf16.msra.mxu1 %v7459_v24 }
 0x226   :  { %1383 = vmatprep.subr.bf16.mxu0 %v7468_v26  ;;  %1424 = vmatprep.subr.bf16.mxu1 %v7474_v42 }
 0x229   :  { %1384 = vmatpush1.bf16.msra.mxu0 %v7488_v46  ;;  %1425 = vmatpush1.bf16.msra.mxu1 %v7494_v47 }
 0x22a   :  { %1465 = vmatprep.subr.bf16.mxu0 %v7137_v58  ;;  %1506 = vmatprep.subr.bf16.mxu1 %v7143_v56 }
 0x22c   :  { %1394 = vmatmul.mubr.bf16.vlgmr.msra.gmra.mrb[40].mxu0 %v7126_v54  ;;  %1435 = vmatmul.mubr.bf16.vlgmr.msra.gmra.mrb[40].mxu1 %v7126_v54 }
 0x22d   :  { %1466 = vmatpush1.bf16.msra.mxu0 %v7153_v59  ;;  %1507 = vmatpush1.bf16.msra.mxu1 %v7159_v2 }
 0x22e   :  { %1467 = vmatprep.subr.bf16.mxu0 %v7165_v62  ;;  %1508 = vmatprep.subr.bf16.mxu1 %v7171_v3 }
 0x22f   :  { %5095 = vmatprep.mubr.msk.bf16.mxu0 %vm335_vm0, %v7613_v55  ;;  %5096 = vmatprep.mubr.msk.bf16.mxu1 %vm335_vm0, %v7613_v55 }
 0x231   :  { %1468 = vmatpush1.bf16.msra.mxu0 %v7181_v4  ;;  %1509 = vmatpush1.bf16.msra.mxu1 %v7187_v5 }
 0x232   :  { %1469 = vmatprep.subr.bf16.mxu0 %v7193_v7  ;;  %1510 = vmatprep.subr.bf16.mxu1 %v7254_v27 }
 0x235   :  { %1470 = vmatpush1.bf16.msra.mxu0 %v7260_v28  ;;  %1511 = vmatpush1.bf16.msra.mxu1 %v7266_v29 }
 0x236   :  { %1471 = vmatprep.subr.bf16.mxu0 %v7272_v30  ;;  %1512 = vmatprep.subr.bf16.mxu1 %v7278_v31 }
 0x239   :  { %1472 = vmatpush1.bf16.msra.mxu0 %v7284_v32  ;;  %1513 = vmatpush1.bf16.msra.mxu1 %v7290_v33 }
 0x23a   :  { %1473 = vmatprep.subr.bf16.mxu0 %v7296_v34  ;;  %1514 = vmatprep.subr.bf16.mxu1 %v7302_v35 }
 0x23d   :  { %1474 = vmatpush1.bf16.msra.mxu0 %v7308_v36  ;;  %1515 = vmatpush1.bf16.msra.mxu1 %v7314_v37 }
 0x23e   :  { %1475 = vmatprep.subr.bf16.mxu0 %v7320_v39  ;;  %1516 = vmatprep.subr.bf16.mxu1 %v7326_v40 }
 0x23f   :  { %v989_v54 = vpop.f32.mrb[24].mxu0  ;;  %v1030_v48 = vpop.f32.mrb[24].mxu1 }
 0x240   :  { %v991_v50 = vpop.f32.mrb[25].mxu0  ;;  %v1032_v53 = vpop.f32.mrb[25].mxu1 }
 0x241   :  { %v1037_v38 = vmax.f32 %v989_v54, %v991_v50  ;;  %v1038_v11 = vmax.f32 %v1030_v48, %v1032_v53  ;;  %v993_v61 = vpop.f32.mrb[26].mxu0  ;;  %v1034_v43 = vpop.f32.mrb[26].mxu1  ;;  %1476 = vmatpush1.bf16.msra.mxu0 %v7332_v51  ;;  %1517 = vmatpush1.bf16.msra.mxu1 %v7338_v52  ;;  %v11658_v48 = vld [vmem:[#allocation4_spill] sm:$0xff] }
 0x242   :  { %v994_v57 = vpop.f32.mrb[27].mxu0  ;;  %v1035_v25 = vpop.f32.mrb[27].mxu1  ;;  %1477 = vmatprep.subr.bf16.mxu0 %v7344_v9  ;;  %1518 = vmatprep.subr.bf16.mxu1 %v7350_v10 }
 0x243   :  { %v1039_v41 = vmax.f32 %v1037_v38, %v1038_v11  ;;  %v6128_v38 = vld [vmem:[%s11217_s1 + $0xc4] ss:$16 sps:$4 sm:$0xff]   ;;  %v6129_v11 = vld [vmem:[%s11217_s1 + $0xcc] ss:$16 sps:$4 sm:$0xff]   ;;  %v6130_v57 = vld [vmem:[%s11217_s1 + $0xc0] ss:$16 sps:$4 sm:$0xff]  }
 0x244   :  { %v6131_v25 = vld [vmem:[%s11217_s1 + $0xc8] ss:$16 sps:$4 sm:$0xff]  }
 0x245   :  { %v1040_v49 = vadd.f32 %v7016_v1, %v1039_v41  ;;  %1478 = vmatpush1.bf16.msra.mxu0 %v7357_v60  ;;  %1519 = vmatpush1.bf16.msra.mxu1 %v7363_v63  ;;  %v1457_v1 = vpop.permute.xlu0 %1456  ;;  %v6132_v41 = vld [vmem:[%s11217_s1 + $0xe4] ss:$16 sps:$4 sm:$0xff]  }
 0x246   :  { %1479 = vmatprep.subr.bf16.mxu0 %v7369_v0  ;;  %1520 = vmatprep.subr.bf16.mxu1 %v7375_v6  ;;  %v1460_v54 = vsel %vm335_vm0, %v1457_v1, %v7613_v55  ;;  %v6127_v55 = vld [vmem:[%s11217_s1 + $0xa8] ss:$16 sps:$4 sm:$0xff]   ;;  %v6134_v1 = vld [vmem:[%s11217_s1 + $0xe0] ss:$16 sps:$4 sm:$0xff]  }
 0x247   :  { %v1041_v44 = vmax.f32 %v1040_v49, 0.0  ;;  %v6133_v49 = vld [vmem:[%s11217_s1 + $0xec] ss:$16 sps:$4 sm:$0xff]  }
 0x249   :  { %v1042_v45 = vpack.c.bf16 %v1041_v44, %v1041_v44  ;;  %1480 = vmatpush1.bf16.msra.mxu0 %v7381_v12  ;;  %1521 = vmatpush1.bf16.msra.mxu1 %v7387_v13 }
 0x24a   :  { %1481 = vmatprep.subr.bf16.mxu0 %v7393_v14  ;;  %1522 = vmatprep.subr.bf16.mxu1 %v7399_v15 }
 0x24b   :  { %1043 = vst [vmem:[#allocation2 + $0x18] sm:$0xf] %v1042_v45 }
 0x24d   :  { %1482 = vmatpush1.bf16.msra.mxu0 %v7405_v16  ;;  %1523 = vmatpush1.bf16.msra.mxu1 %v7411_v17 }
 0x24e   :  { %1483 = vmatprep.subr.bf16.mxu0 %v7417_v8  ;;  %1524 = vmatprep.subr.bf16.mxu1 %v7423_v18 }
 0x251   :  { %1484 = vmatpush1.bf16.msra.mxu0 %v7429_v19  ;;  %1525 = vmatpush1.bf16.msra.mxu1 %v7435_v20 }
 0x252   :  { %1485 = vmatprep.subr.bf16.mxu0 %v7441_v21  ;;  %1526 = vmatprep.subr.bf16.mxu1 %v7447_v22 }
 0x255   :  { %1486 = vmatpush1.bf16.msra.mxu0 %v7453_v23  ;;  %1527 = vmatpush1.bf16.msra.mxu1 %v7459_v24 }
 0x256   :  { %1487 = vmatprep.subr.bf16.mxu0 %v7468_v26  ;;  %1528 = vmatprep.subr.bf16.mxu1 %v7474_v42 }
 0x259   :  { %1488 = vmatpush1.bf16.msra.mxu0 %v7488_v46  ;;  %1529 = vmatpush1.bf16.msra.mxu1 %v7494_v47 }
 0x25a   :  { %1564 = vmatprep.subr.bf16.mxu0 %v7137_v58  ;;  %1605 = vmatprep.subr.bf16.mxu1 %v7143_v56 }
 0x25c   :  { %1498 = vmatmul.mubr.bf16.vlgmr.msra.gmra.mrb[44].mxu0 %v1460_v54  ;;  %1539 = vmatmul.mubr.bf16.vlgmr.msra.gmra.mrb[44].mxu1 %v1460_v54  ;;  %v6135_v54 = vld [vmem:[%s11217_s1 + $0xe8] ss:$16 sps:$4 sm:$0xff]  }
 0x25d   :  { %1565 = vmatpush1.bf16.msra.mxu0 %v7153_v59  ;;  %1606 = vmatpush1.bf16.msra.mxu1 %v7159_v2 }
 0x25e   :  { %1566 = vmatprep.subr.bf16.mxu0 %v7165_v62  ;;  %1607 = vmatprep.subr.bf16.mxu1 %v7171_v3 }
 0x25f   :  { %5099 = vmatprep.mubr.msk.bf16.mxu0 %vm335_vm0, %v11658_v48  ;;  %5100 = vmatprep.mubr.msk.bf16.mxu1 %vm335_vm0, %v11658_v48  ;;  %v6136_v48 = vld [vmem:[%s11217_s1 + $0x104] ss:$16 sps:$4 sm:$0xff]  }
 0x261   :  { %1567 = vmatpush1.bf16.msra.mxu0 %v7181_v4  ;;  %1608 = vmatpush1.bf16.msra.mxu1 %v7187_v5 }
 0x262   :  { %1568 = vmatprep.subr.bf16.mxu0 %v7193_v7  ;;  %1609 = vmatprep.subr.bf16.mxu1 %v7254_v27 }
 0x265   :  { %1569 = vmatpush1.bf16.msra.mxu0 %v7260_v28  ;;  %1610 = vmatpush1.bf16.msra.mxu1 %v7266_v29  ;;  %v7701_v29 = vld [vmem:[%s11218_s2] ss:$0 sm:$0xff] }
 0x266   :  { %1570 = vmatprep.subr.bf16.mxu0 %v7272_v30  ;;  %1611 = vmatprep.subr.bf16.mxu1 %v7278_v31 }
 0x269   :  { %1571 = vmatpush1.bf16.msra.mxu0 %v7284_v32  ;;  %1612 = vmatpush1.bf16.msra.mxu1 %v7290_v33  ;;  %v6104_v33 = vld [vmem:[%s11217_s1 + $0x4] ss:$16 sps:$4 sm:$0xff]  }
 0x26a   :  { %1572 = vmatprep.subr.bf16.mxu0 %v7296_v34  ;;  %1613 = vmatprep.subr.bf16.mxu1 %v7302_v35  ;;  %v6105_v34 = vld [vmem:[%s11217_s1 + $0xc] ss:$16 sps:$4 sm:$0xff]   ;;  %v11659_v35 = vld [vmem:[#allocation5_spill] sm:$0xff] }
 0x26d   :  { %1573 = vmatpush1.bf16.msra.mxu0 %v7308_v36  ;;  %1614 = vmatpush1.bf16.msra.mxu1 %v7314_v37  ;;  %v7734_v36 = vpop.permute.xlu1 %1661  ;;  %v6106_v37 = vld [vmem:[%s11217_s1] ss:$16 sps:$4 sm:$0xff]  }
 0x26e   :  { %1574 = vmatprep.subr.bf16.mxu0 %v7320_v39  ;;  %1615 = vmatprep.subr.bf16.mxu1 %v7326_v40  ;;  %v6107_v39 = vld [vmem:[%s11217_s1 + $0x8] ss:$16 sps:$4 sm:$0xff]   ;;  %v6108_v40 = vld [vmem:[%s11217_s1 + $0x24] ss:$16 sps:$4 sm:$0xff]  }
 0x26f   :  { %v1093_v58 = vpop.f32.mrb[28].mxu0  ;;  %v1134_v56 = vpop.f32.mrb[28].mxu1 }
 0x270   :  { %v1095_v59 = vpop.f32.mrb[29].mxu0  ;;  %v1136_v2 = vpop.f32.mrb[29].mxu1 }
 0x271   :  { %v1141_v62 = vmax.f32 %v1093_v58, %v1095_v59  ;;  %v1142_v3 = vmax.f32 %v1134_v56, %v1136_v2  ;;  %v1097_v4 = vpop.f32.mrb[30].mxu0  ;;  %v1138_v5 = vpop.f32.mrb[30].mxu1  ;;  %1575 = vmatpush1.bf16.msra.mxu0 %v7332_v51  ;;  %1616 = vmatpush1.bf16.msra.mxu1 %v7338_v52  ;;  %v6109_v51 = vld [vmem:[%s11217_s1 + $0x2c] ss:$16 sps:$4 sm:$0xff]   ;;  %v6110_v52 = vld [vmem:[%s11217_s1 + $0x20] ss:$16 sps:$4 sm:$0xff]  }
 0x272   :  { %v1098_v7 = vpop.f32.mrb[31].mxu0  ;;  %v1139_v27 = vpop.f32.mrb[31].mxu1  ;;  %1576 = vmatprep.subr.bf16.mxu0 %v7344_v9  ;;  %1617 = vmatprep.subr.bf16.mxu1 %v7350_v10  ;;  %v6111_v9 = vld [vmem:[%s11217_s1 + $0x28] ss:$16 sps:$4 sm:$0xff]   ;;  %v6112_v10 = vld [vmem:[%s11217_s1 + $0x44] ss:$16 sps:$4 sm:$0xff]  }
 0x273   :  { %v1143_v28 = vmax.f32 %v1141_v62, %v1142_v3  ;;  %v6137_v58 = vld [vmem:[%s11217_s1 + $0x10c] ss:$16 sps:$4 sm:$0xff]   ;;  %v6138_v56 = vld [vmem:[%s11217_s1 + $0x100] ss:$16 sps:$4 sm:$0xff]   ;;  %v6139_v59 = vld [vmem:[%s11217_s1 + $0x108] ss:$16 sps:$4 sm:$0xff]  }
 0x274   :  { %v6140_v2 = vld [vmem:[%s11217_s1 + $0x124] ss:$16 sps:$4 sm:$0xff]   ;;  %v6141_v62 = vld [vmem:[%s11217_s1 + $0x12c] ss:$16 sps:$4 sm:$0xff]   ;;  %v6142_v3 = vld [vmem:[%s11217_s1 + $0x120] ss:$16 sps:$4 sm:$0xff]  }
 0x275   :  { %v1144_v30 = vadd.f32 %v7701_v29, %v1143_v28  ;;  %1577 = vmatpush1.bf16.msra.mxu0 %v7357_v60  ;;  %1618 = vmatpush1.bf16.msra.mxu1 %v7363_v63  ;;  %v6113_v60 = vld [vmem:[%s11217_s1 + $0x4c] ss:$16 sps:$4 sm:$0xff]   ;;  %v6114_v63 = vld [vmem:[%s11217_s1 + $0x40] ss:$16 sps:$4 sm:$0xff]   ;;  %v6143_v4 = vld [vmem:[%s11217_s1 + $0x128] ss:$16 sps:$4 sm:$0xff]  }
 0x276   :  { %1578 = vmatprep.subr.bf16.mxu0 %v7369_v0  ;;  %1619 = vmatprep.subr.bf16.mxu1 %v7375_v6  ;;  %v6115_v0 = vld [vmem:[%s11217_s1 + $0x48] ss:$16 sps:$4 sm:$0xff]   ;;  %v6116_v6 = vld [vmem:[%s11217_s1 + $0x64] ss:$16 sps:$4 sm:$0xff]   ;;  %v6145_v7 = vld [vmem:[%s11217_s1 + $0x14c] ss:$16 sps:$4 sm:$0xff]  }
 0x277   :  { %v1145_v31 = vmax.f32 %v1144_v30, 0.0  ;;  %v6144_v5 = vld [vmem:[%s11217_s1 + $0x144] ss:$16 sps:$4 sm:$0xff]   ;;  %v6146_v27 = vld [vmem:[%s11217_s1 + $0x140] ss:$16 sps:$4 sm:$0xff]  }
 0x278   :  { %v6147_v28 = vld [vmem:[%s11217_s1 + $0x148] ss:$16 sps:$4 sm:$0xff]   ;;  %v6148_v30 = vld [vmem:[%s11217_s1 + $0x164] ss:$16 sps:$4 sm:$0xff]  }
 0x279   :  { %v1146_v32 = vpack.c.bf16 %v1145_v31, %v1145_v31  ;;  %1579 = vmatpush1.bf16.msra.mxu0 %v7381_v12  ;;  %1620 = vmatpush1.bf16.msra.mxu1 %v7387_v13  ;;  %v6117_v12 = vld [vmem:[%s11217_s1 + $0x6c] ss:$16 sps:$4 sm:$0xff]   ;;  %v6118_v13 = vld [vmem:[%s11217_s1 + $0x60] ss:$16 sps:$4 sm:$0xff]  }
 0x27a   :  { %1580 = vmatprep.subr.bf16.mxu0 %v7393_v14  ;;  %1621 = vmatprep.subr.bf16.mxu1 %v7399_v15  ;;  %v6119_v14 = vld [vmem:[%s11217_s1 + $0x68] ss:$16 sps:$4 sm:$0xff]   ;;  %v6120_v15 = vld [vmem:[%s11217_s1 + $0x84] ss:$16 sps:$4 sm:$0xff]   ;;  %v6149_v31 = vld [vmem:[%s11217_s1 + $0x16c] ss:$16 sps:$4 sm:$0xff]  }
 0x27b   :  { %1147 = vst [vmem:[#allocation2 + $0x1c] sm:$0xf] %v1146_v32  ;;  %v1660_v32 = vpop.permute.xlu0 %1659 }
 0x27d   :  { %1581 = vmatpush1.bf16.msra.mxu0 %v7405_v16  ;;  %1622 = vmatpush1.bf16.msra.mxu1 %v7411_v17  ;;  %v6121_v16 = vld [vmem:[%s11217_s1 + $0x8c] ss:$16 sps:$4 sm:$0xff]   ;;  %v6122_v17 = vld [vmem:[%s11217_s1 + $0x80] ss:$16 sps:$4 sm:$0xff]  }
 0x27e   :  { %1582 = vmatprep.subr.bf16.mxu0 %v7417_v8  ;;  %1623 = vmatprep.subr.bf16.mxu1 %v7423_v18  ;;  %v6123_v8 = vld [vmem:[%s11217_s1 + $0x88] ss:$16 sps:$4 sm:$0xff]   ;;  %v6124_v18 = vld [vmem:[%s11217_s1 + $0xa4] ss:$16 sps:$4 sm:$0xff]  }
 0x281   :  { %1583 = vmatpush1.bf16.msra.mxu0 %v7429_v19  ;;  %1624 = vmatpush1.bf16.msra.mxu1 %v7435_v20  ;;  %v6125_v19 = vld [vmem:[%s11217_s1 + $0xac] ss:$16 sps:$4 sm:$0xff]  }
 0x282   :  { %1584 = vmatprep.subr.bf16.mxu0 %v7441_v21  ;;  %1625 = vmatprep.subr.bf16.mxu1 %v7447_v22 }
 0x285   :  { %1585 = vmatpush1.bf16.msra.mxu0 %v7453_v23  ;;  %1626 = vmatpush1.bf16.msra.mxu1 %v7459_v24 }
 0x286   :  { %1586 = vmatprep.subr.bf16.mxu0 %v7468_v26  ;;  %1627 = vmatprep.subr.bf16.mxu1 %v7474_v42 }
 0x289   :  { %1587 = vmatpush1.bf16.msra.mxu0 %v7488_v46  ;;  %1628 = vmatpush1.bf16.msra.mxu1 %v7494_v47  ;;  %v6126_v47 = vld [vmem:[%s11217_s1 + $0xa0] ss:$16 sps:$4 sm:$0xff]  }
 0x28a   :  { %1668 = vmatprep.subr.bf16.mxu0 %v6104_v33  ;;  %1709 = vmatprep.subr.bf16.mxu1 %v6105_v34  ;;  %v7876_v33 = vld [vmem:[%s11219_s3 + $0x4] ss:$16 sps:$4 sm:$0xff]   ;;  %v7881_v34 = vld [vmem:[%s11219_s3 + $0xc] ss:$16 sps:$4 sm:$0xff]  }
 0x28c   :  { %1597 = vmatmul.mubr.bf16.vlgmr.msra.gmra.mrb[48].mxu0 %v11659_v35  ;;  %1638 = vmatmul.mubr.bf16.vlgmr.msra.gmra.mrb[48].mxu1 %v11659_v35  ;;  %v7883_v35 = vld [vmem:[#allocation2] sm:$0xff] }
 0x28d   :  { %1669 = vmatpush1.bf16.msra.mxu0 %v6106_v37  ;;  %1710 = vmatpush1.bf16.msra.mxu1 %v6107_v39  ;;  %v6150_v37 = vld [vmem:[%s11217_s1 + $0x160] ss:$16 sps:$4 sm:$0xff]   ;;  %v6151_v39 = vld [vmem:[%s11217_s1 + $0x168] ss:$16 sps:$4 sm:$0xff]  }
 0x28e   :  { %1670 = vmatprep.subr.bf16.mxu0 %v6108_v40  ;;  %1711 = vmatprep.subr.bf16.mxu1 %v6109_v51  ;;  %v1663_v40 = vsel %vm335_vm0, %v1660_v32, %v7734_v36  ;;  %v7896_v51 = vld [vmem:[%s11219_s3] ss:$16 sps:$4 sm:$0xff]   ;;  %v8145_v32 = vld [vmem:[%s11219_s3 + $0x148] ss:$16 sps:$4 sm:$0xff]  }
 0x28f   :  { %5103 = vmatprep.mubr.msk.bf16.mxu0 %vm335_vm0, %v7734_v36  ;;  %5104 = vmatprep.mubr.msk.bf16.mxu1 %vm335_vm0, %v7734_v36  ;;  %v7910_v36 = vld [vmem:[%s11219_s3 + $0x24] ss:$16 sps:$4 sm:$0xff]  }
 0x291   :  { %1671 = vmatpush1.bf16.msra.mxu0 %v6110_v52  ;;  %1712 = vmatpush1.bf16.msra.mxu1 %v6111_v9  ;;  %v7903_v52 = vld [vmem:[%s11219_s3 + $0x8] ss:$16 sps:$4 sm:$0xff]   ;;  %v5106_v9 = vcombine.high %v7883_v35, %v7883_v35 }
 0x292   :  { %1672 = vmatprep.subr.bf16.mxu0 %v6112_v10  ;;  %1713 = vmatprep.subr.bf16.mxu1 %v6113_v60  ;;  %v7915_v10 = vld [vmem:[%s11219_s3 + $0x2c] ss:$16 sps:$4 sm:$0xff]   ;;  %v7921_v60 = vld [vmem:[%s11219_s3 + $0x20] ss:$16 sps:$4 sm:$0xff]  }
 0x295   :  { %1673 = vmatpush1.bf16.msra.mxu0 %v6114_v63  ;;  %1714 = vmatpush1.bf16.msra.mxu1 %v6115_v0  ;;  %v7927_v63 = vld [vmem:[%s11219_s3 + $0x28] ss:$16 sps:$4 sm:$0xff]   ;;  %v7932_v0 = vld [vmem:[%s11219_s3 + $0x44] ss:$16 sps:$4 sm:$0xff]  }
 0x296   :  { %1674 = vmatprep.subr.bf16.mxu0 %v6116_v6  ;;  %1715 = vmatprep.subr.bf16.mxu1 %v6117_v12  ;;  %v7939_v6 = vld [vmem:[%s11219_s3 + $0x4c] ss:$16 sps:$4 sm:$0xff]   ;;  %v7945_v12 = vld [vmem:[%s11219_s3 + $0x40] ss:$16 sps:$4 sm:$0xff]  }
 0x299   :  { %1675 = vmatpush1.bf16.msra.mxu0 %v6118_v13  ;;  %1716 = vmatpush1.bf16.msra.mxu1 %v6119_v14  ;;  %v7952_v13 = vld [vmem:[%s11219_s3 + $0x48] ss:$16 sps:$4 sm:$0xff]   ;;  %v7957_v14 = vld [vmem:[%s11219_s3 + $0x64] ss:$16 sps:$4 sm:$0xff]  }
 0x29a   :  { %1676 = vmatprep.subr.bf16.mxu0 %v6120_v15  ;;  %1717 = vmatprep.subr.bf16.mxu1 %v6121_v16  ;;  %v7963_v15 = vld [vmem:[%s11219_s3 + $0x6c] ss:$16 sps:$4 sm:$0xff]   ;;  %v7969_v16 = vld [vmem:[%s11219_s3 + $0x60] ss:$16 sps:$4 sm:$0xff]  }
 0x29d   :  { %1677 = vmatpush1.bf16.msra.mxu0 %v6122_v17  ;;  %1718 = vmatpush1.bf16.msra.mxu1 %v6123_v8  ;;  %v7976_v17 = vld [vmem:[%s11219_s3 + $0x68] ss:$16 sps:$4 sm:$0xff]   ;;  %v7981_v8 = vld [vmem:[%s11219_s3 + $0x84] ss:$16 sps:$4 sm:$0xff]  }
 0x29e   :  { %1678 = vmatprep.subr.bf16.mxu0 %v6124_v18  ;;  %1719 = vmatprep.subr.bf16.mxu1 %v6125_v19  ;;  %v7987_v18 = vld [vmem:[%s11219_s3 + $0x8c] ss:$16 sps:$4 sm:$0xff]   ;;  %v7993_v19 = vld [vmem:[%s11219_s3 + $0x80] ss:$16 sps:$4 sm:$0xff]  }
 0x29f   :  { %v1192_v20 = vpop.f32.mrb[32].mxu0  ;;  %v1233_v21 = vpop.f32.mrb[32].mxu1 }
 0x2a0   :  { %v1194_v22 = vpop.f32.mrb[33].mxu0  ;;  %v1235_v23 = vpop.f32.mrb[33].mxu1 }
 0x2a1   :  { %v1240_v24 = vmax.f32 %v1192_v20, %v1194_v22  ;;  %v1241_v26 = vmax.f32 %v1233_v21, %v1235_v23  ;;  %v1196_v42 = vpop.f32.mrb[34].mxu0  ;;  %v1237_v46 = vpop.f32.mrb[34].mxu1  ;;  %1679 = vmatpush1.bf16.msra.mxu0 %v6126_v47  ;;  %1720 = vmatpush1.bf16.msra.mxu1 %v6127_v55  ;;  %v8000_v20 = vld [vmem:[%s11219_s3 + $0x88] ss:$16 sps:$4 sm:$0xff]   ;;  %v8005_v21 = vld [vmem:[%s11219_s3 + $0xa4] ss:$16 sps:$4 sm:$0xff]  }
 0x2a2   :  { %v1197_v50 = vpop.f32.mrb[35].mxu0  ;;  %v1238_v53 = vpop.f32.mrb[35].mxu1  ;;  %1680 = vmatprep.subr.bf16.mxu0 %v6128_v38  ;;  %1721 = vmatprep.subr.bf16.mxu1 %v6129_v11  ;;  %v8011_v22 = vld [vmem:[%s11219_s3 + $0xac] ss:$16 sps:$4 sm:$0xff]   ;;  %v8017_v23 = vld [vmem:[%s11219_s3 + $0xa0] ss:$16 sps:$4 sm:$0xff]  }
 0x2a3   :  { %v1242_v61 = vmax.f32 %v1240_v24, %v1241_v26  ;;  %v8024_v24 = vld [vmem:[%s11219_s3 + $0xa8] ss:$16 sps:$4 sm:$0xff]   ;;  %v8029_v26 = vld [vmem:[%s11219_s3 + $0xc4] ss:$16 sps:$4 sm:$0xff]   ;;  %v8035_v47 = vld [vmem:[%s11219_s3 + $0xcc] ss:$16 sps:$4 sm:$0xff]  }
 0x2a5   :  { %v1243_v43 = vadd.f32 %v7701_v29, %v1242_v61  ;;  %1681 = vmatpush1.bf16.msra.mxu0 %v6130_v57  ;;  %1722 = vmatpush1.bf16.msra.mxu1 %v6131_v25 }
 0x2a6   :  { %1682 = vmatprep.subr.bf16.mxu0 %v6132_v41  ;;  %1723 = vmatprep.subr.bf16.mxu1 %v6133_v49  ;;  %v8048_v41 = vld [vmem:[%s11219_s3 + $0xc8] ss:$16 sps:$4 sm:$0xff]   ;;  %v8053_v49 = vld [vmem:[%s11219_s3 + $0xe4] ss:$16 sps:$4 sm:$0xff]  }
 0x2a7   :  { %v1244_v44 = vmax.f32 %v1243_v43, 0.0  ;;  %v8041_v43 = vld [vmem:[%s11219_s3 + $0xc0] ss:$16 sps:$4 sm:$0xff]  }
 0x2a9   :  { %v1245_v45 = vpack.c.bf16 %v1244_v44, %v1244_v44  ;;  %1683 = vmatpush1.bf16.msra.mxu0 %v6134_v1  ;;  %1724 = vmatpush1.bf16.msra.mxu1 %v6135_v54  ;;  %v8066_v54 = vld [vmem:[%s11219_s3 + $0xe0] ss:$16 sps:$4 sm:$0xff]  }
 0x2aa   :  { %1684 = vmatprep.subr.bf16.mxu0 %v6136_v48  ;;  %1725 = vmatprep.subr.bf16.mxu1 %v6137_v58  ;;  %v8073_v48 = vld [vmem:[%s11219_s3 + $0xe8] ss:$16 sps:$4 sm:$0xff]   ;;  %v8078_v58 = vld [vmem:[%s11219_s3 + $0x104] ss:$16 sps:$4 sm:$0xff]  }
 0x2ab   :  { %1246 = vst [vmem:[#allocation2 + $0x20] sm:$0xf] %v1245_v45  ;;  %v8059_v45 = vld [vmem:[%s11219_s3 + $0xec] ss:$16 sps:$4 sm:$0xff]  }
 0x2ad   :  { %1685 = vmatpush1.bf16.msra.mxu0 %v6138_v56  ;;  %1726 = vmatpush1.bf16.msra.mxu1 %v6139_v59  ;;  %v8084_v59 = vld [vmem:[%s11219_s3 + $0x10c] ss:$16 sps:$4 sm:$0xff]  }
 0x2ae   :  { %1686 = vmatprep.subr.bf16.mxu0 %v6140_v2  ;;  %1727 = vmatprep.subr.bf16.mxu1 %v6141_v62  ;;  %v8090_v62 = vld [vmem:[%s11219_s3 + $0x100] ss:$16 sps:$4 sm:$0xff]  }
 0x2b1   :  { %1687 = vmatpush1.bf16.msra.mxu0 %v6142_v3  ;;  %1728 = vmatpush1.bf16.msra.mxu1 %v6143_v4  ;;  %v8097_v3 = vld [vmem:[%s11219_s3 + $0x108] ss:$16 sps:$4 sm:$0xff]   ;;  %v8102_v4 = vld [vmem:[%s11219_s3 + $0x124] ss:$16 sps:$4 sm:$0xff]  }
 0x2b2   :  { %1688 = vmatprep.subr.bf16.mxu0 %v6144_v5  ;;  %1729 = vmatprep.subr.bf16.mxu1 %v6145_v7  ;;  %v8108_v5 = vld [vmem:[%s11219_s3 + $0x12c] ss:$16 sps:$4 sm:$0xff]   ;;  %v8114_v7 = vld [vmem:[%s11219_s3 + $0x120] ss:$16 sps:$4 sm:$0xff]  }
 0x2b5   :  { %1689 = vmatpush1.bf16.msra.mxu0 %v6146_v27  ;;  %1730 = vmatpush1.bf16.msra.mxu1 %v6147_v28  ;;  %v8121_v27 = vld [vmem:[%s11219_s3 + $0x128] ss:$16 sps:$4 sm:$0xff]   ;;  %v8126_v28 = vld [vmem:[%s11219_s3 + $0x144] ss:$16 sps:$4 sm:$0xff]  }
 0x2b6   :  { %1690 = vmatprep.subr.bf16.mxu0 %v6148_v30  ;;  %1731 = vmatprep.subr.bf16.mxu1 %v6149_v31  ;;  %v8132_v30 = vld [vmem:[%s11219_s3 + $0x14c] ss:$16 sps:$4 sm:$0xff]   ;;  %v8138_v31 = vld [vmem:[%s11219_s3 + $0x140] ss:$16 sps:$4 sm:$0xff]  }
 0x2b9   :  { %1691 = vmatpush1.bf16.msra.mxu0 %v6150_v37  ;;  %1732 = vmatpush1.bf16.msra.mxu1 %v6151_v39  ;;  %v8150_v37 = vld [vmem:[%s11219_s3 + $0x164] ss:$16 sps:$4 sm:$0xff]   ;;  %v8156_v39 = vld [vmem:[%s11219_s3 + $0x16c] ss:$16 sps:$4 sm:$0xff]  }
 0x2ba   :  { %2934 = vmatprep.subr.bf16.mxu0 %v7876_v33  ;;  %3057 = vmatprep.subr.bf16.mxu1 %v7881_v34  ;;  %11660 = vst [vmem:[#allocation4_spill] sm:$0xff] %v8156_v39 }
 0x2bc   :  { %1701 = vmatmul.mubr.bf16.vlgmr.msra.gmra.mrb[52].mxu0 %v1663_v40  ;;  %1742 = vmatmul.mubr.bf16.vlgmr.msra.gmra.mrb[52].mxu1 %v1663_v40  ;;  %v8162_v40 = vld [vmem:[%s11219_s3 + $0x160] ss:$16 sps:$4 sm:$0xff]  }
 0x2bd   :  { %2935 = vmatpush1.bf16.msra.mxu0 %v7896_v51  ;;  %2966 = vmatprep.mubr.bf16.mxu0 %v5106_v9  ;;  %11661 = vst [vmem:[#allocation5_spill] sm:$0xff] %v8162_v40 }
 0x2be   :  { %3058 = vmatpush1.bf16.msra.mxu1 %v7903_v52  ;;  %3089 = vmatprep.mubr.bf16.mxu1 %v5106_v9  ;;  %v8169_v9 = vld [vmem:[%s11219_s3 + $0x168] ss:$16 sps:$4 sm:$0xff]  }
 0x2bf   :  { %2936 = vmatprep.subr.bf16.mxu0 %v7910_v36  ;;  %3059 = vmatprep.subr.bf16.mxu1 %v7915_v10  ;;  %11662 = vst [vmem:[#allocation6_spill] sm:$0xff] %v8169_v9 }
 0x2c1   :  { %2937 = vmatpush1.bf16.msra.mxu0 %v7921_v60 }
 0x2c2   :  { %3060 = vmatpush1.bf16.msra.mxu1 %v7927_v63  ;;  %2938 = vmatprep.subr.bf16.mxu0 %v7932_v0 }
 0x2c3   :  { %3061 = vmatprep.subr.bf16.mxu1 %v7939_v6 }
 0x2c5   :  { %2939 = vmatpush1.bf16.msra.mxu0 %v7945_v12 }
 0x2c6   :  { %3062 = vmatpush1.bf16.msra.mxu1 %v7952_v13  ;;  %2940 = vmatprep.subr.bf16.mxu0 %v7957_v14 }
 0x2c7   :  { %3063 = vmatprep.subr.bf16.mxu1 %v7963_v15 }
 0x2c9   :  { %2941 = vmatpush1.bf16.msra.mxu0 %v7969_v16 }
 0x2ca   :  { %3064 = vmatpush1.bf16.msra.mxu1 %v7976_v17  ;;  %2942 = vmatprep.subr.bf16.mxu0 %v7981_v8 }
 0x2cb   :  { %3065 = vmatprep.subr.bf16.mxu1 %v7987_v18 }
 0x2cd   :  { %2943 = vmatpush1.bf16.msra.mxu0 %v7993_v19 }
 0x2ce   :  { %3066 = vmatpush1.bf16.msra.mxu1 %v8000_v20  ;;  %2944 = vmatprep.subr.bf16.mxu0 %v8005_v21 }
 0x2cf   :  { %v1296_v42 = vpop.f32.mrb[36].mxu0  ;;  %v1337_v46 = vpop.f32.mrb[36].mxu1  ;;  %3067 = vmatprep.subr.bf16.mxu1 %v8011_v22 }
 0x2d0   :  { %v1298_v55 = vpop.f32.mrb[37].mxu0  ;;  %v1339_v50 = vpop.f32.mrb[37].mxu1 }
 0x2d1   :  { %v1344_v53 = vmax.f32 %v1296_v42, %v1298_v55  ;;  %v1345_v38 = vmax.f32 %v1337_v46, %v1339_v50  ;;  %v1300_v11 = vpop.f32.mrb[38].mxu0  ;;  %v1341_v61 = vpop.f32.mrb[38].mxu1  ;;  %2945 = vmatpush1.bf16.msra.mxu0 %v8017_v23  ;;  %v8174_v42 = vld [vmem:[%s11219_s3 + $0x184] ss:$16 sps:$4 sm:$0xff]   ;;  %v8180_v46 = vld [vmem:[%s11219_s3 + $0x18c] ss:$16 sps:$4 sm:$0xff]  }
 0x2d2   :  { %3068 = vmatpush1.bf16.msra.mxu1 %v8024_v24  ;;  %v1301_v57 = vpop.f32.mrb[39].mxu0  ;;  %v1342_v25 = vpop.f32.mrb[39].mxu1  ;;  %2946 = vmatprep.subr.bf16.mxu0 %v8029_v26  ;;  %11663 = vst [vmem:[#allocation7_spill] sm:$0xff] %v8174_v42  ;;  %11664 = vst [vmem:[#allocation8_spill] sm:$0xff] %v8180_v46  ;;  %v8186_v55 = vld [vmem:[%s11219_s3 + $0x180] ss:$16 sps:$4 sm:$0xff]  }
 0x2d3   :  { %v1346_v44 = vmax.f32 %v1344_v53, %v1345_v38  ;;  %3069 = vmatprep.subr.bf16.mxu1 %v8035_v47  ;;  %11665 = vst [vmem:[#allocation9_spill] sm:$0xff] %v8186_v55  ;;  %v8193_v50 = vld [vmem:[%s11219_s3 + $0x188] ss:$16 sps:$4 sm:$0xff]   ;;  %v8198_v53 = vld [vmem:[%s11219_s3 + $0x1a4] ss:$16 sps:$4 sm:$0xff]  }
 0x2d4   :  { %11666 = vst [vmem:[#allocation10_spill] sm:$0xff] %v8193_v50  ;;  %11667 = vst [vmem:[#allocation11_spill] sm:$0xff] %v8198_v53  ;;  %v8204_v38 = vld [vmem:[%s11219_s3 + $0x1ac] ss:$16 sps:$4 sm:$0xff]   ;;  %v8210_v11 = vld [vmem:[%s11219_s3 + $0x1a0] ss:$16 sps:$4 sm:$0xff]  }
 0x2d5   :  { %v1347_v1 = vadd.f32 %v7701_v29, %v1346_v44  ;;  %2947 = vmatpush1.bf16.msra.mxu0 %v8041_v43  ;;  %11668 = vst [vmem:[#allocation12_spill] sm:$0xff] %v8204_v38  ;;  %11669 = vst [vmem:[#allocation13_spill] sm:$0xff] %v8210_v11  ;;  %v8217_v61 = vld [vmem:[%s11219_s3 + $0x1a8] ss:$16 sps:$4 sm:$0xff]   ;;  %v8222_v57 = vld [vmem:[%s11219_s3 + $0x1c4] ss:$16 sps:$4 sm:$0xff]  }
 0x2d6   :  { %3070 = vmatpush1.bf16.msra.mxu1 %v8048_v41  ;;  %2948 = vmatprep.subr.bf16.mxu0 %v8053_v49  ;;  %11670 = vst [vmem:[#allocation14_spill] sm:$0xff] %v8217_v61  ;;  %11671 = vst [vmem:[#allocation15_spill] sm:$0xff] %v8222_v57  ;;  %v8228_v25 = vld [vmem:[%s11219_s3 + $0x1cc] ss:$16 sps:$4 sm:$0xff]   ;;  %v8234_v44 = vld [vmem:[%s11219_s3 + $0x1c0] ss:$16 sps:$4 sm:$0xff]  }
 0x2d7   :  { %v1348_v56 = vmax.f32 %v1347_v1, 0.0  ;;  %3071 = vmatprep.subr.bf16.mxu1 %v8059_v45  ;;  %11672 = vst [vmem:[#allocation16_spill] sm:$0xff] %v8228_v25  ;;  %11673 = vst [vmem:[#allocation17_spill] sm:$0xff] %v8234_v44  ;;  %v8241_v1 = vld [vmem:[%s11219_s3 + $0x1c8] ss:$16 sps:$4 sm:$0xff]  }
 0x2d8   :  { %11674 = vst [vmem:[#allocation18_spill] sm:$0xff] %v8241_v1 }
 0x2d9   :  { %v1349_v2 = vpack.c.bf16 %v1348_v56, %v1348_v56  ;;  %2949 = vmatpush1.bf16.msra.mxu0 %v8066_v54  ;;  %v8246_v56 = vld [vmem:[%s11219_s3 + $0x1e4] ss:$16 sps:$4 sm:$0xff]  }
 0x2da   :  { %3072 = vmatpush1.bf16.msra.mxu1 %v8073_v48  ;;  %2950 = vmatprep.subr.bf16.mxu0 %v8078_v58  ;;  %11675 = vst [vmem:[#allocation19_spill] sm:$0xff] %v8246_v56 }
 0x2db   :  { %1350 = vst [vmem:[#allocation2 + $0x24] sm:$0xf] %v1349_v2  ;;  %3073 = vmatprep.subr.bf16.mxu1 %v8084_v59  ;;  %v8252_v2 = vld [vmem:[%s11219_s3 + $0x1ec] ss:$16 sps:$4 sm:$0xff]  }
 0x2dc   :  { %11676 = vst [vmem:[#allocation20_spill] sm:$0xff] %v8252_v2 }
 0x2dd   :  { %2951 = vmatpush1.bf16.msra.mxu0 %v8090_v62 }
 0x2de   :  { %3074 = vmatpush1.bf16.msra.mxu1 %v8097_v3  ;;  %2952 = vmatprep.subr.bf16.mxu0 %v8102_v4 }
 0x2df   :  { %3075 = vmatprep.subr.bf16.mxu1 %v8108_v5 }
 0x2e1   :  { %2953 = vmatpush1.bf16.msra.mxu0 %v8114_v7 }
 0x2e2   :  { %3076 = vmatpush1.bf16.msra.mxu1 %v8121_v27  ;;  %2954 = vmatprep.subr.bf16.mxu0 %v8126_v28 }
 0x2e3   :  { %3077 = vmatprep.subr.bf16.mxu1 %v8132_v30 }
 0x2e5   :  { %2955 = vmatpush1.bf16.msra.mxu0 %v8138_v31 }
 0x2e6   :  { %3078 = vmatpush1.bf16.msra.mxu1 %v8145_v32  ;;  %2956 = vmatprep.subr.bf16.mxu0 %v8150_v37 }
 0x2e7   :  { %3079 = vmatprep.subr.bf16.mxu1 %v8156_v39 }
 0x2e9   :  { %2957 = vmatpush1.bf16.msra.mxu0 %v8162_v40  ;;  %v8340_v40 = vld [vmem:[%s11219_s3 + $0x240] ss:$16 sps:$4 sm:$0xff]  }
 0x2ea   :  { %3080 = vmatpush1.bf16.msra.mxu1 %v8169_v9  ;;  %2958 = vmatprep.subr.bf16.mxu0 %v8174_v42  ;;  %11689 = vst [vmem:[#allocation33_spill] sm:$0xff] %v8340_v40 }
 0x2eb   :  { %3081 = vmatprep.subr.bf16.mxu1 %v8180_v46 }
 0x2ed   :  { %2959 = vmatpush1.bf16.msra.mxu0 %v8186_v55 }
 0x2ee   :  { %3082 = vmatpush1.bf16.msra.mxu1 %v8193_v50  ;;  %2960 = vmatprep.subr.bf16.mxu0 %v8198_v53 }
 0x2ef   :  { %3083 = vmatprep.subr.bf16.mxu1 %v8204_v38 }
 0x2f1   :  { %2961 = vmatpush1.bf16.msra.mxu0 %v8210_v11  ;;  %v5105_v11 = vcombine.low %v7883_v35, %v7883_v35 }
 0x2f2   :  { %3084 = vmatpush1.bf16.msra.mxu1 %v8217_v61  ;;  %2962 = vmatprep.subr.bf16.mxu0 %v8222_v57  ;;  %v8258_v57 = vld [vmem:[%s11219_s3 + $0x1e0] ss:$16 sps:$4 sm:$0xff]   ;;  %v8270_v61 = vld [vmem:[%s11219_s3 + $0x204] ss:$16 sps:$4 sm:$0xff]  }
 0x2f3   :  { %3085 = vmatprep.subr.bf16.mxu1 %v8228_v25  ;;  %11677 = vst [vmem:[#allocation21_spill] sm:$0xff] %v8258_v57  ;;  %v8265_v25 = vld [vmem:[%s11219_s3 + $0x1e8] ss:$16 sps:$4 sm:$0xff]   ;;  %11679 = vst [vmem:[#allocation23_spill] sm:$0xff] %v8270_v61 }
 0x2f4   :  { %11678 = vst [vmem:[#allocation22_spill] sm:$0xff] %v8265_v25 }
 0x2f5   :  { %2963 = vmatpush1.bf16.msra.mxu0 %v8234_v44  ;;  %v8276_v44 = vld [vmem:[%s11219_s3 + $0x20c] ss:$16 sps:$4 sm:$0xff]  }
 0x2f6   :  { %3086 = vmatpush1.bf16.msra.mxu1 %v8241_v1  ;;  %2964 = vmatprep.subr.bf16.mxu0 %v8246_v56  ;;  %11680 = vst [vmem:[#allocation24_spill] sm:$0xff] %v8276_v44  ;;  %v8282_v56 = vld [vmem:[%s11219_s3 + $0x200] ss:$16 sps:$4 sm:$0xff]   ;;  %v8284_v1 = vld [vmem:[#allocation2 + $0x8] sm:$0xff] }
 0x2f7   :  { %3087 = vmatprep.subr.bf16.mxu1 %v8252_v2  ;;  %11681 = vst [vmem:[#allocation25_spill] sm:$0xff] %v8282_v56  ;;  %v8293_v2 = vld [vmem:[%s11219_s3 + $0x208] ss:$16 sps:$4 sm:$0xff]   ;;  %v8303_v35 = vcombine.high %v8284_v1, %v8284_v1 }
 0x2f8   :  { %11682 = vst [vmem:[#allocation26_spill] sm:$0xff] %v8293_v2 }
 0x2f9   :  { %2965 = vmatpush1.bf16.msra.mxu0 %v8258_v57  ;;  %v8299_v57 = vld [vmem:[%s11219_s3 + $0x224] ss:$16 sps:$4 sm:$0xff]  }
 0x2fa   :  { %3088 = vmatpush1.bf16.msra.mxu1 %v8265_v25  ;;  %2975 = vmatprep.subr.bf16.mxu0 %v8270_v61  ;;  %11683 = vst [vmem:[#allocation27_spill] sm:$0xff] %v8299_v57  ;;  %v8308_v61 = vld [vmem:[%s11219_s3 + $0x22c] ss:$16 sps:$4 sm:$0xff]   ;;  %v8321_v25 = vld [vmem:[%s11219_s3 + $0x228] ss:$16 sps:$4 sm:$0xff]  }
 0x2fb   :  { %3098 = vmatprep.subr.bf16.mxu1 %v8276_v44  ;;  %11684 = vst [vmem:[#allocation28_spill] sm:$0xff] %v8308_v61  ;;  %v8314_v44 = vld [vmem:[%s11219_s3 + $0x220] ss:$16 sps:$4 sm:$0xff]   ;;  %11686 = vst [vmem:[#allocation30_spill] sm:$0xff] %v8321_v25 }
 0x2fc   :  { %2967 = vmatmul.mubr.bf16.vlgmr.msra.gmra.mrb[56].mxu0 %v5105_v11  ;;  %11685 = vst [vmem:[#allocation29_spill] sm:$0xff] %v8314_v44 }
 0x2fd   :  { %3090 = vmatmul.mubr.bf16.vlgmr.msra.gmra.mrb[56].mxu1 %v5105_v11  ;;  %2976 = vmatpush1.bf16.msra.mxu0 %v8282_v56  ;;  %v8326_v11 = vld [vmem:[%s11219_s3 + $0x244] ss:$16 sps:$4 sm:$0xff]  }
 0x2fe   :  { %3007 = vmatprep.mubr.bf16.mxu0 %v8303_v35  ;;  %3099 = vmatpush1.bf16.msra.mxu1 %v8293_v2  ;;  %11687 = vst [vmem:[#allocation31_spill] sm:$0xff] %v8326_v11  ;;  %v8333_v2 = vld [vmem:[%s11219_s3 + $0x24c] ss:$16 sps:$4 sm:$0xff]  }
 0x2ff   :  { %3130 = vmatprep.mubr.bf16.mxu1 %v8303_v35  ;;  %v1395_v56 = vpop.f32.mrb[40].mxu0  ;;  %v1436_v38 = vpop.f32.mrb[40].mxu1  ;;  %2977 = vmatprep.subr.bf16.mxu0 %v8299_v57  ;;  %11688 = vst [vmem:[#allocation32_spill] sm:$0xff] %v8333_v2 }
 0x300   :  { %v1397_v53 = vpop.f32.mrb[41].mxu0  ;;  %v1438_v50 = vpop.f32.mrb[41].mxu1  ;;  %3100 = vmatprep.subr.bf16.mxu1 %v8308_v61 }
 0x301   :  { %v1443_v55 = vmax.f32 %v1395_v56, %v1397_v53  ;;  %v1444_v46 = vmax.f32 %v1436_v38, %v1438_v50  ;;  %v1399_v42 = vpop.f32.mrb[42].mxu0  ;;  %v1440_v9 = vpop.f32.mrb[42].mxu1  ;;  %2978 = vmatpush1.bf16.msra.mxu0 %v8314_v44  ;;  %v8347_v53 = vld [vmem:[%s11219_s3 + $0x248] ss:$16 sps:$4 sm:$0xff]   ;;  %v8358_v50 = vld [vmem:[%s11219_s3 + $0x26c] ss:$16 sps:$4 sm:$0xff]  }
 0x302   :  { %3101 = vmatpush1.bf16.msra.mxu1 %v8321_v25  ;;  %v1400_v57 = vpop.f32.mrb[43].mxu0  ;;  %v1441_v39 = vpop.f32.mrb[43].mxu1  ;;  %2979 = vmatprep.subr.bf16.mxu0 %v8326_v11  ;;  %11690 = vst [vmem:[#allocation34_spill] sm:$0xff] %v8347_v53  ;;  %v8352_v9 = vld [vmem:[%s11219_s3 + $0x264] ss:$16 sps:$4 sm:$0xff]   ;;  %11692 = vst [vmem:[#allocation36_spill] sm:$0xff] %v8358_v50 }
 0x303   :  { %11691 = vst [vmem:[#allocation35_spill] sm:$0xff] %v8352_v9  ;;  %v1445_v42 = vmax.f32 %v1443_v55, %v1444_v46  ;;  %3102 = vmatprep.subr.bf16.mxu1 %v8333_v2  ;;  %v8365_v38 = vld [vmem:[%s11219_s3 + $0x260] ss:$16 sps:$4 sm:$0xff]   ;;  %v8372_v46 = vld [vmem:[%s11219_s3 + $0x268] ss:$16 sps:$4 sm:$0xff]  }
 0x304   :  { %11693 = vst [vmem:[#allocation37_spill] sm:$0xff] %v8365_v38  ;;  %11694 = vst [vmem:[#allocation38_spill] sm:$0xff] %v8372_v46  ;;  %v8377_v55 = vld [vmem:[%s11219_s3 + $0x284] ss:$16 sps:$4 sm:$0xff]   ;;  %v8383_v56 = vld [vmem:[%s11219_s3 + $0x28c] ss:$16 sps:$4 sm:$0xff]  }
 0x305   :  { %v1446_v39 = vadd.f32 %v7701_v29, %v1445_v42  ;;  %2980 = vmatpush1.bf16.msra.mxu0 %v8340_v40  ;;  %11695 = vst [vmem:[#allocation39_spill] sm:$0xff] %v8377_v55  ;;  %11696 = vst [vmem:[#allocation40_spill] sm:$0xff] %v8383_v56  ;;  %v8629_v25 = vld [vmem:[%s11219_s3 + $0x3c0] ss:$16 sps:$4 sm:$0xff]  }
 0x306   :  { %3103 = vmatpush1.bf16.msra.mxu1 %v8347_v53  ;;  %2981 = vmatprep.subr.bf16.mxu0 %v8352_v9  ;;  %v8389_v9 = vld [vmem:[%s11219_s3 + $0x280] ss:$16 sps:$4 sm:$0xff]   ;;  %11737 = vst [vmem:[#allocation81_spill] sm:$0xff] %v8629_v25 }
 0x307   :  { %v1447_v57 = vmax.f32 %v1446_v39, 0.0  ;;  %3104 = vmatprep.subr.bf16.mxu1 %v8358_v50  ;;  %11697 = vst [vmem:[#allocation41_spill] sm:$0xff] %v8389_v9  ;;  %v8396_v39 = vld [vmem:[%s11219_s3 + $0x288] ss:$16 sps:$4 sm:$0xff]  }
 0x308   :  { %11698 = vst [vmem:[#allocation42_spill] sm:$0xff] %v8396_v39 }
 0x309   :  { %v1448_v42 = vpack.c.bf16 %v1447_v57, %v1447_v57  ;;  %2982 = vmatpush1.bf16.msra.mxu0 %v8365_v38  ;;  %v8401_v57 = vld [vmem:[%s11219_s3 + $0x2a4] ss:$16 sps:$4 sm:$0xff]   ;;  %v8407_v38 = vld [vmem:[%s11219_s3 + $0x2ac] ss:$16 sps:$4 sm:$0xff]  }
 0x30a   :  { %3105 = vmatpush1.bf16.msra.mxu1 %v8372_v46  ;;  %2983 = vmatprep.subr.bf16.mxu0 %v8377_v55  ;;  %11699 = vst [vmem:[#allocation43_spill] sm:$0xff] %v8401_v57  ;;  %11700 = vst [vmem:[#allocation44_spill] sm:$0xff] %v8407_v38  ;;  %v8413_v55 = vld [vmem:[%s11219_s3 + $0x2a0] ss:$16 sps:$4 sm:$0xff]  }
 0x30b   :  { %1449 = vst [vmem:[#allocation2 + $0x28] sm:$0xf] %v1448_v42  ;;  %3106 = vmatprep.subr.bf16.mxu1 %v8383_v56  ;;  %11701 = vst [vmem:[#allocation45_spill] sm:$0xff] %v8413_v55  ;;  %v8420_v42 = vld [vmem:[%s11219_s3 + $0x2a8] ss:$16 sps:$4 sm:$0xff]  }
 0x30c   :  { %11702 = vst [vmem:[#allocation46_spill] sm:$0xff] %v8420_v42  ;;  %v8425_v56 = vld [vmem:[%s11219_s3 + $0x2c4] ss:$16 sps:$4 sm:$0xff]  }
 0x30d   :  { %2984 = vmatpush1.bf16.msra.mxu0 %v8389_v9  ;;  %11703 = vst [vmem:[#allocation47_spill] sm:$0xff] %v8425_v56  ;;  %v8431_v9 = vld [vmem:[%s11219_s3 + $0x2cc] ss:$16 sps:$4 sm:$0xff]  }
 0x30e   :  { %3107 = vmatpush1.bf16.msra.mxu1 %v8396_v39  ;;  %2985 = vmatprep.subr.bf16.mxu0 %v8401_v57  ;;  %11704 = vst [vmem:[#allocation48_spill] sm:$0xff] %v8431_v9  ;;  %v8437_v57 = vld [vmem:[%s11219_s3 + $0x2c0] ss:$16 sps:$4 sm:$0xff]   ;;  %v8449_v39 = vld [vmem:[%s11219_s3 + $0x2e4] ss:$16 sps:$4 sm:$0xff]  }
 0x30f   :  { %3108 = vmatprep.subr.bf16.mxu1 %v8407_v38  ;;  %11705 = vst [vmem:[#allocation49_spill] sm:$0xff] %v8437_v57  ;;  %v8444_v38 = vld [vmem:[%s11219_s3 + $0x2c8] ss:$16 sps:$4 sm:$0xff]   ;;  %11707 = vst [vmem:[#allocation51_spill] sm:$0xff] %v8449_v39 }
 0x310   :  { %11706 = vst [vmem:[#allocation50_spill] sm:$0xff] %v8444_v38 }
 0x311   :  { %2986 = vmatpush1.bf16.msra.mxu0 %v8413_v55  ;;  %v8455_v55 = vld [vmem:[%s11219_s3 + $0x2ec] ss:$16 sps:$4 sm:$0xff]  }
 0x312   :  { %3109 = vmatpush1.bf16.msra.mxu1 %v8420_v42  ;;  %2987 = vmatprep.subr.bf16.mxu0 %v8425_v56  ;;  %11708 = vst [vmem:[#allocation52_spill] sm:$0xff] %v8455_v55  ;;  %v8461_v56 = vld [vmem:[%s11219_s3 + $0x2e0] ss:$16 sps:$4 sm:$0xff]   ;;  %v8473_v42 = vld [vmem:[%s11219_s3 + $0x304] ss:$16 sps:$4 sm:$0xff]  }
 0x313   :  { %3110 = vmatprep.subr.bf16.mxu1 %v8431_v9  ;;  %11709 = vst [vmem:[#allocation53_spill] sm:$0xff] %v8461_v56  ;;  %v8468_v9 = vld [vmem:[%s11219_s3 + $0x2e8] ss:$16 sps:$4 sm:$0xff]   ;;  %11711 = vst [vmem:[#allocation55_spill] sm:$0xff] %v8473_v42 }
 0x314   :  { %11710 = vst [vmem:[#allocation54_spill] sm:$0xff] %v8468_v9 }
 0x315   :  { %2988 = vmatpush1.bf16.msra.mxu0 %v8437_v57  ;;  %v8479_v57 = vld [vmem:[%s11219_s3 + $0x30c] ss:$16 sps:$4 sm:$0xff]  }
 0x316   :  { %3111 = vmatpush1.bf16.msra.mxu1 %v8444_v38  ;;  %2989 = vmatprep.subr.bf16.mxu0 %v8449_v39  ;;  %11712 = vst [vmem:[#allocation56_spill] sm:$0xff] %v8479_v57  ;;  %v8485_v39 = vld [vmem:[%s11219_s3 + $0x300] ss:$16 sps:$4 sm:$0xff]   ;;  %v8497_v38 = vld [vmem:[%s11219_s3 + $0x324] ss:$16 sps:$4 sm:$0xff]  }
 0x317   :  { %3112 = vmatprep.subr.bf16.mxu1 %v8455_v55  ;;  %11713 = vst [vmem:[#allocation57_spill] sm:$0xff] %v8485_v39  ;;  %v8492_v55 = vld [vmem:[%s11219_s3 + $0x308] ss:$16 sps:$4 sm:$0xff]   ;;  %11715 = vst [vmem:[#allocation59_spill] sm:$0xff] %v8497_v38 }
 0x318   :  { %11714 = vst [vmem:[#allocation58_spill] sm:$0xff] %v8492_v55 }
 0x319   :  { %2990 = vmatpush1.bf16.msra.mxu0 %v8461_v56  ;;  %v8503_v56 = vld [vmem:[%s11219_s3 + $0x32c] ss:$16 sps:$4 sm:$0xff]  }
 0x31a   :  { %3113 = vmatpush1.bf16.msra.mxu1 %v8468_v9  ;;  %2991 = vmatprep.subr.bf16.mxu0 %v8473_v42  ;;  %11716 = vst [vmem:[#allocation60_spill] sm:$0xff] %v8503_v56  ;;  %v8509_v42 = vld [vmem:[%s11219_s3 + $0x320] ss:$16 sps:$4 sm:$0xff]   ;;  %v8521_v9 = vld [vmem:[%s11219_s3 + $0x344] ss:$16 sps:$4 sm:$0xff]  }
 0x31b   :  { %3114 = vmatprep.subr.bf16.mxu1 %v8479_v57  ;;  %11717 = vst [vmem:[#allocation61_spill] sm:$0xff] %v8509_v42  ;;  %v8516_v57 = vld [vmem:[%s11219_s3 + $0x328] ss:$16 sps:$4 sm:$0xff]   ;;  %11719 = vst [vmem:[#allocation63_spill] sm:$0xff] %v8521_v9 }
 0x31c   :  { %11718 = vst [vmem:[#allocation62_spill] sm:$0xff] %v8516_v57 }
 0x31d   :  { %2992 = vmatpush1.bf16.msra.mxu0 %v8485_v39  ;;  %v8527_v39 = vld [vmem:[%s11219_s3 + $0x34c] ss:$16 sps:$4 sm:$0xff]  }
 0x31e   :  { %3115 = vmatpush1.bf16.msra.mxu1 %v8492_v55  ;;  %2993 = vmatprep.subr.bf16.mxu0 %v8497_v38  ;;  %11720 = vst [vmem:[#allocation64_spill] sm:$0xff] %v8527_v39  ;;  %v8533_v38 = vld [vmem:[%s11219_s3 + $0x340] ss:$16 sps:$4 sm:$0xff]   ;;  %v8545_v55 = vld [vmem:[%s11219_s3 + $0x364] ss:$16 sps:$4 sm:$0xff]  }
 0x31f   :  { %3116 = vmatprep.subr.bf16.mxu1 %v8503_v56  ;;  %11721 = vst [vmem:[#allocation65_spill] sm:$0xff] %v8533_v38  ;;  %v8540_v56 = vld [vmem:[%s11219_s3 + $0x348] ss:$16 sps:$4 sm:$0xff]   ;;  %11723 = vst [vmem:[#allocation67_spill] sm:$0xff] %v8545_v55 }
 0x320   :  { %11722 = vst [vmem:[#allocation66_spill] sm:$0xff] %v8540_v56 }
 0x321   :  { %2994 = vmatpush1.bf16.msra.mxu0 %v8509_v42  ;;  %v8551_v42 = vld [vmem:[%s11219_s3 + $0x36c] ss:$16 sps:$4 sm:$0xff]  }
 0x322   :  { %3117 = vmatpush1.bf16.msra.mxu1 %v8516_v57  ;;  %2995 = vmatprep.subr.bf16.mxu0 %v8521_v9  ;;  %11724 = vst [vmem:[#allocation68_spill] sm:$0xff] %v8551_v42  ;;  %v8557_v9 = vld [vmem:[%s11219_s3 + $0x360] ss:$16 sps:$4 sm:$0xff]   ;;  %v8569_v57 = vld [vmem:[%s11219_s3 + $0x384] ss:$16 sps:$4 sm:$0xff]  }
 0x323   :  { %3118 = vmatprep.subr.bf16.mxu1 %v8527_v39  ;;  %11725 = vst [vmem:[#allocation69_spill] sm:$0xff] %v8557_v9  ;;  %v8564_v39 = vld [vmem:[%s11219_s3 + $0x368] ss:$16 sps:$4 sm:$0xff]   ;;  %11727 = vst [vmem:[#allocation71_spill] sm:$0xff] %v8569_v57 }
 0x324   :  { %11726 = vst [vmem:[#allocation70_spill] sm:$0xff] %v8564_v39 }
 0x325   :  { %2996 = vmatpush1.bf16.msra.mxu0 %v8533_v38  ;;  %v8575_v38 = vld [vmem:[%s11219_s3 + $0x38c] ss:$16 sps:$4 sm:$0xff]  }
 0x326   :  { %3119 = vmatpush1.bf16.msra.mxu1 %v8540_v56  ;;  %2997 = vmatprep.subr.bf16.mxu0 %v8545_v55  ;;  %11728 = vst [vmem:[#allocation72_spill] sm:$0xff] %v8575_v38  ;;  %v8581_v55 = vld [vmem:[%s11219_s3 + $0x380] ss:$16 sps:$4 sm:$0xff]   ;;  %v8593_v56 = vld [vmem:[%s11219_s3 + $0x3a4] ss:$16 sps:$4 sm:$0xff]  }
 0x327   :  { %3120 = vmatprep.subr.bf16.mxu1 %v8551_v42  ;;  %11729 = vst [vmem:[#allocation73_spill] sm:$0xff] %v8581_v55  ;;  %v8588_v42 = vld [vmem:[%s11219_s3 + $0x388] ss:$16 sps:$4 sm:$0xff]   ;;  %11731 = vst [vmem:[#allocation75_spill] sm:$0xff] %v8593_v56 }
 0x328   :  { %11730 = vst [vmem:[#allocation74_spill] sm:$0xff] %v8588_v42 }
 0x329   :  { %2998 = vmatpush1.bf16.msra.mxu0 %v8557_v9  ;;  %v8599_v9 = vld [vmem:[%s11219_s3 + $0x3ac] ss:$16 sps:$4 sm:$0xff]  }
 0x32a   :  { %3121 = vmatpush1.bf16.msra.mxu1 %v8564_v39  ;;  %2999 = vmatprep.subr.bf16.mxu0 %v8569_v57  ;;  %11732 = vst [vmem:[#allocation76_spill] sm:$0xff] %v8599_v9  ;;  %v8605_v57 = vld [vmem:[%s11219_s3 + $0x3a0] ss:$16 sps:$4 sm:$0xff]   ;;  %v8617_v39 = vld [vmem:[%s11219_s3 + $0x3c4] ss:$16 sps:$4 sm:$0xff]  }
 0x32b   :  { %3122 = vmatprep.subr.bf16.mxu1 %v8575_v38  ;;  %11733 = vst [vmem:[#allocation77_spill] sm:$0xff] %v8605_v57  ;;  %v8612_v38 = vld [vmem:[%s11219_s3 + $0x3a8] ss:$16 sps:$4 sm:$0xff]   ;;  %11735 = vst [vmem:[#allocation79_spill] sm:$0xff] %v8617_v39 }
 0x32c   :  { %11734 = vst [vmem:[#allocation78_spill] sm:$0xff] %v8612_v38 }
 0x32d   :  { %3000 = vmatpush1.bf16.msra.mxu0 %v8581_v55 }
 0x32e   :  { %3123 = vmatpush1.bf16.msra.mxu1 %v8588_v42  ;;  %3001 = vmatprep.subr.bf16.mxu0 %v8593_v56  ;;  %v8623_v42 = vld [vmem:[%s11219_s3 + $0x3cc] ss:$16 sps:$4 sm:$0xff]  }
 0x32f   :  { %v1499_v55 = vpop.f32.mrb[44].mxu0  ;;  %v1540_v46 = vpop.f32.mrb[44].mxu1  ;;  %3124 = vmatprep.subr.bf16.mxu1 %v8599_v9  ;;  %11736 = vst [vmem:[#allocation80_spill] sm:$0xff] %v8623_v42 }
 0x330   :  { %v1501_v56 = vpop.f32.mrb[45].mxu0  ;;  %v1542_v50 = vpop.f32.mrb[45].mxu1 }
 0x331   :  { %v1547_v53 = vmax.f32 %v1499_v55, %v1501_v56  ;;  %v1548_v40 = vmax.f32 %v1540_v46, %v1542_v50  ;;  %v1503_v2 = vpop.f32.mrb[46].mxu0  ;;  %v1544_v11 = vpop.f32.mrb[46].mxu1  ;;  %3002 = vmatpush1.bf16.msra.mxu0 %v8605_v57  ;;  %v8636_v55 = vld [vmem:[%s11219_s3 + $0x3c8] ss:$16 sps:$4 sm:$0xff]   ;;  %v8654_v50 = vld [vmem:[%s11219_s3 + $0x3e0] ss:$16 sps:$4 sm:$0xff]  }
 0x332   :  { %3125 = vmatpush1.bf16.msra.mxu1 %v8612_v38  ;;  %v1504_v9 = vpop.f32.mrb[47].mxu0  ;;  %v1545_v44 = vpop.f32.mrb[47].mxu1  ;;  %3003 = vmatprep.subr.bf16.mxu0 %v8617_v39  ;;  %11738 = vst [vmem:[#allocation82_spill] sm:$0xff] %v8636_v55  ;;  %v8641_v2 = vld [vmem:[%s11219_s3 + $0x3e4] ss:$16 sps:$4 sm:$0xff]   ;;  %11741 = vst [vmem:[#allocation85_spill] sm:$0xff] %v8654_v50 }
 0x333   :  { %11739 = vst [vmem:[#allocation83_spill] sm:$0xff] %v8641_v2  ;;  %v1549_v11 = vmax.f32 %v1547_v53, %v1548_v40  ;;  %3126 = vmatprep.subr.bf16.mxu1 %v8623_v42  ;;  %v8647_v9 = vld [vmem:[%s11219_s3 + $0x3ec] ss:$16 sps:$4 sm:$0xff]   ;;  %v8661_v40 = vld [vmem:[%s11219_s3 + $0x3e8] ss:$16 sps:$4 sm:$0xff]  }
 0x334   :  { %11740 = vst [vmem:[#allocation84_spill] sm:$0xff] %v8647_v9  ;;  %11742 = vst [vmem:[#allocation86_spill] sm:$0xff] %v8661_v40  ;;  %v8672_v46 = vld [vmem:[%s11219_s3 + $0x40c] ss:$16 sps:$4 sm:$0xff]   ;;  %v8932_v57 = vld [vmem:[%s11219_s3 + $0x540] ss:$16 sps:$4 sm:$0xff]  }
 0x335   :  { %v1550_v44 = vadd.f32 %v7701_v29, %v1549_v11  ;;  %3004 = vmatpush1.bf16.msra.mxu0 %v8629_v25  ;;  %v8666_v29 = vld [vmem:[%s11219_s3 + $0x404] ss:$16 sps:$4 sm:$0xff]   ;;  %11744 = vst [vmem:[#allocation88_spill] sm:$0xff] %v8672_v46  ;;  %v8678_v11 = vld [vmem:[%s11219_s3 + $0x400] ss:$16 sps:$4 sm:$0xff]  }
 0x336   :  { %3127 = vmatpush1.bf16.msra.mxu1 %v8636_v55  ;;  %3005 = vmatprep.subr.bf16.mxu0 %v8641_v2  ;;  %11743 = vst [vmem:[#allocation87_spill] sm:$0xff] %v8666_v29  ;;  %11745 = vst [vmem:[#allocation89_spill] sm:$0xff] %v8678_v11  ;;  %v8680_v2 = vld [vmem:[#allocation2 + $0x10] sm:$0xff] }
 0x337   :  { %v1551_v53 = vmax.f32 %v1550_v44, 0.0  ;;  %3128 = vmatprep.subr.bf16.mxu1 %v8647_v9  ;;  %v8684_v44 = vcombine.low %v8284_v1, %v8284_v1  ;;  %v8702_v1 = vcombine.high %v8680_v2, %v8680_v2 }
 0x339   :  { %v1552_v56 = vpack.c.bf16 %v1551_v53, %v1551_v53  ;;  %3006 = vmatpush1.bf16.msra.mxu0 %v8654_v50  ;;  %v8691_v53 = vld [vmem:[%s11219_s3 + $0x408] ss:$16 sps:$4 sm:$0xff]   ;;  %v8697_v50 = vld [vmem:[%s11219_s3 + $0x424] ss:$16 sps:$4 sm:$0xff]  }
 0x33a   :  { %3129 = vmatpush1.bf16.msra.mxu1 %v8661_v40  ;;  %3016 = vmatprep.subr.bf16.mxu0 %v8666_v29  ;;  %11746 = vst [vmem:[#allocation90_spill] sm:$0xff] %v8691_v53  ;;  %11747 = vst [vmem:[#allocation91_spill] sm:$0xff] %v8697_v50  ;;  %v8707_v29 = vld [vmem:[%s11219_s3 + $0x42c] ss:$16 sps:$4 sm:$0xff]   ;;  %v8726_v40 = vld [vmem:[%s11219_s3 + $0x444] ss:$16 sps:$4 sm:$0xff]  }
 0x33b   :  { %1553 = vst [vmem:[#allocation2 + $0x2c] sm:$0xf] %v1552_v56  ;;  %3139 = vmatprep.subr.bf16.mxu1 %v8672_v46  ;;  %11748 = vst [vmem:[#allocation92_spill] sm:$0xff] %v8707_v29  ;;  %v8714_v56 = vld [vmem:[%s11219_s3 + $0x420] ss:$16 sps:$4 sm:$0xff]  }
 0x33c   :  { %3008 = vmatmul.mubr.bf16.vlgmr.msra.gmra.mrb[56].mxu0 %v8684_v44  ;;  %11749 = vst [vmem:[#allocation93_spill] sm:$0xff] %v8714_v56  ;;  %v8721_v46 = vld [vmem:[%s11219_s3 + $0x428] ss:$16 sps:$4 sm:$0xff]   ;;  %11751 = vst [vmem:[#allocation95_spill] sm:$0xff] %v8726_v40 }
 0x33d   :  { %3131 = vmatmul.mubr.bf16.vlgmr.msra.gmra.mrb[56].mxu1 %v8684_v44  ;;  %3017 = vmatpush1.bf16.msra.mxu0 %v8678_v11  ;;  %11750 = vst [vmem:[#allocation94_spill] sm:$0xff] %v8721_v46  ;;  %v8733_v11 = vld [vmem:[%s11219_s3 + $0x44c] ss:$16 sps:$4 sm:$0xff]  }
 0x33e   :  { %3048 = vmatprep.mubr.bf16.mxu0 %v8702_v1  ;;  %3140 = vmatpush1.bf16.msra.mxu1 %v8691_v53  ;;  %11752 = vst [vmem:[#allocation96_spill] sm:$0xff] %v8733_v11  ;;  %v8740_v53 = vld [vmem:[%s11219_s3 + $0x440] ss:$16 sps:$4 sm:$0xff]  }
 0x33f   :  { %3171 = vmatprep.mubr.bf16.mxu1 %v8702_v1  ;;  %3018 = vmatprep.subr.bf16.mxu0 %v8697_v50  ;;  %11753 = vst [vmem:[#allocation97_spill] sm:$0xff] %v8740_v53  ;;  %v8747_v50 = vld [vmem:[%s11219_s3 + $0x448] ss:$16 sps:$4 sm:$0xff]  }
 0x340   :  { %3141 = vmatprep.subr.bf16.mxu1 %v8707_v29  ;;  %11754 = vst [vmem:[#allocation98_spill] sm:$0xff] %v8747_v50  ;;  %v8752_v29 = vld [vmem:[%s11219_s3 + $0x464] ss:$16 sps:$4 sm:$0xff]  }
 0x341   :  { %3019 = vmatpush1.bf16.msra.mxu0 %v8714_v56  ;;  %11755 = vst [vmem:[#allocation99_spill] sm:$0xff] %v8752_v29  ;;  %v8758_v56 = vld [vmem:[%s11219_s3 + $0x46c] ss:$16 sps:$4 sm:$0xff]  }
 0x342   :  { %3142 = vmatpush1.bf16.msra.mxu1 %v8721_v46  ;;  %3020 = vmatprep.subr.bf16.mxu0 %v8726_v40  ;;  %11756 = vst [vmem:[#allocation100_spill] sm:$0xff] %v8758_v56  ;;  %v8764_v40 = vld [vmem:[%s11219_s3 + $0x460] ss:$16 sps:$4 sm:$0xff]   ;;  %v8776_v46 = vld [vmem:[%s11219_s3 + $0x484] ss:$16 sps:$4 sm:$0xff]  }
 0x343   :  { %3143 = vmatprep.subr.bf16.mxu1 %v8733_v11  ;;  %11757 = vst [vmem:[#allocation101_spill] sm:$0xff] %v8764_v40  ;;  %v8771_v11 = vld [vmem:[%s11219_s3 + $0x468] ss:$16 sps:$4 sm:$0xff]   ;;  %11759 = vst [vmem:[#allocation103_spill] sm:$0xff] %v8776_v46 }
 0x344   :  { %11758 = vst [vmem:[#allocation102_spill] sm:$0xff] %v8771_v11 }
 0x345   :  { %3021 = vmatpush1.bf16.msra.mxu0 %v8740_v53  ;;  %v8782_v53 = vld [vmem:[%s11219_s3 + $0x48c] ss:$16 sps:$4 sm:$0xff]  }
 0x346   :  { %3144 = vmatpush1.bf16.msra.mxu1 %v8747_v50  ;;  %3022 = vmatprep.subr.bf16.mxu0 %v8752_v29  ;;  %11760 = vst [vmem:[#allocation104_spill] sm:$0xff] %v8782_v53  ;;  %v8788_v29 = vld [vmem:[%s11219_s3 + $0x480] ss:$16 sps:$4 sm:$0xff]   ;;  %v8800_v50 = vld [vmem:[%s11219_s3 + $0x4a4] ss:$16 sps:$4 sm:$0xff]  }
 0x347   :  { %3145 = vmatprep.subr.bf16.mxu1 %v8758_v56  ;;  %11761 = vst [vmem:[#allocation105_spill] sm:$0xff] %v8788_v29  ;;  %v8795_v56 = vld [vmem:[%s11219_s3 + $0x488] ss:$16 sps:$4 sm:$0xff]   ;;  %11763 = vst [vmem:[#allocation107_spill] sm:$0xff] %v8800_v50 }
 0x348   :  { %11762 = vst [vmem:[#allocation106_spill] sm:$0xff] %v8795_v56 }
 0x349   :  { %3023 = vmatpush1.bf16.msra.mxu0 %v8764_v40  ;;  %v8806_v40 = vld [vmem:[%s11219_s3 + $0x4ac] ss:$16 sps:$4 sm:$0xff]  }
 0x34a   :  { %3146 = vmatpush1.bf16.msra.mxu1 %v8771_v11  ;;  %3024 = vmatprep.subr.bf16.mxu0 %v8776_v46  ;;  %11764 = vst [vmem:[#allocation108_spill] sm:$0xff] %v8806_v40  ;;  %v8812_v46 = vld [vmem:[%s11219_s3 + $0x4a0] ss:$16 sps:$4 sm:$0xff]   ;;  %v8824_v11 = vld [vmem:[%s11219_s3 + $0x4c4] ss:$16 sps:$4 sm:$0xff]  }
 0x34b   :  { %3147 = vmatprep.subr.bf16.mxu1 %v8782_v53  ;;  %11765 = vst [vmem:[#allocation109_spill] sm:$0xff] %v8812_v46  ;;  %v8819_v53 = vld [vmem:[%s11219_s3 + $0x4a8] ss:$16 sps:$4 sm:$0xff]   ;;  %11767 = vst [vmem:[#allocation111_spill] sm:$0xff] %v8824_v11 }
 0x34c   :  { %11766 = vst [vmem:[#allocation110_spill] sm:$0xff] %v8819_v53 }
 0x34d   :  { %3025 = vmatpush1.bf16.msra.mxu0 %v8788_v29  ;;  %v8830_v29 = vld [vmem:[%s11219_s3 + $0x4cc] ss:$16 sps:$4 sm:$0xff]  }
 0x34e   :  { %3148 = vmatpush1.bf16.msra.mxu1 %v8795_v56  ;;  %3026 = vmatprep.subr.bf16.mxu0 %v8800_v50  ;;  %11768 = vst [vmem:[#allocation112_spill] sm:$0xff] %v8830_v29  ;;  %v8836_v50 = vld [vmem:[%s11219_s3 + $0x4c0] ss:$16 sps:$4 sm:$0xff]   ;;  %v8848_v56 = vld [vmem:[%s11219_s3 + $0x4e4] ss:$16 sps:$4 sm:$0xff]  }
 0x34f   :  { %3149 = vmatprep.subr.bf16.mxu1 %v8806_v40  ;;  %11769 = vst [vmem:[#allocation113_spill] sm:$0xff] %v8836_v50  ;;  %v8843_v40 = vld [vmem:[%s11219_s3 + $0x4c8] ss:$16 sps:$4 sm:$0xff]   ;;  %11771 = vst [vmem:[#allocation115_spill] sm:$0xff] %v8848_v56 }
 0x350   :  { %11770 = vst [vmem:[#allocation114_spill] sm:$0xff] %v8843_v40 }
 0x351   :  { %3027 = vmatpush1.bf16.msra.mxu0 %v8812_v46  ;;  %v8854_v46 = vld [vmem:[%s11219_s3 + $0x4ec] ss:$16 sps:$4 sm:$0xff]  }
 0x352   :  { %3150 = vmatpush1.bf16.msra.mxu1 %v8819_v53  ;;  %3028 = vmatprep.subr.bf16.mxu0 %v8824_v11  ;;  %11772 = vst [vmem:[#allocation116_spill] sm:$0xff] %v8854_v46  ;;  %v8860_v11 = vld [vmem:[%s11219_s3 + $0x4e0] ss:$16 sps:$4 sm:$0xff]   ;;  %v8872_v53 = vld [vmem:[%s11219_s3 + $0x504] ss:$16 sps:$4 sm:$0xff]  }
 0x353   :  { %3151 = vmatprep.subr.bf16.mxu1 %v8830_v29  ;;  %11773 = vst [vmem:[#allocation117_spill] sm:$0xff] %v8860_v11  ;;  %v8867_v29 = vld [vmem:[%s11219_s3 + $0x4e8] ss:$16 sps:$4 sm:$0xff]   ;;  %11775 = vst [vmem:[#allocation119_spill] sm:$0xff] %v8872_v53 }
 0x354   :  { %11774 = vst [vmem:[#allocation118_spill] sm:$0xff] %v8867_v29 }
 0x355   :  { %3029 = vmatpush1.bf16.msra.mxu0 %v8836_v50  ;;  %v8878_v50 = vld [vmem:[%s11219_s3 + $0x50c] ss:$16 sps:$4 sm:$0xff]  }
 0x356   :  { %3152 = vmatpush1.bf16.msra.mxu1 %v8843_v40  ;;  %3030 = vmatprep.subr.bf16.mxu0 %v8848_v56  ;;  %11776 = vst [vmem:[#allocation120_spill] sm:$0xff] %v8878_v50  ;;  %v8884_v56 = vld [vmem:[%s11219_s3 + $0x500] ss:$16 sps:$4 sm:$0xff]   ;;  %v8896_v40 = vld [vmem:[%s11219_s3 + $0x524] ss:$16 sps:$4 sm:$0xff]  }
 0x357   :  { %3153 = vmatprep.subr.bf16.mxu1 %v8854_v46  ;;  %11777 = vst [vmem:[#allocation121_spill] sm:$0xff] %v8884_v56  ;;  %v8891_v46 = vld [vmem:[%s11219_s3 + $0x508] ss:$16 sps:$4 sm:$0xff]   ;;  %11779 = vst [vmem:[#allocation123_spill] sm:$0xff] %v8896_v40 }
 0x358   :  { %11778 = vst [vmem:[#allocation122_spill] sm:$0xff] %v8891_v46 }
 0x359   :  { %3031 = vmatpush1.bf16.msra.mxu0 %v8860_v11  ;;  %v8902_v11 = vld [vmem:[%s11219_s3 + $0x52c] ss:$16 sps:$4 sm:$0xff]  }
 0x35a   :  { %3154 = vmatpush1.bf16.msra.mxu1 %v8867_v29  ;;  %3032 = vmatprep.subr.bf16.mxu0 %v8872_v53  ;;  %11780 = vst [vmem:[#allocation124_spill] sm:$0xff] %v8902_v11  ;;  %v8908_v53 = vld [vmem:[%s11219_s3 + $0x520] ss:$16 sps:$4 sm:$0xff]   ;;  %v8920_v29 = vld [vmem:[%s11219_s3 + $0x544] ss:$16 sps:$4 sm:$0xff]  }
 0x35b   :  { %3155 = vmatprep.subr.bf16.mxu1 %v8878_v50  ;;  %v8915_v50 = vld [vmem:[%s11219_s3 + $0x528] ss:$16 sps:$4 sm:$0xff]  }
 0x35d   :  { %3033 = vmatpush1.bf16.msra.mxu0 %v8884_v56 }
 0x35e   :  { %3156 = vmatpush1.bf16.msra.mxu1 %v8891_v46  ;;  %3034 = vmatprep.subr.bf16.mxu0 %v8896_v40  ;;  %v8926_v46 = vld [vmem:[%s11219_s3 + $0x54c] ss:$16 sps:$4 sm:$0xff]  }
 0x35f   :  { %v1598_v56 = vpop.f32.mrb[48].mxu0  ;;  %v1639_v9 = vpop.f32.mrb[48].mxu1  ;;  %3157 = vmatprep.subr.bf16.mxu1 %v8902_v11 }
 0x360   :  { %v1600_v40 = vpop.f32.mrb[49].mxu0  ;;  %v1641_v55 = vpop.f32.mrb[49].mxu1 }
 0x361   :  { %v1646_v25 = vmax.f32 %v1598_v56, %v1600_v40  ;;  %v1647_v42 = vmax.f32 %v1639_v9, %v1641_v55  ;;  %v1602_v39 = vpop.f32.mrb[50].mxu0  ;;  %v1643_v38 = vpop.f32.mrb[50].mxu1  ;;  %3035 = vmatpush1.bf16.msra.mxu0 %v8908_v53  ;;  %v8939_v40 = vld [vmem:[%s11219_s3 + $0x548] ss:$16 sps:$4 sm:$0xff]   ;;  %v8950_v55 = vld [vmem:[%s11219_s3 + $0x56c] ss:$16 sps:$4 sm:$0xff]  }
 0x362   :  { %3158 = vmatpush1.bf16.msra.mxu1 %v8915_v50  ;;  %v1603_v11 = vpop.f32.mrb[51].mxu0  ;;  %v1644_v61 = vpop.f32.mrb[51].mxu1  ;;  %3036 = vmatprep.subr.bf16.mxu0 %v8920_v29  ;;  %11781 = vst [vmem:[#allocation125_spill] sm:$0xff] %v8939_v40  ;;  %v8944_v38 = vld [vmem:[%s11219_s3 + $0x564] ss:$16 sps:$4 sm:$0xff]  }
 0x363   :  { %11782 = vst [vmem:[#allocation126_spill] sm:$0xff] %v8944_v38  ;;  %v1648_v39 = vmax.f32 %v1646_v25, %v1647_v42  ;;  %3159 = vmatprep.subr.bf16.mxu1 %v8926_v46  ;;  %v8955_v61 = vld [vmem:[%s11218_s2] ss:$0 sm:$0xff]  ;;  %v8969_v42 = vld [vmem:[%s11219_s3 + $0x568] ss:$16 sps:$4 sm:$0xff]  }
 0x364   :  { %v8962_v25 = vld [vmem:[%s11219_s3 + $0x560] ss:$16 sps:$4 sm:$0xff]   ;;  %v8974_v11 = vld [vmem:[%s11219_s3 + $0x584] ss:$16 sps:$4 sm:$0xff]  }
 0x365   :  { %v1649_v9 = vadd.f32 %v8955_v61, %v1648_v39  ;;  %3037 = vmatpush1.bf16.msra.mxu0 %v8932_v57  ;;  %11783 = vst [vmem:[#allocation127_spill] sm:$0xff] %v8962_v25  ;;  %11784 = vst [vmem:[#allocation128_spill] sm:$0xff] %v8974_v11  ;;  %v8980_v39 = vld [vmem:[%s11219_s3 + $0x58c] ss:$16 sps:$4 sm:$0xff]  }
 0x366   :  { %3160 = vmatpush1.bf16.msra.mxu1 %v8939_v40  ;;  %3038 = vmatprep.subr.bf16.mxu0 %v8944_v38  ;;  %11785 = vst [vmem:[#allocation129_spill] sm:$0xff] %v8980_v39  ;;  %v8986_v38 = vld [vmem:[%s11219_s3 + $0x580] ss:$16 sps:$4 sm:$0xff]  }
 0x367   :  { %v1650_v56 = vmax.f32 %v1649_v9, 0.0  ;;  %3161 = vmatprep.subr.bf16.mxu1 %v8950_v55  ;;  %11786 = vst [vmem:[#allocation130_spill] sm:$0xff] %v8986_v38  ;;  %v8993_v9 = vld [vmem:[%s11219_s3 + $0x588] ss:$16 sps:$4 sm:$0xff]  }
 0x368   :  { %11787 = vst [vmem:[#allocation131_spill] sm:$0xff] %v8993_v9 }
 0x369   :  { %v1651_v40 = vpack.c.bf16 %v1650_v56, %v1650_v56  ;;  %3039 = vmatpush1.bf16.msra.mxu0 %v8962_v25  ;;  %v8998_v56 = vld [vmem:[%s11219_s3 + $0x5a4] ss:$16 sps:$4 sm:$0xff]   ;;  %v9004_v25 = vld [vmem:[%s11219_s3 + $0x5ac] ss:$16 sps:$4 sm:$0xff]  }
 0x36a   :  { %3162 = vmatpush1.bf16.msra.mxu1 %v8969_v42  ;;  %3040 = vmatprep.subr.bf16.mxu0 %v8974_v11  ;;  %11788 = vst [vmem:[#allocation132_spill] sm:$0xff] %v8998_v56  ;;  %11789 = vst [vmem:[#allocation133_spill] sm:$0xff] %v9004_v25  ;;  %v9010_v11 = vld [vmem:[%s11219_s3 + $0x5a0] ss:$16 sps:$4 sm:$0xff]  }
 0x36b   :  { %1652 = vst [vmem:[#allocation2 + $0x30] sm:$0xf] %v1651_v40  ;;  %3163 = vmatprep.subr.bf16.mxu1 %v8980_v39  ;;  %11790 = vst [vmem:[#allocation134_spill] sm:$0xff] %v9010_v11  ;;  %v9017_v40 = vld [vmem:[%s11219_s3 + $0x5a8] ss:$16 sps:$4 sm:$0xff]  }
 0x36c   :  { %v9022_v39 = vld [vmem:[%s11219_s3 + $0x5c4] ss:$16 sps:$4 sm:$0xff]  }
 0x36d   :  { %3041 = vmatpush1.bf16.msra.mxu0 %v8986_v38  ;;  %11791 = vst [vmem:[#allocation135_spill] sm:$0xff] %v9022_v39  ;;  %v9028_v38 = vld [vmem:[%s11219_s3 + $0x5cc] ss:$16 sps:$4 sm:$0xff]  }
 0x36e   :  { %3164 = vmatpush1.bf16.msra.mxu1 %v8993_v9  ;;  %3042 = vmatprep.subr.bf16.mxu0 %v8998_v56  ;;  %11792 = vst [vmem:[#allocation136_spill] sm:$0xff] %v9028_v38  ;;  %v9034_v56 = vld [vmem:[%s11219_s3 + $0x5c0] ss:$16 sps:$4 sm:$0xff]   ;;  %v9046_v9 = vld [vmem:[%s11219_s3 + $0x5e4] ss:$16 sps:$4 sm:$0xff]  }
 0x36f   :  { %3165 = vmatprep.subr.bf16.mxu1 %v9004_v25  ;;  %11793 = vst [vmem:[#allocation137_spill] sm:$0xff] %v9034_v56  ;;  %v9041_v25 = vld [vmem:[%s11219_s3 + $0x5c8] ss:$16 sps:$4 sm:$0xff]  }
 0x371   :  { %3043 = vmatpush1.bf16.msra.mxu0 %v9010_v11  ;;  %v9052_v11 = vld [vmem:[%s11219_s3 + $0x5ec] ss:$16 sps:$4 sm:$0xff]  }
 0x372   :  { %3166 = vmatpush1.bf16.msra.mxu1 %v9017_v40  ;;  %3044 = vmatprep.subr.bf16.mxu0 %v9022_v39  ;;  %v9058_v39 = vld [vmem:[%s11219_s3 + $0x5e0] ss:$16 sps:$4 sm:$0xff]  }
 0x373   :  { %3167 = vmatprep.subr.bf16.mxu1 %v9028_v38  ;;  %v9065_v38 = vld [vmem:[%s11219_s3 + $0x5e8] ss:$16 sps:$4 sm:$0xff]  }
 0x375   :  { %3045 = vmatpush1.bf16.msra.mxu0 %v9034_v56  ;;  %v9071_v56 = vcombine.low %v8680_v2, %v8680_v2  ;;  %v11826_v2 = vld [vmem:[#allocation36_spill] sm:$0xff] }
 0x376   :  { %3168 = vmatpush1.bf16.msra.mxu1 %v9041_v25  ;;  %3046 = vmatprep.subr.bf16.mxu0 %v9046_v9 }
 0x377   :  { %3169 = vmatprep.subr.bf16.mxu1 %v9052_v11 }
 0x379   :  { %3047 = vmatpush1.bf16.msra.mxu0 %v9058_v39 }
 0x37a   :  { %3170 = vmatpush1.bf16.msra.mxu1 %v9065_v38  ;;  %3217 = vmatprep.subr.bf16.mxu0 %v7876_v33 }
 0x37b   :  { %3340 = vmatprep.subr.bf16.mxu1 %v7881_v34 }
 0x37c   :  { %3049 = vmatmul.mubr.bf16.vlgmr.msra.gmra.mrb[56].mxu0 %v9071_v56 }
 0x37d   :  { %3172 = vmatmul.mubr.bf16.vlgmr.msra.gmra.mrb[56].mxu1 %v9071_v56  ;;  %3218 = vmatpush1.bf16.msra.mxu0 %v7896_v51 }
 0x37e   :  { %3249 = vmatprep.mubr.bf16.mxu0 %v8303_v35  ;;  %3341 = vmatpush1.bf16.msra.mxu1 %v7903_v52 }
 0x37f   :  { %3372 = vmatprep.mubr.bf16.mxu1 %v8303_v35  ;;  %3219 = vmatprep.subr.bf16.mxu0 %v7910_v36  ;;  %v11825_v35 = vld [vmem:[#allocation35_spill] sm:$0xff] }
 0x380   :  { %3342 = vmatprep.subr.bf16.mxu1 %v7915_v10 }
 0x381   :  { %3220 = vmatpush1.bf16.msra.mxu0 %v7921_v60 }
 0x382   :  { %3343 = vmatpush1.bf16.msra.mxu1 %v7927_v63  ;;  %3221 = vmatprep.subr.bf16.mxu0 %v7932_v0 }
 0x383   :  { %3344 = vmatprep.subr.bf16.mxu1 %v7939_v6 }
 0x385   :  { %3222 = vmatpush1.bf16.msra.mxu0 %v7945_v12 }
 0x386   :  { %3345 = vmatpush1.bf16.msra.mxu1 %v7952_v13  ;;  %3223 = vmatprep.subr.bf16.mxu0 %v7957_v14 }
 0x387   :  { %3346 = vmatprep.subr.bf16.mxu1 %v7963_v15 }
 0x389   :  { %3224 = vmatpush1.bf16.msra.mxu0 %v7969_v16  ;;  %v11794_v16 = vld [vmem:[#allocation4_spill] sm:$0xff] }
 0x38a   :  { %3347 = vmatpush1.bf16.msra.mxu1 %v7976_v17  ;;  %3225 = vmatprep.subr.bf16.mxu0 %v7981_v8  ;;  %v11795_v17 = vld [vmem:[#allocation5_spill] sm:$0xff]  ;;  %v11796_v8 = vld [vmem:[#allocation6_spill] sm:$0xff] }
 0x38b   :  { %3348 = vmatprep.subr.bf16.mxu1 %v7987_v18  ;;  %v11797_v18 = vld [vmem:[#allocation7_spill] sm:$0xff] }
 0x38d   :  { %3226 = vmatpush1.bf16.msra.mxu0 %v7993_v19  ;;  %v11798_v19 = vld [vmem:[#allocation8_spill] sm:$0xff] }
 0x38e   :  { %3349 = vmatpush1.bf16.msra.mxu1 %v8000_v20  ;;  %3227 = vmatprep.subr.bf16.mxu0 %v8005_v21  ;;  %v11799_v20 = vld [vmem:[#allocation9_spill] sm:$0xff]  ;;  %v11800_v21 = vld [vmem:[#allocation10_spill] sm:$0xff] }
 0x38f   :  { %v1702_v33 = vpop.f32.mrb[52].mxu0  ;;  %v1743_v34 = vpop.f32.mrb[52].mxu1  ;;  %3350 = vmatprep.subr.bf16.mxu1 %v8011_v22  ;;  %v11801_v22 = vld [vmem:[#allocation11_spill] sm:$0xff] }
 0x390   :  { %v1704_v51 = vpop.f32.mrb[53].mxu0  ;;  %v1745_v52 = vpop.f32.mrb[53].mxu1 }
 0x391   :  { %v1750_v36 = vmax.f32 %v1702_v33, %v1704_v51  ;;  %v1751_v10 = vmax.f32 %v1743_v34, %v1745_v52  ;;  %v1706_v60 = vpop.f32.mrb[54].mxu0  ;;  %v1747_v63 = vpop.f32.mrb[54].mxu1  ;;  %3228 = vmatpush1.bf16.msra.mxu0 %v8017_v23  ;;  %v11802_v23 = vld [vmem:[#allocation12_spill] sm:$0xff]  ;;  %v11829_v33 = vld [vmem:[#allocation39_spill] sm:$0xff]  ;;  %v11831_v51 = vld [vmem:[#allocation41_spill] sm:$0xff] }
 0x392   :  { %3351 = vmatpush1.bf16.msra.mxu1 %v8024_v24  ;;  %v1707_v0 = vpop.f32.mrb[55].mxu0  ;;  %v1748_v6 = vpop.f32.mrb[55].mxu1  ;;  %3229 = vmatprep.subr.bf16.mxu0 %v8029_v26  ;;  %v11803_v24 = vld [vmem:[#allocation13_spill] sm:$0xff]  ;;  %v11804_v26 = vld [vmem:[#allocation14_spill] sm:$0xff]  ;;  %v11830_v34 = vld [vmem:[#allocation40_spill] sm:$0xff] }
 0x393   :  { %v1752_v12 = vmax.f32 %v1750_v36, %v1751_v10  ;;  %3352 = vmatprep.subr.bf16.mxu1 %v8035_v47  ;;  %v11805_v47 = vld [vmem:[#allocation15_spill] sm:$0xff]  ;;  %v11832_v52 = vld [vmem:[#allocation42_spill] sm:$0xff]  ;;  %v11834_v10 = vld [vmem:[#allocation44_spill] sm:$0xff] }
 0x394   :  { %v11833_v36 = vld [vmem:[#allocation43_spill] sm:$0xff]  ;;  %v11835_v60 = vld [vmem:[#allocation45_spill] sm:$0xff]  ;;  %v11836_v63 = vld [vmem:[#allocation46_spill] sm:$0xff] }
 0x395   :  { %v1753_v13 = vadd.f32 %v8955_v61, %v1752_v12  ;;  %3230 = vmatpush1.bf16.msra.mxu0 %v8041_v43  ;;  %v11806_v43 = vld [vmem:[#allocation16_spill] sm:$0xff]  ;;  %v11828_v61 = vld [vmem:[#allocation38_spill] sm:$0xff]  ;;  %v11837_v0 = vld [vmem:[#allocation47_spill] sm:$0xff] }
 0x396   :  { %3353 = vmatpush1.bf16.msra.mxu1 %v8048_v41  ;;  %3231 = vmatprep.subr.bf16.mxu0 %v8053_v49  ;;  %v11807_v41 = vld [vmem:[#allocation17_spill] sm:$0xff]  ;;  %v11808_v49 = vld [vmem:[#allocation18_spill] sm:$0xff]  ;;  %v11838_v6 = vld [vmem:[#allocation48_spill] sm:$0xff] }
 0x397   :  { %v1754_v14 = vmax.f32 %v1753_v13, 0.0  ;;  %3354 = vmatprep.subr.bf16.mxu1 %v8059_v45  ;;  %v11809_v45 = vld [vmem:[#allocation19_spill] sm:$0xff]  ;;  %v11839_v12 = vld [vmem:[#allocation49_spill] sm:$0xff]  ;;  %v11840_v13 = vld [vmem:[#allocation50_spill] sm:$0xff] }
 0x399   :  { %v1755_v15 = vpack.c.bf16 %v1754_v14, %v1754_v14  ;;  %3232 = vmatpush1.bf16.msra.mxu0 %v8066_v54  ;;  %v11810_v54 = vld [vmem:[#allocation20_spill] sm:$0xff]  ;;  %v11841_v14 = vld [vmem:[#allocation51_spill] sm:$0xff] }
 0x39a   :  { %3355 = vmatpush1.bf16.msra.mxu1 %v8073_v48  ;;  %3233 = vmatprep.subr.bf16.mxu0 %v8078_v58  ;;  %v11811_v48 = vld [vmem:[#allocation21_spill] sm:$0xff]  ;;  %v11812_v58 = vld [vmem:[#allocation22_spill] sm:$0xff] }
 0x39b   :  { %1756 = vst [vmem:[#allocation2 + $0x34] sm:$0xf] %v1755_v15  ;;  %3356 = vmatprep.subr.bf16.mxu1 %v8084_v59  ;;  %v11813_v59 = vld [vmem:[#allocation23_spill] sm:$0xff]  ;;  %v11842_v15 = vld [vmem:[#allocation52_spill] sm:$0xff] }
 0x39d   :  { %3234 = vmatpush1.bf16.msra.mxu0 %v8090_v62  ;;  %v11814_v62 = vld [vmem:[#allocation24_spill] sm:$0xff] }
 0x39e   :  { %3357 = vmatpush1.bf16.msra.mxu1 %v8097_v3  ;;  %3235 = vmatprep.subr.bf16.mxu0 %v8102_v4  ;;  %v11815_v3 = vld [vmem:[#allocation25_spill] sm:$0xff]  ;;  %v11816_v4 = vld [vmem:[#allocation26_spill] sm:$0xff] }
 0x39f   :  { %3358 = vmatprep.subr.bf16.mxu1 %v8108_v5  ;;  %v11817_v5 = vld [vmem:[#allocation27_spill] sm:$0xff] }
 0x3a1   :  { %3236 = vmatpush1.bf16.msra.mxu0 %v8114_v7  ;;  %v11818_v7 = vld [vmem:[#allocation28_spill] sm:$0xff] }
 0x3a2   :  { %3359 = vmatpush1.bf16.msra.mxu1 %v8121_v27  ;;  %3237 = vmatprep.subr.bf16.mxu0 %v8126_v28  ;;  %v11819_v27 = vld [vmem:[#allocation29_spill] sm:$0xff]  ;;  %v11820_v28 = vld [vmem:[#allocation30_spill] sm:$0xff] }
 0x3a3   :  { %3360 = vmatprep.subr.bf16.mxu1 %v8132_v30  ;;  %v11821_v30 = vld [vmem:[#allocation31_spill] sm:$0xff] }
 0x3a5   :  { %3238 = vmatpush1.bf16.msra.mxu0 %v8138_v31  ;;  %v11822_v31 = vld [vmem:[#allocation32_spill] sm:$0xff] }
 0x3a6   :  { %3361 = vmatpush1.bf16.msra.mxu1 %v8145_v32  ;;  %3239 = vmatprep.subr.bf16.mxu0 %v8150_v37  ;;  %v11823_v32 = vld [vmem:[#allocation33_spill] sm:$0xff]  ;;  %v11824_v37 = vld [vmem:[#allocation34_spill] sm:$0xff] }
 0x3a7   :  { %3362 = vmatprep.subr.bf16.mxu1 %v11794_v16  ;;  %v11843_v16 = vld [vmem:[#allocation53_spill] sm:$0xff] }
 0x3a9   :  { %3240 = vmatpush1.bf16.msra.mxu0 %v11795_v17  ;;  %v11844_v17 = vld [vmem:[#allocation54_spill] sm:$0xff] }
 0x3aa   :  { %3363 = vmatpush1.bf16.msra.mxu1 %v11796_v8  ;;  %3241 = vmatprep.subr.bf16.mxu0 %v11797_v18  ;;  %v11845_v8 = vld [vmem:[#allocation55_spill] sm:$0xff]  ;;  %v11846_v18 = vld [vmem:[#allocation56_spill] sm:$0xff] }
 0x3ab   :  { %3364 = vmatprep.subr.bf16.mxu1 %v11798_v19  ;;  %v11847_v19 = vld [vmem:[#allocation57_spill] sm:$0xff] }
 0x3ad   :  { %3242 = vmatpush1.bf16.msra.mxu0 %v11799_v20  ;;  %v11848_v20 = vld [vmem:[#allocation58_spill] sm:$0xff] }
 0x3ae   :  { %3365 = vmatpush1.bf16.msra.mxu1 %v11800_v21  ;;  %3243 = vmatprep.subr.bf16.mxu0 %v11801_v22  ;;  %v11849_v21 = vld [vmem:[#allocation59_spill] sm:$0xff]  ;;  %v11850_v22 = vld [vmem:[#allocation60_spill] sm:$0xff] }
 0x3af   :  { %3366 = vmatprep.subr.bf16.mxu1 %v11802_v23  ;;  %v11851_v23 = vld [vmem:[#allocation61_spill] sm:$0xff] }
 0x3b1   :  { %3244 = vmatpush1.bf16.msra.mxu0 %v11803_v24  ;;  %v11852_v24 = vld [vmem:[#allocation62_spill] sm:$0xff] }
 0x3b2   :  { %3367 = vmatpush1.bf16.msra.mxu1 %v11804_v26  ;;  %3245 = vmatprep.subr.bf16.mxu0 %v11805_v47  ;;  %v11853_v26 = vld [vmem:[#allocation63_spill] sm:$0xff]  ;;  %v11854_v47 = vld [vmem:[#allocation64_spill] sm:$0xff] }
 0x3b3   :  { %3368 = vmatprep.subr.bf16.mxu1 %v11806_v43  ;;  %v11855_v43 = vld [vmem:[#allocation65_spill] sm:$0xff] }
 0x3b5   :  { %3246 = vmatpush1.bf16.msra.mxu0 %v11807_v41  ;;  %v11856_v41 = vld [vmem:[#allocation66_spill] sm:$0xff] }
 0x3b6   :  { %3369 = vmatpush1.bf16.msra.mxu1 %v11808_v49  ;;  %3247 = vmatprep.subr.bf16.mxu0 %v11809_v45  ;;  %v11857_v49 = vld [vmem:[#allocation67_spill] sm:$0xff]  ;;  %v11858_v45 = vld [vmem:[#allocation68_spill] sm:$0xff] }
 0x3b7   :  { %3370 = vmatprep.subr.bf16.mxu1 %v11810_v54  ;;  %v11859_v54 = vld [vmem:[#allocation69_spill] sm:$0xff] }
 0x3b9   :  { %3248 = vmatpush1.bf16.msra.mxu0 %v11811_v48  ;;  %v11860_v48 = vld [vmem:[#allocation70_spill] sm:$0xff] }
 0x3ba   :  { %3371 = vmatpush1.bf16.msra.mxu1 %v11812_v58  ;;  %3258 = vmatprep.subr.bf16.mxu0 %v11813_v59  ;;  %v11861_v58 = vld [vmem:[#allocation71_spill] sm:$0xff]  ;;  %v11862_v59 = vld [vmem:[#allocation72_spill] sm:$0xff] }
 0x3bb   :  { %3381 = vmatprep.subr.bf16.mxu1 %v11814_v62  ;;  %v11863_v62 = vld [vmem:[#allocation73_spill] sm:$0xff] }
 0x3bc   :  { %3250 = vmatmul.mubr.bf16.vlgmr.msra.gmra.mrb[60].mxu0 %v8684_v44 }
 0x3bd   :  { %3373 = vmatmul.mubr.bf16.vlgmr.msra.gmra.mrb[60].mxu1 %v8684_v44  ;;  %3259 = vmatpush1.bf16.msra.mxu0 %v11815_v3  ;;  %v11827_v44 = vld [vmem:[#allocation37_spill] sm:$0xff]  ;;  %v11864_v3 = vld [vmem:[#allocation74_spill] sm:$0xff] }
 0x3be   :  { %3290 = vmatprep.mubr.bf16.mxu0 %v8702_v1  ;;  %3382 = vmatpush1.bf16.msra.mxu1 %v11816_v4  ;;  %v11865_v4 = vld [vmem:[#allocation75_spill] sm:$0xff] }
 0x3bf   :  { %3413 = vmatprep.mubr.bf16.mxu1 %v8702_v1  ;;  %3260 = vmatprep.subr.bf16.mxu0 %v11817_v5  ;;  %v11866_v5 = vld [vmem:[#allocation76_spill] sm:$0xff] }
 0x3c0   :  { %3383 = vmatprep.subr.bf16.mxu1 %v11818_v7  ;;  %v11867_v7 = vld [vmem:[#allocation77_spill] sm:$0xff] }
 0x3c1   :  { %3261 = vmatpush1.bf16.msra.mxu0 %v11819_v27  ;;  %v11868_v27 = vld [vmem:[#allocation78_spill] sm:$0xff] }
 0x3c2   :  { %3384 = vmatpush1.bf16.msra.mxu1 %v11820_v28  ;;  %3262 = vmatprep.subr.bf16.mxu0 %v11821_v30  ;;  %v11869_v28 = vld [vmem:[#allocation79_spill] sm:$0xff]  ;;  %v11870_v30 = vld [vmem:[#allocation80_spill] sm:$0xff] }
 0x3c3   :  { %3385 = vmatprep.subr.bf16.mxu1 %v11822_v31  ;;  %v11871_v31 = vld [vmem:[#allocation81_spill] sm:$0xff] }
 0x3c5   :  { %3263 = vmatpush1.bf16.msra.mxu0 %v11823_v32  ;;  %v11872_v32 = vld [vmem:[#allocation82_spill] sm:$0xff] }
 0x3c6   :  { %3386 = vmatpush1.bf16.msra.mxu1 %v11824_v37  ;;  %3264 = vmatprep.subr.bf16.mxu0 %v11825_v35  ;;  %v11873_v37 = vld [vmem:[#allocation83_spill] sm:$0xff]  ;;  %v11874_v35 = vld [vmem:[#allocation84_spill] sm:$0xff] }
 0x3c7   :  { %3387 = vmatprep.subr.bf16.mxu1 %v11826_v2  ;;  %v11875_v2 = vld [vmem:[#allocation85_spill] sm:$0xff] }
 0x3c9   :  { %3265 = vmatpush1.bf16.msra.mxu0 %v11827_v44  ;;  %v9210_v44 = vld [vmem:[#allocation2 + $0x18] sm:$0xff] }
 0x3ca   :  { %3388 = vmatpush1.bf16.msra.mxu1 %v11828_v61  ;;  %3266 = vmatprep.subr.bf16.mxu0 %v11829_v33  ;;  %v11876_v61 = vld [vmem:[#allocation86_spill] sm:$0xff]  ;;  %v11877_v33 = vld [vmem:[#allocation87_spill] sm:$0xff] }
 0x3cb   :  { %3389 = vmatprep.subr.bf16.mxu1 %v11830_v34  ;;  %v11878_v34 = vld [vmem:[#allocation88_spill] sm:$0xff] }
 0x3cd   :  { %3267 = vmatpush1.bf16.msra.mxu0 %v11831_v51  ;;  %v9218_v51 = vcombine.high %v9210_v44, %v9210_v44 }
 0x3ce   :  { %3390 = vmatpush1.bf16.msra.mxu1 %v11832_v52  ;;  %3268 = vmatprep.subr.bf16.mxu0 %v11833_v36  ;;  %v11879_v52 = vld [vmem:[#allocation89_spill] sm:$0xff]  ;;  %v11880_v36 = vld [vmem:[#allocation90_spill] sm:$0xff] }
 0x3cf   :  { %3391 = vmatprep.subr.bf16.mxu1 %v11834_v10  ;;  %v11881_v10 = vld [vmem:[#allocation91_spill] sm:$0xff] }
 0x3d1   :  { %3269 = vmatpush1.bf16.msra.mxu0 %v11835_v60  ;;  %v11882_v60 = vld [vmem:[#allocation92_spill] sm:$0xff] }
 0x3d2   :  { %3392 = vmatpush1.bf16.msra.mxu1 %v11836_v63  ;;  %3270 = vmatprep.subr.bf16.mxu0 %v11837_v0  ;;  %v11883_v63 = vld [vmem:[#allocation93_spill] sm:$0xff]  ;;  %v11884_v0 = vld [vmem:[#allocation94_spill] sm:$0xff] }
 0x3d3   :  { %3393 = vmatprep.subr.bf16.mxu1 %v11838_v6  ;;  %v11885_v6 = vld [vmem:[#allocation95_spill] sm:$0xff] }
 0x3d5   :  { %3271 = vmatpush1.bf16.msra.mxu0 %v11839_v12  ;;  %v11886_v12 = vld [vmem:[#allocation96_spill] sm:$0xff] }
 0x3d6   :  { %3394 = vmatpush1.bf16.msra.mxu1 %v11840_v13  ;;  %3272 = vmatprep.subr.bf16.mxu0 %v11841_v14  ;;  %v11887_v13 = vld [vmem:[#allocation97_spill] sm:$0xff]  ;;  %v11888_v14 = vld [vmem:[#allocation98_spill] sm:$0xff] }
 0x3d7   :  { %3395 = vmatprep.subr.bf16.mxu1 %v11842_v15  ;;  %v11889_v15 = vld [vmem:[#allocation99_spill] sm:$0xff] }
 0x3d9   :  { %3273 = vmatpush1.bf16.msra.mxu0 %v11843_v16  ;;  %v11890_v16 = vld [vmem:[#allocation100_spill] sm:$0xff] }
 0x3da   :  { %3396 = vmatpush1.bf16.msra.mxu1 %v11844_v17  ;;  %3274 = vmatprep.subr.bf16.mxu0 %v11845_v8  ;;  %v11891_v17 = vld [vmem:[#allocation101_spill] sm:$0xff]  ;;  %v11892_v8 = vld [vmem:[#allocation102_spill] sm:$0xff] }
 0x3db   :  { %3397 = vmatprep.subr.bf16.mxu1 %v11846_v18  ;;  %v11893_v18 = vld [vmem:[#allocation103_spill] sm:$0xff] }
 0x3dd   :  { %3275 = vmatpush1.bf16.msra.mxu0 %v11847_v19  ;;  %v11894_v19 = vld [vmem:[#allocation104_spill] sm:$0xff] }
 0x3de   :  { %3398 = vmatpush1.bf16.msra.mxu1 %v11848_v20  ;;  %3276 = vmatprep.subr.bf16.mxu0 %v11849_v21  ;;  %v11895_v20 = vld [vmem:[#allocation105_spill] sm:$0xff]  ;;  %v11896_v21 = vld [vmem:[#allocation106_spill] sm:$0xff] }
 0x3df   :  { %3399 = vmatprep.subr.bf16.mxu1 %v11850_v22  ;;  %v11897_v22 = vld [vmem:[#allocation107_spill] sm:$0xff] }
 0x3e1   :  { %3277 = vmatpush1.bf16.msra.mxu0 %v11851_v23  ;;  %v11898_v23 = vld [vmem:[#allocation108_spill] sm:$0xff] }
 0x3e2   :  { %3400 = vmatpush1.bf16.msra.mxu1 %v11852_v24  ;;  %3278 = vmatprep.subr.bf16.mxu0 %v11853_v26  ;;  %v11899_v24 = vld [vmem:[#allocation109_spill] sm:$0xff]  ;;  %v11900_v26 = vld [vmem:[#allocation110_spill] sm:$0xff] }
 0x3e3   :  { %3401 = vmatprep.subr.bf16.mxu1 %v11854_v47  ;;  %v11901_v47 = vld [vmem:[#allocation111_spill] sm:$0xff] }
 0x3e5   :  { %3279 = vmatpush1.bf16.msra.mxu0 %v11855_v43  ;;  %v11902_v43 = vld [vmem:[#allocation112_spill] sm:$0xff] }
 0x3e6   :  { %3402 = vmatpush1.bf16.msra.mxu1 %v11856_v41  ;;  %3280 = vmatprep.subr.bf16.mxu0 %v11857_v49  ;;  %v11903_v41 = vld [vmem:[#allocation113_spill] sm:$0xff]  ;;  %v11904_v49 = vld [vmem:[#allocation114_spill] sm:$0xff] }
 0x3e7   :  { %3403 = vmatprep.subr.bf16.mxu1 %v11858_v45  ;;  %v11905_v45 = vld [vmem:[#allocation115_spill] sm:$0xff] }
 0x3e9   :  { %3281 = vmatpush1.bf16.msra.mxu0 %v11859_v54  ;;  %v11906_v54 = vld [vmem:[#allocation116_spill] sm:$0xff] }
 0x3ea   :  { %3404 = vmatpush1.bf16.msra.mxu1 %v11860_v48  ;;  %3282 = vmatprep.subr.bf16.mxu0 %v11861_v58  ;;  %v11907_v48 = vld [vmem:[#allocation117_spill] sm:$0xff]  ;;  %v11908_v58 = vld [vmem:[#allocation118_spill] sm:$0xff] }
 0x3eb   :  { %3405 = vmatprep.subr.bf16.mxu1 %v11862_v59  ;;  %v11909_v59 = vld [vmem:[#allocation119_spill] sm:$0xff] }
 0x3ed   :  { %3283 = vmatpush1.bf16.msra.mxu0 %v11863_v62  ;;  %v11910_v62 = vld [vmem:[#allocation120_spill] sm:$0xff] }
 0x3ee   :  { %3406 = vmatpush1.bf16.msra.mxu1 %v11864_v3  ;;  %3284 = vmatprep.subr.bf16.mxu0 %v11865_v4  ;;  %v11911_v3 = vld [vmem:[#allocation121_spill] sm:$0xff]  ;;  %v11912_v4 = vld [vmem:[#allocation122_spill] sm:$0xff] }
 0x3ef   :  { %3407 = vmatprep.subr.bf16.mxu1 %v11866_v5  ;;  %v11913_v5 = vld [vmem:[#allocation123_spill] sm:$0xff] }
 0x3f1   :  { %3285 = vmatpush1.bf16.msra.mxu0 %v11867_v7  ;;  %v11914_v7 = vld [vmem:[#allocation124_spill] sm:$0xff] }
 0x3f2   :  { %3408 = vmatpush1.bf16.msra.mxu1 %v11868_v27  ;;  %3286 = vmatprep.subr.bf16.mxu0 %v11869_v28  ;;  %v11915_v27 = vld [vmem:[#allocation125_spill] sm:$0xff]  ;;  %v11916_v28 = vld [vmem:[#allocation126_spill] sm:$0xff] }
 0x3f3   :  { %3409 = vmatprep.subr.bf16.mxu1 %v11870_v30  ;;  %v11917_v30 = vld [vmem:[#allocation127_spill] sm:$0xff] }
 0x3f5   :  { %3287 = vmatpush1.bf16.msra.mxu0 %v11871_v31  ;;  %v11918_v31 = vld [vmem:[#allocation128_spill] sm:$0xff] }
 0x3f6   :  { %3410 = vmatpush1.bf16.msra.mxu1 %v11872_v32  ;;  %3288 = vmatprep.subr.bf16.mxu0 %v11873_v37  ;;  %v11919_v32 = vld [vmem:[#allocation129_spill] sm:$0xff]  ;;  %v11920_v37 = vld [vmem:[#allocation130_spill] sm:$0xff] }
 0x3f7   :  { %3411 = vmatprep.subr.bf16.mxu1 %v11874_v35  ;;  %v11921_v35 = vld [vmem:[#allocation131_spill] sm:$0xff] }
 0x3f9   :  { %3289 = vmatpush1.bf16.msra.mxu0 %v11875_v2  ;;  %v11922_v2 = vld [vmem:[#allocation132_spill] sm:$0xff] }
 0x3fa   :  { %3412 = vmatpush1.bf16.msra.mxu1 %v11876_v61  ;;  %3299 = vmatprep.subr.bf16.mxu0 %v11877_v33  ;;  %v11923_v61 = vld [vmem:[#allocation133_spill] sm:$0xff]  ;;  %v11924_v33 = vld [vmem:[#allocation134_spill] sm:$0xff] }
 0x3fb   :  { %3422 = vmatprep.subr.bf16.mxu1 %v11878_v34  ;;  %v11925_v34 = vld [vmem:[#allocation135_spill] sm:$0xff] }
 0x3fc   :  { %3291 = vmatmul.mubr.bf16.vlgmr.msra.gmra.mrb[60].mxu0 %v9071_v56 }
 0x3fd   :  { %3414 = vmatmul.mubr.bf16.vlgmr.msra.gmra.mrb[60].mxu1 %v9071_v56  ;;  %3300 = vmatpush1.bf16.msra.mxu0 %v11879_v52  ;;  %v11926_v52 = vld [vmem:[#allocation136_spill] sm:$0xff] }
 0x3fe   :  { %3331 = vmatprep.mubr.bf16.mxu0 %v9218_v51  ;;  %3423 = vmatpush1.bf16.msra.mxu1 %v11880_v36  ;;  %v11927_v36 = vld [vmem:[#allocation137_spill] sm:$0xff] }
 0x3ff   :  { %3454 = vmatprep.mubr.bf16.mxu1 %v9218_v51  ;;  %3301 = vmatprep.subr.bf16.mxu0 %v11881_v10  ;;  %v9286_v10 = vcombine.low %v9210_v44, %v9210_v44  ;;  %v9306_v44 = vld [vmem:[%s11219_s3] ss:$16 sps:$4 sm:$0xff]  }
 0x400   :  { %3424 = vmatprep.subr.bf16.mxu1 %v11882_v60  ;;  %v9292_v60 = vld [vmem:[%s11219_s3 + $0x4] ss:$16 sps:$4 sm:$0xff]  }
 0x401   :  { %3302 = vmatpush1.bf16.msra.mxu0 %v11883_v63  ;;  %v9298_v63 = vld [vmem:[%s11219_s3 + $0xc] ss:$16 sps:$4 sm:$0xff]  }
 0x402   :  { %3425 = vmatpush1.bf16.msra.mxu1 %v11884_v0  ;;  %3303 = vmatprep.subr.bf16.mxu0 %v11885_v6  ;;  %v9313_v0 = vld [vmem:[%s11219_s3 + $0x8] ss:$16 sps:$4 sm:$0xff]   ;;  %v9320_v6 = vld [vmem:[%s11219_s3 + $0x24] ss:$16 sps:$4 sm:$0xff]  }
 0x403   :  { %3426 = vmatprep.subr.bf16.mxu1 %v11886_v12  ;;  %11928 = vst [vmem:[#allocation4_spill] sm:$0xff] %v9313_v0  ;;  %11929 = vst [vmem:[#allocation5_spill] sm:$0xff] %v9320_v6  ;;  %v9326_v12 = vld [vmem:[%s11219_s3 + $0x2c] ss:$16 sps:$4 sm:$0xff]  }
 0x404   :  { %11930 = vst [vmem:[#allocation6_spill] sm:$0xff] %v9326_v12 }
 0x405   :  { %3304 = vmatpush1.bf16.msra.mxu0 %v11887_v13  ;;  %v9332_v13 = vld [vmem:[%s11219_s3 + $0x20] ss:$16 sps:$4 sm:$0xff]  }
 0x406   :  { %3427 = vmatpush1.bf16.msra.mxu1 %v11888_v14  ;;  %3305 = vmatprep.subr.bf16.mxu0 %v11889_v15  ;;  %11931 = vst [vmem:[#allocation7_spill] sm:$0xff] %v9332_v13  ;;  %v9344_v14 = vld [vmem:[%s11219_s3 + $0x44] ss:$16 sps:$4 sm:$0xff]   ;;  %v9350_v15 = vld [vmem:[%s11219_s3 + $0x4c] ss:$16 sps:$4 sm:$0xff]  }
 0x407   :  { %3428 = vmatprep.subr.bf16.mxu1 %v11890_v16  ;;  %11933 = vst [vmem:[#allocation9_spill] sm:$0xff] %v9344_v14  ;;  %11934 = vst [vmem:[#allocation10_spill] sm:$0xff] %v9350_v15  ;;  %v9356_v16 = vld [vmem:[%s11219_s3 + $0x40] ss:$16 sps:$4 sm:$0xff]  }
 0x408   :  { %11935 = vst [vmem:[#allocation11_spill] sm:$0xff] %v9356_v16 }
 0x409   :  { %3306 = vmatpush1.bf16.msra.mxu0 %v11891_v17  ;;  %v9362_v17 = vld [vmem:[%s11219_s3 + $0x48] ss:$16 sps:$4 sm:$0xff]  }
 0x40a   :  { %3429 = vmatpush1.bf16.msra.mxu1 %v11892_v8  ;;  %3307 = vmatprep.subr.bf16.mxu0 %v11893_v18  ;;  %11936 = vst [vmem:[#allocation12_spill] sm:$0xff] %v9362_v17  ;;  %v9368_v8 = vld [vmem:[%s11219_s3 + $0x64] ss:$16 sps:$4 sm:$0xff]   ;;  %v9374_v18 = vld [vmem:[%s11219_s3 + $0x6c] ss:$16 sps:$4 sm:$0xff]  }
 0x40b   :  { %3430 = vmatprep.subr.bf16.mxu1 %v11894_v19  ;;  %11937 = vst [vmem:[#allocation13_spill] sm:$0xff] %v9368_v8  ;;  %11938 = vst [vmem:[#allocation14_spill] sm:$0xff] %v9374_v18 }
 0x40d   :  { %3308 = vmatpush1.bf16.msra.mxu0 %v11895_v20 }
 0x40e   :  { %3431 = vmatpush1.bf16.msra.mxu1 %v11896_v21  ;;  %3309 = vmatprep.subr.bf16.mxu0 %v11897_v22 }
 0x40f   :  { %3432 = vmatprep.subr.bf16.mxu1 %v11898_v23 }
 0x411   :  { %3310 = vmatpush1.bf16.msra.mxu0 %v11899_v24 }
 0x412   :  { %3433 = vmatpush1.bf16.msra.mxu1 %v11900_v26  ;;  %3311 = vmatprep.subr.bf16.mxu0 %v11901_v47 }
 0x413   :  { %3434 = vmatprep.subr.bf16.mxu1 %v11902_v43 }
 0x415   :  { %3312 = vmatpush1.bf16.msra.mxu0 %v11903_v41 }
 0x416   :  { %3435 = vmatpush1.bf16.msra.mxu1 %v11904_v49  ;;  %3313 = vmatprep.subr.bf16.mxu0 %v11905_v45 }
 0x417   :  { %3436 = vmatprep.subr.bf16.mxu1 %v11906_v54 }
 0x419   :  { %3314 = vmatpush1.bf16.msra.mxu0 %v11907_v48 }
 0x41a   :  { %3437 = vmatpush1.bf16.msra.mxu1 %v11908_v58  ;;  %3315 = vmatprep.subr.bf16.mxu0 %v11909_v59 }
 0x41b   :  { %3438 = vmatprep.subr.bf16.mxu1 %v11910_v62 }
 0x41d   :  { %3316 = vmatpush1.bf16.msra.mxu0 %v11911_v3 }
 0x41e   :  { %3439 = vmatpush1.bf16.msra.mxu1 %v11912_v4  ;;  %3317 = vmatprep.subr.bf16.mxu0 %v11913_v5 }
 0x41f   :  { %3440 = vmatprep.subr.bf16.mxu1 %v11914_v7 }
 0x421   :  { %3318 = vmatpush1.bf16.msra.mxu0 %v8908_v53 }
 0x422   :  { %3441 = vmatpush1.bf16.msra.mxu1 %v8915_v50  ;;  %3319 = vmatprep.subr.bf16.mxu0 %v8920_v29 }
 0x423   :  { %3442 = vmatprep.subr.bf16.mxu1 %v8926_v46 }
 0x425   :  { %3320 = vmatpush1.bf16.msra.mxu0 %v8932_v57 }
 0x426   :  { %3443 = vmatpush1.bf16.msra.mxu1 %v11915_v27  ;;  %3321 = vmatprep.subr.bf16.mxu0 %v11916_v28 }
 0x427   :  { %3444 = vmatprep.subr.bf16.mxu1 %v8950_v55 }
 0x429   :  { %3322 = vmatpush1.bf16.msra.mxu0 %v11917_v30 }
 0x42a   :  { %3445 = vmatpush1.bf16.msra.mxu1 %v8969_v42  ;;  %3323 = vmatprep.subr.bf16.mxu0 %v11918_v31 }
 0x42b   :  { %3446 = vmatprep.subr.bf16.mxu1 %v11919_v32 }
 0x42d   :  { %3324 = vmatpush1.bf16.msra.mxu0 %v11920_v37 }
 0x42e   :  { %3447 = vmatpush1.bf16.msra.mxu1 %v11921_v35  ;;  %3325 = vmatprep.subr.bf16.mxu0 %v11922_v2 }
 0x42f   :  { %3448 = vmatprep.subr.bf16.mxu1 %v11923_v61 }
 0x431   :  { %3326 = vmatpush1.bf16.msra.mxu0 %v11924_v33 }
 0x432   :  { %3449 = vmatpush1.bf16.msra.mxu1 %v9017_v40  ;;  %3327 = vmatprep.subr.bf16.mxu0 %v11925_v34 }
 0x433   :  { %3450 = vmatprep.subr.bf16.mxu1 %v11926_v52 }
 0x435   :  { %3328 = vmatpush1.bf16.msra.mxu0 %v11927_v36 }
 0x436   :  { %3451 = vmatpush1.bf16.msra.mxu1 %v9041_v25  ;;  %3329 = vmatprep.subr.bf16.mxu0 %v9046_v9 }
 0x437   :  { %3452 = vmatprep.subr.bf16.mxu1 %v9052_v11 }
 0x439   :  { %3330 = vmatpush1.bf16.msra.mxu0 %v9058_v39 }
 0x43a   :  { %3453 = vmatpush1.bf16.msra.mxu1 %v9065_v38  ;;  %3494 = vmatprep.subr.bf16.mxu0 %v9292_v60 }
 0x43b   :  { %3617 = vmatprep.subr.bf16.mxu1 %v9298_v63 }
 0x43c   :  { %3332 = vmatmul.mubr.bf16.vlgmr.msra.gmra.mrb[60].mxu0 %v9286_v10 }
 0x43d   :  { %3455 = vmatmul.mubr.bf16.vlgmr.msra.gmra.mrb[60].mxu1 %v9286_v10  ;;  %3495 = vmatpush1.bf16.msra.mxu0 %v9306_v44 }
 0x43e   :  { %3526 = vmatprep.mubr.bf16.mxu0 %v8702_v1  ;;  %3618 = vmatpush1.bf16.msra.mxu1 %v9313_v0  ;;  %v9434_v0 = vld [vmem:[%s11219_s3 + $0xa8] ss:$16 sps:$4 sm:$0xff]  }
 0x43f   :  { %3649 = vmatprep.mubr.bf16.mxu1 %v8702_v1  ;;  %3496 = vmatprep.subr.bf16.mxu0 %v9320_v6  ;;  %v9338_v1 = vld [vmem:[%s11219_s3 + $0x28] ss:$16 sps:$4 sm:$0xff]  }
 0x440   :  { %3619 = vmatprep.subr.bf16.mxu1 %v9326_v12  ;;  %11932 = vst [vmem:[#allocation8_spill] sm:$0xff] %v9338_v1  ;;  %v9428_v12 = vld [vmem:[%s11219_s3 + $0xa0] ss:$16 sps:$4 sm:$0xff]  }
 0x441   :  { %3497 = vmatpush1.bf16.msra.mxu0 %v9332_v13 }
 0x442   :  { %3620 = vmatpush1.bf16.msra.mxu1 %v9338_v1  ;;  %3498 = vmatprep.subr.bf16.mxu0 %v9344_v14 }
 0x443   :  { %3621 = vmatprep.subr.bf16.mxu1 %v9350_v15  ;;  %v9422_v15 = vld [vmem:[%s11219_s3 + $0xac] ss:$16 sps:$4 sm:$0xff]  }
 0x444   :  { %11946 = vst [vmem:[#allocation22_spill] sm:$0xff] %v9422_v15 }
 0x445   :  { %3499 = vmatpush1.bf16.msra.mxu0 %v9356_v16  ;;  %v9380_v16 = vld [vmem:[%s11219_s3 + $0x60] ss:$16 sps:$4 sm:$0xff]  }
 0x446   :  { %3622 = vmatpush1.bf16.msra.mxu1 %v9362_v17  ;;  %3500 = vmatprep.subr.bf16.mxu0 %v9368_v8  ;;  %11939 = vst [vmem:[#allocation15_spill] sm:$0xff] %v9380_v16  ;;  %v9386_v17 = vld [vmem:[%s11219_s3 + $0x68] ss:$16 sps:$4 sm:$0xff]   ;;  %v9392_v8 = vld [vmem:[%s11219_s3 + $0x84] ss:$16 sps:$4 sm:$0xff]  }
 0x447   :  { %3623 = vmatprep.subr.bf16.mxu1 %v9374_v18  ;;  %11940 = vst [vmem:[#allocation16_spill] sm:$0xff] %v9386_v17  ;;  %11941 = vst [vmem:[#allocation17_spill] sm:$0xff] %v9392_v8  ;;  %v9398_v18 = vld [vmem:[%s11219_s3 + $0x8c] ss:$16 sps:$4 sm:$0xff]  }
 0x448   :  { %11942 = vst [vmem:[#allocation18_spill] sm:$0xff] %v9398_v18 }
 0x449   :  { %3501 = vmatpush1.bf16.msra.mxu0 %v9380_v16  ;;  %v9404_v16 = vld [vmem:[%s11219_s3 + $0x80] ss:$16 sps:$4 sm:$0xff]  }
 0x44a   :  { %3624 = vmatpush1.bf16.msra.mxu1 %v9386_v17  ;;  %3502 = vmatprep.subr.bf16.mxu0 %v9392_v8  ;;  %11943 = vst [vmem:[#allocation19_spill] sm:$0xff] %v9404_v16  ;;  %v9410_v17 = vld [vmem:[%s11219_s3 + $0x88] ss:$16 sps:$4 sm:$0xff]   ;;  %v9416_v8 = vld [vmem:[%s11219_s3 + $0xa4] ss:$16 sps:$4 sm:$0xff]  }
 0x44b   :  { %3625 = vmatprep.subr.bf16.mxu1 %v9398_v18  ;;  %11944 = vst [vmem:[#allocation20_spill] sm:$0xff] %v9410_v17  ;;  %11945 = vst [vmem:[#allocation21_spill] sm:$0xff] %v9416_v8 }
 0x44d   :  { %3503 = vmatpush1.bf16.msra.mxu0 %v9404_v16 }
 0x44e   :  { %3626 = vmatpush1.bf16.msra.mxu1 %v9410_v17  ;;  %3504 = vmatprep.subr.bf16.mxu0 %v9416_v8 }
 0x44f   :  { %v3050_v18 = vpop.f32.mrb[56].mxu0  ;;  %3627 = vmatprep.subr.bf16.mxu1 %v9422_v15 }
 0x450   :  { %v3173_v16 = vpop.f32.mrb[56].mxu1  ;;  %v3052_v14 = vpop.f32.mrb[57].mxu0 }
 0x451   :  { %v3180_v1 = vmax.f32 %v3050_v18, %v3052_v14  ;;  %v3175_v13 = vpop.f32.mrb[57].mxu1  ;;  %v3054_v17 = vpop.f32.mrb[58].mxu0  ;;  %3505 = vmatpush1.bf16.msra.mxu0 %v9428_v12  ;;  %v9440_v14 = vld [vmem:[%s11219_s3 + $0xc4] ss:$16 sps:$4 sm:$0xff]  }
 0x452   :  { %v3181_v8 = vmax.f32 %v3173_v16, %v3175_v13  ;;  %v3177_v6 = vpop.f32.mrb[58].mxu1  ;;  %3628 = vmatpush1.bf16.msra.mxu1 %v9434_v0  ;;  %v3055_v15 = vpop.f32.mrb[59].mxu0  ;;  %3506 = vmatprep.subr.bf16.mxu0 %v9440_v14  ;;  %v9446_v13 = vld [vmem:[%s11220_s4] ss:$0 sm:$0xff]  ;;  %v9451_v16 = vld [vmem:[%s11219_s3 + $0xcc] ss:$16 sps:$4 sm:$0xff]  }
 0x453   :  { %11947 = vst [vmem:[#allocation23_spill] sm:$0xff] %v9446_v13  ;;  %v3178_v6 = vpop.f32.mrb[59].mxu1  ;;  %3629 = vmatprep.subr.bf16.mxu1 %v9451_v16  ;;  %v9457_v17 = vld [vmem:[%s11219_s3 + $0xc0] ss:$16 sps:$4 sm:$0xff]  }
 0x454   :  { %v3182_v15 = vmax.f32 %v3180_v1, %v3181_v8  ;;  %v9464_v6 = vld [vmem:[%s11219_s3 + $0xc8] ss:$16 sps:$4 sm:$0xff]   ;;  %v9470_v1 = vld [vmem:[%s11219_s3 + $0xe4] ss:$16 sps:$4 sm:$0xff]   ;;  %v9476_v8 = vld [vmem:[%s11219_s3 + $0xec] ss:$16 sps:$4 sm:$0xff]  }
 0x455   :  { %3507 = vmatpush1.bf16.msra.mxu0 %v9457_v17  ;;  %11948 = vst [vmem:[#allocation24_spill] sm:$0xff] %v9464_v6  ;;  %11949 = vst [vmem:[#allocation25_spill] sm:$0xff] %v9470_v1 }
 0x456   :  { %v3189_v18 = vadd.f32 %v9446_v13, %v3182_v15  ;;  %3630 = vmatpush1.bf16.msra.mxu1 %v9464_v6  ;;  %3508 = vmatprep.subr.bf16.mxu0 %v9470_v1  ;;  %11950 = vst [vmem:[#allocation26_spill] sm:$0xff] %v9476_v8  ;;  %v9482_v13 = vld [vmem:[%s11219_s3 + $0xe0] ss:$16 sps:$4 sm:$0xff]   ;;  %v9488_v1 = vld [vmem:[%s11219_s3 + $0xe8] ss:$16 sps:$4 sm:$0xff]  }
 0x457   :  { %3631 = vmatprep.subr.bf16.mxu1 %v9476_v8  ;;  %11951 = vst [vmem:[#allocation27_spill] sm:$0xff] %v9488_v1  ;;  %v9494_v8 = vld [vmem:[%s11219_s3 + $0x104] ss:$16 sps:$4 sm:$0xff]  }
 0x458   :  { %v3190_v15 = vmax.f32 %v3189_v18, 0.0  ;;  %11952 = vst [vmem:[#allocation28_spill] sm:$0xff] %v9494_v8  ;;  %v9500_v18 = vld [vmem:[%s11219_s3 + $0x10c] ss:$16 sps:$4 sm:$0xff]  }
 0x459   :  { %3509 = vmatpush1.bf16.msra.mxu0 %v9482_v13 }
 0x45a   :  { %v3191_v6 = vpack.c.bf16 %v3190_v15, %v3190_v15  ;;  %3632 = vmatpush1.bf16.msra.mxu1 %v9488_v1  ;;  %3510 = vmatprep.subr.bf16.mxu0 %v9494_v8  ;;  %v9506_v15 = vld [vmem:[%s11219_s3 + $0x100] ss:$16 sps:$4 sm:$0xff]   ;;  %v9512_v1 = vld [vmem:[%s11219_s3 + $0x108] ss:$16 sps:$4 sm:$0xff]   ;;  %v9518_v8 = vld [vmem:[%s11219_s3 + $0x124] ss:$16 sps:$4 sm:$0xff]  }
 0x45b   :  { %3633 = vmatprep.subr.bf16.mxu1 %v9500_v18  ;;  %11953 = vst [vmem:[#allocation29_spill] sm:$0xff] %v9506_v15  ;;  %11954 = vst [vmem:[#allocation30_spill] sm:$0xff] %v9512_v1 }
 0x45c   :  { %3192 = vst [vmem:[#allocation3] sm:$0xf] %v3191_v6  ;;  %11955 = vst [vmem:[#allocation31_spill] sm:$0xff] %v9518_v8  ;;  %v9524_v6 = vld [vmem:[%s11219_s3 + $0x12c] ss:$16 sps:$4 sm:$0xff]  }
 0x45d   :  { %3511 = vmatpush1.bf16.msra.mxu0 %v9506_v15  ;;  %11956 = vst [vmem:[#allocation32_spill] sm:$0xff] %v9524_v6  ;;  %v9530_v15 = vld [vmem:[%s11219_s3 + $0x120] ss:$16 sps:$4 sm:$0xff]  }
 0x45e   :  { %3634 = vmatpush1.bf16.msra.mxu1 %v9512_v1  ;;  %3512 = vmatprep.subr.bf16.mxu0 %v9518_v8  ;;  %11957 = vst [vmem:[#allocation33_spill] sm:$0xff] %v9530_v15  ;;  %v9536_v1 = vld [vmem:[%s11219_s3 + $0x128] ss:$16 sps:$4 sm:$0xff]   ;;  %v9542_v8 = vld [vmem:[%s11219_s3 + $0x144] ss:$16 sps:$4 sm:$0xff]  }
 0x45f   :  { %3635 = vmatprep.subr.bf16.mxu1 %v9524_v6  ;;  %11958 = vst [vmem:[#allocation34_spill] sm:$0xff] %v9536_v1  ;;  %11959 = vst [vmem:[#allocation35_spill] sm:$0xff] %v9542_v8  ;;  %v9548_v6 = vld [vmem:[%s11219_s3 + $0x14c] ss:$16 sps:$4 sm:$0xff]  }
 0x460   :  { %11960 = vst [vmem:[#allocation36_spill] sm:$0xff] %v9548_v6 }
 0x461   :  { %3513 = vmatpush1.bf16.msra.mxu0 %v9530_v15  ;;  %v9554_v15 = vld [vmem:[%s11219_s3 + $0x140] ss:$16 sps:$4 sm:$0xff]  }
 0x462   :  { %3636 = vmatpush1.bf16.msra.mxu1 %v9536_v1  ;;  %3514 = vmatprep.subr.bf16.mxu0 %v9542_v8  ;;  %11961 = vst [vmem:[#allocation37_spill] sm:$0xff] %v9554_v15  ;;  %v9560_v1 = vld [vmem:[%s11219_s3 + $0x148] ss:$16 sps:$4 sm:$0xff]   ;;  %v9566_v8 = vld [vmem:[%s11219_s3 + $0x164] ss:$16 sps:$4 sm:$0xff]  }
 0x463   :  { %3637 = vmatprep.subr.bf16.mxu1 %v9548_v6  ;;  %11962 = vst [vmem:[#allocation38_spill] sm:$0xff] %v9560_v1  ;;  %11963 = vst [vmem:[#allocation39_spill] sm:$0xff] %v9566_v8  ;;  %v9572_v6 = vld [vmem:[%s11219_s3 + $0x16c] ss:$16 sps:$4 sm:$0xff]  }
 0x464   :  { %11964 = vst [vmem:[#allocation40_spill] sm:$0xff] %v9572_v6 }
 0x465   :  { %3515 = vmatpush1.bf16.msra.mxu0 %v9554_v15  ;;  %v9578_v15 = vld [vmem:[%s11219_s3 + $0x160] ss:$16 sps:$4 sm:$0xff]  }
 0x466   :  { %3638 = vmatpush1.bf16.msra.mxu1 %v9560_v1  ;;  %3516 = vmatprep.subr.bf16.mxu0 %v9566_v8  ;;  %11965 = vst [vmem:[#allocation41_spill] sm:$0xff] %v9578_v15  ;;  %v9584_v1 = vld [vmem:[%s11219_s3 + $0x168] ss:$16 sps:$4 sm:$0xff]   ;;  %v9590_v8 = vld [vmem:[%s11219_s3 + $0x184] ss:$16 sps:$4 sm:$0xff]  }
 0x467   :  { %3639 = vmatprep.subr.bf16.mxu1 %v9572_v6  ;;  %11966 = vst [vmem:[#allocation42_spill] sm:$0xff] %v9584_v1  ;;  %11967 = vst [vmem:[#allocation43_spill] sm:$0xff] %v9590_v8  ;;  %v9596_v6 = vld [vmem:[%s11219_s3 + $0x18c] ss:$16 sps:$4 sm:$0xff]  }
 0x468   :  { %11968 = vst [vmem:[#allocation44_spill] sm:$0xff] %v9596_v6 }
 0x469   :  { %3517 = vmatpush1.bf16.msra.mxu0 %v9578_v15  ;;  %v9602_v15 = vld [vmem:[%s11219_s3 + $0x180] ss:$16 sps:$4 sm:$0xff]  }
 0x46a   :  { %3640 = vmatpush1.bf16.msra.mxu1 %v9584_v1  ;;  %3518 = vmatprep.subr.bf16.mxu0 %v9590_v8  ;;  %11969 = vst [vmem:[#allocation45_spill] sm:$0xff] %v9602_v15  ;;  %v9608_v1 = vld [vmem:[%s11219_s3 + $0x188] ss:$16 sps:$4 sm:$0xff]   ;;  %v9614_v8 = vld [vmem:[%s11219_s3 + $0x1a4] ss:$16 sps:$4 sm:$0xff]  }
 0x46b   :  { %3641 = vmatprep.subr.bf16.mxu1 %v9596_v6  ;;  %11970 = vst [vmem:[#allocation46_spill] sm:$0xff] %v9608_v1  ;;  %11971 = vst [vmem:[#allocation47_spill] sm:$0xff] %v9614_v8  ;;  %v9620_v6 = vld [vmem:[%s11219_s3 + $0x1ac] ss:$16 sps:$4 sm:$0xff]  }
 0x46c   :  { %11972 = vst [vmem:[#allocation48_spill] sm:$0xff] %v9620_v6 }
 0x46d   :  { %3519 = vmatpush1.bf16.msra.mxu0 %v9602_v15  ;;  %v9626_v15 = vld [vmem:[%s11219_s3 + $0x1a0] ss:$16 sps:$4 sm:$0xff]  }
 0x46e   :  { %3642 = vmatpush1.bf16.msra.mxu1 %v9608_v1  ;;  %3520 = vmatprep.subr.bf16.mxu0 %v9614_v8  ;;  %11973 = vst [vmem:[#allocation49_spill] sm:$0xff] %v9626_v15  ;;  %v9632_v1 = vld [vmem:[%s11219_s3 + $0x1a8] ss:$16 sps:$4 sm:$0xff]   ;;  %v9638_v8 = vld [vmem:[%s11219_s3 + $0x1c4] ss:$16 sps:$4 sm:$0xff]  }
 0x46f   :  { %3643 = vmatprep.subr.bf16.mxu1 %v9620_v6  ;;  %11974 = vst [vmem:[#allocation50_spill] sm:$0xff] %v9632_v1  ;;  %11975 = vst [vmem:[#allocation51_spill] sm:$0xff] %v9638_v8  ;;  %v9644_v6 = vld [vmem:[%s11219_s3 + $0x1cc] ss:$16 sps:$4 sm:$0xff]  }
 0x470   :  { %11976 = vst [vmem:[#allocation52_spill] sm:$0xff] %v9644_v6 }
 0x471   :  { %3521 = vmatpush1.bf16.msra.mxu0 %v9626_v15  ;;  %v9650_v15 = vld [vmem:[%s11219_s3 + $0x1c0] ss:$16 sps:$4 sm:$0xff]  }
 0x472   :  { %3644 = vmatpush1.bf16.msra.mxu1 %v9632_v1  ;;  %3522 = vmatprep.subr.bf16.mxu0 %v9638_v8  ;;  %11977 = vst [vmem:[#allocation53_spill] sm:$0xff] %v9650_v15  ;;  %v9656_v1 = vld [vmem:[%s11219_s3 + $0x1c8] ss:$16 sps:$4 sm:$0xff]   ;;  %v9662_v8 = vld [vmem:[%s11219_s3 + $0x1e4] ss:$16 sps:$4 sm:$0xff]  }
 0x473   :  { %3645 = vmatprep.subr.bf16.mxu1 %v9644_v6  ;;  %11978 = vst [vmem:[#allocation54_spill] sm:$0xff] %v9656_v1  ;;  %11979 = vst [vmem:[#allocation55_spill] sm:$0xff] %v9662_v8  ;;  %v9668_v6 = vld [vmem:[%s11219_s3 + $0x1ec] ss:$16 sps:$4 sm:$0xff]  }
 0x474   :  { %11980 = vst [vmem:[#allocation56_spill] sm:$0xff] %v9668_v6 }
 0x475   :  { %3523 = vmatpush1.bf16.msra.mxu0 %v9650_v15  ;;  %v9674_v15 = vld [vmem:[%s11219_s3 + $0x1e0] ss:$16 sps:$4 sm:$0xff]  }
 0x476   :  { %3646 = vmatpush1.bf16.msra.mxu1 %v9656_v1  ;;  %3524 = vmatprep.subr.bf16.mxu0 %v9662_v8  ;;  %11981 = vst [vmem:[#allocation57_spill] sm:$0xff] %v9674_v15  ;;  %v9680_v1 = vld [vmem:[%s11219_s3 + $0x1e8] ss:$16 sps:$4 sm:$0xff]   ;;  %v9686_v8 = vld [vmem:[%s11219_s3 + $0x204] ss:$16 sps:$4 sm:$0xff]  }
 0x477   :  { %3647 = vmatprep.subr.bf16.mxu1 %v9668_v6  ;;  %11982 = vst [vmem:[#allocation58_spill] sm:$0xff] %v9680_v1  ;;  %11983 = vst [vmem:[#allocation59_spill] sm:$0xff] %v9686_v8  ;;  %v9692_v6 = vld [vmem:[%s11219_s3 + $0x20c] ss:$16 sps:$4 sm:$0xff]  }
 0x478   :  { %11984 = vst [vmem:[#allocation60_spill] sm:$0xff] %v9692_v6 }
 0x479   :  { %3525 = vmatpush1.bf16.msra.mxu0 %v9674_v15 }
 0x47a   :  { %3648 = vmatpush1.bf16.msra.mxu1 %v9680_v1  ;;  %3535 = vmatprep.subr.bf16.mxu0 %v9686_v8  ;;  %v9700_v1 = vld [vmem:[%s11219_s3 + $0x200] ss:$16 sps:$4 sm:$0xff]   ;;  %v9707_v8 = vld [vmem:[%s11219_s3 + $0x208] ss:$16 sps:$4 sm:$0xff]  }
 0x47b   :  { %3658 = vmatprep.subr.bf16.mxu1 %v9692_v6  ;;  %11985 = vst [vmem:[#allocation61_spill] sm:$0xff] %v9700_v1  ;;  %11986 = vst [vmem:[#allocation62_spill] sm:$0xff] %v9707_v8  ;;  %v9732_v6 = vld [vmem:[%s11219_s3 + $0x228] ss:$16 sps:$4 sm:$0xff]  }
 0x47c   :  { %3527 = vmatmul.mubr.bf16.vlgmr.msra.gmra.mrb[64].mxu0 %v9071_v56  ;;  %11990 = vst [vmem:[#allocation66_spill] sm:$0xff] %v9732_v6 }
 0x47d   :  { %3650 = vmatmul.mubr.bf16.vlgmr.msra.gmra.mrb[64].mxu1 %v9071_v56  ;;  %3536 = vmatpush1.bf16.msra.mxu0 %v9700_v1  ;;  %v9714_v56 = vld [vmem:[%s11219_s3 + $0x224] ss:$16 sps:$4 sm:$0xff]   ;;  %v9720_v1 = vld [vmem:[%s11219_s3 + $0x22c] ss:$16 sps:$4 sm:$0xff]  }
 0x47e   :  { %3567 = vmatprep.mubr.bf16.mxu0 %v9218_v51  ;;  %3659 = vmatpush1.bf16.msra.mxu1 %v9707_v8  ;;  %11987 = vst [vmem:[#allocation63_spill] sm:$0xff] %v9714_v56  ;;  %11988 = vst [vmem:[#allocation64_spill] sm:$0xff] %v9720_v1  ;;  %v9726_v8 = vld [vmem:[%s11219_s3 + $0x220] ss:$16 sps:$4 sm:$0xff]  }
 0x47f   :  { %3690 = vmatprep.mubr.bf16.mxu1 %v9218_v51  ;;  %3537 = vmatprep.subr.bf16.mxu0 %v9714_v56  ;;  %11989 = vst [vmem:[#allocation65_spill] sm:$0xff] %v9726_v8  ;;  %v9738_v56 = vld [vmem:[%s11219_s3 + $0x244] ss:$16 sps:$4 sm:$0xff]  }
 0x480   :  { %3660 = vmatprep.subr.bf16.mxu1 %v9720_v1  ;;  %11991 = vst [vmem:[#allocation67_spill] sm:$0xff] %v9738_v56  ;;  %v9744_v1 = vld [vmem:[%s11219_s3 + $0x24c] ss:$16 sps:$4 sm:$0xff]  }
 0x481   :  { %3538 = vmatpush1.bf16.msra.mxu0 %v9726_v8  ;;  %11992 = vst [vmem:[#allocation68_spill] sm:$0xff] %v9744_v1  ;;  %v9750_v8 = vld [vmem:[%s11219_s3 + $0x240] ss:$16 sps:$4 sm:$0xff]  }
 0x482   :  { %3661 = vmatpush1.bf16.msra.mxu1 %v9732_v6  ;;  %3539 = vmatprep.subr.bf16.mxu0 %v9738_v56  ;;  %11993 = vst [vmem:[#allocation69_spill] sm:$0xff] %v9750_v8  ;;  %v9756_v6 = vld [vmem:[%s11219_s3 + $0x248] ss:$16 sps:$4 sm:$0xff]   ;;  %v9762_v56 = vld [vmem:[%s11219_s3 + $0x264] ss:$16 sps:$4 sm:$0xff]  }
 0x483   :  { %3662 = vmatprep.subr.bf16.mxu1 %v9744_v1  ;;  %11994 = vst [vmem:[#allocation70_spill] sm:$0xff] %v9756_v6  ;;  %11995 = vst [vmem:[#allocation71_spill] sm:$0xff] %v9762_v56  ;;  %v9768_v1 = vld [vmem:[%s11219_s3 + $0x26c] ss:$16 sps:$4 sm:$0xff]  }
 0x484   :  { %11996 = vst [vmem:[#allocation72_spill] sm:$0xff] %v9768_v1 }
 0x485   :  { %3540 = vmatpush1.bf16.msra.mxu0 %v9750_v8  ;;  %v9774_v8 = vld [vmem:[%s11219_s3 + $0x260] ss:$16 sps:$4 sm:$0xff]  }
 0x486   :  { %3663 = vmatpush1.bf16.msra.mxu1 %v9756_v6  ;;  %3541 = vmatprep.subr.bf16.mxu0 %v9762_v56  ;;  %11997 = vst [vmem:[#allocation73_spill] sm:$0xff] %v9774_v8  ;;  %v9780_v6 = vld [vmem:[%s11219_s3 + $0x268] ss:$16 sps:$4 sm:$0xff]   ;;  %v9786_v56 = vld [vmem:[%s11219_s3 + $0x284] ss:$16 sps:$4 sm:$0xff]  }
 0x487   :  { %3664 = vmatprep.subr.bf16.mxu1 %v9768_v1  ;;  %11998 = vst [vmem:[#allocation74_spill] sm:$0xff] %v9780_v6  ;;  %11999 = vst [vmem:[#allocation75_spill] sm:$0xff] %v9786_v56  ;;  %v9792_v1 = vld [vmem:[%s11219_s3 + $0x28c] ss:$16 sps:$4 sm:$0xff]  }
 0x488   :  { %12000 = vst [vmem:[#allocation76_spill] sm:$0xff] %v9792_v1 }
 0x489   :  { %3542 = vmatpush1.bf16.msra.mxu0 %v9774_v8  ;;  %v9798_v8 = vld [vmem:[%s11219_s3 + $0x280] ss:$16 sps:$4 sm:$0xff]  }
 0x48a   :  { %3665 = vmatpush1.bf16.msra.mxu1 %v9780_v6  ;;  %3543 = vmatprep.subr.bf16.mxu0 %v9786_v56  ;;  %12001 = vst [vmem:[#allocation77_spill] sm:$0xff] %v9798_v8  ;;  %v9804_v6 = vld [vmem:[%s11219_s3 + $0x288] ss:$16 sps:$4 sm:$0xff]   ;;  %v9810_v56 = vld [vmem:[%s11219_s3 + $0x2a4] ss:$16 sps:$4 sm:$0xff]  }
 0x48b   :  { %3666 = vmatprep.subr.bf16.mxu1 %v9792_v1  ;;  %12002 = vst [vmem:[#allocation78_spill] sm:$0xff] %v9804_v6  ;;  %12003 = vst [vmem:[#allocation79_spill] sm:$0xff] %v9810_v56  ;;  %v9816_v1 = vld [vmem:[%s11219_s3 + $0x2ac] ss:$16 sps:$4 sm:$0xff]  }
 0x48c   :  { %12004 = vst [vmem:[#allocation80_spill] sm:$0xff] %v9816_v1 }
 0x48d   :  { %3544 = vmatpush1.bf16.msra.mxu0 %v9798_v8  ;;  %v9822_v8 = vld [vmem:[%s11219_s3 + $0x2a0] ss:$16 sps:$4 sm:$0xff]  }
 0x48e   :  { %3667 = vmatpush1.bf16.msra.mxu1 %v9804_v6  ;;  %3545 = vmatprep.subr.bf16.mxu0 %v9810_v56  ;;  %12005 = vst [vmem:[#allocation81_spill] sm:$0xff] %v9822_v8  ;;  %v9828_v6 = vld [vmem:[%s11219_s3 + $0x2a8] ss:$16 sps:$4 sm:$0xff]   ;;  %v9834_v56 = vld [vmem:[%s11219_s3 + $0x2c4] ss:$16 sps:$4 sm:$0xff]  }
 0x48f   :  { %3668 = vmatprep.subr.bf16.mxu1 %v9816_v1  ;;  %12006 = vst [vmem:[#allocation82_spill] sm:$0xff] %v9828_v6  ;;  %12007 = vst [vmem:[#allocation83_spill] sm:$0xff] %v9834_v56  ;;  %v9840_v1 = vld [vmem:[%s11219_s3 + $0x2cc] ss:$16 sps:$4 sm:$0xff]  }
 0x490   :  { %12008 = vst [vmem:[#allocation84_spill] sm:$0xff] %v9840_v1 }
 0x491   :  { %3546 = vmatpush1.bf16.msra.mxu0 %v9822_v8  ;;  %v9846_v8 = vld [vmem:[%s11219_s3 + $0x2c0] ss:$16 sps:$4 sm:$0xff]  }
 0x492   :  { %3669 = vmatpush1.bf16.msra.mxu1 %v9828_v6  ;;  %3547 = vmatprep.subr.bf16.mxu0 %v9834_v56  ;;  %12009 = vst [vmem:[#allocation85_spill] sm:$0xff] %v9846_v8  ;;  %v9852_v6 = vld [vmem:[%s11219_s3 + $0x2c8] ss:$16 sps:$4 sm:$0xff]   ;;  %v9858_v56 = vld [vmem:[%s11219_s3 + $0x2e4] ss:$16 sps:$4 sm:$0xff]  }
 0x493   :  { %3670 = vmatprep.subr.bf16.mxu1 %v9840_v1  ;;  %12010 = vst [vmem:[#allocation86_spill] sm:$0xff] %v9852_v6  ;;  %12011 = vst [vmem:[#allocation87_spill] sm:$0xff] %v9858_v56  ;;  %v9864_v1 = vld [vmem:[%s11219_s3 + $0x2ec] ss:$16 sps:$4 sm:$0xff]  }
 0x494   :  { %12012 = vst [vmem:[#allocation88_spill] sm:$0xff] %v9864_v1 }
 0x495   :  { %3548 = vmatpush1.bf16.msra.mxu0 %v9846_v8  ;;  %v9870_v8 = vld [vmem:[%s11219_s3 + $0x2e0] ss:$16 sps:$4 sm:$0xff]  }
 0x496   :  { %3671 = vmatpush1.bf16.msra.mxu1 %v9852_v6  ;;  %3549 = vmatprep.subr.bf16.mxu0 %v9858_v56  ;;  %12013 = vst [vmem:[#allocation89_spill] sm:$0xff] %v9870_v8  ;;  %v9876_v6 = vld [vmem:[%s11219_s3 + $0x2e8] ss:$16 sps:$4 sm:$0xff]   ;;  %v9882_v56 = vld [vmem:[%s11219_s3 + $0x304] ss:$16 sps:$4 sm:$0xff]  }
 0x497   :  { %3672 = vmatprep.subr.bf16.mxu1 %v9864_v1  ;;  %12014 = vst [vmem:[#allocation90_spill] sm:$0xff] %v9876_v6  ;;  %12015 = vst [vmem:[#allocation91_spill] sm:$0xff] %v9882_v56  ;;  %v9888_v1 = vld [vmem:[%s11219_s3 + $0x30c] ss:$16 sps:$4 sm:$0xff]  }
 0x498   :  { %12016 = vst [vmem:[#allocation92_spill] sm:$0xff] %v9888_v1 }
 0x499   :  { %3550 = vmatpush1.bf16.msra.mxu0 %v9870_v8  ;;  %v9894_v8 = vld [vmem:[%s11219_s3 + $0x300] ss:$16 sps:$4 sm:$0xff]  }
 0x49a   :  { %3673 = vmatpush1.bf16.msra.mxu1 %v9876_v6  ;;  %3551 = vmatprep.subr.bf16.mxu0 %v9882_v56  ;;  %12017 = vst [vmem:[#allocation93_spill] sm:$0xff] %v9894_v8  ;;  %v9900_v6 = vld [vmem:[%s11219_s3 + $0x308] ss:$16 sps:$4 sm:$0xff]   ;;  %v9906_v56 = vld [vmem:[%s11219_s3 + $0x324] ss:$16 sps:$4 sm:$0xff]  }
 0x49b   :  { %3674 = vmatprep.subr.bf16.mxu1 %v9888_v1  ;;  %12018 = vst [vmem:[#allocation94_spill] sm:$0xff] %v9900_v6  ;;  %12019 = vst [vmem:[#allocation95_spill] sm:$0xff] %v9906_v56  ;;  %v9912_v1 = vld [vmem:[%s11219_s3 + $0x32c] ss:$16 sps:$4 sm:$0xff]  }
 0x49c   :  { %12020 = vst [vmem:[#allocation96_spill] sm:$0xff] %v9912_v1 }
 0x49d   :  { %3552 = vmatpush1.bf16.msra.mxu0 %v9894_v8  ;;  %v9918_v8 = vld [vmem:[%s11219_s3 + $0x320] ss:$16 sps:$4 sm:$0xff]  }
 0x49e   :  { %3675 = vmatpush1.bf16.msra.mxu1 %v9900_v6  ;;  %3553 = vmatprep.subr.bf16.mxu0 %v9906_v56  ;;  %12021 = vst [vmem:[#allocation97_spill] sm:$0xff] %v9918_v8  ;;  %v9924_v6 = vld [vmem:[%s11219_s3 + $0x328] ss:$16 sps:$4 sm:$0xff]   ;;  %v9930_v56 = vld [vmem:[%s11219_s3 + $0x344] ss:$16 sps:$4 sm:$0xff]  }
 0x49f   :  { %3676 = vmatprep.subr.bf16.mxu1 %v9912_v1  ;;  %12022 = vst [vmem:[#allocation98_spill] sm:$0xff] %v9924_v6  ;;  %12023 = vst [vmem:[#allocation99_spill] sm:$0xff] %v9930_v56  ;;  %v9936_v1 = vld [vmem:[%s11219_s3 + $0x34c] ss:$16 sps:$4 sm:$0xff]  }
 0x4a0   :  { %12024 = vst [vmem:[#allocation100_spill] sm:$0xff] %v9936_v1 }
 0x4a1   :  { %3554 = vmatpush1.bf16.msra.mxu0 %v9918_v8  ;;  %v9942_v8 = vld [vmem:[%s11219_s3 + $0x340] ss:$16 sps:$4 sm:$0xff]  }
 0x4a2   :  { %3677 = vmatpush1.bf16.msra.mxu1 %v9924_v6  ;;  %3555 = vmatprep.subr.bf16.mxu0 %v9930_v56  ;;  %12025 = vst [vmem:[#allocation101_spill] sm:$0xff] %v9942_v8  ;;  %v9948_v6 = vld [vmem:[%s11219_s3 + $0x348] ss:$16 sps:$4 sm:$0xff]   ;;  %v9954_v56 = vld [vmem:[%s11219_s3 + $0x364] ss:$16 sps:$4 sm:$0xff]  }
 0x4a3   :  { %3678 = vmatprep.subr.bf16.mxu1 %v9936_v1  ;;  %12026 = vst [vmem:[#allocation102_spill] sm:$0xff] %v9948_v6  ;;  %12027 = vst [vmem:[#allocation103_spill] sm:$0xff] %v9954_v56  ;;  %v9960_v1 = vld [vmem:[%s11219_s3 + $0x36c] ss:$16 sps:$4 sm:$0xff]  }
 0x4a4   :  { %12028 = vst [vmem:[#allocation104_spill] sm:$0xff] %v9960_v1 }
 0x4a5   :  { %3556 = vmatpush1.bf16.msra.mxu0 %v9942_v8  ;;  %v9966_v8 = vld [vmem:[%s11219_s3 + $0x360] ss:$16 sps:$4 sm:$0xff]  }
 0x4a6   :  { %3679 = vmatpush1.bf16.msra.mxu1 %v9948_v6  ;;  %3557 = vmatprep.subr.bf16.mxu0 %v9954_v56  ;;  %12029 = vst [vmem:[#allocation105_spill] sm:$0xff] %v9966_v8  ;;  %v9972_v6 = vld [vmem:[%s11219_s3 + $0x368] ss:$16 sps:$4 sm:$0xff]   ;;  %v9978_v56 = vld [vmem:[%s11219_s3 + $0x384] ss:$16 sps:$4 sm:$0xff]  }
 0x4a7   :  { %3680 = vmatprep.subr.bf16.mxu1 %v9960_v1  ;;  %12030 = vst [vmem:[#allocation106_spill] sm:$0xff] %v9972_v6  ;;  %12031 = vst [vmem:[#allocation107_spill] sm:$0xff] %v9978_v56  ;;  %v9984_v1 = vld [vmem:[%s11219_s3 + $0x38c] ss:$16 sps:$4 sm:$0xff]  }
 0x4a8   :  { %12032 = vst [vmem:[#allocation108_spill] sm:$0xff] %v9984_v1 }
 0x4a9   :  { %3558 = vmatpush1.bf16.msra.mxu0 %v9966_v8  ;;  %v9990_v8 = vld [vmem:[%s11219_s3 + $0x380] ss:$16 sps:$4 sm:$0xff]  }
 0x4aa   :  { %3681 = vmatpush1.bf16.msra.mxu1 %v9972_v6  ;;  %3559 = vmatprep.subr.bf16.mxu0 %v9978_v56  ;;  %12033 = vst [vmem:[#allocation109_spill] sm:$0xff] %v9990_v8  ;;  %v9996_v6 = vld [vmem:[%s11219_s3 + $0x388] ss:$16 sps:$4 sm:$0xff]   ;;  %v10002_v56 = vld [vmem:[%s11219_s3 + $0x3a4] ss:$16 sps:$4 sm:$0xff]  }
 0x4ab   :  { %3682 = vmatprep.subr.bf16.mxu1 %v9984_v1  ;;  %12034 = vst [vmem:[#allocation110_spill] sm:$0xff] %v9996_v6  ;;  %12035 = vst [vmem:[#allocation111_spill] sm:$0xff] %v10002_v56  ;;  %v10008_v1 = vld [vmem:[%s11219_s3 + $0x3ac] ss:$16 sps:$4 sm:$0xff]  }
 0x4ac   :  { %12036 = vst [vmem:[#allocation112_spill] sm:$0xff] %v10008_v1 }
 0x4ad   :  { %3560 = vmatpush1.bf16.msra.mxu0 %v9990_v8  ;;  %v10014_v8 = vld [vmem:[%s11219_s3 + $0x3a0] ss:$16 sps:$4 sm:$0xff]  }
 0x4ae   :  { %3683 = vmatpush1.bf16.msra.mxu1 %v9996_v6  ;;  %3561 = vmatprep.subr.bf16.mxu0 %v10002_v56  ;;  %12037 = vst [vmem:[#allocation113_spill] sm:$0xff] %v10014_v8  ;;  %v10020_v6 = vld [vmem:[%s11219_s3 + $0x3a8] ss:$16 sps:$4 sm:$0xff]   ;;  %v10026_v56 = vld [vmem:[%s11219_s3 + $0x3c4] ss:$16 sps:$4 sm:$0xff]  }
 0x4af   :  { %3684 = vmatprep.subr.bf16.mxu1 %v10008_v1  ;;  %12038 = vst [vmem:[#allocation114_spill] sm:$0xff] %v10020_v6  ;;  %12039 = vst [vmem:[#allocation115_spill] sm:$0xff] %v10026_v56  ;;  %v10032_v1 = vld [vmem:[%s11219_s3 + $0x3cc] ss:$16 sps:$4 sm:$0xff]  }
 0x4b0   :  { %12040 = vst [vmem:[#allocation116_spill] sm:$0xff] %v10032_v1 }
 0x4b1   :  { %3562 = vmatpush1.bf16.msra.mxu0 %v10014_v8  ;;  %v10038_v8 = vld [vmem:[%s11219_s3 + $0x3c0] ss:$16 sps:$4 sm:$0xff]  }
 0x4b2   :  { %3685 = vmatpush1.bf16.msra.mxu1 %v10020_v6  ;;  %3563 = vmatprep.subr.bf16.mxu0 %v10026_v56  ;;  %12041 = vst [vmem:[#allocation117_spill] sm:$0xff] %v10038_v8  ;;  %v10044_v6 = vld [vmem:[%s11219_s3 + $0x3c8] ss:$16 sps:$4 sm:$0xff]   ;;  %v10050_v56 = vld [vmem:[%s11219_s3 + $0x3e4] ss:$16 sps:$4 sm:$0xff]  }
 0x4b3   :  { %3686 = vmatprep.subr.bf16.mxu1 %v10032_v1  ;;  %12042 = vst [vmem:[#allocation118_spill] sm:$0xff] %v10044_v6  ;;  %12043 = vst [vmem:[#allocation119_spill] sm:$0xff] %v10050_v56  ;;  %v10056_v1 = vld [vmem:[%s11219_s3 + $0x3ec] ss:$16 sps:$4 sm:$0xff]  }
 0x4b4   :  { %12044 = vst [vmem:[#allocation120_spill] sm:$0xff] %v10056_v1 }
 0x4b5   :  { %3564 = vmatpush1.bf16.msra.mxu0 %v10038_v8  ;;  %v10062_v8 = vld [vmem:[%s11219_s3 + $0x3e0] ss:$16 sps:$4 sm:$0xff]  }
 0x4b6   :  { %3687 = vmatpush1.bf16.msra.mxu1 %v10044_v6  ;;  %3565 = vmatprep.subr.bf16.mxu0 %v10050_v56  ;;  %12045 = vst [vmem:[#allocation121_spill] sm:$0xff] %v10062_v8  ;;  %v10065_v6 = vld [vmem:[#allocation2 + $0x20] sm:$0xff]  ;;  %v10070_v56 = vld [vmem:[%s11219_s3 + $0x3e8] ss:$16 sps:$4 sm:$0xff]  }
 0x4b7   :  { %3688 = vmatprep.subr.bf16.mxu1 %v10056_v1  ;;  %12046 = vst [vmem:[#allocation122_spill] sm:$0xff] %v10070_v56  ;;  %v10076_v1 = vld [vmem:[%s11219_s3 + $0x404] ss:$16 sps:$4 sm:$0xff]   ;;  %v10088_v15 = vcombine.high %v10065_v6, %v10065_v6 }
 0x4b8   :  { %12047 = vst [vmem:[#allocation123_spill] sm:$0xff] %v10076_v1 }
 0x4b9   :  { %3566 = vmatpush1.bf16.msra.mxu0 %v10062_v8  ;;  %v10082_v8 = vld [vmem:[%s11219_s3 + $0x40c] ss:$16 sps:$4 sm:$0xff]   ;;  %12049 = vst [vmem:[#allocation125_spill] sm:$0xff] %v10088_v15 }
 0x4ba   :  { %3689 = vmatpush1.bf16.msra.mxu1 %v10070_v56  ;;  %3576 = vmatprep.subr.bf16.mxu0 %v10076_v1  ;;  %12048 = vst [vmem:[#allocation124_spill] sm:$0xff] %v10082_v8  ;;  %v10094_v56 = vld [vmem:[%s11219_s3 + $0x400] ss:$16 sps:$4 sm:$0xff]   ;;  %v10108_v1 = vld [vmem:[%s11219_s3 + $0x424] ss:$16 sps:$4 sm:$0xff]  }
 0x4bb   :  { %3699 = vmatprep.subr.bf16.mxu1 %v10082_v8  ;;  %12050 = vst [vmem:[#allocation126_spill] sm:$0xff] %v10094_v56  ;;  %v10101_v8 = vld [vmem:[%s11219_s3 + $0x408] ss:$16 sps:$4 sm:$0xff]   ;;  %12052 = vst [vmem:[#allocation128_spill] sm:$0xff] %v10108_v1 }
 0x4bc   :  { %3568 = vmatmul.mubr.bf16.vlgmr.msra.gmra.mrb[64].mxu0 %v9286_v10  ;;  %12051 = vst [vmem:[#allocation127_spill] sm:$0xff] %v10101_v8 }
 0x4bd   :  { %3691 = vmatmul.mubr.bf16.vlgmr.msra.gmra.mrb[64].mxu1 %v9286_v10  ;;  %3577 = vmatpush1.bf16.msra.mxu0 %v10094_v56  ;;  %v10114_v56 = vld [vmem:[%s11219_s3 + $0x42c] ss:$16 sps:$4 sm:$0xff]  }
 0x4be   :  { %3608 = vmatprep.mubr.bf16.mxu0 %v10088_v15  ;;  %3700 = vmatpush1.bf16.msra.mxu1 %v10101_v8  ;;  %12053 = vst [vmem:[#allocation129_spill] sm:$0xff] %v10114_v56  ;;  %v10120_v8 = vld [vmem:[%s11219_s3 + $0x420] ss:$16 sps:$4 sm:$0xff]  }
 0x4bf   :  { %3731 = vmatprep.mubr.bf16.mxu1 %v10088_v15  ;;  %3578 = vmatprep.subr.bf16.mxu0 %v10108_v1  ;;  %12054 = vst [vmem:[#allocation130_spill] sm:$0xff] %v10120_v8  ;;  %v10126_v15 = vld [vmem:[%s11219_s3 + $0x428] ss:$16 sps:$4 sm:$0xff]   ;;  %v10132_v1 = vld [vmem:[%s11219_s3 + $0x444] ss:$16 sps:$4 sm:$0xff]  }
 0x4c0   :  { %3701 = vmatprep.subr.bf16.mxu1 %v10114_v56  ;;  %12055 = vst [vmem:[#allocation131_spill] sm:$0xff] %v10126_v15  ;;  %12056 = vst [vmem:[#allocation132_spill] sm:$0xff] %v10132_v1  ;;  %v10138_v56 = vld [vmem:[%s11219_s3 + $0x44c] ss:$16 sps:$4 sm:$0xff]  }
 0x4c1   :  { %3579 = vmatpush1.bf16.msra.mxu0 %v10120_v8  ;;  %12057 = vst [vmem:[#allocation133_spill] sm:$0xff] %v10138_v56  ;;  %v10144_v8 = vld [vmem:[%s11219_s3 + $0x440] ss:$16 sps:$4 sm:$0xff]  }
 0x4c2   :  { %3702 = vmatpush1.bf16.msra.mxu1 %v10126_v15  ;;  %3580 = vmatprep.subr.bf16.mxu0 %v10132_v1  ;;  %12058 = vst [vmem:[#allocation134_spill] sm:$0xff] %v10144_v8  ;;  %v10150_v15 = vld [vmem:[%s11219_s3 + $0x448] ss:$16 sps:$4 sm:$0xff]   ;;  %v10156_v1 = vld [vmem:[%s11219_s3 + $0x464] ss:$16 sps:$4 sm:$0xff]  }
 0x4c3   :  { %3703 = vmatprep.subr.bf16.mxu1 %v10138_v56  ;;  %12059 = vst [vmem:[#allocation135_spill] sm:$0xff] %v10150_v15  ;;  %12060 = vst [vmem:[#allocation136_spill] sm:$0xff] %v10156_v1  ;;  %v10162_v56 = vld [vmem:[%s11219_s3 + $0x46c] ss:$16 sps:$4 sm:$0xff]  }
 0x4c5   :  { %3581 = vmatpush1.bf16.msra.mxu0 %v10144_v8  ;;  %v10168_v8 = vld [vmem:[%s11219_s3 + $0x460] ss:$16 sps:$4 sm:$0xff]  }
 0x4c6   :  { %3704 = vmatpush1.bf16.msra.mxu1 %v10150_v15  ;;  %3582 = vmatprep.subr.bf16.mxu0 %v10156_v1  ;;  %v10174_v15 = vld [vmem:[%s11219_s3 + $0x468] ss:$16 sps:$4 sm:$0xff]   ;;  %v10180_v1 = vld [vmem:[%s11219_s3 + $0x484] ss:$16 sps:$4 sm:$0xff]  }
 0x4c7   :  { %3705 = vmatprep.subr.bf16.mxu1 %v10162_v56 }
 0x4c9   :  { %3583 = vmatpush1.bf16.msra.mxu0 %v10168_v8 }
 0x4ca   :  { %3706 = vmatpush1.bf16.msra.mxu1 %v10174_v15  ;;  %3584 = vmatprep.subr.bf16.mxu0 %v10180_v1 }
 0x4cb   :  { %3707 = vmatprep.subr.bf16.mxu1 %v11894_v19  ;;  %v12075_v19 = vld [vmem:[#allocation17_spill] sm:$0xff] }
 0x4cd   :  { %3585 = vmatpush1.bf16.msra.mxu0 %v11895_v20  ;;  %v12076_v20 = vld [vmem:[#allocation18_spill] sm:$0xff] }
 0x4ce   :  { %3708 = vmatpush1.bf16.msra.mxu1 %v11896_v21  ;;  %3586 = vmatprep.subr.bf16.mxu0 %v11897_v22  ;;  %v12077_v21 = vld [vmem:[#allocation19_spill] sm:$0xff]  ;;  %v12078_v22 = vld [vmem:[#allocation20_spill] sm:$0xff] }
 0x4cf   :  { %3709 = vmatprep.subr.bf16.mxu1 %v11898_v23  ;;  %v12079_v23 = vld [vmem:[#allocation21_spill] sm:$0xff] }
 0x4d1   :  { %3587 = vmatpush1.bf16.msra.mxu0 %v11899_v24 }
 0x4d2   :  { %3710 = vmatpush1.bf16.msra.mxu1 %v11900_v26  ;;  %3588 = vmatprep.subr.bf16.mxu0 %v11901_v47  ;;  %v12080_v26 = vld [vmem:[#allocation22_spill] sm:$0xff] }
 0x4d3   :  { %3711 = vmatprep.subr.bf16.mxu1 %v11902_v43 }
 0x4d5   :  { %3589 = vmatpush1.bf16.msra.mxu0 %v11903_v41 }
 0x4d6   :  { %3712 = vmatpush1.bf16.msra.mxu1 %v11904_v49  ;;  %3590 = vmatprep.subr.bf16.mxu0 %v11905_v45 }
 0x4d7   :  { %3713 = vmatprep.subr.bf16.mxu1 %v11906_v54 }
 0x4d9   :  { %3591 = vmatpush1.bf16.msra.mxu0 %v11907_v48 }
 0x4da   :  { %3714 = vmatpush1.bf16.msra.mxu1 %v11908_v58  ;;  %3592 = vmatprep.subr.bf16.mxu0 %v11909_v59 }
 0x4db   :  { %3715 = vmatprep.subr.bf16.mxu1 %v11910_v62 }
 0x4dd   :  { %3593 = vmatpush1.bf16.msra.mxu0 %v11911_v3  ;;  %v12081_v3 = vld [vmem:[#allocation23_spill] sm:$0xff] }
 0x4de   :  { %3716 = vmatpush1.bf16.msra.mxu1 %v11912_v4  ;;  %3594 = vmatprep.subr.bf16.mxu0 %v11913_v5  ;;  %v12082_v5 = vld [vmem:[#allocation24_spill] sm:$0xff] }
 0x4df   :  { %3717 = vmatprep.subr.bf16.mxu1 %v11914_v7  ;;  %v12083_v7 = vld [vmem:[#allocation25_spill] sm:$0xff] }
 0x4e1   :  { %3595 = vmatpush1.bf16.msra.mxu0 %v8908_v53  ;;  %v12065_v53 = vld [vmem:[#allocation7_spill] sm:$0xff] }
 0x4e2   :  { %3718 = vmatpush1.bf16.msra.mxu1 %v8915_v50  ;;  %3596 = vmatprep.subr.bf16.mxu0 %v8920_v29  ;;  %v12062_v50 = vld [vmem:[#allocation4_spill] sm:$0xff]  ;;  %v12063_v29 = vld [vmem:[#allocation5_spill] sm:$0xff] }
 0x4e3   :  { %3719 = vmatprep.subr.bf16.mxu1 %v8926_v46  ;;  %v12064_v46 = vld [vmem:[#allocation6_spill] sm:$0xff] }
 0x4e5   :  { %3597 = vmatpush1.bf16.msra.mxu0 %v8932_v57  ;;  %v10231_v57 = vcombine.low %v10065_v6, %v10065_v6  ;;  %v12095_v6 = vld [vmem:[#allocation37_spill] sm:$0xff] }
 0x4e6   :  { %3720 = vmatpush1.bf16.msra.mxu1 %v11915_v27  ;;  %3598 = vmatprep.subr.bf16.mxu0 %v11916_v28  ;;  %v12084_v27 = vld [vmem:[#allocation26_spill] sm:$0xff] }
 0x4e7   :  { %3721 = vmatprep.subr.bf16.mxu1 %v8950_v55  ;;  %12061 = vst [vmem:[#allocation137_spill] sm:$0xff] %v10231_v57  ;;  %v12067_v55 = vld [vmem:[#allocation9_spill] sm:$0xff] }
 0x4e9   :  { %3599 = vmatpush1.bf16.msra.mxu0 %v11917_v30 }
 0x4ea   :  { %3722 = vmatpush1.bf16.msra.mxu1 %v8969_v42  ;;  %3600 = vmatprep.subr.bf16.mxu0 %v11918_v31  ;;  %v12069_v42 = vld [vmem:[#allocation11_spill] sm:$0xff] }
 0x4eb   :  { %3723 = vmatprep.subr.bf16.mxu1 %v11919_v32  ;;  %v12085_v31 = vld [vmem:[#allocation27_spill] sm:$0xff]  ;;  %v12086_v32 = vld [vmem:[#allocation28_spill] sm:$0xff] }
 0x4ed   :  { %3601 = vmatpush1.bf16.msra.mxu0 %v11920_v37  ;;  %v12087_v37 = vld [vmem:[#allocation29_spill] sm:$0xff] }
 0x4ee   :  { %3724 = vmatpush1.bf16.msra.mxu1 %v11921_v35  ;;  %3602 = vmatprep.subr.bf16.mxu0 %v11922_v2  ;;  %v12088_v35 = vld [vmem:[#allocation30_spill] sm:$0xff]  ;;  %v12089_v2 = vld [vmem:[#allocation31_spill] sm:$0xff] }
 0x4ef   :  { %3725 = vmatprep.subr.bf16.mxu1 %v11923_v61  ;;  %v12090_v61 = vld [vmem:[#allocation32_spill] sm:$0xff] }
 0x4f1   :  { %3603 = vmatpush1.bf16.msra.mxu0 %v11924_v33  ;;  %v12091_v33 = vld [vmem:[#allocation33_spill] sm:$0xff] }
 0x4f2   :  { %3726 = vmatpush1.bf16.msra.mxu1 %v9017_v40  ;;  %3604 = vmatprep.subr.bf16.mxu0 %v11925_v34  ;;  %v12073_v40 = vld [vmem:[#allocation15_spill] sm:$0xff]  ;;  %v12092_v34 = vld [vmem:[#allocation34_spill] sm:$0xff] }
 0x4f3   :  { %3727 = vmatprep.subr.bf16.mxu1 %v11926_v52  ;;  %v12093_v52 = vld [vmem:[#allocation35_spill] sm:$0xff] }
 0x4f5   :  { %3605 = vmatpush1.bf16.msra.mxu0 %v11927_v36  ;;  %v12094_v36 = vld [vmem:[#allocation36_spill] sm:$0xff] }
 0x4f6   :  { %3728 = vmatpush1.bf16.msra.mxu1 %v9041_v25  ;;  %3606 = vmatprep.subr.bf16.mxu0 %v9046_v9  ;;  %v12068_v25 = vld [vmem:[#allocation10_spill] sm:$0xff] }
 0x4f7   :  { %3729 = vmatprep.subr.bf16.mxu1 %v9052_v11  ;;  %v12070_v11 = vld [vmem:[#allocation12_spill] sm:$0xff]  ;;  %v12072_v9 = vld [vmem:[#allocation14_spill] sm:$0xff] }
 0x4f9   :  { %3607 = vmatpush1.bf16.msra.mxu0 %v9058_v39  ;;  %v12071_v39 = vld [vmem:[#allocation13_spill] sm:$0xff] }
 0x4fa   :  { %3730 = vmatpush1.bf16.msra.mxu1 %v9065_v38  ;;  %3771 = vmatprep.subr.bf16.mxu0 %v9292_v60  ;;  %v12066_v38 = vld [vmem:[#allocation8_spill] sm:$0xff] }
 0x4fb   :  { %3894 = vmatprep.subr.bf16.mxu1 %v9298_v63 }
 0x4fc   :  { %3609 = vmatmul.mubr.bf16.vlgmr.msra.gmra.mrb[64].mxu0 %v10231_v57 }
 0x4fd   :  { %3732 = vmatmul.mubr.bf16.vlgmr.msra.gmra.mrb[64].mxu1 %v10231_v57  ;;  %3772 = vmatpush1.bf16.msra.mxu0 %v9306_v44 }
 0x4fe   :  { %3803 = vmatprep.mubr.bf16.mxu0 %v9218_v51  ;;  %3895 = vmatpush1.bf16.msra.mxu1 %v12062_v50 }
 0x4ff   :  { %3926 = vmatprep.mubr.bf16.mxu1 %v9218_v51  ;;  %3773 = vmatprep.subr.bf16.mxu0 %v12063_v29  ;;  %v12074_v51 = vld [vmem:[#allocation16_spill] sm:$0xff] }
 0x500   :  { %3896 = vmatprep.subr.bf16.mxu1 %v12064_v46 }
 0x501   :  { %3774 = vmatpush1.bf16.msra.mxu0 %v12065_v53 }
 0x502   :  { %3897 = vmatpush1.bf16.msra.mxu1 %v12066_v38  ;;  %3775 = vmatprep.subr.bf16.mxu0 %v12067_v55 }
 0x503   :  { %3898 = vmatprep.subr.bf16.mxu1 %v12068_v25 }
 0x505   :  { %3776 = vmatpush1.bf16.msra.mxu0 %v12069_v42 }
 0x506   :  { %3899 = vmatpush1.bf16.msra.mxu1 %v12070_v11  ;;  %3777 = vmatprep.subr.bf16.mxu0 %v12071_v39 }
 0x507   :  { %3900 = vmatprep.subr.bf16.mxu1 %v12072_v9 }
 0x509   :  { %3778 = vmatpush1.bf16.msra.mxu0 %v12073_v40 }
 0x50a   :  { %3901 = vmatpush1.bf16.msra.mxu1 %v12074_v51  ;;  %3779 = vmatprep.subr.bf16.mxu0 %v12075_v19 }
 0x50b   :  { %3902 = vmatprep.subr.bf16.mxu1 %v12076_v20 }
 0x50d   :  { %3780 = vmatpush1.bf16.msra.mxu0 %v12077_v21 }
 0x50e   :  { %3903 = vmatpush1.bf16.msra.mxu1 %v12078_v22  ;;  %3781 = vmatprep.subr.bf16.mxu0 %v12079_v23 }
 0x50f   :  { %v3333_v24 = vpop.f32.mrb[60].mxu0  ;;  %3904 = vmatprep.subr.bf16.mxu1 %v12080_v26 }
 0x510   :  { %v3456_v47 = vpop.f32.mrb[60].mxu1  ;;  %v3335_v43 = vpop.f32.mrb[61].mxu0 }
 0x511   :  { %v3463_v41 = vmax.f32 %v3333_v24, %v3335_v43  ;;  %v3458_v49 = vpop.f32.mrb[61].mxu1  ;;  %v3337_v45 = vpop.f32.mrb[62].mxu0  ;;  %3782 = vmatpush1.bf16.msra.mxu0 %v9428_v12  ;;  %v12096_v24 = vld [vmem:[#allocation38_spill] sm:$0xff]  ;;  %v12098_v43 = vld [vmem:[#allocation40_spill] sm:$0xff] }
 0x512   :  { %v3464_v54 = vmax.f32 %v3456_v47, %v3458_v49  ;;  %v3460_v48 = vpop.f32.mrb[62].mxu1  ;;  %3905 = vmatpush1.bf16.msra.mxu1 %v9434_v0  ;;  %v3338_v58 = vpop.f32.mrb[63].mxu0  ;;  %3783 = vmatprep.subr.bf16.mxu0 %v9440_v14  ;;  %v12097_v47 = vld [vmem:[#allocation39_spill] sm:$0xff]  ;;  %v12100_v49 = vld [vmem:[#allocation42_spill] sm:$0xff] }
 0x513   :  { %v3461_v59 = vpop.f32.mrb[63].mxu1  ;;  %3906 = vmatprep.subr.bf16.mxu1 %v9451_v16  ;;  %v12101_v45 = vld [vmem:[#allocation43_spill] sm:$0xff]  ;;  %v12103_v48 = vld [vmem:[#allocation45_spill] sm:$0xff]  ;;  %v12104_v58 = vld [vmem:[#allocation46_spill] sm:$0xff] }
 0x514   :  { %v3465_v62 = vmax.f32 %v3463_v41, %v3464_v54  ;;  %v12099_v41 = vld [vmem:[#allocation41_spill] sm:$0xff]  ;;  %v12102_v54 = vld [vmem:[#allocation44_spill] sm:$0xff]  ;;  %v12105_v59 = vld [vmem:[#allocation47_spill] sm:$0xff] }
 0x515   :  { %3784 = vmatpush1.bf16.msra.mxu0 %v9457_v17 }
 0x516   :  { %v3466_v4 = vadd.f32 %v12081_v3, %v3465_v62  ;;  %3907 = vmatpush1.bf16.msra.mxu1 %v12082_v5  ;;  %3785 = vmatprep.subr.bf16.mxu0 %v12083_v7  ;;  %v12106_v62 = vld [vmem:[#allocation48_spill] sm:$0xff] }
 0x517   :  { %3908 = vmatprep.subr.bf16.mxu1 %v12084_v27 }
 0x518   :  { %v3467_v28 = vmax.f32 %v3466_v4, 0.0  ;;  %v12107_v4 = vld [vmem:[#allocation49_spill] sm:$0xff] }
 0x519   :  { %3786 = vmatpush1.bf16.msra.mxu0 %v9482_v13 }
 0x51a   :  { %v3468_v30 = vpack.c.bf16 %v3467_v28, %v3467_v28  ;;  %3909 = vmatpush1.bf16.msra.mxu1 %v12085_v31  ;;  %3787 = vmatprep.subr.bf16.mxu0 %v12086_v32  ;;  %v12108_v28 = vld [vmem:[#allocation50_spill] sm:$0xff] }
 0x51b   :  { %3910 = vmatprep.subr.bf16.mxu1 %v9500_v18 }
 0x51c   :  { %3469 = vst [vmem:[#allocation3 + $0x4] sm:$0xf] %v3468_v30  ;;  %v12109_v30 = vld [vmem:[#allocation51_spill] sm:$0xff] }
 0x51d   :  { %3788 = vmatpush1.bf16.msra.mxu0 %v12087_v37 }
 0x51e   :  { %3911 = vmatpush1.bf16.msra.mxu1 %v12088_v35  ;;  %3789 = vmatprep.subr.bf16.mxu0 %v12089_v2 }
 0x51f   :  { %3912 = vmatprep.subr.bf16.mxu1 %v12090_v61 }
 0x521   :  { %3790 = vmatpush1.bf16.msra.mxu0 %v12091_v33 }
 0x522   :  { %3913 = vmatpush1.bf16.msra.mxu1 %v12092_v34  ;;  %3791 = vmatprep.subr.bf16.mxu0 %v12093_v52 }
 0x523   :  { %3914 = vmatprep.subr.bf16.mxu1 %v12094_v36 }
 0x525   :  { %3792 = vmatpush1.bf16.msra.mxu0 %v12095_v6 }
 0x526   :  { %3915 = vmatpush1.bf16.msra.mxu1 %v12096_v24  ;;  %3793 = vmatprep.subr.bf16.mxu0 %v12097_v47 }
 0x527   :  { %3916 = vmatprep.subr.bf16.mxu1 %v12098_v43 }
 0x529   :  { %3794 = vmatpush1.bf16.msra.mxu0 %v12099_v41  ;;  %v12110_v41 = vld [vmem:[#allocation52_spill] sm:$0xff] }
 0x52a   :  { %3917 = vmatpush1.bf16.msra.mxu1 %v12100_v49  ;;  %3795 = vmatprep.subr.bf16.mxu0 %v12101_v45  ;;  %v12111_v49 = vld [vmem:[#allocation53_spill] sm:$0xff]  ;;  %v12112_v45 = vld [vmem:[#allocation54_spill] sm:$0xff] }
 0x52b   :  { %3918 = vmatprep.subr.bf16.mxu1 %v12102_v54  ;;  %v12113_v54 = vld [vmem:[#allocation55_spill] sm:$0xff] }
 0x52d   :  { %3796 = vmatpush1.bf16.msra.mxu0 %v12103_v48  ;;  %v12114_v48 = vld [vmem:[#allocation56_spill] sm:$0xff] }
 0x52e   :  { %3919 = vmatpush1.bf16.msra.mxu1 %v12104_v58  ;;  %3797 = vmatprep.subr.bf16.mxu0 %v12105_v59  ;;  %v12115_v58 = vld [vmem:[#allocation57_spill] sm:$0xff]  ;;  %v12116_v59 = vld [vmem:[#allocation58_spill] sm:$0xff] }
 0x52f   :  { %3920 = vmatprep.subr.bf16.mxu1 %v12106_v62  ;;  %v12117_v62 = vld [vmem:[#allocation59_spill] sm:$0xff] }
 0x531   :  { %3798 = vmatpush1.bf16.msra.mxu0 %v12107_v4  ;;  %v12118_v4 = vld [vmem:[#allocation60_spill] sm:$0xff] }
 0x532   :  { %3921 = vmatpush1.bf16.msra.mxu1 %v12108_v28  ;;  %3799 = vmatprep.subr.bf16.mxu0 %v12109_v30  ;;  %v12130_v30 = vld [vmem:[#allocation71_spill] sm:$0xff]  ;;  %v12132_v28 = vld [vmem:[#allocation73_spill] sm:$0xff] }
 0x533   :  { %3922 = vmatprep.subr.bf16.mxu1 %v12110_v41  ;;  %v12119_v41 = vld [vmem:[#allocation61_spill] sm:$0xff] }
 0x535   :  { %3800 = vmatpush1.bf16.msra.mxu0 %v12111_v49  ;;  %v12120_v49 = vld [vmem:[#allocation125_spill] sm:$0xff] }
 0x536   :  { %3923 = vmatpush1.bf16.msra.mxu1 %v12112_v45  ;;  %3801 = vmatprep.subr.bf16.mxu0 %v12113_v54  ;;  %v12121_v45 = vld [vmem:[#allocation62_spill] sm:$0xff]  ;;  %v12127_v54 = vld [vmem:[#allocation68_spill] sm:$0xff] }
 0x537   :  { %3924 = vmatprep.subr.bf16.mxu1 %v12114_v48  ;;  %v12122_v48 = vld [vmem:[#allocation63_spill] sm:$0xff] }
 0x539   :  { %3802 = vmatpush1.bf16.msra.mxu0 %v12115_v58  ;;  %v12123_v58 = vld [vmem:[#allocation64_spill] sm:$0xff] }
 0x53a   :  { %3925 = vmatpush1.bf16.msra.mxu1 %v12116_v59  ;;  %3812 = vmatprep.subr.bf16.mxu0 %v12117_v62  ;;  %v12124_v59 = vld [vmem:[#allocation65_spill] sm:$0xff]  ;;  %v12125_v62 = vld [vmem:[#allocation66_spill] sm:$0xff] }
 0x53b   :  { %3935 = vmatprep.subr.bf16.mxu1 %v12118_v4  ;;  %v12126_v4 = vld [vmem:[#allocation67_spill] sm:$0xff] }
 0x53c   :  { %3804 = vmatmul.mubr.bf16.vlgmr.msra.gmra.mrb[68].mxu0 %v9286_v10 }
 0x53d   :  { %3927 = vmatmul.mubr.bf16.vlgmr.msra.gmra.mrb[68].mxu1 %v9286_v10  ;;  %3813 = vmatpush1.bf16.msra.mxu0 %v12119_v41  ;;  %v12128_v10 = vld [vmem:[#allocation69_spill] sm:$0xff]  ;;  %v12129_v41 = vld [vmem:[#allocation70_spill] sm:$0xff] }
 0x53e   :  { %3844 = vmatprep.mubr.bf16.mxu0 %v12120_v49  ;;  %3936 = vmatpush1.bf16.msra.mxu1 %v12121_v45  ;;  %v12131_v45 = vld [vmem:[#allocation72_spill] sm:$0xff] }
 0x53f   :  { %3967 = vmatprep.mubr.bf16.mxu1 %v12120_v49  ;;  %3814 = vmatprep.subr.bf16.mxu0 %v12122_v48  ;;  %v12133_v48 = vld [vmem:[#allocation74_spill] sm:$0xff] }
 0x540   :  { %3937 = vmatprep.subr.bf16.mxu1 %v12123_v58  ;;  %v12134_v58 = vld [vmem:[#allocation75_spill] sm:$0xff] }
 0x541   :  { %3815 = vmatpush1.bf16.msra.mxu0 %v12124_v59  ;;  %v12135_v59 = vld [vmem:[#allocation76_spill] sm:$0xff] }
 0x542   :  { %3938 = vmatpush1.bf16.msra.mxu1 %v12125_v62  ;;  %3816 = vmatprep.subr.bf16.mxu0 %v12126_v4  ;;  %v12136_v62 = vld [vmem:[#allocation77_spill] sm:$0xff]  ;;  %v12137_v4 = vld [vmem:[#allocation78_spill] sm:$0xff] }
 0x543   :  { %3939 = vmatprep.subr.bf16.mxu1 %v12127_v54  ;;  %v12138_v54 = vld [vmem:[#allocation79_spill] sm:$0xff] }
 0x545   :  { %3817 = vmatpush1.bf16.msra.mxu0 %v12128_v10  ;;  %v12139_v10 = vld [vmem:[#allocation80_spill] sm:$0xff] }
 0x546   :  { %3940 = vmatpush1.bf16.msra.mxu1 %v12129_v41  ;;  %3818 = vmatprep.subr.bf16.mxu0 %v12130_v30  ;;  %v12140_v41 = vld [vmem:[#allocation81_spill] sm:$0xff]  ;;  %v12141_v30 = vld [vmem:[#allocation82_spill] sm:$0xff] }
 0x547   :  { %3941 = vmatprep.subr.bf16.mxu1 %v12131_v45  ;;  %v12142_v45 = vld [vmem:[#allocation83_spill] sm:$0xff] }
 0x549   :  { %3819 = vmatpush1.bf16.msra.mxu0 %v12132_v28  ;;  %v12143_v28 = vld [vmem:[#allocation84_spill] sm:$0xff] }
 0x54a   :  { %3942 = vmatpush1.bf16.msra.mxu1 %v12133_v48  ;;  %3820 = vmatprep.subr.bf16.mxu0 %v12134_v58  ;;  %v12144_v48 = vld [vmem:[#allocation85_spill] sm:$0xff]  ;;  %v12145_v58 = vld [vmem:[#allocation86_spill] sm:$0xff] }
 0x54b   :  { %3943 = vmatprep.subr.bf16.mxu1 %v12135_v59  ;;  %v12146_v59 = vld [vmem:[#allocation87_spill] sm:$0xff] }
 0x54d   :  { %3821 = vmatpush1.bf16.msra.mxu0 %v12136_v62  ;;  %v12147_v62 = vld [vmem:[#allocation88_spill] sm:$0xff] }
 0x54e   :  { %3944 = vmatpush1.bf16.msra.mxu1 %v12137_v4  ;;  %3822 = vmatprep.subr.bf16.mxu0 %v12138_v54  ;;  %v12148_v4 = vld [vmem:[#allocation89_spill] sm:$0xff]  ;;  %v12149_v54 = vld [vmem:[#allocation90_spill] sm:$0xff] }
 0x54f   :  { %3945 = vmatprep.subr.bf16.mxu1 %v12139_v10  ;;  %v12150_v10 = vld [vmem:[#allocation91_spill] sm:$0xff] }
 0x551   :  { %3823 = vmatpush1.bf16.msra.mxu0 %v12140_v41  ;;  %v12151_v41 = vld [vmem:[#allocation92_spill] sm:$0xff] }
 0x552   :  { %3946 = vmatpush1.bf16.msra.mxu1 %v12141_v30  ;;  %3824 = vmatprep.subr.bf16.mxu0 %v12142_v45  ;;  %v12152_v30 = vld [vmem:[#allocation93_spill] sm:$0xff]  ;;  %v12153_v45 = vld [vmem:[#allocation94_spill] sm:$0xff] }
 0x553   :  { %3947 = vmatprep.subr.bf16.mxu1 %v12143_v28  ;;  %v12154_v28 = vld [vmem:[#allocation95_spill] sm:$0xff] }
 0x555   :  { %3825 = vmatpush1.bf16.msra.mxu0 %v12144_v48  ;;  %v12155_v48 = vld [vmem:[#allocation96_spill] sm:$0xff] }
 0x556   :  { %3948 = vmatpush1.bf16.msra.mxu1 %v12145_v58  ;;  %3826 = vmatprep.subr.bf16.mxu0 %v12146_v59  ;;  %v12156_v58 = vld [vmem:[#allocation97_spill] sm:$0xff]  ;;  %v12157_v59 = vld [vmem:[#allocation98_spill] sm:$0xff] }
 0x557   :  { %3949 = vmatprep.subr.bf16.mxu1 %v12147_v62  ;;  %v12158_v62 = vld [vmem:[#allocation99_spill] sm:$0xff] }
 0x559   :  { %3827 = vmatpush1.bf16.msra.mxu0 %v12148_v4  ;;  %v12159_v4 = vld [vmem:[#allocation100_spill] sm:$0xff] }
 0x55a   :  { %3950 = vmatpush1.bf16.msra.mxu1 %v12149_v54  ;;  %3828 = vmatprep.subr.bf16.mxu0 %v12150_v10  ;;  %v12160_v54 = vld [vmem:[#allocation101_spill] sm:$0xff]  ;;  %v12161_v10 = vld [vmem:[#allocation102_spill] sm:$0xff] }
 0x55b   :  { %3951 = vmatprep.subr.bf16.mxu1 %v12151_v41  ;;  %v12162_v41 = vld [vmem:[#allocation103_spill] sm:$0xff] }
 0x55d   :  { %3829 = vmatpush1.bf16.msra.mxu0 %v12152_v30  ;;  %v12163_v30 = vld [vmem:[#allocation104_spill] sm:$0xff] }
 0x55e   :  { %3952 = vmatpush1.bf16.msra.mxu1 %v12153_v45  ;;  %3830 = vmatprep.subr.bf16.mxu0 %v12154_v28  ;;  %v12164_v45 = vld [vmem:[#allocation105_spill] sm:$0xff]  ;;  %v12165_v28 = vld [vmem:[#allocation106_spill] sm:$0xff] }
 0x55f   :  { %3953 = vmatprep.subr.bf16.mxu1 %v12155_v48  ;;  %v12166_v48 = vld [vmem:[#allocation107_spill] sm:$0xff] }
 0x561   :  { %3831 = vmatpush1.bf16.msra.mxu0 %v12156_v58  ;;  %v12167_v58 = vld [vmem:[#allocation108_spill] sm:$0xff] }
 0x562   :  { %3954 = vmatpush1.bf16.msra.mxu1 %v12157_v59  ;;  %3832 = vmatprep.subr.bf16.mxu0 %v12158_v62  ;;  %v12168_v59 = vld [vmem:[#allocation109_spill] sm:$0xff]  ;;  %v12169_v62 = vld [vmem:[#allocation110_spill] sm:$0xff] }
 0x563   :  { %3955 = vmatprep.subr.bf16.mxu1 %v12159_v4  ;;  %v12170_v4 = vld [vmem:[#allocation111_spill] sm:$0xff] }
 0x565   :  { %3833 = vmatpush1.bf16.msra.mxu0 %v12160_v54  ;;  %v12171_v54 = vld [vmem:[#allocation112_spill] sm:$0xff] }
 0x566   :  { %3956 = vmatpush1.bf16.msra.mxu1 %v12161_v10  ;;  %3834 = vmatprep.subr.bf16.mxu0 %v12162_v41  ;;  %v12172_v10 = vld [vmem:[#allocation113_spill] sm:$0xff]  ;;  %v12173_v41 = vld [vmem:[#allocation114_spill] sm:$0xff] }
 0x567   :  { %3957 = vmatprep.subr.bf16.mxu1 %v12163_v30  ;;  %v12174_v30 = vld [vmem:[#allocation115_spill] sm:$0xff] }
 0x569   :  { %3835 = vmatpush1.bf16.msra.mxu0 %v12164_v45  ;;  %v12175_v45 = vld [vmem:[#allocation116_spill] sm:$0xff] }
 0x56a   :  { %3958 = vmatpush1.bf16.msra.mxu1 %v12165_v28  ;;  %3836 = vmatprep.subr.bf16.mxu0 %v12166_v48  ;;  %v12176_v28 = vld [vmem:[#allocation117_spill] sm:$0xff]  ;;  %v12177_v48 = vld [vmem:[#allocation118_spill] sm:$0xff] }
 0x56b   :  { %3959 = vmatprep.subr.bf16.mxu1 %v12167_v58  ;;  %v12178_v58 = vld [vmem:[#allocation119_spill] sm:$0xff] }
 0x56d   :  { %3837 = vmatpush1.bf16.msra.mxu0 %v12168_v59  ;;  %v12179_v59 = vld [vmem:[#allocation120_spill] sm:$0xff] }
 0x56e   :  { %3960 = vmatpush1.bf16.msra.mxu1 %v12169_v62  ;;  %3838 = vmatprep.subr.bf16.mxu0 %v12170_v4  ;;  %v12180_v62 = vld [vmem:[#allocation121_spill] sm:$0xff]  ;;  %v10370_v4 = vld [vmem:[#allocation2 + $0x28] sm:$0xff] }
 0x56f   :  { %3961 = vmatprep.subr.bf16.mxu1 %v12171_v54  ;;  %v12181_v54 = vld [vmem:[#allocation122_spill] sm:$0xff] }
 0x571   :  { %3839 = vmatpush1.bf16.msra.mxu0 %v12172_v10  ;;  %v12182_v10 = vld [vmem:[#allocation123_spill] sm:$0xff] }
 0x572   :  { %3962 = vmatpush1.bf16.msra.mxu1 %v12173_v41  ;;  %3840 = vmatprep.subr.bf16.mxu0 %v12174_v30  ;;  %v12183_v41 = vld [vmem:[#allocation124_spill] sm:$0xff]  ;;  %v10378_v30 = vcombine.high %v10370_v4, %v10370_v4 }
 0x573   :  { %3963 = vmatprep.subr.bf16.mxu1 %v12175_v45  ;;  %v12184_v45 = vld [vmem:[#allocation126_spill] sm:$0xff] }
 0x575   :  { %3841 = vmatpush1.bf16.msra.mxu0 %v12176_v28  ;;  %v12185_v28 = vld [vmem:[#allocation127_spill] sm:$0xff] }
 0x576   :  { %3964 = vmatpush1.bf16.msra.mxu1 %v12177_v48  ;;  %3842 = vmatprep.subr.bf16.mxu0 %v12178_v58  ;;  %v12186_v48 = vld [vmem:[#allocation128_spill] sm:$0xff]  ;;  %v12187_v58 = vld [vmem:[#allocation129_spill] sm:$0xff] }
 0x577   :  { %3965 = vmatprep.subr.bf16.mxu1 %v12179_v59  ;;  %v12188_v59 = vld [vmem:[#allocation130_spill] sm:$0xff] }
 0x579   :  { %3843 = vmatpush1.bf16.msra.mxu0 %v12180_v62  ;;  %v12189_v62 = vld [vmem:[#allocation131_spill] sm:$0xff] }
 0x57a   :  { %3966 = vmatpush1.bf16.msra.mxu1 %v12181_v54  ;;  %3853 = vmatprep.subr.bf16.mxu0 %v12182_v10  ;;  %v12190_v54 = vld [vmem:[#allocation132_spill] sm:$0xff]  ;;  %v12191_v10 = vld [vmem:[#allocation133_spill] sm:$0xff] }
 0x57b   :  { %3976 = vmatprep.subr.bf16.mxu1 %v12183_v41  ;;  %v12192_v41 = vld [vmem:[#allocation134_spill] sm:$0xff] }
 0x57c   :  { %3845 = vmatmul.mubr.bf16.vlgmr.msra.gmra.mrb[68].mxu0 %v10231_v57 }
 0x57d   :  { %3968 = vmatmul.mubr.bf16.vlgmr.msra.gmra.mrb[68].mxu1 %v10231_v57  ;;  %3854 = vmatpush1.bf16.msra.mxu0 %v12184_v45  ;;  %v12193_v45 = vld [vmem:[#allocation135_spill] sm:$0xff]  ;;  %v12194_v57 = vld [vmem:[#allocation136_spill] sm:$0xff] }
 0x57e   :  { %3885 = vmatprep.mubr.bf16.mxu0 %v10378_v30  ;;  %3977 = vmatpush1.bf16.msra.mxu1 %v12185_v28  ;;  %v10401_v28 = vld [vmem:[%s11219_s3 + $0x48c] ss:$16 sps:$4 sm:$0xff]  }
 0x57f   :  { %4008 = vmatprep.mubr.bf16.mxu1 %v10378_v30  ;;  %3855 = vmatprep.subr.bf16.mxu0 %v12186_v48  ;;  %v10407_v48 = vld [vmem:[%s11219_s3 + $0x480] ss:$16 sps:$4 sm:$0xff]  }
 0x580   :  { %3978 = vmatprep.subr.bf16.mxu1 %v12187_v58  ;;  %v10443_v58 = vld [vmem:[%s11219_s3 + $0x4c4] ss:$16 sps:$4 sm:$0xff]  }
 0x581   :  { %3856 = vmatpush1.bf16.msra.mxu0 %v12188_v59  ;;  %v10449_v59 = vld [vmem:[%s11219_s3 + $0x4cc] ss:$16 sps:$4 sm:$0xff]  }
 0x582   :  { %3979 = vmatpush1.bf16.msra.mxu1 %v12189_v62  ;;  %3857 = vmatprep.subr.bf16.mxu0 %v12190_v54  ;;  %v10455_v62 = vld [vmem:[%s11219_s3 + $0x4c0] ss:$16 sps:$4 sm:$0xff]   ;;  %v10461_v54 = vld [vmem:[%s11219_s3 + $0x4c8] ss:$16 sps:$4 sm:$0xff]  }
 0x583   :  { %3980 = vmatprep.subr.bf16.mxu1 %v12191_v10  ;;  %12195 = vst [vmem:[#allocation4_spill] sm:$0xff] %v10461_v54  ;;  %v10467_v10 = vld [vmem:[%s11219_s3 + $0x4e4] ss:$16 sps:$4 sm:$0xff]  }
 0x584   :  { %12196 = vst [vmem:[#allocation5_spill] sm:$0xff] %v10467_v10 }
 0x585   :  { %3858 = vmatpush1.bf16.msra.mxu0 %v12192_v41  ;;  %v10473_v41 = vld [vmem:[%s11219_s3 + $0x4ec] ss:$16 sps:$4 sm:$0xff]  }
 0x586   :  { %3981 = vmatpush1.bf16.msra.mxu1 %v12193_v45  ;;  %3859 = vmatprep.subr.bf16.mxu0 %v12194_v57  ;;  %v10437_v57 = vld [vmem:[%s11219_s3 + $0x4a8] ss:$16 sps:$4 sm:$0xff]   ;;  %12197 = vst [vmem:[#allocation6_spill] sm:$0xff] %v10473_v41  ;;  %v10479_v45 = vld [vmem:[%s11219_s3 + $0x4e0] ss:$16 sps:$4 sm:$0xff]  }
 0x587   :  { %3982 = vmatprep.subr.bf16.mxu1 %v10162_v56  ;;  %v10431_v56 = vld [vmem:[%s11219_s3 + $0x4a0] ss:$16 sps:$4 sm:$0xff]   ;;  %12198 = vst [vmem:[#allocation7_spill] sm:$0xff] %v10479_v45 }
 0x589   :  { %3860 = vmatpush1.bf16.msra.mxu0 %v10168_v8  ;;  %v10413_v8 = vld [vmem:[%s11219_s3 + $0x488] ss:$16 sps:$4 sm:$0xff]  }
 0x58a   :  { %3983 = vmatpush1.bf16.msra.mxu1 %v10174_v15  ;;  %3861 = vmatprep.subr.bf16.mxu0 %v10180_v1  ;;  %v10419_v1 = vld [vmem:[%s11219_s3 + $0x4a4] ss:$16 sps:$4 sm:$0xff]   ;;  %v10425_v15 = vld [vmem:[%s11219_s3 + $0x4ac] ss:$16 sps:$4 sm:$0xff]  }
 0x58b   :  { %3984 = vmatprep.subr.bf16.mxu1 %v10401_v28 }
 0x58d   :  { %3862 = vmatpush1.bf16.msra.mxu0 %v10407_v48 }
 0x58e   :  { %3985 = vmatpush1.bf16.msra.mxu1 %v10413_v8  ;;  %3863 = vmatprep.subr.bf16.mxu0 %v10419_v1 }
 0x58f   :  { %3986 = vmatprep.subr.bf16.mxu1 %v10425_v15 }
 0x591   :  { %3864 = vmatpush1.bf16.msra.mxu0 %v10431_v56 }
 0x592   :  { %3987 = vmatpush1.bf16.msra.mxu1 %v10437_v57  ;;  %3865 = vmatprep.subr.bf16.mxu0 %v10443_v58 }
 0x593   :  { %3988 = vmatprep.subr.bf16.mxu1 %v10449_v59 }
 0x595   :  { %3866 = vmatpush1.bf16.msra.mxu0 %v10455_v62 }
 0x596   :  { %3989 = vmatpush1.bf16.msra.mxu1 %v10461_v54  ;;  %3867 = vmatprep.subr.bf16.mxu0 %v10467_v10  ;;  %v10485_v54 = vld [vmem:[%s11219_s3 + $0x4e8] ss:$16 sps:$4 sm:$0xff]   ;;  %v10491_v10 = vld [vmem:[%s11219_s3 + $0x504] ss:$16 sps:$4 sm:$0xff]  }
 0x597   :  { %3990 = vmatprep.subr.bf16.mxu1 %v10473_v41  ;;  %12199 = vst [vmem:[#allocation8_spill] sm:$0xff] %v10485_v54  ;;  %12200 = vst [vmem:[#allocation9_spill] sm:$0xff] %v10491_v10  ;;  %v10497_v41 = vld [vmem:[%s11219_s3 + $0x50c] ss:$16 sps:$4 sm:$0xff]  }
 0x598   :  { %12201 = vst [vmem:[#allocation10_spill] sm:$0xff] %v10497_v41 }
 0x599   :  { %3868 = vmatpush1.bf16.msra.mxu0 %v10479_v45  ;;  %v10503_v45 = vld [vmem:[%s11219_s3 + $0x500] ss:$16 sps:$4 sm:$0xff]  }
 0x59a   :  { %3991 = vmatpush1.bf16.msra.mxu1 %v10485_v54  ;;  %3869 = vmatprep.subr.bf16.mxu0 %v10491_v10  ;;  %12202 = vst [vmem:[#allocation11_spill] sm:$0xff] %v10503_v45  ;;  %v10509_v54 = vld [vmem:[%s11219_s3 + $0x508] ss:$16 sps:$4 sm:$0xff]   ;;  %v10515_v10 = vld [vmem:[%s11219_s3 + $0x524] ss:$16 sps:$4 sm:$0xff]  }
 0x59b   :  { %3992 = vmatprep.subr.bf16.mxu1 %v10497_v41  ;;  %12203 = vst [vmem:[#allocation12_spill] sm:$0xff] %v10509_v54  ;;  %12204 = vst [vmem:[#allocation13_spill] sm:$0xff] %v10515_v10  ;;  %v10521_v41 = vld [vmem:[%s11219_s3 + $0x52c] ss:$16 sps:$4 sm:$0xff]  }
 0x59c   :  { %12205 = vst [vmem:[#allocation14_spill] sm:$0xff] %v10521_v41 }
 0x59d   :  { %3870 = vmatpush1.bf16.msra.mxu0 %v10503_v45  ;;  %v10527_v45 = vld [vmem:[%s11219_s3 + $0x520] ss:$16 sps:$4 sm:$0xff]  }
 0x59e   :  { %3993 = vmatpush1.bf16.msra.mxu1 %v10509_v54  ;;  %3871 = vmatprep.subr.bf16.mxu0 %v10515_v10  ;;  %12206 = vst [vmem:[#allocation15_spill] sm:$0xff] %v10527_v45  ;;  %v10533_v54 = vld [vmem:[%s11219_s3 + $0x528] ss:$16 sps:$4 sm:$0xff]   ;;  %v10539_v10 = vld [vmem:[%s11219_s3 + $0x544] ss:$16 sps:$4 sm:$0xff]  }
 0x59f   :  { %3994 = vmatprep.subr.bf16.mxu1 %v10521_v41  ;;  %12207 = vst [vmem:[#allocation16_spill] sm:$0xff] %v10533_v54  ;;  %12208 = vst [vmem:[#allocation17_spill] sm:$0xff] %v10539_v10  ;;  %v10545_v41 = vld [vmem:[%s11219_s3 + $0x54c] ss:$16 sps:$4 sm:$0xff]  }
 0x5a0   :  { %12209 = vst [vmem:[#allocation18_spill] sm:$0xff] %v10545_v41 }
 0x5a1   :  { %3872 = vmatpush1.bf16.msra.mxu0 %v10527_v45  ;;  %v10551_v45 = vld [vmem:[%s11219_s3 + $0x540] ss:$16 sps:$4 sm:$0xff]  }
 0x5a2   :  { %3995 = vmatpush1.bf16.msra.mxu1 %v10533_v54  ;;  %3873 = vmatprep.subr.bf16.mxu0 %v10539_v10  ;;  %12210 = vst [vmem:[#allocation19_spill] sm:$0xff] %v10551_v45  ;;  %v10557_v54 = vld [vmem:[%s11219_s3 + $0x548] ss:$16 sps:$4 sm:$0xff]   ;;  %v10563_v10 = vld [vmem:[%s11219_s3 + $0x564] ss:$16 sps:$4 sm:$0xff]  }
 0x5a3   :  { %3996 = vmatprep.subr.bf16.mxu1 %v10545_v41  ;;  %12211 = vst [vmem:[#allocation20_spill] sm:$0xff] %v10557_v54  ;;  %12212 = vst [vmem:[#allocation21_spill] sm:$0xff] %v10563_v10  ;;  %v10569_v41 = vld [vmem:[%s11219_s3 + $0x56c] ss:$16 sps:$4 sm:$0xff]  }
 0x5a4   :  { %12213 = vst [vmem:[#allocation22_spill] sm:$0xff] %v10569_v41 }
 0x5a5   :  { %3874 = vmatpush1.bf16.msra.mxu0 %v10551_v45  ;;  %v10575_v45 = vld [vmem:[%s11219_s3 + $0x560] ss:$16 sps:$4 sm:$0xff]  }
 0x5a6   :  { %3997 = vmatpush1.bf16.msra.mxu1 %v10557_v54  ;;  %3875 = vmatprep.subr.bf16.mxu0 %v10563_v10  ;;  %12214 = vst [vmem:[#allocation23_spill] sm:$0xff] %v10575_v45  ;;  %v10581_v54 = vld [vmem:[%s11219_s3 + $0x568] ss:$16 sps:$4 sm:$0xff]   ;;  %v10587_v10 = vld [vmem:[%s11219_s3 + $0x584] ss:$16 sps:$4 sm:$0xff]  }
 0x5a7   :  { %3998 = vmatprep.subr.bf16.mxu1 %v10569_v41  ;;  %12215 = vst [vmem:[#allocation24_spill] sm:$0xff] %v10581_v54  ;;  %12216 = vst [vmem:[#allocation25_spill] sm:$0xff] %v10587_v10  ;;  %v10593_v41 = vld [vmem:[%s11219_s3 + $0x58c] ss:$16 sps:$4 sm:$0xff]  }
 0x5a8   :  { %12217 = vst [vmem:[#allocation26_spill] sm:$0xff] %v10593_v41 }
 0x5a9   :  { %3876 = vmatpush1.bf16.msra.mxu0 %v10575_v45  ;;  %v10599_v45 = vld [vmem:[%s11219_s3 + $0x580] ss:$16 sps:$4 sm:$0xff]  }
 0x5aa   :  { %3999 = vmatpush1.bf16.msra.mxu1 %v10581_v54  ;;  %3877 = vmatprep.subr.bf16.mxu0 %v10587_v10  ;;  %12218 = vst [vmem:[#allocation27_spill] sm:$0xff] %v10599_v45  ;;  %v10605_v54 = vld [vmem:[%s11219_s3 + $0x588] ss:$16 sps:$4 sm:$0xff]   ;;  %v10611_v10 = vld [vmem:[%s11219_s3 + $0x5a4] ss:$16 sps:$4 sm:$0xff]  }
 0x5ab   :  { %4000 = vmatprep.subr.bf16.mxu1 %v10593_v41  ;;  %12219 = vst [vmem:[#allocation28_spill] sm:$0xff] %v10605_v54  ;;  %12220 = vst [vmem:[#allocation29_spill] sm:$0xff] %v10611_v10  ;;  %v10617_v41 = vld [vmem:[%s11219_s3 + $0x5ac] ss:$16 sps:$4 sm:$0xff]  }
 0x5ac   :  { %12221 = vst [vmem:[#allocation30_spill] sm:$0xff] %v10617_v41 }
 0x5ad   :  { %3878 = vmatpush1.bf16.msra.mxu0 %v10599_v45  ;;  %v10623_v45 = vld [vmem:[%s11219_s3 + $0x5a0] ss:$16 sps:$4 sm:$0xff]  }
 0x5ae   :  { %4001 = vmatpush1.bf16.msra.mxu1 %v10605_v54  ;;  %3879 = vmatprep.subr.bf16.mxu0 %v10611_v10  ;;  %12222 = vst [vmem:[#allocation31_spill] sm:$0xff] %v10623_v45  ;;  %v10629_v54 = vld [vmem:[%s11219_s3 + $0x5a8] ss:$16 sps:$4 sm:$0xff]   ;;  %v10635_v10 = vld [vmem:[%s11219_s3 + $0x5c4] ss:$16 sps:$4 sm:$0xff]  }
 0x5af   :  { %4002 = vmatprep.subr.bf16.mxu1 %v10617_v41  ;;  %12223 = vst [vmem:[#allocation32_spill] sm:$0xff] %v10629_v54  ;;  %12224 = vst [vmem:[#allocation33_spill] sm:$0xff] %v10635_v10  ;;  %v10641_v41 = vld [vmem:[%s11219_s3 + $0x5cc] ss:$16 sps:$4 sm:$0xff]  }
 0x5b0   :  { %12225 = vst [vmem:[#allocation34_spill] sm:$0xff] %v10641_v41 }
 0x5b1   :  { %3880 = vmatpush1.bf16.msra.mxu0 %v10623_v45  ;;  %v10647_v45 = vld [vmem:[%s11219_s3 + $0x5c0] ss:$16 sps:$4 sm:$0xff]  }
 0x5b2   :  { %4003 = vmatpush1.bf16.msra.mxu1 %v10629_v54  ;;  %3881 = vmatprep.subr.bf16.mxu0 %v10635_v10  ;;  %12226 = vst [vmem:[#allocation35_spill] sm:$0xff] %v10647_v45  ;;  %v10653_v54 = vld [vmem:[%s11219_s3 + $0x5c8] ss:$16 sps:$4 sm:$0xff]   ;;  %v10659_v10 = vld [vmem:[%s11219_s3 + $0x5e4] ss:$16 sps:$4 sm:$0xff]  }
 0x5b3   :  { %4004 = vmatprep.subr.bf16.mxu1 %v10641_v41  ;;  %12227 = vst [vmem:[#allocation36_spill] sm:$0xff] %v10653_v54  ;;  %12228 = vst [vmem:[#allocation37_spill] sm:$0xff] %v10659_v10  ;;  %v10665_v41 = vld [vmem:[%s11219_s3 + $0x5ec] ss:$16 sps:$4 sm:$0xff]  }
 0x5b5   :  { %3882 = vmatpush1.bf16.msra.mxu0 %v10647_v45  ;;  %v10671_v45 = vld [vmem:[%s11219_s3 + $0x5e0] ss:$16 sps:$4 sm:$0xff]  }
 0x5b6   :  { %4005 = vmatpush1.bf16.msra.mxu1 %v10653_v54  ;;  %3883 = vmatprep.subr.bf16.mxu0 %v10659_v10  ;;  %v10676_v54 = vcombine.low %v10370_v4, %v10370_v4  ;;  %v10681_v10 = vld [vmem:[%s11219_s3 + $0x5e8] ss:$16 sps:$4 sm:$0xff]   ;;  %v12263_v4 = vld [vmem:[#allocation74_spill] sm:$0xff] }
 0x5b7   :  { %4006 = vmatprep.subr.bf16.mxu1 %v10665_v41 }
 0x5b9   :  { %3884 = vmatpush1.bf16.msra.mxu0 %v10671_v45 }
 0x5ba   :  { %4007 = vmatpush1.bf16.msra.mxu1 %v10681_v10  ;;  %4048 = vmatprep.subr.bf16.mxu0 %v9292_v60 }
 0x5bb   :  { %4171 = vmatprep.subr.bf16.mxu1 %v9298_v63 }
 0x5bc   :  { %3886 = vmatmul.mubr.bf16.vlgmr.msra.gmra.mrb[68].mxu0 %v10676_v54 }
 0x5bd   :  { %4009 = vmatmul.mubr.bf16.vlgmr.msra.gmra.mrb[68].mxu1 %v10676_v54  ;;  %4049 = vmatpush1.bf16.msra.mxu0 %v9306_v44 }
 0x5be   :  { %4080 = vmatprep.mubr.bf16.mxu0 %v12120_v49  ;;  %4172 = vmatpush1.bf16.msra.mxu1 %v12062_v50 }
 0x5bf   :  { %4203 = vmatprep.mubr.bf16.mxu1 %v12120_v49  ;;  %4050 = vmatprep.subr.bf16.mxu0 %v12063_v29  ;;  %v12262_v49 = vld [vmem:[#allocation73_spill] sm:$0xff] }
 0x5c0   :  { %4173 = vmatprep.subr.bf16.mxu1 %v12064_v46 }
 0x5c1   :  { %4051 = vmatpush1.bf16.msra.mxu0 %v12065_v53 }
 0x5c2   :  { %4174 = vmatpush1.bf16.msra.mxu1 %v12066_v38  ;;  %4052 = vmatprep.subr.bf16.mxu0 %v12067_v55 }
 0x5c3   :  { %4175 = vmatprep.subr.bf16.mxu1 %v12068_v25 }
 0x5c5   :  { %4053 = vmatpush1.bf16.msra.mxu0 %v12069_v42 }
 0x5c6   :  { %4176 = vmatpush1.bf16.msra.mxu1 %v12070_v11  ;;  %4054 = vmatprep.subr.bf16.mxu0 %v12071_v39  ;;  %v12234_v39 = vld [vmem:[#allocation46_spill] sm:$0xff] }
 0x5c7   :  { %4177 = vmatprep.subr.bf16.mxu1 %v12072_v9  ;;  %v12235_v9 = vld [vmem:[#allocation47_spill] sm:$0xff] }
 0x5c9   :  { %4055 = vmatpush1.bf16.msra.mxu0 %v12073_v40  ;;  %v12236_v40 = vld [vmem:[#allocation48_spill] sm:$0xff] }
 0x5ca   :  { %4178 = vmatpush1.bf16.msra.mxu1 %v12074_v51  ;;  %4056 = vmatprep.subr.bf16.mxu0 %v12075_v19  ;;  %v12237_v51 = vld [vmem:[#allocation49_spill] sm:$0xff]  ;;  %v12238_v19 = vld [vmem:[#allocation50_spill] sm:$0xff] }
 0x5cb   :  { %4179 = vmatprep.subr.bf16.mxu1 %v12076_v20  ;;  %v12239_v20 = vld [vmem:[#allocation51_spill] sm:$0xff] }
 0x5cd   :  { %4057 = vmatpush1.bf16.msra.mxu0 %v12077_v21  ;;  %v12240_v21 = vld [vmem:[#allocation52_spill] sm:$0xff] }
 0x5ce   :  { %4180 = vmatpush1.bf16.msra.mxu1 %v12078_v22  ;;  %4058 = vmatprep.subr.bf16.mxu0 %v12079_v23  ;;  %v12241_v22 = vld [vmem:[#allocation53_spill] sm:$0xff]  ;;  %v12242_v23 = vld [vmem:[#allocation54_spill] sm:$0xff] }
 0x5cf   :  { %v3610_v60 = vpop.f32.mrb[64].mxu0  ;;  %4181 = vmatprep.subr.bf16.mxu1 %v12080_v26  ;;  %v12243_v26 = vld [vmem:[#allocation55_spill] sm:$0xff] }
 0x5d0   :  { %v3733_v63 = vpop.f32.mrb[64].mxu1  ;;  %v3612_v44 = vpop.f32.mrb[65].mxu0 }
 0x5d1   :  { %v3740_v50 = vmax.f32 %v3610_v60, %v3612_v44  ;;  %v3735_v29 = vpop.f32.mrb[65].mxu1  ;;  %v3614_v46 = vpop.f32.mrb[66].mxu0  ;;  %4059 = vmatpush1.bf16.msra.mxu0 %v9428_v12  ;;  %v12265_v60 = vld [vmem:[#allocation76_spill] sm:$0xff]  ;;  %v12267_v44 = vld [vmem:[#allocation78_spill] sm:$0xff] }
 0x5d2   :  { %v3741_v53 = vmax.f32 %v3733_v63, %v3735_v29  ;;  %v3737_v38 = vpop.f32.mrb[66].mxu1  ;;  %4182 = vmatpush1.bf16.msra.mxu1 %v9434_v0  ;;  %v3615_v55 = vpop.f32.mrb[67].mxu0  ;;  %4060 = vmatprep.subr.bf16.mxu0 %v9440_v14  ;;  %v12229_v14 = vld [vmem:[#allocation41_spill] sm:$0xff]  ;;  %v12269_v29 = vld [vmem:[#allocation80_spill] sm:$0xff] }
 0x5d3   :  { %v3738_v25 = vpop.f32.mrb[67].mxu1  ;;  %4183 = vmatprep.subr.bf16.mxu1 %v9451_v16  ;;  %v12231_v16 = vld [vmem:[#allocation43_spill] sm:$0xff]  ;;  %v12266_v63 = vld [vmem:[#allocation77_spill] sm:$0xff]  ;;  %v12273_v55 = vld [vmem:[#allocation84_spill] sm:$0xff] }
 0x5d4   :  { %v3742_v42 = vmax.f32 %v3740_v50, %v3741_v53  ;;  %v12268_v50 = vld [vmem:[#allocation79_spill] sm:$0xff]  ;;  %v12270_v46 = vld [vmem:[#allocation81_spill] sm:$0xff]  ;;  %v12271_v53 = vld [vmem:[#allocation82_spill] sm:$0xff] }
 0x5d5   :  { %4061 = vmatpush1.bf16.msra.mxu0 %v9457_v17  ;;  %v12232_v17 = vld [vmem:[#allocation44_spill] sm:$0xff]  ;;  %v12272_v38 = vld [vmem:[#allocation83_spill] sm:$0xff]  ;;  %v12274_v25 = vld [vmem:[#allocation85_spill] sm:$0xff] }
 0x5d6   :  { %v3743_v11 = vadd.f32 %v12081_v3, %v3742_v42  ;;  %4184 = vmatpush1.bf16.msra.mxu1 %v12082_v5  ;;  %4062 = vmatprep.subr.bf16.mxu0 %v12083_v7  ;;  %v12244_v3 = vld [vmem:[#allocation56_spill] sm:$0xff]  ;;  %v12245_v5 = vld [vmem:[#allocation57_spill] sm:$0xff]  ;;  %v12246_v7 = vld [vmem:[#allocation58_spill] sm:$0xff] }
 0x5d7   :  { %4185 = vmatprep.subr.bf16.mxu1 %v12084_v27  ;;  %v12247_v27 = vld [vmem:[#allocation59_spill] sm:$0xff]  ;;  %v12275_v42 = vld [vmem:[#allocation86_spill] sm:$0xff] }
 0x5d8   :  { %v3744_v12 = vmax.f32 %v3743_v11, 0.0  ;;  %v12276_v11 = vld [vmem:[#allocation87_spill] sm:$0xff] }
 0x5d9   :  { %4063 = vmatpush1.bf16.msra.mxu0 %v9482_v13  ;;  %v12230_v13 = vld [vmem:[#allocation42_spill] sm:$0xff] }
 0x5da   :  { %v3745_v0 = vpack.c.bf16 %v3744_v12, %v3744_v12  ;;  %4186 = vmatpush1.bf16.msra.mxu1 %v12085_v31  ;;  %4064 = vmatprep.subr.bf16.mxu0 %v12086_v32  ;;  %v12248_v31 = vld [vmem:[#allocation60_spill] sm:$0xff]  ;;  %v12249_v32 = vld [vmem:[#allocation137_spill] sm:$0xff] }
 0x5db   :  { %4187 = vmatprep.subr.bf16.mxu1 %v9500_v18  ;;  %v12233_v18 = vld [vmem:[#allocation45_spill] sm:$0xff]  ;;  %v12277_v12 = vld [vmem:[#allocation88_spill] sm:$0xff] }
 0x5dc   :  { %3746 = vst [vmem:[#allocation3 + $0x8] sm:$0xf] %v3745_v0  ;;  %v12278_v0 = vld [vmem:[#allocation89_spill] sm:$0xff] }
 0x5dd   :  { %4065 = vmatpush1.bf16.msra.mxu0 %v12087_v37  ;;  %v12250_v37 = vld [vmem:[#allocation61_spill] sm:$0xff] }
 0x5de   :  { %4188 = vmatpush1.bf16.msra.mxu1 %v12088_v35  ;;  %4066 = vmatprep.subr.bf16.mxu0 %v12089_v2  ;;  %v12251_v35 = vld [vmem:[#allocation62_spill] sm:$0xff]  ;;  %v12252_v2 = vld [vmem:[#allocation63_spill] sm:$0xff] }
 0x5df   :  { %4189 = vmatprep.subr.bf16.mxu1 %v12090_v61  ;;  %v12253_v61 = vld [vmem:[#allocation64_spill] sm:$0xff] }
 0x5e1   :  { %4067 = vmatpush1.bf16.msra.mxu0 %v12091_v33  ;;  %v12254_v33 = vld [vmem:[#allocation65_spill] sm:$0xff] }
 0x5e2   :  { %4190 = vmatpush1.bf16.msra.mxu1 %v12092_v34  ;;  %4068 = vmatprep.subr.bf16.mxu0 %v12093_v52  ;;  %v12255_v34 = vld [vmem:[#allocation66_spill] sm:$0xff]  ;;  %v12256_v52 = vld [vmem:[#allocation67_spill] sm:$0xff] }
 0x5e3   :  { %4191 = vmatprep.subr.bf16.mxu1 %v12094_v36  ;;  %v12257_v36 = vld [vmem:[#allocation68_spill] sm:$0xff] }
 0x5e5   :  { %4069 = vmatpush1.bf16.msra.mxu0 %v12095_v6  ;;  %v12258_v6 = vld [vmem:[#allocation69_spill] sm:$0xff] }
 0x5e6   :  { %4192 = vmatpush1.bf16.msra.mxu1 %v12096_v24  ;;  %4070 = vmatprep.subr.bf16.mxu0 %v12097_v47  ;;  %v12259_v24 = vld [vmem:[#allocation70_spill] sm:$0xff]  ;;  %v12260_v47 = vld [vmem:[#allocation71_spill] sm:$0xff] }
 0x5e7   :  { %4193 = vmatprep.subr.bf16.mxu1 %v12098_v43  ;;  %v12261_v43 = vld [vmem:[#allocation72_spill] sm:$0xff] }
 0x5e9   :  { %4071 = vmatpush1.bf16.msra.mxu0 %v12229_v14  ;;  %v6345_v14 = vld [vmem:[%s11219_s3 + $0x2e8] ss:$16 sps:$4 sm:$0xff]  }
 0x5ea   :  { %4194 = vmatpush1.bf16.msra.mxu1 %v12230_v13  ;;  %4072 = vmatprep.subr.bf16.mxu0 %v12231_v16  ;;  %v6346_v13 = vld [vmem:[%s11219_s3 + $0x304] ss:$16 sps:$4 sm:$0xff]   ;;  %v6347_v16 = vld [vmem:[%s11219_s3 + $0x30c] ss:$16 sps:$4 sm:$0xff]  }
 0x5eb   :  { %4195 = vmatprep.subr.bf16.mxu1 %v12232_v17  ;;  %v6348_v17 = vld [vmem:[%s11219_s3 + $0x300] ss:$16 sps:$4 sm:$0xff]  }
 0x5ed   :  { %4073 = vmatpush1.bf16.msra.mxu0 %v12233_v18  ;;  %v6349_v18 = vld [vmem:[%s11219_s3 + $0x308] ss:$16 sps:$4 sm:$0xff]  }
 0x5ee   :  { %4196 = vmatpush1.bf16.msra.mxu1 %v12234_v39  ;;  %4074 = vmatprep.subr.bf16.mxu0 %v12235_v9  ;;  %v6350_v39 = vld [vmem:[%s11219_s3 + $0x324] ss:$16 sps:$4 sm:$0xff]   ;;  %v6351_v9 = vld [vmem:[%s11219_s3 + $0x32c] ss:$16 sps:$4 sm:$0xff]  }
 0x5ef   :  { %4197 = vmatprep.subr.bf16.mxu1 %v12236_v40  ;;  %v6352_v40 = vld [vmem:[%s11219_s3 + $0x320] ss:$16 sps:$4 sm:$0xff]  }
 0x5f1   :  { %4075 = vmatpush1.bf16.msra.mxu0 %v12237_v51  ;;  %v6353_v51 = vld [vmem:[%s11219_s3 + $0x328] ss:$16 sps:$4 sm:$0xff]  }
 0x5f2   :  { %4198 = vmatpush1.bf16.msra.mxu1 %v12238_v19  ;;  %4076 = vmatprep.subr.bf16.mxu0 %v12239_v20  ;;  %v6354_v19 = vld [vmem:[%s11219_s3 + $0x344] ss:$16 sps:$4 sm:$0xff]   ;;  %v6355_v20 = vld [vmem:[%s11219_s3 + $0x34c] ss:$16 sps:$4 sm:$0xff]  }
 0x5f3   :  { %4199 = vmatprep.subr.bf16.mxu1 %v12240_v21  ;;  %v6356_v21 = vld [vmem:[%s11219_s3 + $0x340] ss:$16 sps:$4 sm:$0xff]  }
 0x5f5   :  { %4077 = vmatpush1.bf16.msra.mxu0 %v12241_v22  ;;  %v6357_v22 = vld [vmem:[%s11219_s3 + $0x348] ss:$16 sps:$4 sm:$0xff]  }
 0x5f6   :  { %4200 = vmatpush1.bf16.msra.mxu1 %v12242_v23  ;;  %4078 = vmatprep.subr.bf16.mxu0 %v12243_v26  ;;  %v6358_v23 = vld [vmem:[%s11219_s3 + $0x364] ss:$16 sps:$4 sm:$0xff]   ;;  %v6359_v26 = vld [vmem:[%s11219_s3 + $0x36c] ss:$16 sps:$4 sm:$0xff]  }
 0x5f7   :  { %4201 = vmatprep.subr.bf16.mxu1 %v12244_v3  ;;  %v6360_v3 = vld [vmem:[%s11219_s3 + $0x360] ss:$16 sps:$4 sm:$0xff]  }
 0x5f9   :  { %4079 = vmatpush1.bf16.msra.mxu0 %v12245_v5  ;;  %v6361_v5 = vld [vmem:[%s11219_s3 + $0x368] ss:$16 sps:$4 sm:$0xff]  }
 0x5fa   :  { %4202 = vmatpush1.bf16.msra.mxu1 %v12246_v7  ;;  %4089 = vmatprep.subr.bf16.mxu0 %v12247_v27  ;;  %v6362_v7 = vld [vmem:[%s11219_s3 + $0x384] ss:$16 sps:$4 sm:$0xff]   ;;  %v6363_v27 = vld [vmem:[%s11219_s3 + $0x38c] ss:$16 sps:$4 sm:$0xff]  }
 0x5fb   :  { %4212 = vmatprep.subr.bf16.mxu1 %v12248_v31  ;;  %v6364_v31 = vld [vmem:[%s11219_s3 + $0x380] ss:$16 sps:$4 sm:$0xff]  }
 0x5fc   :  { %4081 = vmatmul.mubr.bf16.vlgmr.msra.gmra.mrb[72].mxu0 %v12249_v32 }
 0x5fd   :  { %4204 = vmatmul.mubr.bf16.vlgmr.msra.gmra.mrb[72].mxu1 %v12249_v32  ;;  %4090 = vmatpush1.bf16.msra.mxu0 %v12250_v37  ;;  %v6365_v32 = vld [vmem:[%s11219_s3 + $0x388] ss:$16 sps:$4 sm:$0xff]   ;;  %v6366_v37 = vld [vmem:[%s11219_s3 + $0x3a4] ss:$16 sps:$4 sm:$0xff]  }
 0x5fe   :  { %4121 = vmatprep.mubr.bf16.mxu0 %v10378_v30  ;;  %4213 = vmatpush1.bf16.msra.mxu1 %v12251_v35  ;;  %v6367_v35 = vld [vmem:[%s11219_s3 + $0x3ac] ss:$16 sps:$4 sm:$0xff]  }
 0x5ff   :  { %4244 = vmatprep.mubr.bf16.mxu1 %v10378_v30  ;;  %4091 = vmatprep.subr.bf16.mxu0 %v12252_v2  ;;  %v12264_v30 = vld [vmem:[#allocation75_spill] sm:$0xff]  ;;  %v6368_v2 = vld [vmem:[%s11219_s3 + $0x3a0] ss:$16 sps:$4 sm:$0xff]  }
 0x600   :  { %4214 = vmatprep.subr.bf16.mxu1 %v12253_v61  ;;  %v6369_v61 = vld [vmem:[%s11219_s3 + $0x3a8] ss:$16 sps:$4 sm:$0xff]  }
 0x601   :  { %4092 = vmatpush1.bf16.msra.mxu0 %v12254_v33  ;;  %v6370_v33 = vld [vmem:[%s11219_s3 + $0x3c4] ss:$16 sps:$4 sm:$0xff]  }
 0x602   :  { %4215 = vmatpush1.bf16.msra.mxu1 %v12255_v34  ;;  %4093 = vmatprep.subr.bf16.mxu0 %v12256_v52  ;;  %v6371_v34 = vld [vmem:[%s11219_s3 + $0x3cc] ss:$16 sps:$4 sm:$0xff]   ;;  %v6372_v52 = vld [vmem:[%s11219_s3 + $0x3c0] ss:$16 sps:$4 sm:$0xff]  }
 0x603   :  { %4216 = vmatprep.subr.bf16.mxu1 %v12257_v36  ;;  %v6373_v36 = vld [vmem:[%s11219_s3 + $0x3c8] ss:$16 sps:$4 sm:$0xff]  }
 0x605   :  { %4094 = vmatpush1.bf16.msra.mxu0 %v12258_v6  ;;  %v6374_v6 = vld [vmem:[%s11219_s3 + $0x3e4] ss:$16 sps:$4 sm:$0xff]  }
 0x606   :  { %4217 = vmatpush1.bf16.msra.mxu1 %v12259_v24  ;;  %4095 = vmatprep.subr.bf16.mxu0 %v12260_v47  ;;  %v6375_v24 = vld [vmem:[%s11219_s3 + $0x3ec] ss:$16 sps:$4 sm:$0xff]   ;;  %v6376_v47 = vld [vmem:[%s11219_s3 + $0x3e0] ss:$16 sps:$4 sm:$0xff]  }
 0x607   :  { %4218 = vmatprep.subr.bf16.mxu1 %v12261_v43  ;;  %v10884_v43 = vld [vmem:[#allocation2 + $0x30] sm:$0xff] }
 0x609   :  { %4096 = vmatpush1.bf16.msra.mxu0 %v12262_v49  ;;  %v6377_v49 = vld [vmem:[%s11219_s3 + $0x3e8] ss:$16 sps:$4 sm:$0xff]  }
 0x60a   :  { %4219 = vmatpush1.bf16.msra.mxu1 %v12263_v4  ;;  %4097 = vmatprep.subr.bf16.mxu0 %v12264_v30  ;;  %v6378_v4 = vld [vmem:[%s11219_s3 + $0x404] ss:$16 sps:$4 sm:$0xff]   ;;  %v6379_v30 = vld [vmem:[%s11219_s3 + $0x40c] ss:$16 sps:$4 sm:$0xff]  }
 0x60b   :  { %4220 = vmatprep.subr.bf16.mxu1 %v12265_v60  ;;  %v5327_v60 = vcombine.high %v10884_v43, %v10884_v43 }
 0x60d   :  { %4098 = vmatpush1.bf16.msra.mxu0 %v12266_v63  ;;  %v6380_v63 = vld [vmem:[%s11219_s3 + $0x400] ss:$16 sps:$4 sm:$0xff]  }
 0x60e   :  { %4221 = vmatpush1.bf16.msra.mxu1 %v12267_v44  ;;  %4099 = vmatprep.subr.bf16.mxu0 %v12268_v50  ;;  %v6381_v44 = vld [vmem:[%s11219_s3 + $0x408] ss:$16 sps:$4 sm:$0xff]   ;;  %v6382_v50 = vld [vmem:[%s11219_s3 + $0x424] ss:$16 sps:$4 sm:$0xff]  }
 0x60f   :  { %4222 = vmatprep.subr.bf16.mxu1 %v12269_v29  ;;  %v6384_v29 = vld [vmem:[%s11219_s3 + $0x420] ss:$16 sps:$4 sm:$0xff]  }
 0x611   :  { %4100 = vmatpush1.bf16.msra.mxu0 %v12270_v46  ;;  %v6385_v46 = vld [vmem:[%s11219_s3 + $0x428] ss:$16 sps:$4 sm:$0xff]  }
 0x612   :  { %4223 = vmatpush1.bf16.msra.mxu1 %v12271_v53  ;;  %4101 = vmatprep.subr.bf16.mxu0 %v12272_v38  ;;  %v6386_v53 = vld [vmem:[%s11219_s3 + $0x444] ss:$16 sps:$4 sm:$0xff]   ;;  %v6387_v38 = vld [vmem:[%s11219_s3 + $0x44c] ss:$16 sps:$4 sm:$0xff]  }
 0x613   :  { %4224 = vmatprep.subr.bf16.mxu1 %v12273_v55  ;;  %v6388_v55 = vld [vmem:[%s11219_s3 + $0x440] ss:$16 sps:$4 sm:$0xff]  }
 0x615   :  { %4102 = vmatpush1.bf16.msra.mxu0 %v12274_v25  ;;  %v6389_v25 = vld [vmem:[%s11219_s3 + $0x448] ss:$16 sps:$4 sm:$0xff]  }
 0x616   :  { %4225 = vmatpush1.bf16.msra.mxu1 %v12275_v42  ;;  %4103 = vmatprep.subr.bf16.mxu0 %v12276_v11  ;;  %v6390_v42 = vld [vmem:[%s11219_s3 + $0x464] ss:$16 sps:$4 sm:$0xff]   ;;  %v6391_v11 = vld [vmem:[%s11219_s3 + $0x46c] ss:$16 sps:$4 sm:$0xff]  }
 0x617   :  { %4226 = vmatprep.subr.bf16.mxu1 %v12277_v12  ;;  %v6392_v12 = vld [vmem:[%s11219_s3 + $0x460] ss:$16 sps:$4 sm:$0xff]  }
 0x619   :  { %4104 = vmatpush1.bf16.msra.mxu0 %v12278_v0  ;;  %v6393_v0 = vld [vmem:[%s11219_s3 + $0x468] ss:$16 sps:$4 sm:$0xff]  }
 0x61a   :  { %4227 = vmatpush1.bf16.msra.mxu1 %v6345_v14  ;;  %4105 = vmatprep.subr.bf16.mxu0 %v6346_v13  ;;  %v6394_v14 = vld [vmem:[%s11219_s3 + $0x484] ss:$16 sps:$4 sm:$0xff]   ;;  %v12279_v13 = vld [vmem:[#allocation4_spill] sm:$0xff] }
 0x61b   :  { %4228 = vmatprep.subr.bf16.mxu1 %v6347_v16  ;;  %v12290_v16 = vld [vmem:[#allocation15_spill] sm:$0xff] }
 0x61d   :  { %4106 = vmatpush1.bf16.msra.mxu0 %v6348_v17  ;;  %v12291_v17 = vld [vmem:[#allocation16_spill] sm:$0xff] }
 0x61e   :  { %4229 = vmatpush1.bf16.msra.mxu1 %v6349_v18  ;;  %4107 = vmatprep.subr.bf16.mxu0 %v6350_v39  ;;  %v12292_v18 = vld [vmem:[#allocation17_spill] sm:$0xff]  ;;  %v12293_v39 = vld [vmem:[#allocation18_spill] sm:$0xff] }
 0x61f   :  { %4230 = vmatprep.subr.bf16.mxu1 %v6351_v9  ;;  %v12294_v9 = vld [vmem:[#allocation19_spill] sm:$0xff] }
 0x621   :  { %4108 = vmatpush1.bf16.msra.mxu0 %v6352_v40  ;;  %v12295_v40 = vld [vmem:[#allocation20_spill] sm:$0xff] }
 0x622   :  { %4231 = vmatpush1.bf16.msra.mxu1 %v6353_v51  ;;  %4109 = vmatprep.subr.bf16.mxu0 %v6354_v19  ;;  %v12296_v51 = vld [vmem:[#allocation21_spill] sm:$0xff]  ;;  %v12297_v19 = vld [vmem:[#allocation22_spill] sm:$0xff] }
 0x623   :  { %4232 = vmatprep.subr.bf16.mxu1 %v6355_v20  ;;  %v12298_v20 = vld [vmem:[#allocation23_spill] sm:$0xff] }
 0x625   :  { %4110 = vmatpush1.bf16.msra.mxu0 %v6356_v21  ;;  %v12299_v21 = vld [vmem:[#allocation24_spill] sm:$0xff] }
 0x626   :  { %4233 = vmatpush1.bf16.msra.mxu1 %v6357_v22  ;;  %4111 = vmatprep.subr.bf16.mxu0 %v6358_v23  ;;  %v12300_v22 = vld [vmem:[#allocation25_spill] sm:$0xff]  ;;  %v12301_v23 = vld [vmem:[#allocation26_spill] sm:$0xff] }
 0x627   :  { %4234 = vmatprep.subr.bf16.mxu1 %v6359_v26  ;;  %v12302_v26 = vld [vmem:[#allocation27_spill] sm:$0xff] }
 0x629   :  { %4112 = vmatpush1.bf16.msra.mxu0 %v6360_v3  ;;  %v12303_v3 = vld [vmem:[#allocation28_spill] sm:$0xff] }
 0x62a   :  { %4235 = vmatpush1.bf16.msra.mxu1 %v6361_v5  ;;  %4113 = vmatprep.subr.bf16.mxu0 %v6362_v7  ;;  %v12304_v5 = vld [vmem:[#allocation29_spill] sm:$0xff]  ;;  %v12305_v7 = vld [vmem:[#allocation30_spill] sm:$0xff] }
 0x62b   :  { %4236 = vmatprep.subr.bf16.mxu1 %v6363_v27  ;;  %v12306_v27 = vld [vmem:[#allocation31_spill] sm:$0xff] }
 0x62d   :  { %4114 = vmatpush1.bf16.msra.mxu0 %v6364_v31  ;;  %v12307_v31 = vld [vmem:[#allocation32_spill] sm:$0xff] }
 0x62e   :  { %4237 = vmatpush1.bf16.msra.mxu1 %v6365_v32  ;;  %4115 = vmatprep.subr.bf16.mxu0 %v6366_v37  ;;  %v12308_v32 = vld [vmem:[#allocation33_spill] sm:$0xff]  ;;  %v12309_v37 = vld [vmem:[#allocation34_spill] sm:$0xff] }
 0x62f   :  { %4238 = vmatprep.subr.bf16.mxu1 %v6367_v35  ;;  %v12310_v35 = vld [vmem:[#allocation35_spill] sm:$0xff] }
 0x631   :  { %4116 = vmatpush1.bf16.msra.mxu0 %v6368_v2  ;;  %v12311_v2 = vld [vmem:[#allocation36_spill] sm:$0xff] }
 0x632   :  { %4239 = vmatpush1.bf16.msra.mxu1 %v6369_v61  ;;  %4117 = vmatprep.subr.bf16.mxu0 %v6370_v33  ;;  %v12312_v61 = vld [vmem:[#allocation37_spill] sm:$0xff]  ;;  %v5994_v33 = vld [vmem:[%s11221_s5 + $0x40] sm:$0xff]  }
 0x633   :  { %4240 = vmatprep.subr.bf16.mxu1 %v6371_v34  ;;  %v6002_v34 = vld [vmem:[%s11221_s5 + $0xc0] sm:$0xff]  }
 0x635   :  { %4118 = vmatpush1.bf16.msra.mxu0 %v6372_v52  ;;  %v5995_v52 = vld [vmem:[%s11221_s5] sm:$0xff]  }
 0x636   :  { %4241 = vmatpush1.bf16.msra.mxu1 %v6373_v36  ;;  %4119 = vmatprep.subr.bf16.mxu0 %v6374_v6  ;;  %v10999_v36 = vld [vmem:[#allocation3] sm:$0xff]  ;;  %v5326_v6 = vcombine.low %v10884_v43, %v10884_v43  ;;  %v6000_v43 = vld [vmem:[%s11221_s5 + $0x50] sm:$0xff]  }
 0x637   :  { %4242 = vmatprep.subr.bf16.mxu1 %v6375_v24  ;;  %v5330_v24 = vcombine.high %v10999_v36, %v10999_v36 }
 0x639   :  { %4120 = vmatpush1.bf16.msra.mxu0 %v6376_v47  ;;  %v6006_v47 = vld [vmem:[%s11221_s5 + $0xc8] sm:$0xff]  }
 0x63a   :  { %4243 = vmatpush1.bf16.msra.mxu1 %v6377_v49  ;;  %4130 = vmatprep.subr.bf16.mxu0 %v6378_v4  ;;  %v6007_v49 = vld [vmem:[%s11221_s5 + $0x88] sm:$0xff]   ;;  %v6010_v4 = vld [vmem:[%s11221_s5 + $0xd0] sm:$0xff]  }
 0x63b   :  { %4253 = vmatprep.subr.bf16.mxu1 %v6379_v30  ;;  %v6001_v30 = vld [vmem:[%s11221_s5 + $0x10] sm:$0xff]  }
 0x63c   :  { %4122 = vmatmul.mubr.bf16.vlgmr.msra.gmra.mrb[72].mxu0 %v10676_v54 }
 0x63d   :  { %4245 = vmatmul.mubr.bf16.vlgmr.msra.gmra.mrb[72].mxu1 %v10676_v54  ;;  %4131 = vmatpush1.bf16.msra.mxu0 %v6380_v63  ;;  %v6383_v54 = vld [vmem:[%s11219_s3 + $0x42c] ss:$16 sps:$4 sm:$0xff]   ;;  %v6011_v63 = vld [vmem:[%s11221_s5 + $0x90] sm:$0xff]  }
 0x63e   :  { %4162 = vmatprep.mubr.bf16.mxu0 %v5327_v60  ;;  %4254 = vmatpush1.bf16.msra.mxu1 %v6381_v44  ;;  %v6014_v44 = vld [vmem:[%s11221_s5 + $0xd8] sm:$0xff]  }
 0x63f   :  { %4285 = vmatprep.mubr.bf16.mxu1 %v5327_v60  ;;  %4132 = vmatprep.subr.bf16.mxu0 %v6382_v50  ;;  %v6004_v60 = vld [vmem:[%s11221_s5 + $0x58] sm:$0xff]  }
 0x640   :  { %4255 = vmatprep.subr.bf16.mxu1 %v6383_v54  ;;  %v6005_v50 = vld [vmem:[%s11221_s5 + $0x18] sm:$0xff]   ;;  %v6008_v54 = vld [vmem:[%s11221_s5 + $0x60] sm:$0xff]  }
 0x641   :  { %4133 = vmatpush1.bf16.msra.mxu0 %v6384_v29  ;;  %v6015_v29 = vld [vmem:[%s11221_s5 + $0x98] sm:$0xff]  }
 0x642   :  { %4256 = vmatpush1.bf16.msra.mxu1 %v6385_v46  ;;  %4134 = vmatprep.subr.bf16.mxu0 %v6386_v53  ;;  %v6018_v46 = vld [vmem:[%s11221_s5 + $0xe0] sm:$0xff]  }
 0x643   :  { %4257 = vmatprep.subr.bf16.mxu1 %v6387_v38  ;;  %v6009_v53 = vld [vmem:[%s11221_s5 + $0x20] sm:$0xff]   ;;  %v6012_v38 = vld [vmem:[%s11221_s5 + $0x68] sm:$0xff]  }
 0x645   :  { %4135 = vmatpush1.bf16.msra.mxu0 %v6388_v55  ;;  %v6019_v55 = vld [vmem:[%s11221_s5 + $0xa0] sm:$0xff]  }
 0x646   :  { %4258 = vmatpush1.bf16.msra.mxu1 %v6389_v25  ;;  %4136 = vmatprep.subr.bf16.mxu0 %v6390_v42  ;;  %v6022_v25 = vld [vmem:[%s11221_s5 + $0xe8] sm:$0xff]  }
 0x647   :  { %4259 = vmatprep.subr.bf16.mxu1 %v6391_v11  ;;  %v6013_v42 = vld [vmem:[%s11221_s5 + $0x28] sm:$0xff]   ;;  %v6016_v11 = vld [vmem:[%s11221_s5 + $0x70] sm:$0xff]  }
 0x649   :  { %4137 = vmatpush1.bf16.msra.mxu0 %v6392_v12 }
 0x64a   :  { %4260 = vmatpush1.bf16.msra.mxu1 %v6393_v0  ;;  %4138 = vmatprep.subr.bf16.mxu0 %v6394_v14  ;;  %v6023_v0 = vld [vmem:[%s11221_s5 + $0xa8] sm:$0xff]  }
 0x64b   :  { %4261 = vmatprep.subr.bf16.mxu1 %v10401_v28  ;;  %v12280_v28 = vld [vmem:[#allocation5_spill] sm:$0xff] }
 0x64d   :  { %4139 = vmatpush1.bf16.msra.mxu0 %v10407_v48  ;;  %v12281_v48 = vld [vmem:[#allocation6_spill] sm:$0xff] }
 0x64e   :  { %4262 = vmatpush1.bf16.msra.mxu1 %v10413_v8  ;;  %4140 = vmatprep.subr.bf16.mxu0 %v10419_v1  ;;  %v12282_v8 = vld [vmem:[#allocation7_spill] sm:$0xff]  ;;  %v12283_v1 = vld [vmem:[#allocation8_spill] sm:$0xff] }
 0x64f   :  { %4263 = vmatprep.subr.bf16.mxu1 %v10425_v15  ;;  %v12284_v15 = vld [vmem:[#allocation9_spill] sm:$0xff] }
 0x651   :  { %4141 = vmatpush1.bf16.msra.mxu0 %v10431_v56  ;;  %v12285_v56 = vld [vmem:[#allocation10_spill] sm:$0xff] }
 0x652   :  { %4264 = vmatpush1.bf16.msra.mxu1 %v10437_v57  ;;  %4142 = vmatprep.subr.bf16.mxu0 %v10443_v58  ;;  %v12286_v57 = vld [vmem:[#allocation11_spill] sm:$0xff]  ;;  %v12287_v58 = vld [vmem:[#allocation12_spill] sm:$0xff] }
 0x653   :  { %4265 = vmatprep.subr.bf16.mxu1 %v10449_v59  ;;  %v12288_v59 = vld [vmem:[#allocation13_spill] sm:$0xff] }
 0x655   :  { %4143 = vmatpush1.bf16.msra.mxu0 %v10455_v62  ;;  %v12289_v62 = vld [vmem:[#allocation14_spill] sm:$0xff] }
 0x656   :  { %4266 = vmatpush1.bf16.msra.mxu1 %v12279_v13  ;;  %4144 = vmatprep.subr.bf16.mxu0 %v12280_v28  ;;  %v6024_v28 = vld [vmem:[%s11221_s5 + $0xf0] sm:$0xff]  }
 0x657   :  { %4267 = vmatprep.subr.bf16.mxu1 %v12281_v48 }
 0x659   :  { %4145 = vmatpush1.bf16.msra.mxu0 %v12282_v8 }
 0x65a   :  { %4268 = vmatpush1.bf16.msra.mxu1 %v12283_v1  ;;  %4146 = vmatprep.subr.bf16.mxu0 %v12284_v15  ;;  %v6017_v15 = vld [vmem:[%s11221_s5 + $0x30] sm:$0xff]  }
 0x65b   :  { %4269 = vmatprep.subr.bf16.mxu1 %v12285_v56 }
 0x65d   :  { %4147 = vmatpush1.bf16.msra.mxu0 %v12286_v57 }
 0x65e   :  { %4270 = vmatpush1.bf16.msra.mxu1 %v12287_v58  ;;  %4148 = vmatprep.subr.bf16.mxu0 %v12288_v59  ;;  %v6020_v59 = vld [vmem:[%s11221_s5 + $0x78] sm:$0xff]  }
 0x65f   :  { %4271 = vmatprep.subr.bf16.mxu1 %v12289_v62 }
 0x661   :  { %4149 = vmatpush1.bf16.msra.mxu0 %v12290_v16  ;;  %v6025_v16 = vld [vmem:[%s11221_s5 + $0xb0] sm:$0xff]  }
 0x662   :  { %4272 = vmatpush1.bf16.msra.mxu1 %v12291_v17  ;;  %4150 = vmatprep.subr.bf16.mxu0 %v12292_v18  ;;  %v6026_v18 = vld [vmem:[%s11221_s5 + $0xf8] sm:$0xff]  }
 0x663   :  { %4273 = vmatprep.subr.bf16.mxu1 %v12293_v39  ;;  %v6021_v39 = vld [vmem:[%s11221_s5 + $0x38] sm:$0xff]  }
 0x665   :  { %4151 = vmatpush1.bf16.msra.mxu0 %v12294_v9  ;;  %v11093_v9 = vld [vmem:[%s11220_s4] ss:$0 sm:$0xff] }
 0x666   :  { %4274 = vmatpush1.bf16.msra.mxu1 %v12295_v40  ;;  %4152 = vmatprep.subr.bf16.mxu0 %v12296_v51  ;;  %v6027_v51 = vld [vmem:[%s11221_s5 + $0xb8] sm:$0xff]  }
 0x667   :  { %4275 = vmatprep.subr.bf16.mxu1 %v12297_v19 }
 0x669   :  { %4153 = vmatpush1.bf16.msra.mxu0 %v12298_v20  ;;  %v6030_v20 = vld [vmem:[%s11221_s5 + $0x100] sm:$0xff]  }
 0x66a   :  { %4276 = vmatpush1.bf16.msra.mxu1 %v12299_v21  ;;  %4154 = vmatprep.subr.bf16.mxu0 %v12300_v22  ;;  %v5329_v21 = vcombine.low %v10999_v36, %v10999_v36  ;;  %v6043_v36 = vld [vmem:[%s11222_s7 + $0x20] sm:$0xff]  }
 0x66b   :  { %4277 = vmatprep.subr.bf16.mxu1 %v12301_v23  ;;  %v6397_v23 = vmov 0.0  }
 0x66d   :  { %4155 = vmatpush1.bf16.msra.mxu0 %v12302_v26  ;;  %v6031_v26 = vld [vmem:[%s11221_s5 + $0x108] sm:$0xff]  }
 0x66e   :  { %4278 = vmatpush1.bf16.msra.mxu1 %v12303_v3  ;;  %4156 = vmatprep.subr.bf16.mxu0 %v12304_v5  ;;  %v6032_v3 = vld [vmem:[%s11221_s5 + $0x110] sm:$0xff]  }
 0x66f   :  { %4279 = vmatprep.subr.bf16.mxu1 %v12305_v7 }
 0x671   :  { %4157 = vmatpush1.bf16.msra.mxu0 %v12306_v27 }
 0x672   :  { %4280 = vmatpush1.bf16.msra.mxu1 %v12307_v31  ;;  %4158 = vmatprep.subr.bf16.mxu0 %v12308_v32  ;;  %v6033_v31 = vld [vmem:[%s11221_s5 + $0x118] sm:$0xff]   ;;  %v6034_v32 = vld [vmem:[%s11221_s5 + $0x120] sm:$0xff]  }
 0x673   :  { %4281 = vmatprep.subr.bf16.mxu1 %v12309_v37  ;;  %v6035_v37 = vld [vmem:[%s11221_s5 + $0x128] sm:$0xff]  }
 0x675   :  { %4159 = vmatpush1.bf16.msra.mxu0 %v12310_v35  ;;  %v6036_v35 = vld [vmem:[%s11221_s5 + $0x130] sm:$0xff]  }
 0x676   :  { %4282 = vmatpush1.bf16.msra.mxu1 %v12311_v2  ;;  %4160 = vmatprep.subr.bf16.mxu0 %v12312_v61  ;;  %v6037_v2 = vld [vmem:[%s11221_s5 + $0x138] sm:$0xff]   ;;  %v6039_v61 = vld [vmem:[%s11222_s7] sm:$0xff]  }
 0x677   :  { %4283 = vmatprep.subr.bf16.mxu1 %v10665_v41  ;;  %v5998_v41 = vld [vmem:[%s11221_s5 + $0x48] sm:$0xff]  }
 0x679   :  { %4161 = vmatpush1.bf16.msra.mxu0 %v10671_v45  ;;  %v6003_v45 = vld [vmem:[%s11221_s5 + $0x80] sm:$0xff]  }
 0x67a   :  { %4284 = vmatpush1.bf16.msra.mxu1 %v10681_v10  ;;  %5392 = vmatprep.subr.bf16.mxu0 %v5994_v33  ;;  %v5999_v10 = vld [vmem:[%s11221_s5 + $0x8] sm:$0xff]  }
 0x67b   :  { %5414 = vmatprep.subr.bf16.mxu1 %v6002_v34  ;;  %v6040_v33 = vld [vmem:[%s11222_s7 + $0x8] sm:$0xff]   ;;  %v6041_v34 = vld [vmem:[%s11222_s7 + $0x10] sm:$0xff]  }
 0x67c   :  { %4163 = vmatmul.mubr.bf16.vlgmr.msra.gmra.mrb[72].mxu0 %v5326_v6 }
 0x67d   :  { %4286 = vmatmul.mubr.bf16.vlgmr.msra.gmra.mrb[72].mxu1 %v5326_v6  ;;  %5393 = vmatpush3.bf16.msra.mxu0 %v5995_v52  ;;  %v6042_v52 = vld [vmem:[%s11222_s7 + $0x18] sm:$0xff]   ;;  %v6044_v6 = vld [vmem:[%s11222_s7 + $0x28] sm:$0xff]  }
 0x67e   :  { %4681 = vmatprep.mubr.bf16.mxu0 %v5330_v24  ;;  %5394 = vmatprep.subr.bf16.mxu0 %v5998_v41 }
 0x67f   :  { %5415 = vmatpush3.bf16.msra.mxu1 %v6003_v45 }
 0x680   :  { %5416 = vmatprep.subr.bf16.mxu1 %v6006_v47 }
 0x681   :  { %5395 = vmatpush3.bf16.msra.mxu0 %v5999_v10 }
 0x682   :  { %5396 = vmatprep.subr.bf16.mxu0 %v6000_v43 }
 0x683   :  { %5417 = vmatpush3.bf16.msra.mxu1 %v6007_v49 }
 0x684   :  { %5418 = vmatprep.subr.bf16.mxu1 %v6010_v4 }
 0x685   :  { %5397 = vmatpush3.bf16.msra.mxu0 %v6001_v30 }
 0x686   :  { %5398 = vmatprep.subr.bf16.mxu0 %v6004_v60 }
 0x687   :  { %5419 = vmatpush3.bf16.msra.mxu1 %v6011_v63 }
 0x688   :  { %5420 = vmatprep.subr.bf16.mxu1 %v6014_v44 }
 0x689   :  { %5399 = vmatpush3.bf16.msra.mxu0 %v6005_v50 }
 0x68a   :  { %5400 = vmatprep.subr.bf16.mxu0 %v6008_v54 }
 0x68b   :  { %5421 = vmatpush3.bf16.msra.mxu1 %v6015_v29 }
 0x68c   :  { %5422 = vmatprep.subr.bf16.mxu1 %v6018_v46 }
 0x68d   :  { %5401 = vmatpush3.bf16.msra.mxu0 %v6009_v53 }
 0x68e   :  { %5402 = vmatprep.subr.bf16.mxu0 %v6012_v38 }
 0x68f   :  { %v3887_v12 = vpop.f32.mrb[68].mxu0  ;;  %5423 = vmatpush3.bf16.msra.mxu1 %v6019_v55 }
 0x690   :  { %v4010_v14 = vpop.f32.mrb[68].mxu1  ;;  %v3889_v13 = vpop.f32.mrb[69].mxu0  ;;  %5424 = vmatprep.subr.bf16.mxu1 %v6022_v25 }
 0x691   :  { %v4017_v48 = vmax.f32 %v3887_v12, %v3889_v13  ;;  %v4012_v8 = vpop.f32.mrb[69].mxu1  ;;  %v3891_v1 = vpop.f32.mrb[70].mxu0  ;;  %5403 = vmatpush3.bf16.msra.mxu0 %v6013_v42  ;;  %v5328_v42 = vld [vmem:[%s11223_s6] ss:$0 sm:$0xff] }
 0x692   :  { %v4018_v56 = vmax.f32 %v4010_v14, %v4012_v8  ;;  %v4014_v57 = vpop.f32.mrb[70].mxu1  ;;  %v3892_v58 = vpop.f32.mrb[71].mxu0  ;;  %5404 = vmatprep.subr.bf16.mxu0 %v6016_v11  ;;  %v6045_v8 = vld [vmem:[%s11222_s7 + $0x30] sm:$0xff]   ;;  %v6046_v1 = vld [vmem:[%s11222_s7 + $0x38] sm:$0xff]  }
 0x693   :  { %v4015_v62 = vpop.f32.mrb[71].mxu1  ;;  %5425 = vmatpush3.bf16.msra.mxu1 %v6023_v0  ;;  %v6049_v57 = vld [vmem:[%s11224_s9 + $0x10] sm:$0xff]   ;;  %v6050_v58 = vld [vmem:[%s11224_s9 + $0x18] sm:$0xff]  }
 0x694   :  { %v4019_v17 = vmax.f32 %v4017_v48, %v4018_v56  ;;  %5426 = vmatprep.subr.bf16.mxu1 %v6024_v28  ;;  %v6048_v56 = vld [vmem:[%s11224_s9 + $0x8] sm:$0xff]  }
 0x695   :  { %5405 = vmatpush3.bf16.msra.mxu0 %v6017_v15  ;;  %v6047_v15 = vld [vmem:[%s11224_s9] sm:$0xff]   ;;  %v6052_v62 = vld [vmem:[%s11224_s9 + $0x28] sm:$0xff]  }
 0x696   :  { %v4020_v40 = vadd.f32 %v11093_v9, %v4019_v17  ;;  %5406 = vmatprep.subr.bf16.mxu0 %v6020_v59  ;;  %v6051_v59 = vld [vmem:[%s11224_s9 + $0x20] sm:$0xff]  }
 0x697   :  { %5427 = vmatpush3.bf16.msra.mxu1 %v6025_v16 }
 0x698   :  { %v4021_v19 = vmax.f32 %v4020_v40, 0.0  ;;  %5428 = vmatprep.subr.bf16.mxu1 %v6026_v18 }
 0x699   :  { %5407 = vmatpush3.bf16.msra.mxu0 %v6021_v39 }
 0x69a   :  { %v4022_v22 = vpack.c.bf16 %v4021_v19, %v4021_v19  ;;  %5463 = vmatprep.subr.bf16.mxu0 %v6397_v23  ;;  %v6053_v19 = vld [vmem:[%s11224_s9 + $0x30] sm:$0xff]  }
 0x69b   :  { %5429 = vmatpush3.bf16.msra.mxu1 %v6027_v51 }
 0x69c   :  { %4023 = vst [vmem:[#allocation3 + $0xc] sm:$0xf] %v4022_v22  ;;  %4682 = vmatmul.mubr.bf16.vlgmr.msra.gmra.mrb[76].mxu0 %v5329_v21  ;;  %5483 = vmatprep.subr.bf16.mxu1 %v6397_v23  ;;  %v5374_v21 = vld [vmem:[%s11225_s8] ss:$0 sm:$0xff] }
 0x69d   :  { %5464 = vmatpush3.bf16.msra.mxu0 %v6030_v20  ;;  %5479 = vmatprep.mubr.msk.bf16.mxu0 %vm6398_vm1, %v6397_v23  ;;  %v6054_v20 = vld [vmem:[%s11224_s9 + $0x38] sm:$0xff]  }
 0x69e   :  { %5465 = vmatprep.subr.bf16.mxu0 %v6397_v23 }
 0x6a1   :  { %5466 = vmatpush3.bf16.msra.mxu0 %v6031_v26 }
 0x6a2   :  { %5467 = vmatprep.subr.bf16.mxu0 %v6397_v23 }
 0x6a3   :  { %v4302_v5 = vld [vmem:[#allocation3 + $0x8] sm:$0xff] }
 0x6a4   :  { %v5331_v7 = vcombine.low %v4302_v5, %v4302_v5  ;;  %v5332_v27 = vcombine.high %v4302_v5, %v4302_v5 }
 0x6a5   :  { %5468 = vmatpush3.bf16.msra.mxu0 %v6032_v3 }
 0x6a6   :  { %4721 = vmatprep.mubr.bf16.mxu1 %v5332_v27  ;;  %5469 = vmatprep.subr.bf16.mxu0 %v6397_v23 }
 0x6a7   :  { %4722 = vmatmul.mubr.bf16.vlgmr.msra.gmra.mrb[76].mxu1 %v5331_v7 }
 0x6a8   :  { %5499 = vmatprep.mubr.msk.bf16.mxu1 %vm6398_vm1, %v6397_v23  ;;  %5484 = vmatpush3.bf16.msra.mxu1 %v6039_v61 }
 0x6a9   :  { %5470 = vmatpush3.bf16.msra.mxu0 %v6033_v31  ;;  %5485 = vmatprep.subr.bf16.mxu1 %v6397_v23 }
 0x6aa   :  { %5471 = vmatprep.subr.bf16.mxu0 %v6397_v23 }
 0x6ac   :  { %5486 = vmatpush3.bf16.msra.mxu1 %v6040_v33 }
 0x6ad   :  { %5472 = vmatpush3.bf16.msra.mxu0 %v6034_v32  ;;  %5487 = vmatprep.subr.bf16.mxu1 %v6397_v23  ;;  %v5383_v32 = vld [vmem:[%s11226_s10] ss:$0 sm:$0xff] }
 0x6ae   :  { %5473 = vmatprep.subr.bf16.mxu0 %v6397_v23 }
 0x6b0   :  { %5488 = vmatpush3.bf16.msra.mxu1 %v6041_v34 }
 0x6b1   :  { %5474 = vmatpush3.bf16.msra.mxu0 %v6035_v37  ;;  %5489 = vmatprep.subr.bf16.mxu1 %v6397_v23 }
 0x6b2   :  { %5475 = vmatprep.subr.bf16.mxu0 %v6397_v23 }
 0x6b4   :  { %5490 = vmatpush3.bf16.msra.mxu1 %v6042_v52 }
 0x6b5   :  { %5476 = vmatpush3.bf16.msra.mxu0 %v6036_v35  ;;  %5491 = vmatprep.subr.bf16.mxu1 %v6397_v23 }
 0x6b6   :  { %5477 = vmatprep.subr.bf16.mxu0 %v6397_v23 }
 0x6b8   :  { %5492 = vmatpush3.bf16.msra.mxu1 %v6043_v36 }
 0x6b9   :  { %5478 = vmatpush3.bf16.msra.mxu0 %v6037_v2  ;;  %5493 = vmatprep.subr.bf16.mxu1 %v6397_v23 }
 0x6ba   :  { %5503 = vmatprep.subr.bf16.mxu0 %v6397_v23 }
 0x6bc   :  { %5494 = vmatpush3.bf16.msra.mxu1 %v6044_v6 }
 0x6bd   :  { %5495 = vmatprep.subr.bf16.mxu1 %v6397_v23 }
 0x6c0   :  { %5496 = vmatpush3.bf16.msra.mxu1 %v6045_v8 }
 0x6c1   :  { %5497 = vmatprep.subr.bf16.mxu1 %v6397_v23 }
 0x6c4   :  { %5498 = vmatpush3.bf16.msra.mxu1 %v6046_v1 }
 0x74f   :  { %v4164_v41 = vpop.f32.mrb[72].mxu0 }
 0x750   :  { %v4287_v45 = vpop.f32.mrb[72].mxu1  ;;  %v4166_v24 = vpop.f32.mrb[73].mxu0 }
 0x751   :  { %v4294_v47 = vmax.f32 %v4164_v41, %v4166_v24  ;;  %v4289_v10 = vpop.f32.mrb[73].mxu1  ;;  %v4168_v43 = vpop.f32.mrb[74].mxu0 }
 0x752   :  { %v4295_v49 = vmax.f32 %v4287_v45, %v4289_v10  ;;  %v4291_v4 = vpop.f32.mrb[74].mxu1  ;;  %v4169_v30 = vpop.f32.mrb[75].mxu0 }
 0x753   :  { %v4292_v60 = vpop.f32.mrb[75].mxu1 }
 0x754   :  { %v4296_v63 = vmax.f32 %v4294_v47, %v4295_v49 }
 0x756   :  { %v4297_v44 = vadd.f32 %v11093_v9, %v4296_v63 }
 0x758   :  { %v4298_v50 = vmax.f32 %v4297_v44, 0.0 }
 0x75a   :  { %v4299_v54 = vpack.c.bf16 %v4298_v50, %v4298_v50 }
 0x75c   :  { %4300 = vst [vmem:[#allocation3 + $0x10] sm:$0xf] %v4299_v54 }
 0x763   :  { %v6038_v29 = vld [vmem:[#allocation3 + $0x10] ss:$0 sps:$4 sm:$0xff]  }
 0x764   :  { %5480 = vmatmul.mubr.bf16.vlgmr.msra.gmra.mrb[80].mxu0 %v6038_v29 }
 0x765   :  { %5519 = vmatprep.mubr.msk.bf16.mxu0 %vm6398_vm1, %v6397_v23  ;;  %5504 = vmatpush3.bf16.msra.mxu0 %v6047_v15 }
 0x766   :  { %5505 = vmatprep.subr.bf16.mxu0 %v6397_v23 }
 0x769   :  { %5506 = vmatpush3.bf16.msra.mxu0 %v6048_v56 }
 0x76a   :  { %5507 = vmatprep.subr.bf16.mxu0 %v6397_v23 }
 0x76d   :  { %5508 = vmatpush3.bf16.msra.mxu0 %v6049_v57 }
 0x76e   :  { %5509 = vmatprep.subr.bf16.mxu0 %v6397_v23 }
 0x76f   :  { %v5408_v46 = vpop.f32.mrb[76].mxu0 }
 0x770   :  { %v5409_v53 = vpop.f32.mrb[77].mxu0 }
 0x771   :  { %v5410_v38 = vadd.f32 %v5409_v53, %v5408_v46  ;;  %v5411_v55 = vpop.f32.mrb[78].mxu0  ;;  %5510 = vmatpush3.bf16.msra.mxu0 %v6050_v58 }
 0x772   :  { %v5412_v25 = vpop.f32.mrb[79].mxu0  ;;  %5511 = vmatprep.subr.bf16.mxu0 %v6397_v23 }
 0x773   :  { %v4684_v0 = vadd.f32 %v5410_v38, %v5328_v42 }
 0x775   :  { %5512 = vmatpush3.bf16.msra.mxu0 %v6051_v59 }
 0x776   :  { %5513 = vmatprep.subr.bf16.mxu0 %v6397_v23 }
 0x779   :  { %5514 = vmatpush3.bf16.msra.mxu0 %v6052_v62 }
 0x77a   :  { %v5430_v11 = vpop.f32.mrb[76].mxu1  ;;  %5515 = vmatprep.subr.bf16.mxu0 %v6397_v23 }
 0x77b   :  { %v5431_v12 = vpop.f32.mrb[77].mxu1 }
 0x77c   :  { %v5432_v14 = vadd.f32 %v5431_v12, %v5430_v11  ;;  %v5433_v13 = vpop.f32.mrb[78].mxu1 }
 0x77d   :  { %v5434_v28 = vpop.f32.mrb[79].mxu1  ;;  %5516 = vmatpush3.bf16.msra.mxu0 %v6053_v19 }
 0x77e   :  { %v4724_v48 = vadd.f32 %v5432_v14, %v4684_v0  ;;  %5517 = vmatprep.subr.bf16.mxu0 %v6397_v23 }
 0x781   :  { %5518 = vmatpush3.bf16.msra.mxu0 %v6054_v20 }
 0x837   :  { %v4763_v16 = vpop.f32.mrb[80].mxu0 }
 0x838   :  { %v4764_v17 = vadd.f32 %v4763_v16, %v4724_v48  ;;  %v5481_v18 = vpop.f32.mrb[81].mxu0 }
 0x839   :  { %v4766_v39 = vpop.f32.mrb[82].mxu0 }
 0x83a   :  { %v4769_v9 = vmax.f32 %v4764_v17, 0.0  ;;  %v5482_v40 = vpop.f32.mrb[83].mxu0 }
 0x83c   :  { %v4770_v51 = vpack.c.bf16 %v4769_v9, %v4769_v9 }
 0x83e   :  { %5500 = vmatmul.mubr.bf16.vlgmr.msra.gmra.mrb[80].mxu1 %v4770_v51 }
 0x911   :  { %v4876_v22 = vpop.f32.mrb[80].mxu1 }
 0x912   :  { %v4877_v26 = vadd.f32 %v5374_v21, %v4876_v22  ;;  %v5501_v3 = vpop.f32.mrb[81].mxu1 }
 0x913   :  { %v4879_v5 = vpop.f32.mrb[82].mxu1 }
 0x914   :  { %v4882_v7 = vmax.f32 %v4877_v26, 0.0  ;;  %v5502_v27 = vpop.f32.mrb[83].mxu1 }
 0x916   :  { %v4883_v31 = vpack.c.bf16 %v4882_v7, %v4882_v7 }
 0x918   :  { %5520 = vmatmul.mubr.bf16.vlgmr.msra.gmra.mrb[84].mxu0 %v4883_v31 }
 0x9eb   :  { %v4989_v37 = vpop.f32.mrb[84].mxu0 }
 0x9ec   :  { %v4990_v35 = vadd.f32 %v5383_v32, %v4989_v37  ;;  %v5521_v23 = vpop.f32.mrb[85].mxu0 }
 0x9ed   :  { %v4992_v2 = vpop.f32.mrb[86].mxu0 }
 0x9ee   :  { %4995 = vst [vmem:[%s11227_s11] sm:$0xff] %v4990_v35  ;;  %v5522_v61 = vpop.f32.mrb[87].mxu0 }

</bundles_post_ra>
